<compile_context>
chip_gen: v7x
topology: tpu7x:2x2x1
jax: 0.10.0
libtpu: 0.0.40
codegen_flags: <defaults>
</compile_context>

<pallas_src>
import jax
import jax.numpy as jnp
from jax.experimental import pallas as pl
from jax.experimental.pallas import tpu as pltpu


# ----------------------------- Pallas kernels ------------------------------

def _conv_relu_pool_kernel(p_ref, w_ref, b_ref, o_ref):
    """Fused Conv3x3(+bias) + ReLU + MaxPool2x2 on parity-grouped im2col patches.

    p_ref: (4, TILE_M, K)  -- 4 = the 2x2 pool-window parities, K = 9*Cin (padded)
    w_ref: (K, Cout); b_ref: (1, Cout); o_ref: (TILE_M, Cout) pooled output rows.
    """
    w = w_ref[...]
    acc = jnp.dot(p_ref[0], w, preferred_element_type=jnp.float32)
    for q in range(1, 4):
        acc = jnp.maximum(acc, jnp.dot(p_ref[q], w, preferred_element_type=jnp.float32))
    # max(conv) + b == max(conv + b); ReLU is monotone, so this equals
    # maxpool(relu(conv + bias)).
    o_ref[...] = jnp.maximum(acc + b_ref[...], 0.0).astype(o_ref.dtype)


def _mlp_head_kernel(x_ref, w1_ref, b1_ref, drop_ref, w2_ref, b2_ref, o_ref):
    """fc1 + ReLU + Dropout(0.5, training) + fc2 (fc2 padded to lane-dense N)."""
    h = jnp.dot(x_ref[...], w1_ref[...], preferred_element_type=jnp.float32)
    h = jnp.maximum(h + b1_ref[...], 0.0)
    h = h * drop_ref[...]          # mask values are 0.0 or 2.0 (keep w.p. 0.5, scale 1/(1-p))
    o = jnp.dot(h, w2_ref[...], preferred_element_type=jnp.float32) + b2_ref[...]
    o_ref[...] = o.astype(o_ref.dtype)


# ------------------------------- wrappers -----------------------------------

def _round_up(n, m):
    return ((n + m - 1) // m) * m


def _im2col_pooled(x_nhwc):
    """(B, H, W, Cin) -> (4, B*Ho*Wo, 9*Cin), grouped by 2x2 pool-window parity.

    Built from 9 contiguous slices + 1 concat + 1 transpose (fuses well in XLA),
    instead of 36 stride-2 slices.  Row (q, m) with q = 2*dr + dc and
    m = (b, r, c) holds the 3x3 patch around conv output pixel (2r+dr, 2c+dc).
    """
    B, H, W, Cin = x_nhwc.shape
    Ho, Wo = H // 2, W // 2
    K = 9 * Cin
    xp = jnp.pad(x_nhwc, ((0, 0), (1, 1), (1, 1), (0, 0)))
    taps = [xp[:, ky:ky + H, kx:kx + W, :] for ky in range(3) for kx in range(3)]
    t = jnp.concatenate(taps, axis=-1)                  # (B, H, W, 9*Cin)
    t = t.reshape(B, Ho, 2, Wo, 2, K)                   # split pool parities
    return t.transpose(2, 4, 0, 1, 3, 5).reshape(4, B * Ho * Wo, K)


def conv3x3_relu_pool(x_nhwc, w_hwio, b):
    """Conv2d(k=3, padding=1) + ReLU + MaxPool2d(2, 2), fused in one Pallas kernel."""
    B, H, W, Cin = x_nhwc.shape
    Cout = w_hwio.shape[-1]
    Ho, Wo = H // 2, W // 2
    K = 9 * Cin
    Kp = _round_up(K, 8)                               # conv1: 27 -> 32

    # TODO(synk): build the patches inside the kernel via a halo-reading
    # BlockSpec instead of materializing the 9x-expanded matrix with XLA.
    patches = _im2col_pooled(x_nhwc)                   # (4, M, K)
    if Kp != K:
        patches = jnp.pad(patches, ((0, 0), (0, 0), (0, Kp - K)))

    wmat = w_hwio.reshape(K, Cout)
    if Kp != K:
        wmat = jnp.pad(wmat, ((0, Kp - K), (0, 0)))

    M = B * Ho * Wo
    tm = M if M <= 512 else 512                        # small per-step VMEM, fits v7x too
    grid = (pl.cdiv(M, tm),)

    out = pl.pallas_call(
        _conv_relu_pool_kernel,
        out_shape=jax.ShapeDtypeStruct((M, Cout), jnp.float32),
        grid=grid,
        in_specs=[
            pl.BlockSpec((4, tm, Kp), lambda i: (0, i, 0)),
            pl.BlockSpec((Kp, Cout), lambda i: (0, 0)),
            pl.BlockSpec((1, Cout), lambda i: (0, 0)),
        ],
        out_specs=pl.BlockSpec((tm, Cout), lambda i: (i, 0)),
        compiler_params=pltpu.CompilerParams(
            dimension_semantics=("parallel",),
            vmem_limit_bytes=32 * 1024 * 1024,
        ),
        cost_estimate=pl.CostEstimate(
            flops=2 * 4 * M * Kp * Cout,
            transcendentals=0,
            bytes_accessed=4 * (4 * M * Kp + Kp * Cout + Cout + M * Cout),
        ),
    )(patches, wmat, b.reshape(1, Cout))
    return out.reshape(B, Ho, Wo, Cout)


def mlp_head(x, w1, b1, drop_mask, w2p, b2p):
    B, Fin = x.shape
    Hmid = w1.shape[1]
    Nout = w2p.shape[1]
    tb = B if B <= 128 else 128
    grid = (pl.cdiv(B, tb),)
    return pl.pallas_call(
        _mlp_head_kernel,
        out_shape=jax.ShapeDtypeStruct((B, Nout), jnp.float32),
        grid=grid,
        in_specs=[
            pl.BlockSpec((tb, Fin), lambda i: (i, 0)),     # x
            pl.BlockSpec((Fin, Hmid), lambda i: (0, 0)),   # w1 (kept resident, 2 MiB)
            pl.BlockSpec((1, Hmid), lambda i: (0, 0)),     # b1
            pl.BlockSpec((tb, Hmid), lambda i: (i, 0)),    # dropout mask
            pl.BlockSpec((Hmid, Nout), lambda i: (0, 0)),  # w2 (padded to 128)
            pl.BlockSpec((1, Nout), lambda i: (0, 0)),     # b2 (padded to 128)
        ],
        out_specs=pl.BlockSpec((tb, Nout), lambda i: (i, 0)),
        compiler_params=pltpu.CompilerParams(
            dimension_semantics=("parallel",),
            vmem_limit_bytes=32 * 1024 * 1024,
        ),
        cost_estimate=pl.CostEstimate(
            flops=2 * B * (Fin * Hmid + Hmid * Nout),
            transcendentals=0,
            bytes_accessed=4 * (B * Fin + Fin * Hmid + Hmid * Nout
                                + 2 * B * Hmid + B * Nout),
        ),
    )(x, w1, b1.reshape(1, Hmid), drop_mask, w2p, b2p.reshape(1, Nout))


def init_params(key):
    ks = jax.random.split(key, 10)

    def conv(kw, kb, cin, cout):
        scale = 1.0 / jnp.sqrt(9.0 * cin)
        w = jax.random.uniform(kw, (3, 3, cin, cout), jnp.float32, -1.0, 1.0) * scale
        b = jax.random.uniform(kb, (cout,), jnp.float32, -1.0, 1.0) * scale
        return w, b

    def lin(kw, kb, fin, fout):
        scale = 1.0 / jnp.sqrt(float(fin))
        w = jax.random.uniform(kw, (fin, fout), jnp.float32, -1.0, 1.0) * scale
        b = jax.random.uniform(kb, (fout,), jnp.float32, -1.0, 1.0) * scale
        return w, b

    p = {}
    p["w1"], p["b1"] = conv(ks[0], ks[1], 3, 32)
    p["w2"], p["b2"] = conv(ks[2], ks[3], 32, 64)
    p["w3"], p["b3"] = conv(ks[4], ks[5], 64, 128)

    # fc1: rows are created in torch CHW-flatten order, then permuted ONCE to the
    # NHWC (h, w, c) flatten order produced by the conv pipeline, removing the
    # runtime flatten-transpose.  (Importing real torch weights would use the same
    # permutation, plus OIHW -> HWIO for the conv kernels.)
    wf1_chw, p["bf1"] = lin(ks[6], ks[7], 128 * 4 * 4, 256)
    p["wf1"] = (wf1_chw.reshape(128, 4, 4, 256)
                .transpose(1, 2, 0, 3)
                .reshape(128 * 4 * 4, 256))

    # fc2: pad N 10 -> 128 so the head kernel's only store is lane-dense
    # (sliced back to 10 on the host after the kernel).
    wf2, bf2 = lin(ks[8], ks[9], 256, 10)
    p["wf2"] = jnp.pad(wf2, ((0, 0), (0, 118)))
    p["bf2"] = jnp.pad(bf2, (0, 118))
    return p


def test_cnn_forward(params, x_nchw, dropout_key):
    x = jnp.transpose(x_nchw, (0, 2, 3, 1))                 # NCHW -> NHWC
    x = conv3x3_relu_pool(x, params["w1"], params["b1"])    # (B, 16, 16, 32)
    x = conv3x3_relu_pool(x, params["w2"], params["b2"])    # (B, 8, 8, 64)
    x = conv3x3_relu_pool(x, params["w3"], params["b3"])    # (B, 4, 4, 128)
    B = x.shape[0]
    x = x.reshape(B, 128 * 4 * 4)                           # NHWC flatten (free bitcast; wf1 pre-permuted)

    # Dropout(0.5), training-mode semantics (torch default for a fresh nn.Module).
    # Mask is built with the JAX PRNG outside the kernel (deterministic given the
    # key); it cannot match torch's RNG stream.
    keep = jax.random.bernoulli(dropout_key, 0.5, (B, 256))
    drop_mask = keep.astype(jnp.float32) * 2.0

    logits = mlp_head(x, params["wf1"], params["bf1"], drop_mask,
                      params["wf2"], params["bf2"])
    return logits[:, :10]


if __name__ == "__main__":
    key = jax.random.PRNGKey(0)
    kx, kp, kd = jax.random.split(key, 3)
    x = jax.random.normal(kx, (2, 3, 32, 32), dtype=jnp.float32)  # NCHW, like torch
    params = init_params(kp)

    fwd = jax.jit(test_cnn_forward)
    out = fwd(params, x, kd)
    out = jax.block_until_ready(out)
    assert out.shape == (2, 10) and out.dtype == jnp.float32
    print("KERNEL_OK")
</pallas_src>

<mosaic_0001>
module attributes {stable_mosaic.version = 11 : i64} {
  func.func @_conv_relu_pool_kernel(%arg0: i32, %arg1: memref<4x512x32xf32, #tpu.memory_space<vmem>>, %arg2: memref<32x32xf32, #tpu.memory_space<vmem>>, %arg3: memref<1x32xf32, #tpu.memory_space<vmem>>, %arg4: memref<512x32xf32, #tpu.memory_space<vmem>>) attributes {dimension_semantics = [#tpu.dimension_semantics<parallel>], iteration_bounds = array<i64: 1>, scalar_prefetch = 0 : i64, scratch_operands = 0 : i64, tpu.core_type = #tpu.core_type<tc>, window_params = [{transform_indices = @transform_0, window_bounds = array<i64: 4, 512, 32>}, {pipeline_mode = #tpu.pipeline_mode<synchronous>, transform_indices = @transform_1, window_bounds = array<i64: 32, 32>}, {pipeline_mode = #tpu.pipeline_mode<synchronous>, transform_indices = @transform_2, window_bounds = array<i64: 1, 32>}, {transform_indices = @transform_3, window_bounds = array<i64: 512, 32>}]} {
    %c0 = arith.constant 0 : index
    %c0_0 = arith.constant 0 : index
    %0 = vector.load %arg2[%c0, %c0_0] : memref<32x32xf32, #tpu.memory_space<vmem>>, vector<32x32xf32>
    %c0_1 = arith.constant 0 : index
    %c0_2 = arith.constant 0 : index
    %c0_3 = arith.constant 0 : index
    %1 = vector.load %arg1[%c0_1, %c0_2, %c0_3] : memref<4x512x32xf32, #tpu.memory_space<vmem>>, vector<1x512x32xf32>
    %2 = vector.shape_cast %1 : vector<1x512x32xf32> to vector<512x32xf32>
    %cst = arith.constant dense<0.000000e+00> : vector<512x32xf32>
    %3 = tpu.matmul %2, %0, %cst {dimension_numbers = #tpu.dot_dimension_numbers<[1], [0], [0], [1], [0, 0, 1, 1], [], []>} : vector<512x32xf32>, vector<32x32xf32>, vector<512x32xf32> -> vector<512x32xf32>
    %c1 = arith.constant 1 : index
    %c0_4 = arith.constant 0 : index
    %c0_5 = arith.constant 0 : index
    %4 = vector.load %arg1[%c1, %c0_4, %c0_5] : memref<4x512x32xf32, #tpu.memory_space<vmem>>, vector<1x512x32xf32>
    %5 = vector.shape_cast %4 : vector<1x512x32xf32> to vector<512x32xf32>
    %cst_6 = arith.constant dense<0.000000e+00> : vector<512x32xf32>
    %6 = tpu.matmul %5, %0, %cst_6 {dimension_numbers = #tpu.dot_dimension_numbers<[1], [0], [0], [1], [0, 0, 1, 1], [], []>} : vector<512x32xf32>, vector<32x32xf32>, vector<512x32xf32> -> vector<512x32xf32>
    %7 = arith.maximumf %3, %6 : vector<512x32xf32>
    %c2 = arith.constant 2 : index
    %c0_7 = arith.constant 0 : index
    %c0_8 = arith.constant 0 : index
    %8 = vector.load %arg1[%c2, %c0_7, %c0_8] : memref<4x512x32xf32, #tpu.memory_space<vmem>>, vector<1x512x32xf32>
    %9 = vector.shape_cast %8 : vector<1x512x32xf32> to vector<512x32xf32>
    %cst_9 = arith.constant dense<0.000000e+00> : vector<512x32xf32>
    %10 = tpu.matmul %9, %0, %cst_9 {dimension_numbers = #tpu.dot_dimension_numbers<[1], [0], [0], [1], [0, 0, 1, 1], [], []>} : vector<512x32xf32>, vector<32x32xf32>, vector<512x32xf32> -> vector<512x32xf32>
    %11 = arith.maximumf %7, %10 : vector<512x32xf32>
    %c3 = arith.constant 3 : index
    %c0_10 = arith.constant 0 : index
    %c0_11 = arith.constant 0 : index
    %12 = vector.load %arg1[%c3, %c0_10, %c0_11] : memref<4x512x32xf32, #tpu.memory_space<vmem>>, vector<1x512x32xf32>
    %13 = vector.shape_cast %12 : vector<1x512x32xf32> to vector<512x32xf32>
    %cst_12 = arith.constant dense<0.000000e+00> : vector<512x32xf32>
    %14 = tpu.matmul %13, %0, %cst_12 {dimension_numbers = #tpu.dot_dimension_numbers<[1], [0], [0], [1], [0, 0, 1, 1], [], []>} : vector<512x32xf32>, vector<32x32xf32>, vector<512x32xf32> -> vector<512x32xf32>
    %15 = arith.maximumf %11, %14 : vector<512x32xf32>
    %c0_13 = arith.constant 0 : index
    %c0_14 = arith.constant 0 : index
    %16 = vector.load %arg3[%c0_13, %c0_14] : memref<1x32xf32, #tpu.memory_space<vmem>>, vector<1x32xf32>
    %17 = vector.broadcast %16 : vector<1x32xf32> to vector<512x32xf32>
    %18 = arith.addf %15, %17 : vector<512x32xf32>
    %cst_15 = arith.constant 0.000000e+00 : f32
    %19 = vector.broadcast %cst_15 : f32 to vector<512x32xf32>
    %20 = arith.maximumf %18, %19 : vector<512x32xf32>
    %c0_16 = arith.constant 0 : index
    %c0_17 = arith.constant 0 : index
    %21 = vector.load %arg4[%c0_16, %c0_17] : memref<512x32xf32, #tpu.memory_space<vmem>>, vector<512x32xf32>
    tpu.vector_store %arg4[%c0_16, %c0_17], %20 {strides = array<i32>} : memref<512x32xf32, #tpu.memory_space<vmem>>, vector<512x32xf32>,
    return
  }
  func.func @transform_0(%arg0: i32) -> (i32, i32, i32) {
    %c0_i32 = arith.constant 0 : i32
    %c0_i32_0 = arith.constant 0 : i32
    %c0_i32_1 = arith.constant 0 : i32
    return %c0_i32, %arg0, %c0_i32_0 : i32, i32, i32
  }
  func.func @transform_1(%arg0: i32) -> (i32, i32) {
    %c0_i32 = arith.constant 0 : i32
    %c0_i32_0 = arith.constant 0 : i32
    %c0_i32_1 = arith.constant 0 : i32
    return %c0_i32, %c0_i32_0 : i32, i32
  }
  func.func @transform_2(%arg0: i32) -> (i32, i32) {
    %c0_i32 = arith.constant 0 : i32
    %c0_i32_0 = arith.constant 0 : i32
    %c0_i32_1 = arith.constant 0 : i32
    return %c0_i32, %c0_i32_0 : i32, i32
  }
  func.func @transform_3(%arg0: i32) -> (i32, i32) {
    %c0_i32 = arith.constant 0 : i32
    %c0_i32_0 = arith.constant 0 : i32
    return %arg0, %c0_i32 : i32, i32
  }
}

module attributes {stable_mosaic.version = 11 : i64} {
  func.func @_conv_relu_pool_kernel(%arg0: i32, %arg1: memref<4x128x288xf32, #tpu.memory_space<vmem>>, %arg2: memref<288x64xf32, #tpu.memory_space<vmem>>, %arg3: memref<1x64xf32, #tpu.memory_space<vmem>>, %arg4: memref<128x64xf32, #tpu.memory_space<vmem>>) attributes {dimension_semantics = [#tpu.dimension_semantics<parallel>], iteration_bounds = array<i64: 1>, scalar_prefetch = 0 : i64, scratch_operands = 0 : i64, tpu.core_type = #tpu.core_type<tc>, window_params = [{transform_indices = @transform_0, window_bounds = array<i64: 4, 128, 288>}, {pipeline_mode = #tpu.pipeline_mode<synchronous>, transform_indices = @transform_1, window_bounds = array<i64: 288, 64>}, {pipeline_mode = #tpu.pipeline_mode<synchronous>, transform_indices = @transform_2, window_bounds = array<i64: 1, 64>}, {transform_indices = @transform_3, window_bounds = array<i64: 128, 64>}]} {
    %c0 = arith.constant 0 : index
    %c0_0 = arith.constant 0 : index
    %0 = vector.load %arg2[%c0, %c0_0] : memref<288x64xf32, #tpu.memory_space<vmem>>, vector<288x64xf32>
    %c0_1 = arith.constant 0 : index
    %c0_2 = arith.constant 0 : index
    %c0_3 = arith.constant 0 : index
    %1 = vector.load %arg1[%c0_1, %c0_2, %c0_3] : memref<4x128x288xf32, #tpu.memory_space<vmem>>, vector<1x128x288xf32>
    %2 = vector.shape_cast %1 : vector<1x128x288xf32> to vector<128x288xf32>
    %cst = arith.constant dense<0.000000e+00> : vector<128x64xf32>
    %3 = tpu.matmul %2, %0, %cst {dimension_numbers = #tpu.dot_dimension_numbers<[1], [0], [0], [1], [0, 0, 1, 1], [], []>} : vector<128x288xf32>, vector<288x64xf32>, vector<128x64xf32> -> vector<128x64xf32>
    %c1 = arith.constant 1 : index
    %c0_4 = arith.constant 0 : index
    %c0_5 = arith.constant 0 : index
    %4 = vector.load %arg1[%c1, %c0_4, %c0_5] : memref<4x128x288xf32, #tpu.memory_space<vmem>>, vector<1x128x288xf32>
    %5 = vector.shape_cast %4 : vector<1x128x288xf32> to vector<128x288xf32>
    %cst_6 = arith.constant dense<0.000000e+00> : vector<128x64xf32>
    %6 = tpu.matmul %5, %0, %cst_6 {dimension_numbers = #tpu.dot_dimension_numbers<[1], [0], [0], [1], [0, 0, 1, 1], [], []>} : vector<128x288xf32>, vector<288x64xf32>, vector<128x64xf32> -> vector<128x64xf32>
    %7 = arith.maximumf %3, %6 : vector<128x64xf32>
    %c2 = arith.constant 2 : index
    %c0_7 = arith.constant 0 : index
    %c0_8 = arith.constant 0 : index
    %8 = vector.load %arg1[%c2, %c0_7, %c0_8] : memref<4x128x288xf32, #tpu.memory_space<vmem>>, vector<1x128x288xf32>
    %9 = vector.shape_cast %8 : vector<1x128x288xf32> to vector<128x288xf32>
    %cst_9 = arith.constant dense<0.000000e+00> : vector<128x64xf32>
    %10 = tpu.matmul %9, %0, %cst_9 {dimension_numbers = #tpu.dot_dimension_numbers<[1], [0], [0], [1], [0, 0, 1, 1], [], []>} : vector<128x288xf32>, vector<288x64xf32>, vector<128x64xf32> -> vector<128x64xf32>
    %11 = arith.maximumf %7, %10 : vector<128x64xf32>
    %c3 = arith.constant 3 : index
    %c0_10 = arith.constant 0 : index
    %c0_11 = arith.constant 0 : index
    %12 = vector.load %arg1[%c3, %c0_10, %c0_11] : memref<4x128x288xf32, #tpu.memory_space<vmem>>, vector<1x128x288xf32>
    %13 = vector.shape_cast %12 : vector<1x128x288xf32> to vector<128x288xf32>
    %cst_12 = arith.constant dense<0.000000e+00> : vector<128x64xf32>
    %14 = tpu.matmul %13, %0, %cst_12 {dimension_numbers = #tpu.dot_dimension_numbers<[1], [0], [0], [1], [0, 0, 1, 1], [], []>} : vector<128x288xf32>, vector<288x64xf32>, vector<128x64xf32> -> vector<128x64xf32>
    %15 = arith.maximumf %11, %14 : vector<128x64xf32>
    %c0_13 = arith.constant 0 : index
    %c0_14 = arith.constant 0 : index
    %16 = vector.load %arg3[%c0_13, %c0_14] : memref<1x64xf32, #tpu.memory_space<vmem>>, vector<1x64xf32>
    %17 = vector.broadcast %16 : vector<1x64xf32> to vector<128x64xf32>
    %18 = arith.addf %15, %17 : vector<128x64xf32>
    %cst_15 = arith.constant 0.000000e+00 : f32
    %19 = vector.broadcast %cst_15 : f32 to vector<128x64xf32>
    %20 = arith.maximumf %18, %19 : vector<128x64xf32>
    %c0_16 = arith.constant 0 : index
    %c0_17 = arith.constant 0 : index
    %21 = vector.load %arg4[%c0_16, %c0_17] : memref<128x64xf32, #tpu.memory_space<vmem>>, vector<128x64xf32>
    tpu.vector_store %arg4[%c0_16, %c0_17], %20 {strides = array<i32>} : memref<128x64xf32, #tpu.memory_space<vmem>>, vector<128x64xf32>,
    return
  }
  func.func @transform_0(%arg0: i32) -> (i32, i32, i32) {
    %c0_i32 = arith.constant 0 : i32
    %c0_i32_0 = arith.constant 0 : i32
    %c0_i32_1 = arith.constant 0 : i32
    return %c0_i32, %arg0, %c0_i32_0 : i32, i32, i32
  }
  func.func @transform_1(%arg0: i32) -> (i32, i32) {
    %c0_i32 = arith.constant 0 : i32
    %c0_i32_0 = arith.constant 0 : i32
    %c0_i32_1 = arith.constant 0 : i32
    return %c0_i32, %c0_i32_0 : i32, i32
  }
  func.func @transform_2(%arg0: i32) -> (i32, i32) {
    %c0_i32 = arith.constant 0 : i32
    %c0_i32_0 = arith.constant 0 : i32
    %c0_i32_1 = arith.constant 0 : i32
    return %c0_i32, %c0_i32_0 : i32, i32
  }
  func.func @transform_3(%arg0: i32) -> (i32, i32) {
    %c0_i32 = arith.constant 0 : i32
    %c0_i32_0 = arith.constant 0 : i32
    return %arg0, %c0_i32 : i32, i32
  }
}

module attributes {stable_mosaic.version = 11 : i64} {
  func.func @_conv_relu_pool_kernel(%arg0: i32, %arg1: memref<4x32x576xf32, #tpu.memory_space<vmem>>, %arg2: memref<576x128xf32, #tpu.memory_space<vmem>>, %arg3: memref<1x128xf32, #tpu.memory_space<vmem>>, %arg4: memref<32x128xf32, #tpu.memory_space<vmem>>) attributes {dimension_semantics = [#tpu.dimension_semantics<parallel>], iteration_bounds = array<i64: 1>, scalar_prefetch = 0 : i64, scratch_operands = 0 : i64, tpu.core_type = #tpu.core_type<tc>, window_params = [{transform_indices = @transform_0, window_bounds = array<i64: 4, 32, 576>}, {pipeline_mode = #tpu.pipeline_mode<synchronous>, transform_indices = @transform_1, window_bounds = array<i64: 576, 128>}, {pipeline_mode = #tpu.pipeline_mode<synchronous>, transform_indices = @transform_2, window_bounds = array<i64: 1, 128>}, {transform_indices = @transform_3, window_bounds = array<i64: 32, 128>}]} {
    %c0 = arith.constant 0 : index
    %c0_0 = arith.constant 0 : index
    %0 = vector.load %arg2[%c0, %c0_0] : memref<576x128xf32, #tpu.memory_space<vmem>>, vector<576x128xf32>
    %c0_1 = arith.constant 0 : index
    %c0_2 = arith.constant 0 : index
    %c0_3 = arith.constant 0 : index
    %1 = vector.load %arg1[%c0_1, %c0_2, %c0_3] : memref<4x32x576xf32, #tpu.memory_space<vmem>>, vector<1x32x576xf32>
    %2 = vector.shape_cast %1 : vector<1x32x576xf32> to vector<32x576xf32>
    %cst = arith.constant dense<0.000000e+00> : vector<32x128xf32>
    %3 = tpu.matmul %2, %0, %cst {dimension_numbers = #tpu.dot_dimension_numbers<[1], [0], [0], [1], [0, 0, 1, 1], [], []>} : vector<32x576xf32>, vector<576x128xf32>, vector<32x128xf32> -> vector<32x128xf32>
    %c1 = arith.constant 1 : index
    %c0_4 = arith.constant 0 : index
    %c0_5 = arith.constant 0 : index
    %4 = vector.load %arg1[%c1, %c0_4, %c0_5] : memref<4x32x576xf32, #tpu.memory_space<vmem>>, vector<1x32x576xf32>
    %5 = vector.shape_cast %4 : vector<1x32x576xf32> to vector<32x576xf32>
    %cst_6 = arith.constant dense<0.000000e+00> : vector<32x128xf32>
    %6 = tpu.matmul %5, %0, %cst_6 {dimension_numbers = #tpu.dot_dimension_numbers<[1], [0], [0], [1], [0, 0, 1, 1], [], []>} : vector<32x576xf32>, vector<576x128xf32>, vector<32x128xf32> -> vector<32x128xf32>
    %7 = arith.maximumf %3, %6 : vector<32x128xf32>
    %c2 = arith.constant 2 : index
    %c0_7 = arith.constant 0 : index
    %c0_8 = arith.constant 0 : index
    %8 = vector.load %arg1[%c2, %c0_7, %c0_8] : memref<4x32x576xf32, #tpu.memory_space<vmem>>, vector<1x32x576xf32>
    %9 = vector.shape_cast %8 : vector<1x32x576xf32> to vector<32x576xf32>
    %cst_9 = arith.constant dense<0.000000e+00> : vector<32x128xf32>
    %10 = tpu.matmul %9, %0, %cst_9 {dimension_numbers = #tpu.dot_dimension_numbers<[1], [0], [0], [1], [0, 0, 1, 1], [], []>} : vector<32x576xf32>, vector<576x128xf32>, vector<32x128xf32> -> vector<32x128xf32>
    %11 = arith.maximumf %7, %10 : vector<32x128xf32>
    %c3 = arith.constant 3 : index
    %c0_10 = arith.constant 0 : index
    %c0_11 = arith.constant 0 : index
    %12 = vector.load %arg1[%c3, %c0_10, %c0_11] : memref<4x32x576xf32, #tpu.memory_space<vmem>>, vector<1x32x576xf32>
    %13 = vector.shape_cast %12 : vector<1x32x576xf32> to vector<32x576xf32>
    %cst_12 = arith.constant dense<0.000000e+00> : vector<32x128xf32>
    %14 = tpu.matmul %13, %0, %cst_12 {dimension_numbers = #tpu.dot_dimension_numbers<[1], [0], [0], [1], [0, 0, 1, 1], [], []>} : vector<32x576xf32>, vector<576x128xf32>, vector<32x128xf32> -> vector<32x128xf32>
    %15 = arith.maximumf %11, %14 : vector<32x128xf32>
    %c0_13 = arith.constant 0 : index
    %c0_14 = arith.constant 0 : index
    %16 = vector.load %arg3[%c0_13, %c0_14] : memref<1x128xf32, #tpu.memory_space<vmem>>, vector<1x128xf32>
    %17 = vector.broadcast %16 : vector<1x128xf32> to vector<32x128xf32>
    %18 = arith.addf %15, %17 : vector<32x128xf32>
    %cst_15 = arith.constant 0.000000e+00 : f32
    %19 = vector.broadcast %cst_15 : f32 to vector<32x128xf32>
    %20 = arith.maximumf %18, %19 : vector<32x128xf32>
    %c0_16 = arith.constant 0 : index
    %c0_17 = arith.constant 0 : index
    %21 = vector.load %arg4[%c0_16, %c0_17] : memref<32x128xf32, #tpu.memory_space<vmem>>, vector<32x128xf32>
    tpu.vector_store %arg4[%c0_16, %c0_17], %20 {strides = array<i32>} : memref<32x128xf32, #tpu.memory_space<vmem>>, vector<32x128xf32>,
    return
  }
  func.func @transform_0(%arg0: i32) -> (i32, i32, i32) {
    %c0_i32 = arith.constant 0 : i32
    %c0_i32_0 = arith.constant 0 : i32
    %c0_i32_1 = arith.constant 0 : i32
    return %c0_i32, %arg0, %c0_i32_0 : i32, i32, i32
  }
  func.func @transform_1(%arg0: i32) -> (i32, i32) {
    %c0_i32 = arith.constant 0 : i32
    %c0_i32_0 = arith.constant 0 : i32
    %c0_i32_1 = arith.constant 0 : i32
    return %c0_i32, %c0_i32_0 : i32, i32
  }
  func.func @transform_2(%arg0: i32) -> (i32, i32) {
    %c0_i32 = arith.constant 0 : i32
    %c0_i32_0 = arith.constant 0 : i32
    %c0_i32_1 = arith.constant 0 : i32
    return %c0_i32, %c0_i32_0 : i32, i32
  }
  func.func @transform_3(%arg0: i32) -> (i32, i32) {
    %c0_i32 = arith.constant 0 : i32
    %c0_i32_0 = arith.constant 0 : i32
    return %arg0, %c0_i32 : i32, i32
  }
}

module attributes {stable_mosaic.version = 11 : i64} {
  func.func @_mlp_head_kernel(%arg0: i32, %arg1: memref<2x2048xf32, #tpu.memory_space<vmem>>, %arg2: memref<2048x256xf32, #tpu.memory_space<vmem>>, %arg3: memref<1x256xf32, #tpu.memory_space<vmem>>, %arg4: memref<2x256xf32, #tpu.memory_space<vmem>>, %arg5: memref<256x128xf32, #tpu.memory_space<vmem>>, %arg6: memref<1x128xf32, #tpu.memory_space<vmem>>, %arg7: memref<2x128xf32, #tpu.memory_space<vmem>>) attributes {dimension_semantics = [#tpu.dimension_semantics<parallel>], iteration_bounds = array<i64: 1>, scalar_prefetch = 0 : i64, scratch_operands = 0 : i64, tpu.core_type = #tpu.core_type<tc>, window_params = [{transform_indices = @transform_0, window_bounds = array<i64: 2, 2048>}, {pipeline_mode = #tpu.pipeline_mode<synchronous>, transform_indices = @transform_1, window_bounds = array<i64: 2048, 256>}, {pipeline_mode = #tpu.pipeline_mode<synchronous>, transform_indices = @transform_2, window_bounds = array<i64: 1, 256>}, {transform_indices = @transform_3, window_bounds = array<i64: 2, 256>}, {pipeline_mode = #tpu.pipeline_mode<synchronous>, transform_indices = @transform_4, window_bounds = array<i64: 256, 128>}, {pipeline_mode = #tpu.pipeline_mode<synchronous>, transform_indices = @transform_5, window_bounds = array<i64: 1, 128>}, {transform_indices = @transform_6, window_bounds = array<i64: 2, 128>}]} {
    %c0 = arith.constant 0 : index
    %c0_0 = arith.constant 0 : index
    %0 = vector.load %arg1[%c0, %c0_0] : memref<2x2048xf32, #tpu.memory_space<vmem>>, vector<2x2048xf32>
    %c0_1 = arith.constant 0 : index
    %c0_2 = arith.constant 0 : index
    %1 = vector.load %arg2[%c0_1, %c0_2] : memref<2048x256xf32, #tpu.memory_space<vmem>>, vector<2048x256xf32>
    %cst = arith.constant dense<0.000000e+00> : vector<2x256xf32>
    %2 = tpu.matmul %0, %1, %cst {dimension_numbers = #tpu.dot_dimension_numbers<[1], [0], [0], [1], [0, 0, 1, 1], [], []>} : vector<2x2048xf32>, vector<2048x256xf32>, vector<2x256xf32> -> vector<2x256xf32>
    %c0_3 = arith.constant 0 : index
    %c0_4 = arith.constant 0 : index
    %3 = vector.load %arg3[%c0_3, %c0_4] : memref<1x256xf32, #tpu.memory_space<vmem>>, vector<1x256xf32>
    %4 = vector.broadcast %3 : vector<1x256xf32> to vector<2x256xf32>
    %5 = arith.addf %2, %4 : vector<2x256xf32>
    %cst_5 = arith.constant 0.000000e+00 : f32
    %6 = vector.broadcast %cst_5 : f32 to vector<2x256xf32>
    %7 = arith.maximumf %5, %6 : vector<2x256xf32>
    %c0_6 = arith.constant 0 : index
    %c0_7 = arith.constant 0 : index
    %8 = vector.load %arg4[%c0_6, %c0_7] : memref<2x256xf32, #tpu.memory_space<vmem>>, vector<2x256xf32>
    %9 = arith.mulf %7, %8 : vector<2x256xf32>
    %c0_8 = arith.constant 0 : index
    %c0_9 = arith.constant 0 : index
    %10 = vector.load %arg5[%c0_8, %c0_9] : memref<256x128xf32, #tpu.memory_space<vmem>>, vector<256x128xf32>
    %cst_10 = arith.constant dense<0.000000e+00> : vector<2x128xf32>
    %11 = tpu.matmul %9, %10, %cst_10 {dimension_numbers = #tpu.dot_dimension_numbers<[1], [0], [0], [1], [0, 0, 1, 1], [], []>} : vector<2x256xf32>, vector<256x128xf32>, vector<2x128xf32> -> vector<2x128xf32>
    %c0_11 = arith.constant 0 : index
    %c0_12 = arith.constant 0 : index
    %12 = vector.load %arg6[%c0_11, %c0_12] : memref<1x128xf32, #tpu.memory_space<vmem>>, vector<1x128xf32>
    %13 = vector.broadcast %12 : vector<1x128xf32> to vector<2x128xf32>
    %14 = arith.addf %11, %13 : vector<2x128xf32>
    %c0_13 = arith.constant 0 : index
    %c0_14 = arith.constant 0 : index
    %15 = vector.load %arg7[%c0_13, %c0_14] : memref<2x128xf32, #tpu.memory_space<vmem>>, vector<2x128xf32>
    tpu.vector_store %arg7[%c0_13, %c0_14], %14 {strides = array<i32>} : memref<2x128xf32, #tpu.memory_space<vmem>>, vector<2x128xf32>,
    return
  }
  func.func @transform_0(%arg0: i32) -> (i32, i32) {
    %c0_i32 = arith.constant 0 : i32
    %c0_i32_0 = arith.constant 0 : i32
    return %arg0, %c0_i32 : i32, i32
  }
  func.func @transform_1(%arg0: i32) -> (i32, i32) {
    %c0_i32 = arith.constant 0 : i32
    %c0_i32_0 = arith.constant 0 : i32
    %c0_i32_1 = arith.constant 0 : i32
    return %c0_i32, %c0_i32_0 : i32, i32
  }
  func.func @transform_2(%arg0: i32) -> (i32, i32) {
    %c0_i32 = arith.constant 0 : i32
    %c0_i32_0 = arith.constant 0 : i32
    %c0_i32_1 = arith.constant 0 : i32
    return %c0_i32, %c0_i32_0 : i32, i32
  }
  func.func @transform_3(%arg0: i32) -> (i32, i32) {
    %c0_i32 = arith.constant 0 : i32
    %c0_i32_0 = arith.constant 0 : i32
    return %arg0, %c0_i32 : i32, i32
  }
  func.func @transform_4(%arg0: i32) -> (i32, i32) {
    %c0_i32 = arith.constant 0 : i32
    %c0_i32_0 = arith.constant 0 : i32
    %c0_i32_1 = arith.constant 0 : i32
    return %c0_i32, %c0_i32_0 : i32, i32
  }
  func.func @transform_5(%arg0: i32) -> (i32, i32) {
    %c0_i32 = arith.constant 0 : i32
    %c0_i32_0 = arith.constant 0 : i32
    %c0_i32_1 = arith.constant 0 : i32
    return %c0_i32, %c0_i32_0 : i32, i32
  }
  func.func @transform_6(%arg0: i32) -> (i32, i32) {
    %c0_i32 = arith.constant 0 : i32
    %c0_i32_0 = arith.constant 0 : i32
    return %arg0, %c0_i32 : i32, i32
  }
}

</mosaic_0001>

<bundles_post_ra>
// kernel: test_cnn_forward.4
= control target key start
LH: loop header
LB: loop body
LE: loop exit
PB: predicated region body
PF: predicated region fallthrough
CT: control target
= control target key end

     0   :  { %vm82_vm0 = vcmask 261120   ;;  %s6107_s1 = inlined_call_operand.vmem [shape: f32[32,32], index: 1, kind: input, shape index: {}]   ;;  %s6108_s0 = inlined_call_operand.vmem [shape: f32[4,512,32], index: 0, kind: input, shape index: {}]   ;;  %s6109_s2 = inlined_call_operand.vmem [shape: f32[1,32], index: 2, kind: input, shape index: {}]   ;;  %s6110_s3 = inlined_call_operand.vmem [shape: f32[512,32], index: 3, kind: output, shape index: {}]  }
   0x1   :  { %v14_v0 = vld [vmem:[%s6107_s1] sm:$0xff]  ;;  %v15_v1 = vld [vmem:[%s6107_s1 + $0x8] sm:$0xff]  ;;  %v16_v2 = vld [vmem:[%s6107_s1 + $0x10] sm:$0xff] }
   0x2   :  { %v4118_v3 = vpack.c.bf16 %v15_v1, %v14_v0  ;;  %v17_v4 = vld [vmem:[%s6107_s1 + $0x18] sm:$0xff]  ;;  %v18_v5 = vld [vmem:[%s6108_s0] sm:$0xff]  ;;  %v19_v8 = vld [vmem:[%s6108_s0 + $0x8] sm:$0xff] }
   0x3   :  { %v3045_v6 = vld [vmem:[%s6108_s0 + $0x200] sm:$0xff]  ;;  %v4122_v7 = vpack.c.bf16 %v17_v4, %v16_v2  ;;  %3710 = vmatprep.mubr.msk.f32.mxu0 %vm82_vm0, %v18_v5  ;;  %v3046_v9 = vld [vmem:[%s6108_s0 + $0x208] sm:$0xff]  ;;  %v20_v10 = vld [vmem:[%s6108_s0 + $0x10] sm:$0xff] }
   0x4   :  { %3814 = vmatprep.mubr.msk.f32.mxu1 %vm82_vm0, %v3045_v6  ;;  %4119 = vmatprep.subr.bf16.mxu0 %v4118_v3  ;;  %v3047_v11 = vld [vmem:[%s6108_s0 + $0x210] sm:$0xff]  ;;  %v21_v12 = vld [vmem:[%s6108_s0 + $0x18] sm:$0xff]  ;;  %v22_v14 = vld [vmem:[%s6108_s0 + $0x20] sm:$0xff] }
   0x5   :  { %4127 = vmatprep.subr.bf16.mxu1 %v4118_v3  ;;  %4121 = vmatpush3.bf16.msra.mxu0 %v4118_v3  ;;  %v3048_v13 = vld [vmem:[%s6108_s0 + $0x218] sm:$0xff]  ;;  %v3049_v15 = vld [vmem:[%s6108_s0 + $0x220] sm:$0xff]  ;;  %v23_v16 = vld [vmem:[%s6108_s0 + $0x28] sm:$0xff] }
   0x6   :  { %4129 = vmatpush3.bf16.msra.mxu1 %v4118_v3  ;;  %4123 = vmatprep.subr.bf16.mxu0 %v4122_v7  ;;  %v3050_v17 = vld [vmem:[%s6108_s0 + $0x228] sm:$0xff]  ;;  %v24_v18 = vld [vmem:[%s6108_s0 + $0x30] sm:$0xff]  ;;  %v25_v20 = vld [vmem:[%s6108_s0 + $0x38] sm:$0xff] }
   0x7   :  { %4131 = vmatprep.subr.bf16.mxu1 %v4122_v7  ;;  %v3051_v19 = vld [vmem:[%s6108_s0 + $0x230] sm:$0xff]  ;;  %v3052_v21 = vld [vmem:[%s6108_s0 + $0x238] sm:$0xff]  ;;  %v26_v22 = vld [vmem:[%s6108_s0 + $0x40] sm:$0xff] }
   0x8   :  { %v3053_v23 = vld [vmem:[%s6108_s0 + $0x240] sm:$0xff]  ;;  %v27_v24 = vld [vmem:[%s6108_s0 + $0x48] sm:$0xff]  ;;  %v28_v26 = vld [vmem:[%s6108_s0 + $0x50] sm:$0xff] }
   0x9   :  { %4125 = vmatpush3.bf16.msra.mxu0 %v4122_v7  ;;  %v3054_v25 = vld [vmem:[%s6108_s0 + $0x248] sm:$0xff]  ;;  %v3055_v27 = vld [vmem:[%s6108_s0 + $0x250] sm:$0xff]  ;;  %v29_v28 = vld [vmem:[%s6108_s0 + $0x58] sm:$0xff] }
   0xa   :  { %4133 = vmatpush3.bf16.msra.mxu1 %v4122_v7  ;;  %4135 = vmatprep.subr.bf16.mxu0 %v4118_v3  ;;  %v3056_v29 = vld [vmem:[%s6108_s0 + $0x258] sm:$0xff]  ;;  %v30_v30 = vld [vmem:[%s6108_s0 + $0x60] sm:$0xff]  ;;  %v31_v32 = vld [vmem:[%s6108_s0 + $0x68] sm:$0xff] }
   0xb   :  { %4143 = vmatprep.subr.bf16.mxu1 %v4118_v3  ;;  %v3057_v31 = vld [vmem:[%s6108_s0 + $0x260] sm:$0xff]  ;;  %v3058_v33 = vld [vmem:[%s6108_s0 + $0x268] sm:$0xff]  ;;  %v32_v34 = vld [vmem:[%s6108_s0 + $0x70] sm:$0xff] }
   0xc   :  { %3711 = vmatmul.mubr.msk.f32.vlgmr.msra.gmra.mrb[0].mxu0 %vm82_vm0, %v19_v8  ;;  %v3059_v35 = vld [vmem:[%s6108_s0 + $0x270] sm:$0xff]  ;;  %v33_v36 = vld [vmem:[%s6108_s0 + $0x78] sm:$0xff]  ;;  %v34_v38 = vld [vmem:[%s6108_s0 + $0x80] sm:$0xff] }
   0xd   :  { %3815 = vmatmul.mubr.msk.f32.vlgmr.msra.gmra.mrb[0].mxu1 %vm82_vm0, %v3046_v9  ;;  %4137 = vmatpush3.bf16.msra.mxu0 %v4118_v3  ;;  %v3060_v37 = vld [vmem:[%s6108_s0 + $0x278] sm:$0xff]  ;;  %v3061_v39 = vld [vmem:[%s6108_s0 + $0x280] sm:$0xff]  ;;  %v35_v40 = vld [vmem:[%s6108_s0 + $0x88] sm:$0xff] }
   0xe   :  { %3713 = vmatprep.mubr.msk.f32.mxu0 %vm82_vm0, %v20_v10  ;;  %3817 = vmatprep.mubr.msk.f32.mxu1 %vm82_vm0, %v3047_v11  ;;  %v3062_v41 = vld [vmem:[%s6108_s0 + $0x288] sm:$0xff]  ;;  %v36_v42 = vld [vmem:[%s6108_s0 + $0x90] sm:$0xff]  ;;  %v37_v44 = vld [vmem:[%s6108_s0 + $0x98] sm:$0xff] }
   0xf   :  { %4145 = vmatpush3.bf16.msra.mxu1 %v4118_v3  ;;  %4139 = vmatprep.subr.bf16.mxu0 %v4122_v7  ;;  %v3063_v43 = vld [vmem:[%s6108_s0 + $0x290] sm:$0xff]  ;;  %v3064_v45 = vld [vmem:[%s6108_s0 + $0x298] sm:$0xff]  ;;  %v38_v46 = vld [vmem:[%s6108_s0 + $0xa0] sm:$0xff] }
  0x10   :  { %4147 = vmatprep.subr.bf16.mxu1 %v4122_v7  ;;  %3714 = vmatmul.mubr.msk.f32.gmra.mrb[2].mxu0 %vm82_vm0, %v21_v12  ;;  %v3065_v47 = vld [vmem:[%s6108_s0 + $0x2a0] sm:$0xff]  ;;  %v39_v48 = vld [vmem:[%s6108_s0 + $0xa8] sm:$0xff]  ;;  %v40_v50 = vld [vmem:[%s6108_s0 + $0xb0] sm:$0xff] }
  0x11   :  { %3818 = vmatmul.mubr.msk.f32.gmra.mrb[2].mxu1 %vm82_vm0, %v3048_v13  ;;  %3716 = vmatprep.mubr.msk.f32.mxu0 %vm82_vm0, %v22_v14  ;;  %v3066_v49 = vld [vmem:[%s6108_s0 + $0x2a8] sm:$0xff]  ;;  %v3067_v51 = vld [vmem:[%s6108_s0 + $0x2b0] sm:$0xff]  ;;  %v41_v52 = vld [vmem:[%s6108_s0 + $0xb8] sm:$0xff] }
  0x12   :  { %3820 = vmatprep.mubr.msk.f32.mxu1 %vm82_vm0, %v3049_v15  ;;  %4141 = vmatpush3.bf16.msra.mxu0 %v4122_v7  ;;  %v3068_v53 = vld [vmem:[%s6108_s0 + $0x2b8] sm:$0xff]  ;;  %v42_v54 = vld [vmem:[%s6108_s0 + $0xc0] sm:$0xff]  ;;  %v43_v56 = vld [vmem:[%s6108_s0 + $0xc8] sm:$0xff] }
  0x13   :  { %4149 = vmatpush3.bf16.msra.mxu1 %v4122_v7  ;;  %v3069_v55 = vld [vmem:[%s6108_s0 + $0x2c0] sm:$0xff]  ;;  %v3070_v57 = vld [vmem:[%s6108_s0 + $0x2c8] sm:$0xff]  ;;  %v44_v58 = vld [vmem:[%s6108_s0 + $0xd0] sm:$0xff] }
  0x14   :  { %3717 = vmatmul.mubr.msk.f32.gmra.mrb[4].mxu0 %vm82_vm0, %v23_v16  ;;  %v3071_v59 = vld [vmem:[%s6108_s0 + $0x2d0] sm:$0xff]  ;;  %v45_v60 = vld [vmem:[%s6108_s0 + $0xd8] sm:$0xff]  ;;  %v46_v62 = vld [vmem:[%s6108_s0 + $0xe0] sm:$0xff] }
  0x15   :  { %3821 = vmatmul.mubr.msk.f32.gmra.mrb[4].mxu1 %vm82_vm0, %v3050_v17  ;;  %3719 = vmatprep.mubr.msk.f32.mxu0 %vm82_vm0, %v24_v18  ;;  %v3072_v61 = vld [vmem:[%s6108_s0 + $0x2d8] sm:$0xff]  ;;  %v3073_v63 = vld [vmem:[%s6108_s0 + $0x2e0] sm:$0xff]  ;;  %v47_v0 = vld [vmem:[%s6108_s0 + $0xe8] sm:$0xff] }
  0x16   :  { %3823 = vmatprep.mubr.msk.f32.mxu1 %vm82_vm0, %v3051_v19  ;;  %v3074_v1 = vld [vmem:[%s6108_s0 + $0x2e8] sm:$0xff]  ;;  %v48_v2 = vld [vmem:[%s6108_s0 + $0xf0] sm:$0xff]  ;;  %v49_v4 = vld [vmem:[%s6108_s0 + $0xf8] sm:$0xff] }
  0x17   :  { %v3075_v3 = vld [vmem:[%s6108_s0 + $0x2f0] sm:$0xff]  ;;  %v3076_v5 = vld [vmem:[%s6108_s0 + $0x2f8] sm:$0xff]  ;;  %v50_v6 = vld [vmem:[%s6108_s0 + $0x100] sm:$0xff] }
  0x18   :  { %3720 = vmatmul.mubr.msk.f32.gmra.mrb[6].mxu0 %vm82_vm0, %v25_v20  ;;  %v3077_v7 = vld [vmem:[%s6108_s0 + $0x300] sm:$0xff]  ;;  %v51_v8 = vld [vmem:[%s6108_s0 + $0x108] sm:$0xff]  ;;  %v52_v10 = vld [vmem:[%s6108_s0 + $0x110] sm:$0xff] }
  0x19   :  { %3824 = vmatmul.mubr.msk.f32.gmra.mrb[6].mxu1 %vm82_vm0, %v3052_v21  ;;  %3722 = vmatprep.mubr.msk.f32.mxu0 %vm82_vm0, %v26_v22  ;;  %v3078_v9 = vld [vmem:[%s6108_s0 + $0x308] sm:$0xff]  ;;  %v3079_v11 = vld [vmem:[%s6108_s0 + $0x310] sm:$0xff]  ;;  %v53_v12 = vld [vmem:[%s6108_s0 + $0x118] sm:$0xff] }
  0x1a   :  { %3826 = vmatprep.mubr.msk.f32.mxu1 %vm82_vm0, %v3053_v23  ;;  %v3080_v13 = vld [vmem:[%s6108_s0 + $0x318] sm:$0xff]  ;;  %v54_v14 = vld [vmem:[%s6108_s0 + $0x120] sm:$0xff]  ;;  %v55_v16 = vld [vmem:[%s6108_s0 + $0x128] sm:$0xff] }
  0x1b   :  { %v3081_v15 = vld [vmem:[%s6108_s0 + $0x320] sm:$0xff]  ;;  %v3082_v17 = vld [vmem:[%s6108_s0 + $0x328] sm:$0xff]  ;;  %v56_v18 = vld [vmem:[%s6108_s0 + $0x130] sm:$0xff] }
  0x1c   :  { %3723 = vmatmul.mubr.msk.f32.gmra.mrb[8].mxu0 %vm82_vm0, %v27_v24  ;;  %v3083_v19 = vld [vmem:[%s6108_s0 + $0x330] sm:$0xff]  ;;  %v57_v20 = vld [vmem:[%s6108_s0 + $0x138] sm:$0xff]  ;;  %v58_v22 = vld [vmem:[%s6108_s0 + $0x140] sm:$0xff] }
  0x1d   :  { %3827 = vmatmul.mubr.msk.f32.gmra.mrb[8].mxu1 %vm82_vm0, %v3054_v25  ;;  %3725 = vmatprep.mubr.msk.f32.mxu0 %vm82_vm0, %v28_v26  ;;  %v3084_v21 = vld [vmem:[%s6108_s0 + $0x338] sm:$0xff]  ;;  %v3085_v23 = vld [vmem:[%s6108_s0 + $0x340] sm:$0xff]  ;;  %v59_v24 = vld [vmem:[%s6108_s0 + $0x148] sm:$0xff] }
  0x1e   :  { %3829 = vmatprep.mubr.msk.f32.mxu1 %vm82_vm0, %v3055_v27  ;;  %v3086_v25 = vld [vmem:[%s6108_s0 + $0x348] sm:$0xff]  ;;  %v60_v26 = vld [vmem:[%s6108_s0 + $0x150] sm:$0xff] }
  0x1f   :  { %v3087_v27 = vld [vmem:[%s6108_s0 + $0x350] sm:$0xff] }
  0x20   :  { %3726 = vmatmul.mubr.msk.f32.gmra.mrb[10].mxu0 %vm82_vm0, %v29_v28  ;;  %v61_v28 = vld [vmem:[%s6108_s0 + $0x158] sm:$0xff] }
  0x21   :  { %3830 = vmatmul.mubr.msk.f32.gmra.mrb[10].mxu1 %vm82_vm0, %v3056_v29  ;;  %3728 = vmatprep.mubr.msk.f32.mxu0 %vm82_vm0, %v30_v30  ;;  %v3088_v29 = vld [vmem:[%s6108_s0 + $0x358] sm:$0xff]  ;;  %v62_v30 = vld [vmem:[%s6108_s0 + $0x160] sm:$0xff] }
  0x22   :  { %3832 = vmatprep.mubr.msk.f32.mxu1 %vm82_vm0, %v3057_v31  ;;  %v3089_v31 = vld [vmem:[%s6108_s0 + $0x360] sm:$0xff] }
  0x24   :  { %3729 = vmatmul.mubr.msk.f32.gmra.mrb[12].mxu0 %vm82_vm0, %v31_v32  ;;  %v63_v32 = vld [vmem:[%s6108_s0 + $0x168] sm:$0xff] }
  0x25   :  { %3833 = vmatmul.mubr.msk.f32.gmra.mrb[12].mxu1 %vm82_vm0, %v3058_v33  ;;  %3731 = vmatprep.mubr.msk.f32.mxu0 %vm82_vm0, %v32_v34  ;;  %v3090_v33 = vld [vmem:[%s6108_s0 + $0x368] sm:$0xff]  ;;  %v64_v34 = vld [vmem:[%s6108_s0 + $0x170] sm:$0xff] }
  0x26   :  { %3835 = vmatprep.mubr.msk.f32.mxu1 %vm82_vm0, %v3059_v35  ;;  %v3091_v35 = vld [vmem:[%s6108_s0 + $0x370] sm:$0xff] }
  0x28   :  { %3732 = vmatmul.mubr.msk.f32.gmra.mrb[14].mxu0 %vm82_vm0, %v33_v36  ;;  %v65_v36 = vld [vmem:[%s6108_s0 + $0x178] sm:$0xff] }
  0x29   :  { %3836 = vmatmul.mubr.msk.f32.gmra.mrb[14].mxu1 %vm82_vm0, %v3060_v37  ;;  %3734 = vmatprep.mubr.msk.f32.mxu0 %vm82_vm0, %v34_v38  ;;  %v3092_v37 = vld [vmem:[%s6108_s0 + $0x378] sm:$0xff]  ;;  %v66_v38 = vld [vmem:[%s6108_s0 + $0x180] sm:$0xff] }
  0x2a   :  { %3838 = vmatprep.mubr.msk.f32.mxu1 %vm82_vm0, %v3061_v39  ;;  %v3093_v39 = vld [vmem:[%s6108_s0 + $0x380] sm:$0xff] }
  0x2c   :  { %3735 = vmatmul.mubr.msk.f32.gmra.mrb[16].mxu0 %vm82_vm0, %v35_v40  ;;  %v67_v40 = vld [vmem:[%s6108_s0 + $0x188] sm:$0xff] }
  0x2d   :  { %3839 = vmatmul.mubr.msk.f32.gmra.mrb[16].mxu1 %vm82_vm0, %v3062_v41  ;;  %3737 = vmatprep.mubr.msk.f32.mxu0 %vm82_vm0, %v36_v42  ;;  %v3094_v41 = vld [vmem:[%s6108_s0 + $0x388] sm:$0xff]  ;;  %v68_v42 = vld [vmem:[%s6108_s0 + $0x190] sm:$0xff] }
  0x2e   :  { %3841 = vmatprep.mubr.msk.f32.mxu1 %vm82_vm0, %v3063_v43  ;;  %v3095_v43 = vld [vmem:[%s6108_s0 + $0x390] sm:$0xff] }
  0x30   :  { %3738 = vmatmul.mubr.msk.f32.gmra.mrb[18].mxu0 %vm82_vm0, %v37_v44  ;;  %v69_v44 = vld [vmem:[%s6108_s0 + $0x198] sm:$0xff] }
  0x31   :  { %3842 = vmatmul.mubr.msk.f32.gmra.mrb[18].mxu1 %vm82_vm0, %v3064_v45  ;;  %3740 = vmatprep.mubr.msk.f32.mxu0 %vm82_vm0, %v38_v46  ;;  %v3096_v45 = vld [vmem:[%s6108_s0 + $0x398] sm:$0xff]  ;;  %v70_v46 = vld [vmem:[%s6108_s0 + $0x1a0] sm:$0xff] }
  0x32   :  { %3844 = vmatprep.mubr.msk.f32.mxu1 %vm82_vm0, %v3065_v47  ;;  %v3097_v47 = vld [vmem:[%s6108_s0 + $0x3a0] sm:$0xff] }
  0x34   :  { %3741 = vmatmul.mubr.msk.f32.gmra.mrb[20].mxu0 %vm82_vm0, %v39_v48  ;;  %v71_v48 = vld [vmem:[%s6108_s0 + $0x1a8] sm:$0xff] }
  0x35   :  { %3845 = vmatmul.mubr.msk.f32.gmra.mrb[20].mxu1 %vm82_vm0, %v3066_v49  ;;  %3743 = vmatprep.mubr.msk.f32.mxu0 %vm82_vm0, %v40_v50  ;;  %v3098_v49 = vld [vmem:[%s6108_s0 + $0x3a8] sm:$0xff]  ;;  %v72_v50 = vld [vmem:[%s6108_s0 + $0x1b0] sm:$0xff] }
  0x36   :  { %3847 = vmatprep.mubr.msk.f32.mxu1 %vm82_vm0, %v3067_v51  ;;  %v3099_v51 = vld [vmem:[%s6108_s0 + $0x3b0] sm:$0xff] }
  0x38   :  { %3744 = vmatmul.mubr.msk.f32.gmra.mrb[22].mxu0 %vm82_vm0, %v41_v52  ;;  %v73_v52 = vld [vmem:[%s6108_s0 + $0x1b8] sm:$0xff] }
  0x39   :  { %3848 = vmatmul.mubr.msk.f32.gmra.mrb[22].mxu1 %vm82_vm0, %v3068_v53  ;;  %3746 = vmatprep.mubr.msk.f32.mxu0 %vm82_vm0, %v42_v54  ;;  %v3100_v53 = vld [vmem:[%s6108_s0 + $0x3b8] sm:$0xff]  ;;  %v74_v54 = vld [vmem:[%s6108_s0 + $0x1c0] sm:$0xff] }
  0x3a   :  { %3850 = vmatprep.mubr.msk.f32.mxu1 %vm82_vm0, %v3069_v55  ;;  %v3101_v55 = vld [vmem:[%s6108_s0 + $0x3c0] sm:$0xff] }
  0x3c   :  { %3747 = vmatmul.mubr.msk.f32.gmra.mrb[24].mxu0 %vm82_vm0, %v43_v56  ;;  %v75_v56 = vld [vmem:[%s6108_s0 + $0x1c8] sm:$0xff] }
  0x3d   :  { %3851 = vmatmul.mubr.msk.f32.gmra.mrb[24].mxu1 %vm82_vm0, %v3070_v57  ;;  %3749 = vmatprep.mubr.msk.f32.mxu0 %vm82_vm0, %v44_v58  ;;  %v3102_v57 = vld [vmem:[%s6108_s0 + $0x3c8] sm:$0xff]  ;;  %v76_v58 = vld [vmem:[%s6108_s0 + $0x1d0] sm:$0xff] }
  0x3e   :  { %3853 = vmatprep.mubr.msk.f32.mxu1 %vm82_vm0, %v3071_v59  ;;  %v3103_v59 = vld [vmem:[%s6108_s0 + $0x3d0] sm:$0xff] }
  0x40   :  { %3750 = vmatmul.mubr.msk.f32.gmra.mrb[26].mxu0 %vm82_vm0, %v45_v60  ;;  %v77_v60 = vld [vmem:[%s6108_s0 + $0x1d8] sm:$0xff] }
  0x41   :  { %3854 = vmatmul.mubr.msk.f32.gmra.mrb[26].mxu1 %vm82_vm0, %v3072_v61  ;;  %3752 = vmatprep.mubr.msk.f32.mxu0 %vm82_vm0, %v46_v62  ;;  %v3104_v61 = vld [vmem:[%s6108_s0 + $0x3d8] sm:$0xff]  ;;  %v78_v62 = vld [vmem:[%s6108_s0 + $0x1e0] sm:$0xff] }
  0x42   :  { %3856 = vmatprep.mubr.msk.f32.mxu1 %vm82_vm0, %v3073_v63  ;;  %v3105_v63 = vld [vmem:[%s6108_s0 + $0x3e0] sm:$0xff] }
  0x44   :  { %3753 = vmatmul.mubr.msk.f32.gmra.mrb[28].mxu0 %vm82_vm0, %v47_v0  ;;  %v79_v0 = vld [vmem:[%s6108_s0 + $0x1e8] sm:$0xff] }
  0x45   :  { %3857 = vmatmul.mubr.msk.f32.gmra.mrb[28].mxu1 %vm82_vm0, %v3074_v1  ;;  %3755 = vmatprep.mubr.msk.f32.mxu0 %vm82_vm0, %v48_v2  ;;  %v3106_v1 = vld [vmem:[%s6108_s0 + $0x3e8] sm:$0xff]  ;;  %v80_v2 = vld [vmem:[%s6108_s0 + $0x1f0] sm:$0xff] }
  0x46   :  { %3859 = vmatprep.mubr.msk.f32.mxu1 %vm82_vm0, %v3075_v3  ;;  %v3107_v3 = vld [vmem:[%s6108_s0 + $0x3f0] sm:$0xff] }
  0x48   :  { %3756 = vmatmul.mubr.msk.f32.gmra.mrb[30].mxu0 %vm82_vm0, %v49_v4  ;;  %v81_v4 = vld [vmem:[%s6108_s0 + $0x1f8] sm:$0xff] }
  0x49   :  { %3860 = vmatmul.mubr.msk.f32.gmra.mrb[30].mxu1 %vm82_vm0, %v3076_v5  ;;  %3758 = vmatprep.mubr.msk.f32.mxu0 %vm82_vm0, %v50_v6  ;;  %v3108_v5 = vld [vmem:[%s6108_s0 + $0x3f8] sm:$0xff]  ;;  %v3173_v6 = vld [vmem:[%s6108_s0 + $0x400] sm:$0xff] }
  0x4a   :  { %3862 = vmatprep.mubr.msk.f32.mxu1 %vm82_vm0, %v3077_v7  ;;  %v3301_v7 = vld [vmem:[%s6108_s0 + $0x600] sm:$0xff] }
  0x4c   :  { %3759 = vmatmul.mubr.msk.f32.gmra.mrb[32].mxu0 %vm82_vm0, %v51_v8  ;;  %v3174_v8 = vld [vmem:[%s6108_s0 + $0x408] sm:$0xff] }
  0x4d   :  { %3863 = vmatmul.mubr.msk.f32.gmra.mrb[32].mxu1 %vm82_vm0, %v3078_v9  ;;  %3761 = vmatprep.mubr.msk.f32.mxu0 %vm82_vm0, %v52_v10  ;;  %v3302_v9 = vld [vmem:[%s6108_s0 + $0x608] sm:$0xff]  ;;  %v3175_v10 = vld [vmem:[%s6108_s0 + $0x410] sm:$0xff] }
  0x4e   :  { %3865 = vmatprep.mubr.msk.f32.mxu1 %vm82_vm0, %v3079_v11  ;;  %v3303_v11 = vld [vmem:[%s6108_s0 + $0x610] sm:$0xff] }
  0x50   :  { %3762 = vmatmul.mubr.msk.f32.gmra.mrb[34].mxu0 %vm82_vm0, %v53_v12  ;;  %v3176_v12 = vld [vmem:[%s6108_s0 + $0x418] sm:$0xff] }
  0x51   :  { %3866 = vmatmul.mubr.msk.f32.gmra.mrb[34].mxu1 %vm82_vm0, %v3080_v13  ;;  %3764 = vmatprep.mubr.msk.f32.mxu0 %vm82_vm0, %v54_v14  ;;  %v3304_v13 = vld [vmem:[%s6108_s0 + $0x618] sm:$0xff]  ;;  %v3177_v14 = vld [vmem:[%s6108_s0 + $0x420] sm:$0xff] }
  0x52   :  { %3868 = vmatprep.mubr.msk.f32.mxu1 %vm82_vm0, %v3081_v15  ;;  %v3305_v15 = vld [vmem:[%s6108_s0 + $0x620] sm:$0xff] }
  0x54   :  { %3765 = vmatmul.mubr.msk.f32.gmra.mrb[36].mxu0 %vm82_vm0, %v55_v16  ;;  %v3178_v16 = vld [vmem:[%s6108_s0 + $0x428] sm:$0xff] }
  0x55   :  { %3869 = vmatmul.mubr.msk.f32.gmra.mrb[36].mxu1 %vm82_vm0, %v3082_v17  ;;  %3767 = vmatprep.mubr.msk.f32.mxu0 %vm82_vm0, %v56_v18  ;;  %v3306_v17 = vld [vmem:[%s6108_s0 + $0x628] sm:$0xff]  ;;  %v3179_v18 = vld [vmem:[%s6108_s0 + $0x430] sm:$0xff] }
  0x56   :  { %3871 = vmatprep.mubr.msk.f32.mxu1 %vm82_vm0, %v3083_v19  ;;  %v3307_v19 = vld [vmem:[%s6108_s0 + $0x630] sm:$0xff] }
  0x58   :  { %3768 = vmatmul.mubr.msk.f32.gmra.mrb[38].mxu0 %vm82_vm0, %v57_v20  ;;  %v3180_v20 = vld [vmem:[%s6108_s0 + $0x438] sm:$0xff] }
  0x59   :  { %3872 = vmatmul.mubr.msk.f32.gmra.mrb[38].mxu1 %vm82_vm0, %v3084_v21  ;;  %3770 = vmatprep.mubr.msk.f32.mxu0 %vm82_vm0, %v58_v22  ;;  %v3308_v21 = vld [vmem:[%s6108_s0 + $0x638] sm:$0xff]  ;;  %v3181_v22 = vld [vmem:[%s6108_s0 + $0x440] sm:$0xff] }
  0x5a   :  { %3874 = vmatprep.mubr.msk.f32.mxu1 %vm82_vm0, %v3085_v23  ;;  %v3309_v23 = vld [vmem:[%s6108_s0 + $0x640] sm:$0xff] }
  0x5c   :  { %3771 = vmatmul.mubr.msk.f32.gmra.mrb[40].mxu0 %vm82_vm0, %v59_v24  ;;  %v3182_v24 = vld [vmem:[%s6108_s0 + $0x448] sm:$0xff] }
  0x5d   :  { %3875 = vmatmul.mubr.msk.f32.gmra.mrb[40].mxu1 %vm82_vm0, %v3086_v25  ;;  %3773 = vmatprep.mubr.msk.f32.mxu0 %vm82_vm0, %v60_v26  ;;  %v3310_v25 = vld [vmem:[%s6108_s0 + $0x648] sm:$0xff]  ;;  %v3183_v26 = vld [vmem:[%s6108_s0 + $0x450] sm:$0xff] }
  0x5e   :  { %3877 = vmatprep.mubr.msk.f32.mxu1 %vm82_vm0, %v3087_v27  ;;  %v3311_v27 = vld [vmem:[%s6108_s0 + $0x650] sm:$0xff] }
  0x60   :  { %3774 = vmatmul.mubr.msk.f32.gmra.mrb[42].mxu0 %vm82_vm0, %v61_v28  ;;  %v3184_v28 = vld [vmem:[%s6108_s0 + $0x458] sm:$0xff] }
  0x61   :  { %3878 = vmatmul.mubr.msk.f32.gmra.mrb[42].mxu1 %vm82_vm0, %v3088_v29  ;;  %3776 = vmatprep.mubr.msk.f32.mxu0 %vm82_vm0, %v62_v30  ;;  %v3312_v29 = vld [vmem:[%s6108_s0 + $0x658] sm:$0xff]  ;;  %v3185_v30 = vld [vmem:[%s6108_s0 + $0x460] sm:$0xff] }
  0x62   :  { %3880 = vmatprep.mubr.msk.f32.mxu1 %vm82_vm0, %v3089_v31  ;;  %v3313_v31 = vld [vmem:[%s6108_s0 + $0x660] sm:$0xff] }
  0x64   :  { %3777 = vmatmul.mubr.msk.f32.gmra.mrb[44].mxu0 %vm82_vm0, %v63_v32  ;;  %v3186_v32 = vld [vmem:[%s6108_s0 + $0x468] sm:$0xff] }
  0x65   :  { %3881 = vmatmul.mubr.msk.f32.gmra.mrb[44].mxu1 %vm82_vm0, %v3090_v33  ;;  %3779 = vmatprep.mubr.msk.f32.mxu0 %vm82_vm0, %v64_v34  ;;  %v3314_v33 = vld [vmem:[%s6108_s0 + $0x668] sm:$0xff]  ;;  %v3187_v34 = vld [vmem:[%s6108_s0 + $0x470] sm:$0xff] }
  0x66   :  { %3883 = vmatprep.mubr.msk.f32.mxu1 %vm82_vm0, %v3091_v35  ;;  %v3315_v35 = vld [vmem:[%s6108_s0 + $0x670] sm:$0xff] }
  0x68   :  { %3780 = vmatmul.mubr.msk.f32.gmra.mrb[46].mxu0 %vm82_vm0, %v65_v36  ;;  %v3188_v36 = vld [vmem:[%s6108_s0 + $0x478] sm:$0xff] }
  0x69   :  { %3884 = vmatmul.mubr.msk.f32.gmra.mrb[46].mxu1 %vm82_vm0, %v3092_v37  ;;  %3782 = vmatprep.mubr.msk.f32.mxu0 %vm82_vm0, %v66_v38  ;;  %v3316_v37 = vld [vmem:[%s6108_s0 + $0x678] sm:$0xff]  ;;  %v3189_v38 = vld [vmem:[%s6108_s0 + $0x480] sm:$0xff] }
  0x6a   :  { %3886 = vmatprep.mubr.msk.f32.mxu1 %vm82_vm0, %v3093_v39  ;;  %v3317_v39 = vld [vmem:[%s6108_s0 + $0x680] sm:$0xff] }
  0x6c   :  { %3783 = vmatmul.mubr.msk.f32.gmra.mrb[48].mxu0 %vm82_vm0, %v67_v40  ;;  %v3190_v40 = vld [vmem:[%s6108_s0 + $0x488] sm:$0xff] }
  0x6d   :  { %3887 = vmatmul.mubr.msk.f32.gmra.mrb[48].mxu1 %vm82_vm0, %v3094_v41  ;;  %3785 = vmatprep.mubr.msk.f32.mxu0 %vm82_vm0, %v68_v42  ;;  %v3318_v41 = vld [vmem:[%s6108_s0 + $0x688] sm:$0xff]  ;;  %v3191_v42 = vld [vmem:[%s6108_s0 + $0x490] sm:$0xff] }
  0x6e   :  { %3889 = vmatprep.mubr.msk.f32.mxu1 %vm82_vm0, %v3095_v43  ;;  %v3319_v43 = vld [vmem:[%s6108_s0 + $0x690] sm:$0xff] }
  0x70   :  { %3786 = vmatmul.mubr.msk.f32.gmra.mrb[50].mxu0 %vm82_vm0, %v69_v44  ;;  %v3192_v44 = vld [vmem:[%s6108_s0 + $0x498] sm:$0xff] }
  0x71   :  { %3890 = vmatmul.mubr.msk.f32.gmra.mrb[50].mxu1 %vm82_vm0, %v3096_v45  ;;  %3788 = vmatprep.mubr.msk.f32.mxu0 %vm82_vm0, %v70_v46  ;;  %v3320_v45 = vld [vmem:[%s6108_s0 + $0x698] sm:$0xff]  ;;  %v3193_v46 = vld [vmem:[%s6108_s0 + $0x4a0] sm:$0xff] }
  0x72   :  { %3892 = vmatprep.mubr.msk.f32.mxu1 %vm82_vm0, %v3097_v47  ;;  %v3321_v47 = vld [vmem:[%s6108_s0 + $0x6a0] sm:$0xff] }
  0x74   :  { %3789 = vmatmul.mubr.msk.f32.gmra.mrb[52].mxu0 %vm82_vm0, %v71_v48  ;;  %v3194_v48 = vld [vmem:[%s6108_s0 + $0x4a8] sm:$0xff] }
  0x75   :  { %3893 = vmatmul.mubr.msk.f32.gmra.mrb[52].mxu1 %vm82_vm0, %v3098_v49  ;;  %3791 = vmatprep.mubr.msk.f32.mxu0 %vm82_vm0, %v72_v50  ;;  %v3322_v49 = vld [vmem:[%s6108_s0 + $0x6a8] sm:$0xff]  ;;  %v3195_v50 = vld [vmem:[%s6108_s0 + $0x4b0] sm:$0xff] }
  0x76   :  { %3895 = vmatprep.mubr.msk.f32.mxu1 %vm82_vm0, %v3099_v51  ;;  %v3323_v51 = vld [vmem:[%s6108_s0 + $0x6b0] sm:$0xff] }
  0x78   :  { %3792 = vmatmul.mubr.msk.f32.gmra.mrb[54].mxu0 %vm82_vm0, %v73_v52  ;;  %v3196_v52 = vld [vmem:[%s6108_s0 + $0x4b8] sm:$0xff] }
  0x79   :  { %3896 = vmatmul.mubr.msk.f32.gmra.mrb[54].mxu1 %vm82_vm0, %v3100_v53  ;;  %3794 = vmatprep.mubr.msk.f32.mxu0 %vm82_vm0, %v74_v54  ;;  %v3324_v53 = vld [vmem:[%s6108_s0 + $0x6b8] sm:$0xff]  ;;  %v3197_v54 = vld [vmem:[%s6108_s0 + $0x4c0] sm:$0xff] }
  0x7a   :  { %3898 = vmatprep.mubr.msk.f32.mxu1 %vm82_vm0, %v3101_v55  ;;  %v3325_v55 = vld [vmem:[%s6108_s0 + $0x6c0] sm:$0xff] }
  0x7c   :  { %3795 = vmatmul.mubr.msk.f32.gmra.mrb[56].mxu0 %vm82_vm0, %v75_v56  ;;  %v3198_v56 = vld [vmem:[%s6108_s0 + $0x4c8] sm:$0xff] }
  0x7d   :  { %3899 = vmatmul.mubr.msk.f32.gmra.mrb[56].mxu1 %vm82_vm0, %v3102_v57  ;;  %3797 = vmatprep.mubr.msk.f32.mxu0 %vm82_vm0, %v76_v58  ;;  %v3326_v57 = vld [vmem:[%s6108_s0 + $0x6c8] sm:$0xff]  ;;  %v3199_v58 = vld [vmem:[%s6108_s0 + $0x4d0] sm:$0xff] }
  0x7e   :  { %3901 = vmatprep.mubr.msk.f32.mxu1 %vm82_vm0, %v3103_v59  ;;  %v3327_v59 = vld [vmem:[%s6108_s0 + $0x6d0] sm:$0xff] }
  0x80   :  { %3798 = vmatmul.mubr.msk.f32.gmra.mrb[58].mxu0 %vm82_vm0, %v77_v60  ;;  %v3200_v60 = vld [vmem:[%s6108_s0 + $0x4d8] sm:$0xff] }
  0x81   :  { %3902 = vmatmul.mubr.msk.f32.gmra.mrb[58].mxu1 %vm82_vm0, %v3104_v61  ;;  %3800 = vmatprep.mubr.msk.f32.mxu0 %vm82_vm0, %v78_v62  ;;  %v3328_v61 = vld [vmem:[%s6108_s0 + $0x6d8] sm:$0xff]  ;;  %v3201_v62 = vld [vmem:[%s6108_s0 + $0x4e0] sm:$0xff] }
  0x82   :  { %3904 = vmatprep.mubr.msk.f32.mxu1 %vm82_vm0, %v3105_v63  ;;  %v3329_v63 = vld [vmem:[%s6108_s0 + $0x6e0] sm:$0xff] }
  0x84   :  { %3801 = vmatmul.mubr.msk.f32.gmra.mrb[60].mxu0 %vm82_vm0, %v79_v0  ;;  %v3202_v0 = vld [vmem:[%s6108_s0 + $0x4e8] sm:$0xff] }
  0x85   :  { %3905 = vmatmul.mubr.msk.f32.gmra.mrb[60].mxu1 %vm82_vm0, %v3106_v1  ;;  %3803 = vmatprep.mubr.msk.f32.mxu0 %vm82_vm0, %v80_v2  ;;  %v3330_v1 = vld [vmem:[%s6108_s0 + $0x6e8] sm:$0xff]  ;;  %v3203_v2 = vld [vmem:[%s6108_s0 + $0x4f0] sm:$0xff] }
  0x86   :  { %3907 = vmatprep.mubr.msk.f32.mxu1 %vm82_vm0, %v3107_v3  ;;  %v3331_v3 = vld [vmem:[%s6108_s0 + $0x6f0] sm:$0xff] }
  0x88   :  { %3804 = vmatmul.mubr.msk.f32.gmra.mrb[62].mxu0 %vm82_vm0, %v81_v4  ;;  %v3204_v4 = vld [vmem:[%s6108_s0 + $0x4f8] sm:$0xff] }
  0x89   :  { %3908 = vmatmul.mubr.msk.f32.gmra.mrb[62].mxu1 %vm82_vm0, %v3108_v5  ;;  %3918 = vmatprep.mubr.msk.f32.mxu0 %vm82_vm0, %v3173_v6  ;;  %v3332_v5 = vld [vmem:[%s6108_s0 + $0x6f8] sm:$0xff]  ;;  %v3205_v6 = vld [vmem:[%s6108_s0 + $0x500] sm:$0xff] }
  0x8a   :  { %4022 = vmatprep.mubr.msk.f32.mxu1 %vm82_vm0, %v3301_v7  ;;  %v3333_v7 = vld [vmem:[%s6108_s0 + $0x700] sm:$0xff] }
  0x8c   :  { %3919 = vmatmul.mubr.msk.f32.vlgmr.msra.gmra.mrb[64].mxu0 %vm82_vm0, %v3174_v8  ;;  %v3206_v8 = vld [vmem:[%s6108_s0 + $0x508] sm:$0xff] }
  0x8d   :  { %4023 = vmatmul.mubr.msk.f32.vlgmr.msra.gmra.mrb[64].mxu1 %vm82_vm0, %v3302_v9  ;;  %3921 = vmatprep.mubr.msk.f32.mxu0 %vm82_vm0, %v3175_v10  ;;  %v3334_v9 = vld [vmem:[%s6108_s0 + $0x708] sm:$0xff]  ;;  %v3207_v10 = vld [vmem:[%s6108_s0 + $0x510] sm:$0xff] }
  0x8e   :  { %4025 = vmatprep.mubr.msk.f32.mxu1 %vm82_vm0, %v3303_v11  ;;  %v3335_v11 = vld [vmem:[%s6108_s0 + $0x710] sm:$0xff] }
  0x90   :  { %3922 = vmatmul.mubr.msk.f32.gmra.mrb[66].mxu0 %vm82_vm0, %v3176_v12  ;;  %v3208_v12 = vld [vmem:[%s6108_s0 + $0x518] sm:$0xff] }
  0x91   :  { %4026 = vmatmul.mubr.msk.f32.gmra.mrb[66].mxu1 %vm82_vm0, %v3304_v13  ;;  %3924 = vmatprep.mubr.msk.f32.mxu0 %vm82_vm0, %v3177_v14  ;;  %v3336_v13 = vld [vmem:[%s6108_s0 + $0x718] sm:$0xff]  ;;  %v3209_v14 = vld [vmem:[%s6108_s0 + $0x520] sm:$0xff] }
  0x92   :  { %4028 = vmatprep.mubr.msk.f32.mxu1 %vm82_vm0, %v3305_v15  ;;  %v3337_v15 = vld [vmem:[%s6108_s0 + $0x720] sm:$0xff] }
  0x94   :  { %3925 = vmatmul.mubr.msk.f32.gmra.mrb[68].mxu0 %vm82_vm0, %v3178_v16  ;;  %v3210_v16 = vld [vmem:[%s6108_s0 + $0x528] sm:$0xff] }
  0x95   :  { %4029 = vmatmul.mubr.msk.f32.gmra.mrb[68].mxu1 %vm82_vm0, %v3306_v17  ;;  %3927 = vmatprep.mubr.msk.f32.mxu0 %vm82_vm0, %v3179_v18  ;;  %v3338_v17 = vld [vmem:[%s6108_s0 + $0x728] sm:$0xff]  ;;  %v3211_v18 = vld [vmem:[%s6108_s0 + $0x530] sm:$0xff] }
  0x96   :  { %4031 = vmatprep.mubr.msk.f32.mxu1 %vm82_vm0, %v3307_v19  ;;  %v3339_v19 = vld [vmem:[%s6108_s0 + $0x730] sm:$0xff] }
  0x98   :  { %3928 = vmatmul.mubr.msk.f32.gmra.mrb[70].mxu0 %vm82_vm0, %v3180_v20  ;;  %v3212_v20 = vld [vmem:[%s6108_s0 + $0x538] sm:$0xff] }
  0x99   :  { %4032 = vmatmul.mubr.msk.f32.gmra.mrb[70].mxu1 %vm82_vm0, %v3308_v21  ;;  %3930 = vmatprep.mubr.msk.f32.mxu0 %vm82_vm0, %v3181_v22  ;;  %v3340_v21 = vld [vmem:[%s6108_s0 + $0x738] sm:$0xff]  ;;  %v3213_v22 = vld [vmem:[%s6108_s0 + $0x540] sm:$0xff] }
  0x9a   :  { %4034 = vmatprep.mubr.msk.f32.mxu1 %vm82_vm0, %v3309_v23  ;;  %v3341_v23 = vld [vmem:[%s6108_s0 + $0x740] sm:$0xff] }
  0x9c   :  { %3931 = vmatmul.mubr.msk.f32.gmra.mrb[72].mxu0 %vm82_vm0, %v3182_v24  ;;  %v3214_v24 = vld [vmem:[%s6108_s0 + $0x548] sm:$0xff] }
  0x9d   :  { %4035 = vmatmul.mubr.msk.f32.gmra.mrb[72].mxu1 %vm82_vm0, %v3310_v25  ;;  %3933 = vmatprep.mubr.msk.f32.mxu0 %vm82_vm0, %v3183_v26  ;;  %v3342_v25 = vld [vmem:[%s6108_s0 + $0x748] sm:$0xff]  ;;  %v3215_v26 = vld [vmem:[%s6108_s0 + $0x550] sm:$0xff] }
  0x9e   :  { %4037 = vmatprep.mubr.msk.f32.mxu1 %vm82_vm0, %v3311_v27  ;;  %v3343_v27 = vld [vmem:[%s6108_s0 + $0x750] sm:$0xff] }
  0xa0   :  { %3934 = vmatmul.mubr.msk.f32.gmra.mrb[74].mxu0 %vm82_vm0, %v3184_v28  ;;  %v3216_v28 = vld [vmem:[%s6108_s0 + $0x558] sm:$0xff] }
  0xa1   :  { %4038 = vmatmul.mubr.msk.f32.gmra.mrb[74].mxu1 %vm82_vm0, %v3312_v29  ;;  %3936 = vmatprep.mubr.msk.f32.mxu0 %vm82_vm0, %v3185_v30  ;;  %v3344_v29 = vld [vmem:[%s6108_s0 + $0x758] sm:$0xff]  ;;  %v3217_v30 = vld [vmem:[%s6108_s0 + $0x560] sm:$0xff] }
  0xa2   :  { %4040 = vmatprep.mubr.msk.f32.mxu1 %vm82_vm0, %v3313_v31  ;;  %v3345_v31 = vld [vmem:[%s6108_s0 + $0x760] sm:$0xff] }
  0xa4   :  { %3937 = vmatmul.mubr.msk.f32.gmra.mrb[76].mxu0 %vm82_vm0, %v3186_v32 }
  0xa5   :  { %4041 = vmatmul.mubr.msk.f32.gmra.mrb[76].mxu1 %vm82_vm0, %v3314_v33  ;;  %3939 = vmatprep.mubr.msk.f32.mxu0 %vm82_vm0, %v3187_v34 }
  0xa6   :  { %4043 = vmatprep.mubr.msk.f32.mxu1 %vm82_vm0, %v3315_v35 }
  0xa8   :  { %3940 = vmatmul.mubr.msk.f32.gmra.mrb[78].mxu0 %vm82_vm0, %v3188_v36 }
  0xa9   :  { %4044 = vmatmul.mubr.msk.f32.gmra.mrb[78].mxu1 %vm82_vm0, %v3316_v37  ;;  %3942 = vmatprep.mubr.msk.f32.mxu0 %vm82_vm0, %v3189_v38  ;;  %v3218_v38 = vld [vmem:[%s6108_s0 + $0x568] sm:$0xff] }
  0xaa   :  { %4046 = vmatprep.mubr.msk.f32.mxu1 %vm82_vm0, %v3317_v39  ;;  %v3346_v39 = vld [vmem:[%s6108_s0 + $0x768] sm:$0xff] }
  0xac   :  { %3943 = vmatmul.mubr.msk.f32.gmra.mrb[80].mxu0 %vm82_vm0, %v3190_v40  ;;  %v3219_v40 = vld [vmem:[%s6108_s0 + $0x570] sm:$0xff] }
  0xad   :  { %4047 = vmatmul.mubr.msk.f32.gmra.mrb[80].mxu1 %vm82_vm0, %v3318_v41  ;;  %3945 = vmatprep.mubr.msk.f32.mxu0 %vm82_vm0, %v3191_v42  ;;  %v3347_v41 = vld [vmem:[%s6108_s0 + $0x770] sm:$0xff] }
  0xae   :  { %4049 = vmatprep.mubr.msk.f32.mxu1 %vm82_vm0, %v3319_v43 }
  0xb0   :  { %3946 = vmatmul.mubr.msk.f32.gmra.mrb[82].mxu0 %vm82_vm0, %v3192_v44 }
  0xb1   :  { %4050 = vmatmul.mubr.msk.f32.gmra.mrb[82].mxu1 %vm82_vm0, %v3320_v45  ;;  %3948 = vmatprep.mubr.msk.f32.mxu0 %vm82_vm0, %v3193_v46 }
  0xb2   :  { %4052 = vmatprep.mubr.msk.f32.mxu1 %vm82_vm0, %v3321_v47 }
  0xb4   :  { %3949 = vmatmul.mubr.msk.f32.gmra.mrb[84].mxu0 %vm82_vm0, %v3194_v48  ;;  %v3220_v48 = vld [vmem:[%s6108_s0 + $0x578] sm:$0xff] }
  0xb5   :  { %4053 = vmatmul.mubr.msk.f32.gmra.mrb[84].mxu1 %vm82_vm0, %v3322_v49  ;;  %3951 = vmatprep.mubr.msk.f32.mxu0 %vm82_vm0, %v3195_v50  ;;  %v3348_v49 = vld [vmem:[%s6108_s0 + $0x778] sm:$0xff]  ;;  %v3221_v50 = vld [vmem:[%s6108_s0 + $0x580] sm:$0xff] }
  0xb6   :  { %4055 = vmatprep.mubr.msk.f32.mxu1 %vm82_vm0, %v3323_v51  ;;  %v3349_v51 = vld [vmem:[%s6108_s0 + $0x780] sm:$0xff] }
  0xb8   :  { %3952 = vmatmul.mubr.msk.f32.gmra.mrb[86].mxu0 %vm82_vm0, %v3196_v52 }
  0xb9   :  { %4056 = vmatmul.mubr.msk.f32.gmra.mrb[86].mxu1 %vm82_vm0, %v3324_v53  ;;  %3954 = vmatprep.mubr.msk.f32.mxu0 %vm82_vm0, %v3197_v54 }
  0xba   :  { %4058 = vmatprep.mubr.msk.f32.mxu1 %vm82_vm0, %v3325_v55 }
  0xbc   :  { %3955 = vmatmul.mubr.msk.f32.gmra.mrb[88].mxu0 %vm82_vm0, %v3198_v56 }
  0xbd   :  { %4059 = vmatmul.mubr.msk.f32.gmra.mrb[88].mxu1 %vm82_vm0, %v3326_v57  ;;  %3957 = vmatprep.mubr.msk.f32.mxu0 %vm82_vm0, %v3199_v58  ;;  %v3222_v58 = vld [vmem:[%s6108_s0 + $0x588] sm:$0xff] }
  0xbe   :  { %4061 = vmatprep.mubr.msk.f32.mxu1 %vm82_vm0, %v3327_v59  ;;  %v3350_v59 = vld [vmem:[%s6108_s0 + $0x788] sm:$0xff] }
  0xc0   :  { %3958 = vmatmul.mubr.msk.f32.gmra.mrb[90].mxu0 %vm82_vm0, %v3200_v60  ;;  %v3223_v60 = vld [vmem:[%s6108_s0 + $0x590] sm:$0xff] }
  0xc1   :  { %4062 = vmatmul.mubr.msk.f32.gmra.mrb[90].mxu1 %vm82_vm0, %v3328_v61  ;;  %3960 = vmatprep.mubr.msk.f32.mxu0 %vm82_vm0, %v3201_v62  ;;  %v3351_v61 = vld [vmem:[%s6108_s0 + $0x790] sm:$0xff] }
  0xc2   :  { %4064 = vmatprep.mubr.msk.f32.mxu1 %vm82_vm0, %v3329_v63 }
  0xc4   :  { %3961 = vmatmul.mubr.msk.f32.gmra.mrb[92].mxu0 %vm82_vm0, %v3202_v0 }
  0xc5   :  { %4065 = vmatmul.mubr.msk.f32.gmra.mrb[92].mxu1 %vm82_vm0, %v3330_v1  ;;  %3963 = vmatprep.mubr.msk.f32.mxu0 %vm82_vm0, %v3203_v2 }
  0xc6   :  { %4067 = vmatprep.mubr.msk.f32.mxu1 %vm82_vm0, %v3331_v3 }
  0xc8   :  { %3964 = vmatmul.mubr.msk.f32.gmra.mrb[94].mxu0 %vm82_vm0, %v3204_v4  ;;  %v3224_v4 = vld [vmem:[%s6108_s0 + $0x598] sm:$0xff] }
  0xc9   :  { %4068 = vmatmul.mubr.msk.f32.gmra.mrb[94].mxu1 %vm82_vm0, %v3332_v5  ;;  %3966 = vmatprep.mubr.msk.f32.mxu0 %vm82_vm0, %v3205_v6  ;;  %v3352_v5 = vld [vmem:[%s6108_s0 + $0x798] sm:$0xff]  ;;  %v3225_v6 = vld [vmem:[%s6108_s0 + $0x5a0] sm:$0xff] }
  0xca   :  { %4070 = vmatprep.mubr.msk.f32.mxu1 %vm82_vm0, %v3333_v7  ;;  %v3353_v7 = vld [vmem:[%s6108_s0 + $0x7a0] sm:$0xff] }
  0xcc   :  { %3967 = vmatmul.mubr.msk.f32.gmra.mrb[96].mxu0 %vm82_vm0, %v3206_v8 }
  0xcd   :  { %4071 = vmatmul.mubr.msk.f32.gmra.mrb[96].mxu1 %vm82_vm0, %v3334_v9  ;;  %3969 = vmatprep.mubr.msk.f32.mxu0 %vm82_vm0, %v3207_v10 }
  0xce   :  { %4073 = vmatprep.mubr.msk.f32.mxu1 %vm82_vm0, %v3335_v11 }
  0xd0   :  { %3970 = vmatmul.mubr.msk.f32.gmra.mrb[98].mxu0 %vm82_vm0, %v3208_v12 }
  0xd1   :  { %4074 = vmatmul.mubr.msk.f32.gmra.mrb[98].mxu1 %vm82_vm0, %v3336_v13  ;;  %3972 = vmatprep.mubr.msk.f32.mxu0 %vm82_vm0, %v3209_v14  ;;  %v3226_v14 = vld [vmem:[%s6108_s0 + $0x5a8] sm:$0xff] }
  0xd2   :  { %4076 = vmatprep.mubr.msk.f32.mxu1 %vm82_vm0, %v3337_v15  ;;  %v3354_v15 = vld [vmem:[%s6108_s0 + $0x7a8] sm:$0xff] }
  0xd4   :  { %3973 = vmatmul.mubr.msk.f32.gmra.mrb[100].mxu0 %vm82_vm0, %v3210_v16  ;;  %v3227_v16 = vld [vmem:[%s6108_s0 + $0x5b0] sm:$0xff] }
  0xd5   :  { %4077 = vmatmul.mubr.msk.f32.gmra.mrb[100].mxu1 %vm82_vm0, %v3338_v17  ;;  %3975 = vmatprep.mubr.msk.f32.mxu0 %vm82_vm0, %v3211_v18  ;;  %v3355_v17 = vld [vmem:[%s6108_s0 + $0x7b0] sm:$0xff] }
  0xd6   :  { %4079 = vmatprep.mubr.msk.f32.mxu1 %vm82_vm0, %v3339_v19 }
  0xd8   :  { %3976 = vmatmul.mubr.msk.f32.gmra.mrb[102].mxu0 %vm82_vm0, %v3212_v20 }
  0xd9   :  { %4080 = vmatmul.mubr.msk.f32.gmra.mrb[102].mxu1 %vm82_vm0, %v3340_v21  ;;  %3978 = vmatprep.mubr.msk.f32.mxu0 %vm82_vm0, %v3213_v22 }
  0xda   :  { %4082 = vmatprep.mubr.msk.f32.mxu1 %vm82_vm0, %v3341_v23  ;;  %v5599_v23 = vld [vmem:[%s6109_s2] ss:$0 sm:$0xff] }
  0xdc   :  { %3979 = vmatmul.mubr.msk.f32.gmra.mrb[104].mxu0 %vm82_vm0, %v3214_v24  ;;  %v3228_v24 = vld [vmem:[%s6108_s0 + $0x5b8] sm:$0xff] }
  0xdd   :  { %4083 = vmatmul.mubr.msk.f32.gmra.mrb[104].mxu1 %vm82_vm0, %v3342_v25  ;;  %3981 = vmatprep.mubr.msk.f32.mxu0 %vm82_vm0, %v3215_v26  ;;  %v3356_v25 = vld [vmem:[%s6108_s0 + $0x7b8] sm:$0xff]  ;;  %v3229_v26 = vld [vmem:[%s6108_s0 + $0x5c0] sm:$0xff] }
  0xde   :  { %4085 = vmatprep.mubr.msk.f32.mxu1 %vm82_vm0, %v3343_v27  ;;  %v3357_v27 = vld [vmem:[%s6108_s0 + $0x7c0] sm:$0xff] }
  0xdf   :  { %v5050_v32 = vpop.f32.mrb[0].mxu0 }
  0xe0   :  { %v5052_v33 = vpop.f32.mrb[0].mxu1  ;;  %v5056_v35 = vpop.f32.mrb[1].mxu0  ;;  %3982 = vmatmul.mubr.msk.f32.gmra.mrb[106].mxu0 %vm82_vm0, %v3216_v28 }
  0xe1   :  { %v5058_v36 = vpop.f32.mrb[1].mxu1  ;;  %4086 = vmatmul.mubr.msk.f32.gmra.mrb[106].mxu1 %vm82_vm0, %v3344_v29  ;;  %3984 = vmatprep.mubr.msk.f32.mxu0 %vm82_vm0, %v3217_v30 }
  0xe2   :  { %4088 = vmatprep.mubr.msk.f32.mxu1 %vm82_vm0, %v3345_v31 }
  0xe3   :  { %v5078_v42 = vpop.f32.mrb[2].mxu0 }
  0xe4   :  { %v5080_v43 = vpop.f32.mrb[2].mxu1  ;;  %v5084_v45 = vpop.f32.mrb[3].mxu0  ;;  %3985 = vmatmul.mubr.msk.f32.gmra.mrb[108].mxu0 %vm82_vm0, %v3218_v38 }
  0xe5   :  { %v5086_v46 = vpop.f32.mrb[3].mxu1  ;;  %4089 = vmatmul.mubr.msk.f32.gmra.mrb[108].mxu1 %vm82_vm0, %v3346_v39  ;;  %3987 = vmatprep.mubr.msk.f32.mxu0 %vm82_vm0, %v3219_v40  ;;  %v3230_v40 = vld [vmem:[%s6108_s0 + $0x5c8] sm:$0xff] }
  0xe6   :  { %4091 = vmatprep.mubr.msk.f32.mxu1 %vm82_vm0, %v3347_v41  ;;  %v3358_v41 = vld [vmem:[%s6108_s0 + $0x7c8] sm:$0xff] }
  0xe7   :  { %v5106_v52 = vpop.f32.mrb[4].mxu0 }
  0xe8   :  { %v5108_v53 = vpop.f32.mrb[4].mxu1  ;;  %v5112_v55 = vpop.f32.mrb[5].mxu0  ;;  %3988 = vmatmul.mubr.msk.f32.gmra.mrb[110].mxu0 %vm82_vm0, %v3220_v48  ;;  %v3231_v48 = vld [vmem:[%s6108_s0 + $0x5d0] sm:$0xff] }
  0xe9   :  { %v5114_v56 = vpop.f32.mrb[5].mxu1  ;;  %4092 = vmatmul.mubr.msk.f32.gmra.mrb[110].mxu1 %vm82_vm0, %v3348_v49  ;;  %3990 = vmatprep.mubr.msk.f32.mxu0 %vm82_vm0, %v3221_v50  ;;  %v3359_v49 = vld [vmem:[%s6108_s0 + $0x7d0] sm:$0xff] }
  0xea   :  { %4094 = vmatprep.mubr.msk.f32.mxu1 %vm82_vm0, %v3349_v51 }
  0xeb   :  { %v5134_v62 = vpop.f32.mrb[6].mxu0 }
  0xec   :  { %v5136_v63 = vpop.f32.mrb[6].mxu1  ;;  %v5140_v1 = vpop.f32.mrb[7].mxu0  ;;  %3991 = vmatmul.mubr.msk.f32.gmra.mrb[112].mxu0 %vm82_vm0, %v3222_v58 }
  0xed   :  { %v5142_v2 = vpop.f32.mrb[7].mxu1  ;;  %4095 = vmatmul.mubr.msk.f32.gmra.mrb[112].mxu1 %vm82_vm0, %v3350_v59  ;;  %3993 = vmatprep.mubr.msk.f32.mxu0 %vm82_vm0, %v3223_v60 }
  0xee   :  { %4097 = vmatprep.mubr.msk.f32.mxu1 %vm82_vm0, %v3351_v61 }
  0xef   :  { %v5162_v8 = vpop.f32.mrb[8].mxu0 }
  0xf0   :  { %v5164_v9 = vpop.f32.mrb[8].mxu1  ;;  %v5168_v11 = vpop.f32.mrb[9].mxu0  ;;  %3994 = vmatmul.mubr.msk.f32.gmra.mrb[114].mxu0 %vm82_vm0, %v3224_v4  ;;  %v3232_v4 = vld [vmem:[%s6108_s0 + $0x5d8] sm:$0xff] }
  0xf1   :  { %v5170_v12 = vpop.f32.mrb[9].mxu1  ;;  %4098 = vmatmul.mubr.msk.f32.gmra.mrb[114].mxu1 %vm82_vm0, %v3352_v5  ;;  %3996 = vmatprep.mubr.msk.f32.mxu0 %vm82_vm0, %v3225_v6  ;;  %v3360_v5 = vld [vmem:[%s6108_s0 + $0x7d8] sm:$0xff]  ;;  %v3233_v6 = vld [vmem:[%s6108_s0 + $0x5e0] sm:$0xff] }
  0xf2   :  { %4100 = vmatprep.mubr.msk.f32.mxu1 %vm82_vm0, %v3353_v7  ;;  %v3361_v7 = vld [vmem:[%s6108_s0 + $0x7e0] sm:$0xff] }
  0xf3   :  { %v5190_v18 = vpop.f32.mrb[10].mxu0 }
  0xf4   :  { %v5192_v19 = vpop.f32.mrb[10].mxu1  ;;  %v5196_v21 = vpop.f32.mrb[11].mxu0  ;;  %3997 = vmatmul.mubr.msk.f32.gmra.mrb[116].mxu0 %vm82_vm0, %v3226_v14 }
  0xf5   :  { %v5198_v22 = vpop.f32.mrb[11].mxu1  ;;  %4101 = vmatmul.mubr.msk.f32.gmra.mrb[116].mxu1 %vm82_vm0, %v3354_v15  ;;  %3999 = vmatprep.mubr.msk.f32.mxu0 %vm82_vm0, %v3227_v16 }
  0xf6   :  { %4103 = vmatprep.mubr.msk.f32.mxu1 %vm82_vm0, %v3355_v17 }
  0xf7   :  { %v5218_v28 = vpop.f32.mrb[12].mxu0 }
  0xf8   :  { %v5220_v29 = vpop.f32.mrb[12].mxu1  ;;  %v5224_v31 = vpop.f32.mrb[13].mxu0  ;;  %4000 = vmatmul.mubr.msk.f32.gmra.mrb[118].mxu0 %vm82_vm0, %v3228_v24 }
  0xf9   :  { %v5226_v38 = vpop.f32.mrb[13].mxu1  ;;  %4104 = vmatmul.mubr.msk.f32.gmra.mrb[118].mxu1 %vm82_vm0, %v3356_v25  ;;  %4002 = vmatprep.mubr.msk.f32.mxu0 %vm82_vm0, %v3229_v26  ;;  %v3234_v26 = vld [vmem:[%s6108_s0 + $0x5e8] sm:$0xff]  ;;  %v3236_v25 = vld [vmem:[%s6108_s0 + $0x5f8] sm:$0xff] }
  0xfa   :  { %4106 = vmatprep.mubr.msk.f32.mxu1 %vm82_vm0, %v3357_v27  ;;  %v3362_v27 = vld [vmem:[%s6108_s0 + $0x7e8] sm:$0xff] }
  0xfb   :  { %v5246_v50 = vpop.f32.mrb[14].mxu0 }
  0xfc   :  { %v5248_v51 = vpop.f32.mrb[14].mxu1  ;;  %v5252_v59 = vpop.f32.mrb[15].mxu0  ;;  %4003 = vmatmul.mubr.msk.f32.gmra.mrb[120].mxu0 %vm82_vm0, %v3230_v40  ;;  %v3235_v40 = vld [vmem:[%s6108_s0 + $0x5f0] sm:$0xff] }
  0xfd   :  { %v5254_v60 = vpop.f32.mrb[15].mxu1  ;;  %4107 = vmatmul.mubr.msk.f32.gmra.mrb[120].mxu1 %vm82_vm0, %v3358_v41  ;;  %4005 = vmatprep.mubr.msk.f32.mxu0 %vm82_vm0, %v3231_v48  ;;  %v3363_v41 = vld [vmem:[%s6108_s0 + $0x7f0] sm:$0xff] }
  0xfe   :  { %4109 = vmatprep.mubr.msk.f32.mxu1 %vm82_vm0, %v3359_v49 }
  0xff   :  { %v5274_v14 = vpop.f32.mrb[16].mxu0 }
 0x100   :  { %v5276_v15 = vpop.f32.mrb[16].mxu1  ;;  %v5280_v17 = vpop.f32.mrb[17].mxu0  ;;  %4006 = vmatmul.mubr.msk.f32.gmra.mrb[122].mxu0 %vm82_vm0, %v3232_v4  ;;  %v3364_v4 = vld [vmem:[%s6108_s0 + $0x7f8] sm:$0xff] }
 0x101   :  { %v5282_v24 = vpop.f32.mrb[17].mxu1  ;;  %4110 = vmatmul.mubr.msk.f32.gmra.mrb[122].mxu1 %vm82_vm0, %v3360_v5  ;;  %4008 = vmatprep.mubr.msk.f32.mxu0 %vm82_vm0, %v3233_v6 }
 0x102   :  { %4112 = vmatprep.mubr.msk.f32.mxu1 %vm82_vm0, %v3361_v7 }
 0x103   :  { %v5302_v48 = vpop.f32.mrb[18].mxu0 }
 0x104   :  { %v5304_v49 = vpop.f32.mrb[18].mxu1  ;;  %v5308_v5 = vpop.f32.mrb[19].mxu0  ;;  %4009 = vmatmul.mubr.msk.f32.gmra.mrb[124].mxu0 %vm82_vm0, %v3234_v26 }
 0x105   :  { %v5310_v6 = vpop.f32.mrb[19].mxu1  ;;  %4113 = vmatmul.mubr.msk.f32.gmra.mrb[124].mxu1 %vm82_vm0, %v3362_v27  ;;  %4011 = vmatprep.mubr.msk.f32.mxu0 %vm82_vm0, %v3235_v40 }
 0x106   :  { %4115 = vmatprep.mubr.msk.f32.mxu1 %vm82_vm0, %v3363_v41 }
 0x107   :  { %v5324_v16 = vpop.f32.mrb[20].mxu0 }
 0x108   :  { %v5326_v26 = vpop.f32.mrb[20].mxu1  ;;  %v5330_v7 = vpop.f32.mrb[21].mxu0  ;;  %4012 = vmatmul.mubr.msk.f32.gmra.mrb[126].mxu0 %vm82_vm0, %v3236_v25 }
 0x109   :  { %v5332_v40 = vpop.f32.mrb[21].mxu1  ;;  %4116 = vmatmul.mubr.msk.f32.gmra.mrb[126].mxu1 %vm82_vm0, %v3364_v4 }
 0x10b   :  { %v5338_v61 = vpop.f32.mrb[22].mxu0 }
 0x10c   :  { %v5340_v58 = vpop.f32.mrb[22].mxu1  ;;  %v5344_v30 = vpop.f32.mrb[23].mxu0 }
 0x10d   :  { %v5346_v27 = vpop.f32.mrb[23].mxu1 }
 0x10f   :  { %v5350_v25 = vpop.f32.mrb[24].mxu0 }
 0x110   :  { %v5352_v4 = vpop.f32.mrb[24].mxu1  ;;  %v5356_v20 = vpop.f32.mrb[25].mxu0 }
 0x111   :  { %6190 = vst [vmem:[#allocation2_spill] sm:$0xff] %v5352_v4  ;;  %6191 = vst [vmem:[#allocation3_spill] sm:$0xff] %v5356_v20  ;;  %v5358_v13 = vpop.f32.mrb[25].mxu1 }
 0x112   :  { %6192 = vst [vmem:[#allocation4_spill] sm:$0xff] %v5358_v13  ;;  %v6270_v13 = vmax.f32 %v5056_v35, %v5058_v36  ;;  %v6272_v36 = vmax.f32 %v5084_v45, %v5086_v46 }
 0x113   :  { %v5362_v10 = vpop.f32.mrb[26].mxu0 }
 0x114   :  { %6193 = vst [vmem:[#allocation5_spill] sm:$0xff] %v5362_v10  ;;  %v5364_v3 = vpop.f32.mrb[26].mxu1  ;;  %v5368_v0 = vpop.f32.mrb[27].mxu0  ;;  %v6269_v10 = vmax.f32 %v5050_v32, %v5052_v33  ;;  %v6271_v32 = vmax.f32 %v5078_v42, %v5080_v43 }
 0x115   :  { %6194 = vst [vmem:[#allocation6_spill] sm:$0xff] %v5364_v3  ;;  %6195 = vst [vmem:[#allocation7_spill] sm:$0xff] %v5368_v0  ;;  %v5370_v57 = vpop.f32.mrb[27].mxu1 }
 0x116   :  { %6196 = vst [vmem:[#allocation8_spill] sm:$0xff] %v5370_v57 }
 0x117   :  { %v5374_v54 = vpop.f32.mrb[28].mxu0 }
 0x118   :  { %6197 = vst [vmem:[#allocation9_spill] sm:$0xff] %v5374_v54  ;;  %v5376_v47 = vpop.f32.mrb[28].mxu1  ;;  %v5380_v44 = vpop.f32.mrb[29].mxu0 }
 0x119   :  { %6198 = vst [vmem:[#allocation10_spill] sm:$0xff] %v5376_v47  ;;  %6199 = vst [vmem:[#allocation11_spill] sm:$0xff] %v5380_v44  ;;  %v5382_v37 = vpop.f32.mrb[29].mxu1 }
 0x11a   :  { %6200 = vst [vmem:[#allocation12_spill] sm:$0xff] %v5382_v37 }
 0x11b   :  { %v5386_v34 = vpop.f32.mrb[30].mxu0 }
 0x11c   :  { %6201 = vst [vmem:[#allocation13_spill] sm:$0xff] %v5386_v34  ;;  %v5388_v3 = vpop.f32.mrb[30].mxu1  ;;  %v5392_v57 = vpop.f32.mrb[31].mxu0 }
 0x11d   :  { %6202 = vst [vmem:[#allocation14_spill] sm:$0xff] %v5388_v3  ;;  %6203 = vst [vmem:[#allocation15_spill] sm:$0xff] %v5392_v57  ;;  %v5394_v0 = vpop.f32.mrb[31].mxu1 }
 0x11e   :  { %6204 = vst [vmem:[#allocation16_spill] sm:$0xff] %v5394_v0 }
 0x11f   :  { %v5398_v47 = vpop.f32.mrb[32].mxu0 }
 0x120   :  { %6205 = vst [vmem:[#allocation17_spill] sm:$0xff] %v5398_v47  ;;  %v5400_v54 = vpop.f32.mrb[32].mxu1  ;;  %v5404_v37 = vpop.f32.mrb[33].mxu0 }
 0x121   :  { %6206 = vst [vmem:[#allocation18_spill] sm:$0xff] %v5400_v54  ;;  %6207 = vst [vmem:[#allocation19_spill] sm:$0xff] %v5404_v37  ;;  %v5406_v44 = vpop.f32.mrb[33].mxu1 }
 0x122   :  { %6208 = vst [vmem:[#allocation20_spill] sm:$0xff] %v5406_v44 }
 0x123   :  { %v5410_v3 = vpop.f32.mrb[34].mxu0 }
 0x124   :  { %6209 = vst [vmem:[#allocation21_spill] sm:$0xff] %v5410_v3  ;;  %v5412_v34 = vpop.f32.mrb[34].mxu1  ;;  %v5416_v0 = vpop.f32.mrb[35].mxu0 }
 0x125   :  { %6210 = vst [vmem:[#allocation22_spill] sm:$0xff] %v5412_v34  ;;  %6211 = vst [vmem:[#allocation23_spill] sm:$0xff] %v5416_v0  ;;  %v5418_v57 = vpop.f32.mrb[35].mxu1 }
 0x126   :  { %6212 = vst [vmem:[#allocation24_spill] sm:$0xff] %v5418_v57 }
 0x127   :  { %v5422_v54 = vpop.f32.mrb[36].mxu0 }
 0x128   :  { %6213 = vst [vmem:[#allocation25_spill] sm:$0xff] %v5422_v54  ;;  %v5424_v47 = vpop.f32.mrb[36].mxu1  ;;  %v5428_v44 = vpop.f32.mrb[37].mxu0 }
 0x129   :  { %6214 = vst [vmem:[#allocation26_spill] sm:$0xff] %v5424_v47  ;;  %6215 = vst [vmem:[#allocation27_spill] sm:$0xff] %v5428_v44  ;;  %v5430_v37 = vpop.f32.mrb[37].mxu1 }
 0x12a   :  { %6216 = vst [vmem:[#allocation28_spill] sm:$0xff] %v5430_v37 }
 0x12b   :  { %v5434_v34 = vpop.f32.mrb[38].mxu0 }
 0x12c   :  { %6217 = vst [vmem:[#allocation29_spill] sm:$0xff] %v5434_v34  ;;  %v5436_v3 = vpop.f32.mrb[38].mxu1  ;;  %v5440_v57 = vpop.f32.mrb[39].mxu0 }
 0x12d   :  { %6218 = vst [vmem:[#allocation30_spill] sm:$0xff] %v5436_v3  ;;  %6219 = vst [vmem:[#allocation31_spill] sm:$0xff] %v5440_v57  ;;  %v5442_v0 = vpop.f32.mrb[39].mxu1 }
 0x12e   :  { %6220 = vst [vmem:[#allocation32_spill] sm:$0xff] %v5442_v0 }
 0x12f   :  { %v5446_v47 = vpop.f32.mrb[40].mxu0 }
 0x130   :  { %6221 = vst [vmem:[#allocation33_spill] sm:$0xff] %v5446_v47  ;;  %v5448_v54 = vpop.f32.mrb[40].mxu1  ;;  %v5452_v37 = vpop.f32.mrb[41].mxu0 }
 0x131   :  { %6222 = vst [vmem:[#allocation34_spill] sm:$0xff] %v5448_v54  ;;  %6223 = vst [vmem:[#allocation35_spill] sm:$0xff] %v5452_v37  ;;  %v5454_v44 = vpop.f32.mrb[41].mxu1 }
 0x132   :  { %6224 = vst [vmem:[#allocation36_spill] sm:$0xff] %v5454_v44 }
 0x133   :  { %v5458_v3 = vpop.f32.mrb[42].mxu0 }
 0x134   :  { %6225 = vst [vmem:[#allocation37_spill] sm:$0xff] %v5458_v3  ;;  %v5460_v34 = vpop.f32.mrb[42].mxu1  ;;  %v5464_v0 = vpop.f32.mrb[43].mxu0 }
 0x135   :  { %6226 = vst [vmem:[#allocation38_spill] sm:$0xff] %v5460_v34  ;;  %6227 = vst [vmem:[#allocation39_spill] sm:$0xff] %v5464_v0  ;;  %v5466_v57 = vpop.f32.mrb[43].mxu1 }
 0x136   :  { %6228 = vst [vmem:[#allocation40_spill] sm:$0xff] %v5466_v57 }
 0x137   :  { %v5470_v54 = vpop.f32.mrb[44].mxu0 }
 0x138   :  { %6229 = vst [vmem:[#allocation41_spill] sm:$0xff] %v5470_v54  ;;  %v5472_v47 = vpop.f32.mrb[44].mxu1  ;;  %v5476_v44 = vpop.f32.mrb[45].mxu0 }
 0x139   :  { %6230 = vst [vmem:[#allocation42_spill] sm:$0xff] %v5472_v47  ;;  %6231 = vst [vmem:[#allocation43_spill] sm:$0xff] %v5476_v44  ;;  %v5478_v37 = vpop.f32.mrb[45].mxu1 }
 0x13a   :  { %6232 = vst [vmem:[#allocation44_spill] sm:$0xff] %v5478_v37 }
 0x13b   :  { %v5482_v34 = vpop.f32.mrb[46].mxu0 }
 0x13c   :  { %6233 = vst [vmem:[#allocation45_spill] sm:$0xff] %v5482_v34  ;;  %v5484_v3 = vpop.f32.mrb[46].mxu1  ;;  %v5488_v57 = vpop.f32.mrb[47].mxu0 }
 0x13d   :  { %6234 = vst [vmem:[#allocation46_spill] sm:$0xff] %v5484_v3  ;;  %6235 = vst [vmem:[#allocation47_spill] sm:$0xff] %v5488_v57  ;;  %v5490_v0 = vpop.f32.mrb[47].mxu1 }
 0x13e   :  { %6236 = vst [vmem:[#allocation48_spill] sm:$0xff] %v5490_v0 }
 0x13f   :  { %v5494_v47 = vpop.f32.mrb[48].mxu0 }
 0x140   :  { %6237 = vst [vmem:[#allocation49_spill] sm:$0xff] %v5494_v47  ;;  %v5496_v54 = vpop.f32.mrb[48].mxu1  ;;  %v5500_v37 = vpop.f32.mrb[49].mxu0 }
 0x141   :  { %6238 = vst [vmem:[#allocation50_spill] sm:$0xff] %v5496_v54  ;;  %6239 = vst [vmem:[#allocation51_spill] sm:$0xff] %v5500_v37  ;;  %v5502_v44 = vpop.f32.mrb[49].mxu1 }
 0x142   :  { %6240 = vst [vmem:[#allocation52_spill] sm:$0xff] %v5502_v44 }
 0x143   :  { %v5506_v3 = vpop.f32.mrb[50].mxu0 }
 0x144   :  { %6241 = vst [vmem:[#allocation53_spill] sm:$0xff] %v5506_v3  ;;  %v5508_v34 = vpop.f32.mrb[50].mxu1  ;;  %v5512_v0 = vpop.f32.mrb[51].mxu0 }
 0x145   :  { %6242 = vst [vmem:[#allocation54_spill] sm:$0xff] %v5508_v34  ;;  %6243 = vst [vmem:[#allocation55_spill] sm:$0xff] %v5512_v0  ;;  %v5514_v57 = vpop.f32.mrb[51].mxu1 }
 0x146   :  { %6244 = vst [vmem:[#allocation56_spill] sm:$0xff] %v5514_v57 }
 0x147   :  { %v5518_v54 = vpop.f32.mrb[52].mxu0 }
 0x148   :  { %6245 = vst [vmem:[#allocation57_spill] sm:$0xff] %v5518_v54  ;;  %v5520_v47 = vpop.f32.mrb[52].mxu1  ;;  %v5524_v44 = vpop.f32.mrb[53].mxu0 }
 0x149   :  { %6246 = vst [vmem:[#allocation58_spill] sm:$0xff] %v5520_v47  ;;  %6247 = vst [vmem:[#allocation59_spill] sm:$0xff] %v5524_v44  ;;  %v5526_v37 = vpop.f32.mrb[53].mxu1 }
 0x14a   :  { %6248 = vst [vmem:[#allocation60_spill] sm:$0xff] %v5526_v37 }
 0x14b   :  { %v5530_v34 = vpop.f32.mrb[54].mxu0 }
 0x14c   :  { %6249 = vst [vmem:[#allocation61_spill] sm:$0xff] %v5530_v34  ;;  %v5532_v3 = vpop.f32.mrb[54].mxu1  ;;  %v5536_v57 = vpop.f32.mrb[55].mxu0 }
 0x14d   :  { %6250 = vst [vmem:[#allocation62_spill] sm:$0xff] %v5532_v3  ;;  %6251 = vst [vmem:[#allocation63_spill] sm:$0xff] %v5536_v57  ;;  %v5538_v0 = vpop.f32.mrb[55].mxu1 }
 0x14e   :  { %6252 = vst [vmem:[#allocation64_spill] sm:$0xff] %v5538_v0 }
 0x14f   :  { %v5542_v47 = vpop.f32.mrb[56].mxu0 }
 0x150   :  { %6253 = vst [vmem:[#allocation65_spill] sm:$0xff] %v5542_v47  ;;  %v5544_v54 = vpop.f32.mrb[56].mxu1  ;;  %v5548_v37 = vpop.f32.mrb[57].mxu0 }
 0x151   :  { %6254 = vst [vmem:[#allocation66_spill] sm:$0xff] %v5544_v54  ;;  %6255 = vst [vmem:[#allocation67_spill] sm:$0xff] %v5548_v37  ;;  %v5550_v44 = vpop.f32.mrb[57].mxu1 }
 0x152   :  { %6256 = vst [vmem:[#allocation68_spill] sm:$0xff] %v5550_v44 }
 0x153   :  { %v5554_v3 = vpop.f32.mrb[58].mxu0 }
 0x154   :  { %6257 = vst [vmem:[#allocation69_spill] sm:$0xff] %v5554_v3  ;;  %v5556_v34 = vpop.f32.mrb[58].mxu1  ;;  %v5560_v0 = vpop.f32.mrb[59].mxu0 }
 0x155   :  { %6258 = vst [vmem:[#allocation70_spill] sm:$0xff] %v5556_v34  ;;  %6259 = vst [vmem:[#allocation71_spill] sm:$0xff] %v5560_v0  ;;  %v5562_v57 = vpop.f32.mrb[59].mxu1 }
 0x156   :  { %6260 = vst [vmem:[#allocation72_spill] sm:$0xff] %v5562_v57 }
 0x157   :  { %v5566_v54 = vpop.f32.mrb[60].mxu0 }
 0x158   :  { %6261 = vst [vmem:[#allocation73_spill] sm:$0xff] %v5566_v54  ;;  %v5568_v47 = vpop.f32.mrb[60].mxu1  ;;  %v5572_v44 = vpop.f32.mrb[61].mxu0 }
 0x159   :  { %6262 = vst [vmem:[#allocation74_spill] sm:$0xff] %v5568_v47  ;;  %6263 = vst [vmem:[#allocation75_spill] sm:$0xff] %v5572_v44  ;;  %v5574_v37 = vpop.f32.mrb[61].mxu1 }
 0x15a   :  { %6264 = vst [vmem:[#allocation76_spill] sm:$0xff] %v5574_v37 }
 0x15b   :  { %v5578_v34 = vpop.f32.mrb[62].mxu0 }
 0x15c   :  { %6265 = vst [vmem:[#allocation77_spill] sm:$0xff] %v5578_v34  ;;  %v5580_v3 = vpop.f32.mrb[62].mxu1  ;;  %v5584_v57 = vpop.f32.mrb[63].mxu0 }
 0x15d   :  { %6266 = vst [vmem:[#allocation78_spill] sm:$0xff] %v5580_v3  ;;  %6267 = vst [vmem:[#allocation79_spill] sm:$0xff] %v5584_v57  ;;  %v5586_v0 = vpop.f32.mrb[63].mxu1 }
 0x15e   :  { %6268 = vst [vmem:[#allocation80_spill] sm:$0xff] %v5586_v0 }
 0x15f   :  { %v3920_v47 = vpop.f32.mrb[64].mxu0 }
 0x160   :  { %v4024_v54 = vpop.f32.mrb[64].mxu1  ;;  %v2009_v39 = vmax.f32 %v6269_v10, %v3920_v47  ;;  %v1689_v37 = vpop.f32.mrb[65].mxu0 }
 0x161   :  { %v2395_v44 = vpop.f32.mrb[65].mxu1  ;;  %v2008_v20 = vmax.f32 %v6270_v13, %v1689_v37 }
 0x162   :  { %v2715_v3 = vmax.f32 %v2009_v39, %v4024_v54 }
 0x163   :  { %v2714_v34 = vmax.f32 %v2008_v20, %v2395_v44  ;;  %v3923_v41 = vpop.f32.mrb[66].mxu0 }
 0x164   :  { %v4027_v0 = vpop.f32.mrb[66].mxu1  ;;  %v2786_v57 = vadd.f32 %v5599_v23, %v2715_v3  ;;  %v2011_v33 = vmax.f32 %v6271_v32, %v3923_v41  ;;  %v1699_v47 = vpop.f32.mrb[67].mxu0 }
 0x165   :  { %v2405_v10 = vpop.f32.mrb[67].mxu1  ;;  %v2785_v35 = vadd.f32 %v5599_v23, %v2714_v34  ;;  %v2010_v37 = vmax.f32 %v6272_v36, %v1699_v47  ;;  %v6273_v34 = vmax.f32 %v5106_v52, %v5108_v53 }
 0x166   :  { %v2850_v13 = vmax.f32 %v2786_v57, 0.0  ;;  %v2717_v4 = vmax.f32 %v2011_v33, %v4027_v0  ;;  %v6274_v57 = vmax.f32 %v5112_v55, %v5114_v56 }
 0x167   :  { %v2849_v54 = vmax.f32 %v2785_v35, 0.0  ;;  %v2716_v44 = vmax.f32 %v2010_v37, %v2405_v10  ;;  %v3926_v20 = vpop.f32.mrb[68].mxu0  ;;  %v6275_v10 = vmax.f32 %v5134_v62, %v5136_v63  ;;  %v6276_v37 = vmax.f32 %v5140_v1, %v5142_v2 }
 0x168   :  { %v4030_v39 = vpop.f32.mrb[68].mxu1  ;;  %2914 = vst.msk [vmem:[%s6110_s3 + $0x8] sm:$0xff] %vm82_vm0, %v2850_v13  ;;  %v2788_v42 = vadd.f32 %v5599_v23, %v2717_v4  ;;  %v2013_v43 = vmax.f32 %v6273_v34, %v3926_v20  ;;  %v1709_v3 = vpop.f32.mrb[69].mxu0  ;;  %v6277_v34 = vmax.f32 %v5162_v8, %v5164_v9 }
 0x169   :  { %v2415_v45 = vpop.f32.mrb[69].mxu1  ;;  %2913 = vst.msk [vmem:[%s6110_s3] sm:$0xff] %vm82_vm0, %v2849_v54  ;;  %v2787_v46 = vadd.f32 %v5599_v23, %v2716_v44  ;;  %v2012_v0 = vmax.f32 %v6274_v57, %v1709_v3 }
 0x16a   :  { %v2852_v41 = vmax.f32 %v2788_v42, 0.0  ;;  %v2719_v32 = vmax.f32 %v2013_v43, %v4030_v39 }
 0x16b   :  { %v2851_v4 = vmax.f32 %v2787_v46, 0.0  ;;  %v2718_v33 = vmax.f32 %v2012_v0, %v2415_v45  ;;  %v3929_v47 = vpop.f32.mrb[70].mxu0  ;;  %v6278_v45 = vmax.f32 %v5168_v11, %v5170_v12 }
 0x16c   :  { %v4033_v52 = vpop.f32.mrb[70].mxu1  ;;  %2916 = vst.msk [vmem:[%s6110_s3 + $0x18] sm:$0xff] %vm82_vm0, %v2852_v41  ;;  %v2790_v53 = vadd.f32 %v5599_v23, %v2719_v32  ;;  %v2015_v35 = vmax.f32 %v6275_v10, %v3929_v47  ;;  %v1719_v36 = vpop.f32.mrb[71].mxu0 }
 0x16d   :  { %v2425_v55 = vpop.f32.mrb[71].mxu1  ;;  %2915 = vst.msk [vmem:[%s6110_s3 + $0x10] sm:$0xff] %vm82_vm0, %v2851_v4  ;;  %v2789_v56 = vadd.f32 %v5599_v23, %v2718_v33  ;;  %v2014_v13 = vmax.f32 %v6276_v37, %v1719_v36  ;;  %v6279_v33 = vmax.f32 %v5190_v18, %v5192_v19 }
 0x16e   :  { %v2854_v54 = vmax.f32 %v2790_v53, 0.0  ;;  %v2721_v44 = vmax.f32 %v2015_v35, %v4033_v52  ;;  %v6280_v53 = vmax.f32 %v5196_v21, %v5198_v22 }
 0x16f   :  { %v2853_v20 = vmax.f32 %v2789_v56, 0.0  ;;  %v2720_v39 = vmax.f32 %v2014_v13, %v2425_v55  ;;  %v3932_v42 = vpop.f32.mrb[72].mxu0  ;;  %v6281_v13 = vmax.f32 %v5218_v28, %v5220_v29 }
 0x170   :  { %v4036_v62 = vpop.f32.mrb[72].mxu1  ;;  %2918 = vst.msk [vmem:[%s6110_s3 + $0x28] sm:$0xff] %vm82_vm0, %v2854_v54  ;;  %v2792_v63 = vadd.f32 %v5599_v23, %v2721_v44  ;;  %v2017_v43 = vmax.f32 %v6277_v34, %v3932_v42  ;;  %v1729_v3 = vpop.f32.mrb[73].mxu0 }
 0x171   :  { %v2435_v1 = vpop.f32.mrb[73].mxu1  ;;  %2917 = vst.msk [vmem:[%s6110_s3 + $0x20] sm:$0xff] %vm82_vm0, %v2853_v20  ;;  %v2791_v2 = vadd.f32 %v5599_v23, %v2720_v39  ;;  %v2016_v46 = vmax.f32 %v6278_v45, %v1729_v3  ;;  %v6282_v20 = vmax.f32 %v5224_v31, %v5226_v38  ;;  %v6283_v3 = vmax.f32 %v5246_v50, %v5248_v51 }
 0x172   :  { %v2856_v57 = vmax.f32 %v2792_v63, 0.0  ;;  %v2723_v0 = vmax.f32 %v2017_v43, %v4036_v62  ;;  %v6284_v45 = vmax.f32 %v5252_v59, %v5254_v60 }
 0x173   :  { %v2855_v41 = vmax.f32 %v2791_v2, 0.0  ;;  %v2722_v32 = vmax.f32 %v2016_v46, %v2435_v1  ;;  %v3935_v4 = vpop.f32.mrb[74].mxu0 }
 0x174   :  { %v4039_v8 = vpop.f32.mrb[74].mxu1  ;;  %2920 = vst.msk [vmem:[%s6110_s3 + $0x38] sm:$0xff] %vm82_vm0, %v2856_v57  ;;  %v2794_v9 = vadd.f32 %v5599_v23, %v2723_v0  ;;  %v2019_v47 = vmax.f32 %v6279_v33, %v3935_v4  ;;  %v1739_v52 = vpop.f32.mrb[75].mxu0 }
 0x175   :  { %v2445_v11 = vpop.f32.mrb[75].mxu1  ;;  %2919 = vst.msk [vmem:[%s6110_s3 + $0x30] sm:$0xff] %vm82_vm0, %v2855_v41  ;;  %v2793_v12 = vadd.f32 %v5599_v23, %v2722_v32  ;;  %v2018_v10 = vmax.f32 %v6280_v53, %v1739_v52 }
 0x176   :  { %v2858_v35 = vmax.f32 %v2794_v9, 0.0  ;;  %v2725_v36 = vmax.f32 %v2019_v47, %v4039_v8  ;;  %v6285_v8 = vmax.f32 %v5274_v14, %v5276_v15  ;;  %v6286_v47 = vmax.f32 %v5280_v17, %v5282_v24 }
 0x177   :  { %v2857_v55 = vmax.f32 %v2793_v12, 0.0  ;;  %v2724_v56 = vmax.f32 %v2018_v10, %v2445_v11  ;;  %v3938_v37 = vpop.f32.mrb[76].mxu0 }
 0x178   :  { %v4042_v18 = vpop.f32.mrb[76].mxu1  ;;  %2922 = vst.msk [vmem:[%s6110_s3 + $0x48] sm:$0xff] %vm82_vm0, %v2858_v35  ;;  %v2796_v19 = vadd.f32 %v5599_v23, %v2725_v36  ;;  %v2021_v54 = vmax.f32 %v6281_v13, %v3938_v37  ;;  %v1749_v44 = vpop.f32.mrb[77].mxu0  ;;  %v6287_v36 = vmax.f32 %v5302_v48, %v5304_v49  ;;  %v6288_v37 = vmax.f32 %v5308_v5, %v5310_v6 }
 0x179   :  { %v2455_v21 = vpop.f32.mrb[77].mxu1  ;;  %2921 = vst.msk [vmem:[%s6110_s3 + $0x40] sm:$0xff] %vm82_vm0, %v2857_v55  ;;  %v2795_v22 = vadd.f32 %v5599_v23, %v2724_v56  ;;  %v2020_v39 = vmax.f32 %v6282_v20, %v1749_v44 }
 0x17a   :  { %v2860_v42 = vmax.f32 %v2796_v19, 0.0  ;;  %v2727_v62 = vmax.f32 %v2021_v54, %v4042_v18 }
 0x17b   :  { %v2859_v63 = vmax.f32 %v2795_v22, 0.0  ;;  %v2726_v34 = vmax.f32 %v2020_v39, %v2455_v21  ;;  %v3941_v43 = vpop.f32.mrb[78].mxu0  ;;  %v6289_v22 = vmax.f32 %v5324_v16, %v5326_v26 }
 0x17c   :  { %v4045_v28 = vpop.f32.mrb[78].mxu1  ;;  %2924 = vst.msk [vmem:[%s6110_s3 + $0x58] sm:$0xff] %vm82_vm0, %v2860_v42  ;;  %v2798_v29 = vadd.f32 %v5599_v23, %v2727_v62  ;;  %v2023_v1 = vmax.f32 %v6283_v3, %v3941_v43  ;;  %v1759_v2 = vpop.f32.mrb[79].mxu0  ;;  %v6290_v42 = vmax.f32 %v5330_v7, %v5332_v40  ;;  %v6291_v3 = vmax.f32 %v5338_v61, %v5340_v58 }
 0x17d   :  { %v2465_v31 = vpop.f32.mrb[79].mxu1  ;;  %2923 = vst.msk [vmem:[%s6110_s3 + $0x50] sm:$0xff] %vm82_vm0, %v2859_v63  ;;  %v2797_v38 = vadd.f32 %v5599_v23, %v2726_v34  ;;  %v2022_v46 = vmax.f32 %v6284_v45, %v1759_v2 }
 0x17e   :  { %v2862_v57 = vmax.f32 %v2798_v29, 0.0  ;;  %v2729_v0 = vmax.f32 %v2023_v1, %v4045_v28 }
 0x17f   :  { %v2861_v41 = vmax.f32 %v2797_v38, 0.0  ;;  %v2728_v32 = vmax.f32 %v2022_v46, %v2465_v31  ;;  %v3944_v4 = vpop.f32.mrb[80].mxu0  ;;  %v6292_v31 = vmax.f32 %v5344_v30, %v5346_v27 }
 0x180   :  { %v4048_v50 = vpop.f32.mrb[80].mxu1  ;;  %2926 = vst.msk [vmem:[%s6110_s3 + $0x68] sm:$0xff] %vm82_vm0, %v2862_v57  ;;  %v2800_v51 = vadd.f32 %v5599_v23, %v2729_v0  ;;  %v2025_v9 = vmax.f32 %v6285_v8, %v3944_v4  ;;  %v1769_v33 = vpop.f32.mrb[81].mxu0  ;;  %v6295_v8 = vld [vmem:[#allocation3_spill] sm:$0xff] }
 0x181   :  { %v2475_v59 = vpop.f32.mrb[81].mxu1  ;;  %2925 = vst.msk [vmem:[%s6110_s3 + $0x60] sm:$0xff] %vm82_vm0, %v2861_v41  ;;  %v2799_v60 = vadd.f32 %v5599_v23, %v2728_v32  ;;  %v2024_v52 = vmax.f32 %v6286_v47, %v1769_v33  ;;  %v6293_v32 = vld [vmem:[#allocation2_spill] sm:$0xff] }
 0x182   :  { %v2864_v11 = vmax.f32 %v2800_v51, 0.0  ;;  %v2731_v12 = vmax.f32 %v2025_v9, %v4048_v50  ;;  %v6294_v4 = vmax.f32 %v5350_v25, %v6293_v32  ;;  %v6296_v9 = vld [vmem:[#allocation4_spill] sm:$0xff] }
 0x183   :  { %v2863_v53 = vmax.f32 %v2799_v60, 0.0  ;;  %v2730_v10 = vmax.f32 %v2024_v52, %v2475_v59  ;;  %v3947_v35 = vpop.f32.mrb[82].mxu0  ;;  %v6297_v33 = vmax.f32 %v6295_v8, %v6296_v9 }
 0x184   :  { %v4051_v14 = vpop.f32.mrb[82].mxu1  ;;  %2928 = vst.msk [vmem:[%s6110_s3 + $0x78] sm:$0xff] %vm82_vm0, %v2864_v11  ;;  %v2802_v15 = vadd.f32 %v5599_v23, %v2731_v12  ;;  %v2027_v55 = vmax.f32 %v6287_v36, %v3947_v35  ;;  %v1779_v56 = vpop.f32.mrb[83].mxu0  ;;  %v6299_v35 = vld [vmem:[#allocation6_spill] sm:$0xff] }
 0x185   :  { %v2485_v17 = vpop.f32.mrb[83].mxu1  ;;  %2927 = vst.msk [vmem:[%s6110_s3 + $0x70] sm:$0xff] %vm82_vm0, %v2863_v53  ;;  %v2801_v24 = vadd.f32 %v5599_v23, %v2730_v10  ;;  %v2026_v18 = vmax.f32 %v6288_v37, %v1779_v56  ;;  %v6298_v10 = vld [vmem:[#allocation5_spill] sm:$0xff] }
 0x186   :  { %v2866_v19 = vmax.f32 %v2802_v15, 0.0  ;;  %v2733_v13 = vmax.f32 %v2027_v55, %v4051_v14  ;;  %v6300_v14 = vmax.f32 %v6298_v10, %v6299_v35 }
 0x187   :  { %v2865_v54 = vmax.f32 %v2801_v24, 0.0  ;;  %v2732_v44 = vmax.f32 %v2026_v18, %v2485_v17  ;;  %v3950_v21 = vpop.f32.mrb[84].mxu0  ;;  %v6301_v17 = vld [vmem:[#allocation7_spill] sm:$0xff]  ;;  %v6302_v24 = vld [vmem:[#allocation8_spill] sm:$0xff] }
 0x188   :  { %v4054_v48 = vpop.f32.mrb[84].mxu1  ;;  %2930 = vst.msk [vmem:[%s6110_s3 + $0x88] sm:$0xff] %vm82_vm0, %v2866_v19  ;;  %v2804_v49 = vadd.f32 %v5599_v23, %v2733_v13  ;;  %v2029_v20 = vmax.f32 %v6289_v22, %v3950_v21  ;;  %v1789_v39 = vpop.f32.mrb[85].mxu0  ;;  %v6303_v37 = vmax.f32 %v6301_v17, %v6302_v24  ;;  %v6304_v22 = vld [vmem:[#allocation9_spill] sm:$0xff] }
 0x189   :  { %v2495_v5 = vpop.f32.mrb[85].mxu1  ;;  %2929 = vst.msk [vmem:[%s6110_s3 + $0x80] sm:$0xff] %vm82_vm0, %v2865_v54  ;;  %v2803_v6 = vadd.f32 %v5599_v23, %v2732_v44  ;;  %v2028_v62 = vmax.f32 %v6290_v42, %v1789_v39 }
 0x18a   :  { %v2868_v63 = vmax.f32 %v2804_v49, 0.0  ;;  %v2735_v34 = vmax.f32 %v2029_v20, %v4054_v48  ;;  %v6305_v20 = vld [vmem:[#allocation10_spill] sm:$0xff] }
 0x18b   :  { %v2867_v43 = vmax.f32 %v2803_v6, 0.0  ;;  %v2734_v28 = vmax.f32 %v2028_v62, %v2495_v5  ;;  %v3953_v29 = vpop.f32.mrb[86].mxu0  ;;  %v6306_v39 = vmax.f32 %v6304_v22, %v6305_v20 }
 0x18c   :  { %v4057_v16 = vpop.f32.mrb[86].mxu1  ;;  %2932 = vst.msk [vmem:[%s6110_s3 + $0x98] sm:$0xff] %vm82_vm0, %v2868_v63  ;;  %v2806_v26 = vadd.f32 %v5599_v23, %v2735_v34  ;;  %v2031_v1 = vmax.f32 %v6291_v3, %v3953_v29  ;;  %v1799_v2 = vpop.f32.mrb[87].mxu0  ;;  %v6307_v63 = vld [vmem:[#allocation11_spill] sm:$0xff]  ;;  %v6308_v34 = vld [vmem:[#allocation12_spill] sm:$0xff] }
 0x18d   :  { %v2505_v7 = vpop.f32.mrb[87].mxu1  ;;  %2931 = vst.msk [vmem:[%s6110_s3 + $0x90] sm:$0xff] %vm82_vm0, %v2867_v43  ;;  %v2805_v40 = vadd.f32 %v5599_v23, %v2734_v28  ;;  %v2030_v38 = vmax.f32 %v6292_v31, %v1799_v2  ;;  %v6309_v43 = vmax.f32 %v6307_v63, %v6308_v34  ;;  %v6311_v31 = vld [vmem:[#allocation14_spill] sm:$0xff] }
 0x18e   :  { %v2870_v45 = vmax.f32 %v2806_v26, 0.0  ;;  %v2737_v46 = vmax.f32 %v2031_v1, %v4057_v16 }
 0x18f   :  { %v2869_v57 = vmax.f32 %v2805_v40, 0.0  ;;  %v2736_v0 = vmax.f32 %v2030_v38, %v2505_v7  ;;  %v3956_v41 = vpop.f32.mrb[88].mxu0  ;;  %v6310_v40 = vld [vmem:[#allocation13_spill] sm:$0xff] }
 0x190   :  { %v4060_v58 = vpop.f32.mrb[88].mxu1  ;;  %2934 = vst.msk [vmem:[%s6110_s3 + $0xa8] sm:$0xff] %vm82_vm0, %v2870_v45  ;;  %v2808_v61 = vadd.f32 %v5599_v23, %v2737_v46  ;;  %v2033_v50 = vmax.f32 %v6294_v4, %v3956_v41  ;;  %v1809_v51 = vpop.f32.mrb[89].mxu0  ;;  %v6312_v38 = vmax.f32 %v6310_v40, %v6311_v31  ;;  %v6313_v41 = vld [vmem:[#allocation15_spill] sm:$0xff] }
 0x191   :  { %v2515_v30 = vpop.f32.mrb[89].mxu1  ;;  %2933 = vst.msk [vmem:[%s6110_s3 + $0xa0] sm:$0xff] %vm82_vm0, %v2869_v57  ;;  %v2807_v27 = vadd.f32 %v5599_v23, %v2736_v0  ;;  %v2032_v59 = vmax.f32 %v6297_v33, %v1809_v51  ;;  %v6316_v33 = vld [vmem:[#allocation17_spill] sm:$0xff] }
 0x192   :  { %v2872_v60 = vmax.f32 %v2808_v61, 0.0  ;;  %v2739_v47 = vmax.f32 %v2033_v50, %v4060_v58  ;;  %v6314_v58 = vld [vmem:[#allocation16_spill] sm:$0xff] }
 0x193   :  { %v2871_v52 = vmax.f32 %v2807_v27, 0.0  ;;  %v2738_v11 = vmax.f32 %v2032_v59, %v2515_v30  ;;  %v3959_v12 = vpop.f32.mrb[90].mxu0  ;;  %v6315_v61 = vmax.f32 %v6313_v41, %v6314_v58  ;;  %v6317_v59 = vld [vmem:[#allocation18_spill] sm:$0xff] }
 0x194   :  { %v4063_v25 = vpop.f32.mrb[90].mxu1  ;;  %2936 = vst.msk [vmem:[%s6110_s3 + $0xb8] sm:$0xff] %vm82_vm0, %v2872_v60  ;;  %v2810_v53 = vadd.f32 %v5599_v23, %v2739_v47  ;;  %v2035_v15 = vmax.f32 %v6300_v14, %v3959_v12  ;;  %v1819_v36 = vpop.f32.mrb[91].mxu0  ;;  %v6318_v60 = vmax.f32 %v6316_v33, %v6317_v59 }
 0x195   :  { %v2525_v55 = vpop.f32.mrb[91].mxu1  ;;  %2935 = vst.msk [vmem:[%s6110_s3 + $0xb0] sm:$0xff] %vm82_vm0, %v2871_v52  ;;  %v2809_v56 = vadd.f32 %v5599_v23, %v2738_v11  ;;  %v2034_v18 = vmax.f32 %v6303_v37, %v1819_v36  ;;  %v6322_v37 = vld [vmem:[#allocation21_spill] sm:$0xff] }
 0x196   :  { %v2874_v19 = vmax.f32 %v2810_v53, 0.0  ;;  %v2741_v13 = vmax.f32 %v2035_v15, %v4063_v25  ;;  %v6319_v25 = vld [vmem:[#allocation19_spill] sm:$0xff]  ;;  %v6320_v53 = vld [vmem:[#allocation20_spill] sm:$0xff] }
 0x197   :  { %v2873_v54 = vmax.f32 %v2809_v56, 0.0  ;;  %v2740_v44 = vmax.f32 %v2034_v18, %v2525_v55  ;;  %v3962_v21 = vpop.f32.mrb[92].mxu0  ;;  %v6321_v10 = vmax.f32 %v6319_v25, %v6320_v53  ;;  %v6323_v18 = vld [vmem:[#allocation22_spill] sm:$0xff] }
 0x198   :  { %v4066_v48 = vpop.f32.mrb[92].mxu1  ;;  %2938 = vst.msk [vmem:[%s6110_s3 + $0xc8] sm:$0xff] %vm82_vm0, %v2874_v19  ;;  %v2812_v49 = vadd.f32 %v5599_v23, %v2741_v13  ;;  %v2037_v5 = vmax.f32 %v6306_v39, %v3962_v21  ;;  %v1829_v6 = vpop.f32.mrb[93].mxu0  ;;  %v6324_v19 = vmax.f32 %v6322_v37, %v6323_v18 }
 0x199   :  { %v2535_v42 = vpop.f32.mrb[93].mxu1  ;;  %2937 = vst.msk [vmem:[%s6110_s3 + $0xc0] sm:$0xff] %vm82_vm0, %v2873_v54  ;;  %v2811_v62 = vadd.f32 %v5599_v23, %v2740_v44  ;;  %v2036_v28 = vmax.f32 %v6309_v43, %v1829_v6  ;;  %v6328_v43 = vld [vmem:[#allocation25_spill] sm:$0xff] }
 0x19a   :  { %v2876_v29 = vmax.f32 %v2812_v49, 0.0  ;;  %v2743_v16 = vmax.f32 %v2037_v5, %v4066_v48  ;;  %v6325_v48 = vld [vmem:[#allocation23_spill] sm:$0xff]  ;;  %v6326_v49 = vld [vmem:[#allocation24_spill] sm:$0xff] }
 0x19b   :  { %v2875_v26 = vmax.f32 %v2811_v62, 0.0  ;;  %v2742_v3 = vmax.f32 %v2036_v28, %v2535_v42  ;;  %v3965_v1 = vpop.f32.mrb[94].mxu0  ;;  %v6327_v22 = vmax.f32 %v6325_v48, %v6326_v49  ;;  %v6329_v28 = vld [vmem:[#allocation26_spill] sm:$0xff] }
 0x19c   :  { %v4069_v2 = vpop.f32.mrb[94].mxu1  ;;  %2940 = vst.msk [vmem:[%s6110_s3 + $0xd8] sm:$0xff] %vm82_vm0, %v2876_v29  ;;  %v2814_v7 = vadd.f32 %v5599_v23, %v2743_v16  ;;  %v2039_v45 = vmax.f32 %v6312_v38, %v3965_v1  ;;  %v1839_v46 = vpop.f32.mrb[95].mxu0  ;;  %v6330_v29 = vmax.f32 %v6328_v43, %v6329_v28 }
 0x19d   :  { %v2545_v57 = vpop.f32.mrb[95].mxu1  ;;  %2939 = vst.msk [vmem:[%s6110_s3 + $0xd0] sm:$0xff] %vm82_vm0, %v2875_v26  ;;  %v2813_v0 = vadd.f32 %v5599_v23, %v2742_v3  ;;  %v2038_v32 = vmax.f32 %v6315_v61, %v1839_v46  ;;  %v6334_v61 = vld [vmem:[#allocation29_spill] sm:$0xff] }
 0x19e   :  { %v2878_v4 = vmax.f32 %v2814_v7, 0.0  ;;  %v2745_v50 = vmax.f32 %v2039_v45, %v4069_v2  ;;  %v6331_v2 = vld [vmem:[#allocation27_spill] sm:$0xff]  ;;  %v6332_v7 = vld [vmem:[#allocation28_spill] sm:$0xff] }
 0x19f   :  { %v2877_v51 = vmax.f32 %v2813_v0, 0.0  ;;  %v2744_v30 = vmax.f32 %v2038_v32, %v2545_v57  ;;  %v3968_v27 = vpop.f32.mrb[96].mxu0  ;;  %v6333_v40 = vmax.f32 %v6331_v2, %v6332_v7  ;;  %v6335_v32 = vld [vmem:[#allocation30_spill] sm:$0xff] }
 0x1a0   :  { %v4072_v8 = vpop.f32.mrb[96].mxu1  ;;  %2942 = vst.msk [vmem:[%s6110_s3 + $0xe8] sm:$0xff] %vm82_vm0, %v2878_v4  ;;  %v2816_v9 = vadd.f32 %v5599_v23, %v2745_v50  ;;  %v2041_v47 = vmax.f32 %v6318_v60, %v3968_v27  ;;  %v1849_v52 = vpop.f32.mrb[97].mxu0  ;;  %v6336_v4 = vmax.f32 %v6334_v61, %v6335_v32 }
 0x1a1   :  { %v2555_v11 = vpop.f32.mrb[97].mxu1  ;;  %2941 = vst.msk [vmem:[%s6110_s3 + $0xe0] sm:$0xff] %vm82_vm0, %v2877_v51  ;;  %v2815_v12 = vadd.f32 %v5599_v23, %v2744_v30  ;;  %v2040_v35 = vmax.f32 %v6321_v10, %v1849_v52  ;;  %v6340_v10 = vld [vmem:[#allocation33_spill] sm:$0xff] }
 0x1a2   :  { %v2880_v14 = vmax.f32 %v2816_v9, 0.0  ;;  %v2747_v15 = vmax.f32 %v2041_v47, %v4072_v8  ;;  %v6337_v8 = vld [vmem:[#allocation31_spill] sm:$0xff]  ;;  %v6338_v9 = vld [vmem:[#allocation32_spill] sm:$0xff] }
 0x1a3   :  { %v2879_v36 = vmax.f32 %v2815_v12, 0.0  ;;  %v2746_v55 = vmax.f32 %v2040_v35, %v2555_v11  ;;  %v3971_v56 = vpop.f32.mrb[98].mxu0  ;;  %v6339_v33 = vmax.f32 %v6337_v8, %v6338_v9  ;;  %v6341_v35 = vld [vmem:[#allocation34_spill] sm:$0xff] }
 0x1a4   :  { %v4075_v17 = vpop.f32.mrb[98].mxu1  ;;  %2944 = vst.msk [vmem:[%s6110_s3 + $0xf8] sm:$0xff] %vm82_vm0, %v2880_v14  ;;  %v2818_v24 = vadd.f32 %v5599_v23, %v2747_v15  ;;  %v2043_v13 = vmax.f32 %v6324_v19, %v3971_v56  ;;  %v1859_v54 = vpop.f32.mrb[99].mxu0  ;;  %v6342_v14 = vmax.f32 %v6340_v10, %v6341_v35 }
 0x1a5   :  { %v2565_v44 = vpop.f32.mrb[99].mxu1  ;;  %2943 = vst.msk [vmem:[%s6110_s3 + $0xf0] sm:$0xff] %vm82_vm0, %v2879_v36  ;;  %v2817_v21 = vadd.f32 %v5599_v23, %v2746_v55  ;;  %v2042_v20 = vmax.f32 %v6327_v22, %v1859_v54  ;;  %v6346_v22 = vld [vmem:[#allocation37_spill] sm:$0xff] }
 0x1a6   :  { %v2882_v39 = vmax.f32 %v2818_v24, 0.0  ;;  %v2749_v5 = vmax.f32 %v2043_v13, %v4075_v17  ;;  %v6343_v17 = vld [vmem:[#allocation35_spill] sm:$0xff]  ;;  %v6344_v24 = vld [vmem:[#allocation36_spill] sm:$0xff] }
 0x1a7   :  { %v2881_v6 = vmax.f32 %v2817_v21, 0.0  ;;  %v2748_v42 = vmax.f32 %v2042_v20, %v2565_v44  ;;  %v3974_v62 = vpop.f32.mrb[100].mxu0  ;;  %v6345_v37 = vmax.f32 %v6343_v17, %v6344_v24  ;;  %v6347_v20 = vld [vmem:[#allocation38_spill] sm:$0xff] }
 0x1a8   :  { %v4078_v63 = vpop.f32.mrb[100].mxu1  ;;  %2946 = vst.msk [vmem:[%s6110_s3 + $0x108] sm:$0xff] %vm82_vm0, %v2882_v39  ;;  %v2820_v34 = vadd.f32 %v5599_v23, %v2749_v5  ;;  %v2045_v16 = vmax.f32 %v6330_v29, %v3974_v62  ;;  %v1869_v26 = vpop.f32.mrb[101].mxu0  ;;  %v6348_v39 = vmax.f32 %v6346_v22, %v6347_v20 }
 0x1a9   :  { %v2575_v3 = vpop.f32.mrb[101].mxu1  ;;  %2945 = vst.msk [vmem:[%s6110_s3 + $0x100] sm:$0xff] %vm82_vm0, %v2881_v6  ;;  %v2819_v1 = vadd.f32 %v5599_v23, %v2748_v42  ;;  %v2044_v31 = vmax.f32 %v6333_v40, %v1869_v26  ;;  %v6352_v40 = vld [vmem:[#allocation41_spill] sm:$0xff] }
 0x1aa   :  { %v2884_v38 = vmax.f32 %v2820_v34, 0.0  ;;  %v2751_v45 = vmax.f32 %v2045_v16, %v4078_v63  ;;  %v6349_v63 = vld [vmem:[#allocation39_spill] sm:$0xff]  ;;  %v6350_v34 = vld [vmem:[#allocation40_spill] sm:$0xff] }
 0x1ab   :  { %v2883_v46 = vmax.f32 %v2819_v1, 0.0  ;;  %v2750_v57 = vmax.f32 %v2044_v31, %v2575_v3  ;;  %v3977_v0 = vpop.f32.mrb[102].mxu0  ;;  %v6351_v43 = vmax.f32 %v6349_v63, %v6350_v34  ;;  %v6353_v31 = vld [vmem:[#allocation42_spill] sm:$0xff] }
 0x1ac   :  { %v4081_v41 = vpop.f32.mrb[102].mxu1  ;;  %2948 = vst.msk [vmem:[%s6110_s3 + $0x118] sm:$0xff] %vm82_vm0, %v2884_v38  ;;  %v2822_v58 = vadd.f32 %v5599_v23, %v2751_v45  ;;  %v2047_v50 = vmax.f32 %v6336_v4, %v3977_v0  ;;  %v1879_v51 = vpop.f32.mrb[103].mxu0  ;;  %v6354_v38 = vmax.f32 %v6352_v40, %v6353_v31 }
 0x1ad   :  { %v2585_v30 = vpop.f32.mrb[103].mxu1  ;;  %2947 = vst.msk [vmem:[%s6110_s3 + $0x110] sm:$0xff] %vm82_vm0, %v2883_v46  ;;  %v2821_v27 = vadd.f32 %v5599_v23, %v2750_v57  ;;  %v2046_v59 = vmax.f32 %v6339_v33, %v1879_v51  ;;  %v6358_v33 = vld [vmem:[#allocation45_spill] sm:$0xff] }
 0x1ae   :  { %v2886_v60 = vmax.f32 %v2822_v58, 0.0  ;;  %v2753_v47 = vmax.f32 %v2047_v50, %v4081_v41  ;;  %v6355_v41 = vld [vmem:[#allocation43_spill] sm:$0xff]  ;;  %v6356_v58 = vld [vmem:[#allocation44_spill] sm:$0xff] }
 0x1af   :  { %v2885_v52 = vmax.f32 %v2821_v27, 0.0  ;;  %v2752_v11 = vmax.f32 %v2046_v59, %v2585_v30  ;;  %v3980_v12 = vpop.f32.mrb[104].mxu0  ;;  %v6357_v61 = vmax.f32 %v6355_v41, %v6356_v58  ;;  %v6359_v59 = vld [vmem:[#allocation46_spill] sm:$0xff] }
 0x1b0   :  { %v4084_v25 = vpop.f32.mrb[104].mxu1  ;;  %2950 = vst.msk [vmem:[%s6110_s3 + $0x128] sm:$0xff] %vm82_vm0, %v2886_v60  ;;  %v2824_v53 = vadd.f32 %v5599_v23, %v2753_v47  ;;  %v2049_v15 = vmax.f32 %v6342_v14, %v3980_v12  ;;  %v1889_v36 = vpop.f32.mrb[105].mxu0  ;;  %v6360_v60 = vmax.f32 %v6358_v33, %v6359_v59 }
 0x1b1   :  { %v2595_v55 = vpop.f32.mrb[105].mxu1  ;;  %2949 = vst.msk [vmem:[%s6110_s3 + $0x120] sm:$0xff] %vm82_vm0, %v2885_v52  ;;  %v2823_v56 = vadd.f32 %v5599_v23, %v2752_v11  ;;  %v2048_v18 = vmax.f32 %v6345_v37, %v1889_v36  ;;  %v6364_v37 = vld [vmem:[#allocation49_spill] sm:$0xff] }
 0x1b2   :  { %v2888_v19 = vmax.f32 %v2824_v53, 0.0  ;;  %v2755_v13 = vmax.f32 %v2049_v15, %v4084_v25  ;;  %v6361_v25 = vld [vmem:[#allocation47_spill] sm:$0xff]  ;;  %v6362_v53 = vld [vmem:[#allocation48_spill] sm:$0xff] }
 0x1b3   :  { %v2887_v54 = vmax.f32 %v2823_v56, 0.0  ;;  %v2754_v44 = vmax.f32 %v2048_v18, %v2595_v55  ;;  %v3983_v21 = vpop.f32.mrb[106].mxu0  ;;  %v6363_v10 = vmax.f32 %v6361_v25, %v6362_v53  ;;  %v6365_v18 = vld [vmem:[#allocation50_spill] sm:$0xff] }
 0x1b4   :  { %v4087_v48 = vpop.f32.mrb[106].mxu1  ;;  %2952 = vst.msk [vmem:[%s6110_s3 + $0x138] sm:$0xff] %vm82_vm0, %v2888_v19  ;;  %v2826_v49 = vadd.f32 %v5599_v23, %v2755_v13  ;;  %v2051_v5 = vmax.f32 %v6348_v39, %v3983_v21  ;;  %v1899_v6 = vpop.f32.mrb[107].mxu0  ;;  %v6366_v19 = vmax.f32 %v6364_v37, %v6365_v18 }
 0x1b5   :  { %v2605_v42 = vpop.f32.mrb[107].mxu1  ;;  %2951 = vst.msk [vmem:[%s6110_s3 + $0x130] sm:$0xff] %vm82_vm0, %v2887_v54  ;;  %v2825_v62 = vadd.f32 %v5599_v23, %v2754_v44  ;;  %v2050_v28 = vmax.f32 %v6351_v43, %v1899_v6  ;;  %v6370_v43 = vld [vmem:[#allocation53_spill] sm:$0xff] }
 0x1b6   :  { %v2890_v29 = vmax.f32 %v2826_v49, 0.0  ;;  %v2757_v16 = vmax.f32 %v2051_v5, %v4087_v48  ;;  %v6367_v48 = vld [vmem:[#allocation51_spill] sm:$0xff]  ;;  %v6368_v49 = vld [vmem:[#allocation52_spill] sm:$0xff] }
 0x1b7   :  { %v2889_v26 = vmax.f32 %v2825_v62, 0.0  ;;  %v2756_v3 = vmax.f32 %v2050_v28, %v2605_v42  ;;  %v3986_v1 = vpop.f32.mrb[108].mxu0  ;;  %v6369_v22 = vmax.f32 %v6367_v48, %v6368_v49  ;;  %v6371_v28 = vld [vmem:[#allocation54_spill] sm:$0xff] }
 0x1b8   :  { %v4090_v2 = vpop.f32.mrb[108].mxu1  ;;  %2954 = vst.msk [vmem:[%s6110_s3 + $0x148] sm:$0xff] %vm82_vm0, %v2890_v29  ;;  %v2828_v7 = vadd.f32 %v5599_v23, %v2757_v16  ;;  %v2053_v45 = vmax.f32 %v6354_v38, %v3986_v1  ;;  %v1909_v46 = vpop.f32.mrb[109].mxu0  ;;  %v6372_v29 = vmax.f32 %v6370_v43, %v6371_v28 }
 0x1b9   :  { %v2615_v57 = vpop.f32.mrb[109].mxu1  ;;  %2953 = vst.msk [vmem:[%s6110_s3 + $0x140] sm:$0xff] %vm82_vm0, %v2889_v26  ;;  %v2827_v0 = vadd.f32 %v5599_v23, %v2756_v3  ;;  %v2052_v32 = vmax.f32 %v6357_v61, %v1909_v46  ;;  %v6376_v61 = vld [vmem:[#allocation57_spill] sm:$0xff] }
 0x1ba   :  { %v2892_v4 = vmax.f32 %v2828_v7, 0.0  ;;  %v2759_v50 = vmax.f32 %v2053_v45, %v4090_v2  ;;  %v6373_v2 = vld [vmem:[#allocation55_spill] sm:$0xff]  ;;  %v6374_v7 = vld [vmem:[#allocation56_spill] sm:$0xff] }
 0x1bb   :  { %v2891_v51 = vmax.f32 %v2827_v0, 0.0  ;;  %v2758_v30 = vmax.f32 %v2052_v32, %v2615_v57  ;;  %v3989_v27 = vpop.f32.mrb[110].mxu0  ;;  %v6375_v40 = vmax.f32 %v6373_v2, %v6374_v7  ;;  %v6377_v32 = vld [vmem:[#allocation58_spill] sm:$0xff] }
 0x1bc   :  { %v4093_v8 = vpop.f32.mrb[110].mxu1  ;;  %2956 = vst.msk [vmem:[%s6110_s3 + $0x158] sm:$0xff] %vm82_vm0, %v2892_v4  ;;  %v2830_v9 = vadd.f32 %v5599_v23, %v2759_v50  ;;  %v2055_v47 = vmax.f32 %v6360_v60, %v3989_v27  ;;  %v1919_v52 = vpop.f32.mrb[111].mxu0  ;;  %v6378_v4 = vmax.f32 %v6376_v61, %v6377_v32 }
 0x1bd   :  { %v2625_v11 = vpop.f32.mrb[111].mxu1  ;;  %2955 = vst.msk [vmem:[%s6110_s3 + $0x150] sm:$0xff] %vm82_vm0, %v2891_v51  ;;  %v2829_v12 = vadd.f32 %v5599_v23, %v2758_v30  ;;  %v2054_v35 = vmax.f32 %v6363_v10, %v1919_v52  ;;  %v6382_v10 = vld [vmem:[#allocation61_spill] sm:$0xff] }
 0x1be   :  { %v2894_v14 = vmax.f32 %v2830_v9, 0.0  ;;  %v2761_v15 = vmax.f32 %v2055_v47, %v4093_v8  ;;  %v6379_v8 = vld [vmem:[#allocation59_spill] sm:$0xff]  ;;  %v6380_v9 = vld [vmem:[#allocation60_spill] sm:$0xff] }
 0x1bf   :  { %v2893_v36 = vmax.f32 %v2829_v12, 0.0  ;;  %v2760_v55 = vmax.f32 %v2054_v35, %v2625_v11  ;;  %v3992_v56 = vpop.f32.mrb[112].mxu0  ;;  %v6381_v33 = vmax.f32 %v6379_v8, %v6380_v9  ;;  %v6383_v35 = vld [vmem:[#allocation62_spill] sm:$0xff] }
 0x1c0   :  { %v4096_v17 = vpop.f32.mrb[112].mxu1  ;;  %2958 = vst.msk [vmem:[%s6110_s3 + $0x168] sm:$0xff] %vm82_vm0, %v2894_v14  ;;  %v2832_v24 = vadd.f32 %v5599_v23, %v2761_v15  ;;  %v2057_v13 = vmax.f32 %v6366_v19, %v3992_v56  ;;  %v1929_v54 = vpop.f32.mrb[113].mxu0  ;;  %v6384_v14 = vmax.f32 %v6382_v10, %v6383_v35 }
 0x1c1   :  { %v2635_v44 = vpop.f32.mrb[113].mxu1  ;;  %2957 = vst.msk [vmem:[%s6110_s3 + $0x160] sm:$0xff] %vm82_vm0, %v2893_v36  ;;  %v2831_v21 = vadd.f32 %v5599_v23, %v2760_v55  ;;  %v2056_v20 = vmax.f32 %v6369_v22, %v1929_v54  ;;  %v6388_v22 = vld [vmem:[#allocation65_spill] sm:$0xff] }
 0x1c2   :  { %v2896_v39 = vmax.f32 %v2832_v24, 0.0  ;;  %v2763_v5 = vmax.f32 %v2057_v13, %v4096_v17  ;;  %v6385_v17 = vld [vmem:[#allocation63_spill] sm:$0xff]  ;;  %v6386_v24 = vld [vmem:[#allocation64_spill] sm:$0xff] }
 0x1c3   :  { %v2895_v6 = vmax.f32 %v2831_v21, 0.0  ;;  %v2762_v42 = vmax.f32 %v2056_v20, %v2635_v44  ;;  %v3995_v62 = vpop.f32.mrb[114].mxu0  ;;  %v6387_v37 = vmax.f32 %v6385_v17, %v6386_v24  ;;  %v6389_v20 = vld [vmem:[#allocation66_spill] sm:$0xff] }
 0x1c4   :  { %v4099_v63 = vpop.f32.mrb[114].mxu1  ;;  %2960 = vst.msk [vmem:[%s6110_s3 + $0x178] sm:$0xff] %vm82_vm0, %v2896_v39  ;;  %v2834_v34 = vadd.f32 %v5599_v23, %v2763_v5  ;;  %v2059_v16 = vmax.f32 %v6372_v29, %v3995_v62  ;;  %v1939_v26 = vpop.f32.mrb[115].mxu0  ;;  %v6390_v39 = vmax.f32 %v6388_v22, %v6389_v20 }
 0x1c5   :  { %v2645_v3 = vpop.f32.mrb[115].mxu1  ;;  %2959 = vst.msk [vmem:[%s6110_s3 + $0x170] sm:$0xff] %vm82_vm0, %v2895_v6  ;;  %v2833_v1 = vadd.f32 %v5599_v23, %v2762_v42  ;;  %v2058_v31 = vmax.f32 %v6375_v40, %v1939_v26  ;;  %v6394_v40 = vld [vmem:[#allocation69_spill] sm:$0xff] }
 0x1c6   :  { %v2898_v38 = vmax.f32 %v2834_v34, 0.0  ;;  %v2765_v45 = vmax.f32 %v2059_v16, %v4099_v63  ;;  %v6391_v63 = vld [vmem:[#allocation67_spill] sm:$0xff]  ;;  %v6392_v34 = vld [vmem:[#allocation68_spill] sm:$0xff] }
 0x1c7   :  { %v2897_v46 = vmax.f32 %v2833_v1, 0.0  ;;  %v2764_v57 = vmax.f32 %v2058_v31, %v2645_v3  ;;  %v3998_v0 = vpop.f32.mrb[116].mxu0  ;;  %v6393_v43 = vmax.f32 %v6391_v63, %v6392_v34  ;;  %v6395_v31 = vld [vmem:[#allocation70_spill] sm:$0xff] }
 0x1c8   :  { %v4102_v41 = vpop.f32.mrb[116].mxu1  ;;  %2962 = vst.msk [vmem:[%s6110_s3 + $0x188] sm:$0xff] %vm82_vm0, %v2898_v38  ;;  %v2836_v58 = vadd.f32 %v5599_v23, %v2765_v45  ;;  %v2061_v50 = vmax.f32 %v6378_v4, %v3998_v0  ;;  %v1949_v51 = vpop.f32.mrb[117].mxu0  ;;  %v6396_v38 = vmax.f32 %v6394_v40, %v6395_v31 }
 0x1c9   :  { %v2655_v30 = vpop.f32.mrb[117].mxu1  ;;  %2961 = vst.msk [vmem:[%s6110_s3 + $0x180] sm:$0xff] %vm82_vm0, %v2897_v46  ;;  %v2835_v27 = vadd.f32 %v5599_v23, %v2764_v57  ;;  %v2060_v59 = vmax.f32 %v6381_v33, %v1949_v51  ;;  %v6400_v33 = vld [vmem:[#allocation73_spill] sm:$0xff] }
 0x1ca   :  { %v2900_v60 = vmax.f32 %v2836_v58, 0.0  ;;  %v2767_v47 = vmax.f32 %v2061_v50, %v4102_v41  ;;  %v6397_v41 = vld [vmem:[#allocation71_spill] sm:$0xff]  ;;  %v6398_v58 = vld [vmem:[#allocation72_spill] sm:$0xff] }
 0x1cb   :  { %v2899_v52 = vmax.f32 %v2835_v27, 0.0  ;;  %v2766_v11 = vmax.f32 %v2060_v59, %v2655_v30  ;;  %v4001_v12 = vpop.f32.mrb[118].mxu0  ;;  %v6399_v61 = vmax.f32 %v6397_v41, %v6398_v58  ;;  %v6401_v59 = vld [vmem:[#allocation74_spill] sm:$0xff] }
 0x1cc   :  { %v4105_v25 = vpop.f32.mrb[118].mxu1  ;;  %2964 = vst.msk [vmem:[%s6110_s3 + $0x198] sm:$0xff] %vm82_vm0, %v2900_v60  ;;  %v2838_v53 = vadd.f32 %v5599_v23, %v2767_v47  ;;  %v2063_v15 = vmax.f32 %v6384_v14, %v4001_v12  ;;  %v1959_v36 = vpop.f32.mrb[119].mxu0  ;;  %v6402_v60 = vmax.f32 %v6400_v33, %v6401_v59 }
 0x1cd   :  { %v2665_v55 = vpop.f32.mrb[119].mxu1  ;;  %2963 = vst.msk [vmem:[%s6110_s3 + $0x190] sm:$0xff] %vm82_vm0, %v2899_v52  ;;  %v2837_v56 = vadd.f32 %v5599_v23, %v2766_v11  ;;  %v2062_v18 = vmax.f32 %v6387_v37, %v1959_v36  ;;  %v6406_v37 = vld [vmem:[#allocation77_spill] sm:$0xff] }
 0x1ce   :  { %v2902_v19 = vmax.f32 %v2838_v53, 0.0  ;;  %v2769_v13 = vmax.f32 %v2063_v15, %v4105_v25  ;;  %v6403_v25 = vld [vmem:[#allocation75_spill] sm:$0xff]  ;;  %v6404_v53 = vld [vmem:[#allocation76_spill] sm:$0xff] }
 0x1cf   :  { %v2901_v54 = vmax.f32 %v2837_v56, 0.0  ;;  %v2768_v44 = vmax.f32 %v2062_v18, %v2665_v55  ;;  %v4004_v21 = vpop.f32.mrb[120].mxu0  ;;  %v6405_v10 = vmax.f32 %v6403_v25, %v6404_v53  ;;  %v6407_v18 = vld [vmem:[#allocation78_spill] sm:$0xff] }
 0x1d0   :  { %v4108_v48 = vpop.f32.mrb[120].mxu1  ;;  %2966 = vst.msk [vmem:[%s6110_s3 + $0x1a8] sm:$0xff] %vm82_vm0, %v2902_v19  ;;  %v2840_v49 = vadd.f32 %v5599_v23, %v2769_v13  ;;  %v2065_v5 = vmax.f32 %v6390_v39, %v4004_v21  ;;  %v1969_v6 = vpop.f32.mrb[121].mxu0  ;;  %v6408_v19 = vmax.f32 %v6406_v37, %v6407_v18 }
 0x1d1   :  { %v2675_v42 = vpop.f32.mrb[121].mxu1  ;;  %2965 = vst.msk [vmem:[%s6110_s3 + $0x1a0] sm:$0xff] %vm82_vm0, %v2901_v54  ;;  %v2839_v62 = vadd.f32 %v5599_v23, %v2768_v44  ;;  %v2064_v28 = vmax.f32 %v6393_v43, %v1969_v6 }
 0x1d2   :  { %v2904_v29 = vmax.f32 %v2840_v49, 0.0  ;;  %v2771_v16 = vmax.f32 %v2065_v5, %v4108_v48  ;;  %v6409_v48 = vld [vmem:[#allocation79_spill] sm:$0xff]  ;;  %v6410_v49 = vld [vmem:[#allocation80_spill] sm:$0xff] }
 0x1d3   :  { %v2903_v26 = vmax.f32 %v2839_v62, 0.0  ;;  %v2770_v3 = vmax.f32 %v2064_v28, %v2675_v42  ;;  %v4007_v1 = vpop.f32.mrb[122].mxu0  ;;  %v6411_v22 = vmax.f32 %v6409_v48, %v6410_v49 }
 0x1d4   :  { %v4111_v2 = vpop.f32.mrb[122].mxu1  ;;  %2968 = vst.msk [vmem:[%s6110_s3 + $0x1b8] sm:$0xff] %vm82_vm0, %v2904_v29  ;;  %v2842_v7 = vadd.f32 %v5599_v23, %v2771_v16  ;;  %v2067_v45 = vmax.f32 %v6396_v38, %v4007_v1  ;;  %v1979_v46 = vpop.f32.mrb[123].mxu0 }
 0x1d5   :  { %v2685_v57 = vpop.f32.mrb[123].mxu1  ;;  %2967 = vst.msk [vmem:[%s6110_s3 + $0x1b0] sm:$0xff] %vm82_vm0, %v2903_v26  ;;  %v2841_v0 = vadd.f32 %v5599_v23, %v2770_v3  ;;  %v2066_v32 = vmax.f32 %v6399_v61, %v1979_v46 }
 0x1d6   :  { %v2906_v4 = vmax.f32 %v2842_v7, 0.0  ;;  %v2773_v50 = vmax.f32 %v2067_v45, %v4111_v2 }
 0x1d7   :  { %v2905_v51 = vmax.f32 %v2841_v0, 0.0  ;;  %v2772_v30 = vmax.f32 %v2066_v32, %v2685_v57  ;;  %v4010_v27 = vpop.f32.mrb[124].mxu0 }
 0x1d8   :  { %v4114_v8 = vpop.f32.mrb[124].mxu1  ;;  %2970 = vst.msk [vmem:[%s6110_s3 + $0x1c8] sm:$0xff] %vm82_vm0, %v2906_v4  ;;  %v2844_v9 = vadd.f32 %v5599_v23, %v2773_v50  ;;  %v2069_v47 = vmax.f32 %v6402_v60, %v4010_v27  ;;  %v1989_v52 = vpop.f32.mrb[125].mxu0 }
 0x1d9   :  { %v2695_v11 = vpop.f32.mrb[125].mxu1  ;;  %2969 = vst.msk [vmem:[%s6110_s3 + $0x1c0] sm:$0xff] %vm82_vm0, %v2905_v51  ;;  %v2843_v12 = vadd.f32 %v5599_v23, %v2772_v30  ;;  %v2068_v35 = vmax.f32 %v6405_v10, %v1989_v52 }
 0x1da   :  { %v2908_v14 = vmax.f32 %v2844_v9, 0.0  ;;  %v2775_v15 = vmax.f32 %v2069_v47, %v4114_v8 }
 0x1db   :  { %v2907_v36 = vmax.f32 %v2843_v12, 0.0  ;;  %v2774_v55 = vmax.f32 %v2068_v35, %v2695_v11  ;;  %v4013_v56 = vpop.f32.mrb[126].mxu0 }
 0x1dc   :  { %v4117_v17 = vpop.f32.mrb[126].mxu1  ;;  %2972 = vst.msk [vmem:[%s6110_s3 + $0x1d8] sm:$0xff] %vm82_vm0, %v2908_v14  ;;  %v2846_v24 = vadd.f32 %v5599_v23, %v2775_v15  ;;  %v2071_v13 = vmax.f32 %v6408_v19, %v4013_v56  ;;  %v1999_v54 = vpop.f32.mrb[127].mxu0 }
 0x1dd   :  { %v2705_v44 = vpop.f32.mrb[127].mxu1  ;;  %2971 = vst.msk [vmem:[%s6110_s3 + $0x1d0] sm:$0xff] %vm82_vm0, %v2907_v36  ;;  %v2845_v21 = vadd.f32 %v5599_v23, %v2774_v55  ;;  %v2070_v20 = vmax.f32 %v6411_v22, %v1999_v54 }
 0x1de   :  { %v2910_v39 = vmax.f32 %v2846_v24, 0.0  ;;  %v2777_v5 = vmax.f32 %v2071_v13, %v4117_v17 }
 0x1df   :  { %v2909_v6 = vmax.f32 %v2845_v21, 0.0  ;;  %v2776_v42 = vmax.f32 %v2070_v20, %v2705_v44 }
 0x1e0   :  { %2974 = vst.msk [vmem:[%s6110_s3 + $0x1e8] sm:$0xff] %vm82_vm0, %v2910_v39  ;;  %v2848_v62 = vadd.f32 %v5599_v23, %v2777_v5 }
 0x1e1   :  { %2973 = vst.msk [vmem:[%s6110_s3 + $0x1e0] sm:$0xff] %vm82_vm0, %v2909_v6  ;;  %v2847_v63 = vadd.f32 %v5599_v23, %v2776_v42 }
 0x1e2   :  { %v2912_v34 = vmax.f32 %v2848_v62, 0.0 }
 0x1e3   :  { %v2911_v43 = vmax.f32 %v2847_v63, 0.0 }
 0x1e4   :  { %2976 = vst.msk [vmem:[%s6110_s3 + $0x1f8] sm:$0xff] %vm82_vm0, %v2912_v34 }
 0x1e5   :  { %2975 = vst.msk [vmem:[%s6110_s3 + $0x1f0] sm:$0xff] %vm82_vm0, %v2911_v43 }

// kernel: test_cnn_forward.5
= control target key start
LH: loop header
LB: loop body
LE: loop exit
PB: predicated region body
PF: predicated region fallthrough
CT: control target
= control target key end

     0   :  { %vm98_vm0 = vcmask 261120   ;;  %vm1685_vm1 = vcmask 523264   ;;  %s3865_s1 = inlined_call_operand.vmem [shape: f32[288,64], index: 1, kind: input, shape index: {}]   ;;  %s3866_s0 = inlined_call_operand.vmem [shape: f32[4,128,288], index: 0, kind: input, shape index: {}]   ;;  %s3867_s2 = inlined_call_operand.vmem [shape: f32[1,64], index: 2, kind: input, shape index: {}]   ;;  %s3868_s3 = inlined_call_operand.vmem [shape: f32[128,64], index: 3, kind: output, shape index: {}]  }
   0x1   :  { %v30_v0 = vld [vmem:[%s3865_s1 + $0x80] sm:$0xff]  ;;  %v31_v1 = vld [vmem:[%s3865_s1 + $0x88] sm:$0xff]  ;;  %v32_v9 = vld [vmem:[%s3865_s1 + $0x90] sm:$0xff] }
   0x2   :  { %v46_v2 = vld [vmem:[%s3865_s1 + $0x100] sm:$0xff]  ;;  %v2648_v3 = vpack.c.bf16 %v31_v1, %v30_v0  ;;  %v47_v4 = vld [vmem:[%s3865_s1 + $0x108] sm:$0xff]  ;;  %v33_v10 = vld [vmem:[%s3865_s1 + $0x98] sm:$0xff] }
   0x3   :  { %v14_v5 = vld [vmem:[%s3865_s1] sm:$0xff]  ;;  %v15_v6 = vld [vmem:[%s3865_s1 + $0x8] sm:$0xff]  ;;  %v2659_v7 = vpack.c.bf16 %v47_v4, %v46_v2  ;;  %v48_v11 = vld [vmem:[%s3865_s1 + $0x110] sm:$0xff]  ;;  %v2673_v12 = vpack.c.bf16 %v33_v10, %v32_v9 }
   0x4   :  { %v2661_v8 = vpack.c.bf16 %v15_v6, %v14_v5  ;;  %2444 = vmatprep.subr.bf16.mxu0 %v2648_v3  ;;  %v49_v13 = vld [vmem:[%s3865_s1 + $0x118] sm:$0xff]  ;;  %v16_v14 = vld [vmem:[%s3865_s1 + $0x10] sm:$0xff]  ;;  %v34_v19 = vld [vmem:[%s3865_s1 + $0xa0] sm:$0xff] }
   0x5   :  { %v17_v15 = vld [vmem:[%s3865_s1 + $0x18] sm:$0xff]  ;;  %2476 = vmatprep.subr.bf16.mxu1 %v2659_v7  ;;  %v2686_v16 = vpack.c.bf16 %v49_v13, %v48_v11  ;;  %v52_v18 = vld [vmem:[%s3866_s0 + $0x10] sm:$0xff]  ;;  %v35_v20 = vld [vmem:[%s3865_s1 + $0xa8] sm:$0xff] }
   0x6   :  { %2446 = vmatpush3.bf16.msra.mxu0 %v2661_v8  ;;  %v2688_v17 = vpack.c.bf16 %v17_v15, %v16_v14  ;;  %2478 = vmatpush3.bf16.msra.mxu1 %v2659_v7  ;;  %v2701_v21 = vpack.c.bf16 %v35_v20, %v34_v19  ;;  %v18_v22 = vld [vmem:[%s3865_s1 + $0x20] sm:$0xff]  ;;  %v19_v23 = vld [vmem:[%s3865_s1 + $0x28] sm:$0xff]  ;;  %v36_v24 = vld [vmem:[%s3865_s1 + $0xb0] sm:$0xff] }
   0x7   :  { %2448 = vmatprep.subr.bf16.mxu0 %v2673_v12  ;;  %2480 = vmatprep.subr.bf16.mxu1 %v2686_v16  ;;  %v37_v25 = vld [vmem:[%s3865_s1 + $0xb8] sm:$0xff]  ;;  %v2718_v26 = vpack.c.bf16 %v19_v23, %v18_v22  ;;  %v55_v27 = vld [vmem:[%s3866_s0 + $0x28] sm:$0xff]  ;;  %v20_v28 = vld [vmem:[%s3865_s1 + $0x30] sm:$0xff] }
   0x8   :  { %2323 = vmatprep.mubr.msk.f32.mxu1 %vm98_vm0, %v52_v18  ;;  %v21_v29 = vld [vmem:[%s3865_s1 + $0x38] sm:$0xff]  ;;  %v58_v30 = vld [vmem:[%s3866_s0 + $0x40] sm:$0xff]  ;;  %v2735_v31 = vpack.c.bf16 %v37_v25, %v36_v24  ;;  %v39_v33 = vld [vmem:[%s3865_s1 + $0xc8] sm:$0xff] }
   0x9   :  { %v38_v32 = vld [vmem:[%s3865_s1 + $0xc0] sm:$0xff]  ;;  %v2745_v34 = vpack.c.bf16 %v21_v29, %v20_v28  ;;  %v61_v35 = vld [vmem:[%s3866_s0 + $0x58] sm:$0xff]  ;;  %v23_v37 = vld [vmem:[%s3865_s1 + $0x48] sm:$0xff] }
   0xa   :  { %2450 = vmatpush3.bf16.msra.mxu0 %v2688_v17  ;;  %2482 = vmatpush3.bf16.msra.mxu1 %v2686_v16  ;;  %v22_v36 = vld [vmem:[%s3865_s1 + $0x40] sm:$0xff]  ;;  %v64_v38 = vld [vmem:[%s3866_s0 + $0x70] sm:$0xff]  ;;  %v2763_v39 = vpack.c.bf16 %v39_v33, %v38_v32  ;;  %v41_v41 = vld [vmem:[%s3865_s1 + $0xd8] sm:$0xff] }
   0xb   :  { %2452 = vmatprep.subr.bf16.mxu0 %v2701_v21  ;;  %2484 = vmatprep.subr.bf16.mxu1 %v2648_v3  ;;  %v40_v40 = vld [vmem:[%s3865_s1 + $0xd0] sm:$0xff]  ;;  %v2773_v42 = vpack.c.bf16 %v23_v37, %v22_v36  ;;  %v51_v43 = vld [vmem:[%s3866_s0 + $0x8] sm:$0xff]  ;;  %v25_v46 = vld [vmem:[%s3865_s1 + $0x58] sm:$0xff] }
   0xc   :  { %v67_v44 = vld [vmem:[%s3866_s0 + $0x88] sm:$0xff]  ;;  %v24_v45 = vld [vmem:[%s3865_s1 + $0x50] sm:$0xff]  ;;  %v70_v47 = vld [vmem:[%s3866_s0 + $0xa0] sm:$0xff]  ;;  %v2794_v48 = vpack.c.bf16 %v41_v41, %v40_v40  ;;  %211 = vmatprep.mubr.f32.mxu0 %v51_v43 }
   0xd   :  { %2324 = vmatmul.mubr.msk.f32.vlgmr.msra.gmra.mrb[0].mxu1 %vm98_vm0, %v55_v27  ;;  %v42_v49 = vld [vmem:[%s3865_s1 + $0xe0] sm:$0xff]  ;;  %v43_v50 = vld [vmem:[%s3865_s1 + $0xe8] sm:$0xff]  ;;  %v2804_v51 = vpack.c.bf16 %v25_v46, %v24_v45  ;;  %v73_v52 = vld [vmem:[%s3866_s0 + $0xb8] sm:$0xff] }
   0xe   :  { %2454 = vmatpush3.bf16.msra.mxu0 %v2718_v26  ;;  %2486 = vmatpush3.bf16.msra.mxu1 %v2661_v8  ;;  %v26_v53 = vld [vmem:[%s3865_s1 + $0x60] sm:$0xff]  ;;  %v27_v54 = vld [vmem:[%s3865_s1 + $0x68] sm:$0xff]  ;;  %v76_v55 = vld [vmem:[%s3866_s0 + $0xd0] sm:$0xff]  ;;  %v2822_v56 = vpack.c.bf16 %v43_v50, %v42_v49 }
   0xf   :  { %2326 = vmatprep.mubr.msk.f32.mxu1 %vm98_vm0, %v58_v30  ;;  %2456 = vmatprep.subr.bf16.mxu0 %v2735_v31  ;;  %v44_v57 = vld [vmem:[%s3865_s1 + $0xf0] sm:$0xff]  ;;  %v45_v58 = vld [vmem:[%s3865_s1 + $0xf8] sm:$0xff]  ;;  %v2832_v59 = vpack.c.bf16 %v27_v54, %v26_v53  ;;  %v79_v60 = vld [vmem:[%s3866_s0 + $0xe8] sm:$0xff] }
  0x10   :  { %2488 = vmatprep.subr.bf16.mxu1 %v2673_v12  ;;  %v28_v61 = vld [vmem:[%s3865_s1 + $0x70] sm:$0xff]  ;;  %v29_v62 = vld [vmem:[%s3865_s1 + $0x78] sm:$0xff]  ;;  %v82_v63 = vld [vmem:[%s3866_s0 + $0x100] sm:$0xff]  ;;  %v2850_v0 = vpack.c.bf16 %v45_v58, %v44_v57 }
  0x11   :  { %2327 = vmatmul.mubr.msk.f32.gmra.mrb[2].mxu1 %vm98_vm0, %v61_v35  ;;  %v2854_v1 = vpack.c.bf16 %v29_v62, %v28_v61  ;;  %v85_v2 = vld [vmem:[%s3866_s0 + $0x118] sm:$0xff]  ;;  %v88_v4 = vld [vmem:[%s3866_s0 + $0x130] sm:$0xff]  ;;  %v50_v5 = vld [vmem:[%s3866_s0] sm:$0xff] }
  0x12   :  { %2458 = vmatpush3.bf16.msra.mxu0 %v2745_v34  ;;  %2490 = vmatpush3.bf16.msra.mxu1 %v2688_v17  ;;  %v91_v6 = vld [vmem:[%s3866_s0 + $0x148] sm:$0xff]  ;;  %v54_v9 = vld [vmem:[%s3866_s0 + $0x20] sm:$0xff]  ;;  %v53_v11 = vld [vmem:[%s3866_s0 + $0x18] sm:$0xff] }
  0x13   :  { %2329 = vmatprep.mubr.msk.f32.mxu1 %vm98_vm0, %v64_v38  ;;  %2460 = vmatprep.subr.bf16.mxu0 %v2763_v39  ;;  %v94_v10 = vld [vmem:[%s3866_s0 + $0x160] sm:$0xff]  ;;  %v97_v13 = vld [vmem:[%s3866_s0 + $0x178] sm:$0xff]  ;;  %v1723_v15 = vld [vmem:[%s3866_s0 + $0x188] sm:$0xff] }
  0x14   :  { %2492 = vmatprep.subr.bf16.mxu1 %v2701_v21  ;;  %v57_v14 = vld [vmem:[%s3866_s0 + $0x38] sm:$0xff]  ;;  %v56_v18 = vld [vmem:[%s3866_s0 + $0x30] sm:$0xff]  ;;  %v1722_v19 = vld [vmem:[%s3866_s0 + $0x180] sm:$0xff] }
  0x15   :  { %2330 = vmatmul.mubr.msk.f32.gmra.mrb[4].mxu1 %vm98_vm0, %v67_v44  ;;  %v60_v20 = vld [vmem:[%s3866_s0 + $0x50] sm:$0xff]  ;;  %v1726_v22 = vld [vmem:[%s3866_s0 + $0x1a0] sm:$0xff]  ;;  %v59_v23 = vld [vmem:[%s3866_s0 + $0x48] sm:$0xff] }
  0x16   :  { %2462 = vmatpush3.bf16.msra.mxu0 %v2773_v42  ;;  %2494 = vmatpush3.bf16.msra.mxu1 %v2718_v26  ;;  %v1725_v24 = vld [vmem:[%s3866_s0 + $0x198] sm:$0xff]  ;;  %v63_v25 = vld [vmem:[%s3866_s0 + $0x68] sm:$0xff]  ;;  %v62_v28 = vld [vmem:[%s3866_s0 + $0x60] sm:$0xff] }
  0x17   :  { %2332 = vmatprep.mubr.msk.f32.mxu1 %vm98_vm0, %v70_v47  ;;  %2464 = vmatprep.subr.bf16.mxu0 %v2794_v48  ;;  %v1729_v27 = vld [vmem:[%s3866_s0 + $0x1b8] sm:$0xff]  ;;  %v1728_v29 = vld [vmem:[%s3866_s0 + $0x1b0] sm:$0xff]  ;;  %v66_v30 = vld [vmem:[%s3866_s0 + $0x80] sm:$0xff] }
  0x18   :  { %2496 = vmatprep.subr.bf16.mxu1 %v2735_v31  ;;  %v1732_v32 = vld [vmem:[%s3866_s0 + $0x1d0] sm:$0xff]  ;;  %v65_v33 = vld [vmem:[%s3866_s0 + $0x78] sm:$0xff]  ;;  %v1731_v35 = vld [vmem:[%s3866_s0 + $0x1c8] sm:$0xff] }
  0x19   :  { %2333 = vmatmul.mubr.msk.f32.gmra.mrb[6].mxu1 %vm98_vm0, %v73_v52  ;;  %v69_v36 = vld [vmem:[%s3866_s0 + $0x98] sm:$0xff]  ;;  %v1735_v37 = vld [vmem:[%s3866_s0 + $0x1e8] sm:$0xff]  ;;  %v68_v38 = vld [vmem:[%s3866_s0 + $0x90] sm:$0xff] }
  0x1a   :  { %2466 = vmatpush3.bf16.msra.mxu0 %v2804_v51  ;;  %2498 = vmatpush3.bf16.msra.mxu1 %v2745_v34  ;;  %v1734_v40 = vld [vmem:[%s3866_s0 + $0x1e0] sm:$0xff]  ;;  %v72_v41 = vld [vmem:[%s3866_s0 + $0xb0] sm:$0xff]  ;;  %v71_v44 = vld [vmem:[%s3866_s0 + $0xa8] sm:$0xff] }
  0x1b   :  { %2335 = vmatprep.mubr.msk.f32.mxu1 %vm98_vm0, %v76_v55  ;;  %2468 = vmatprep.subr.bf16.mxu0 %v2822_v56  ;;  %v1738_v43 = vld [vmem:[%s3866_s0 + $0x200] sm:$0xff]  ;;  %v1737_v45 = vld [vmem:[%s3866_s0 + $0x1f8] sm:$0xff]  ;;  %v75_v46 = vld [vmem:[%s3866_s0 + $0xc8] sm:$0xff] }
  0x1c   :  { %2500 = vmatprep.subr.bf16.mxu1 %v2763_v39  ;;  %v1741_v47 = vld [vmem:[%s3866_s0 + $0x218] sm:$0xff]  ;;  %v74_v49 = vld [vmem:[%s3866_s0 + $0xc0] sm:$0xff]  ;;  %v1740_v50 = vld [vmem:[%s3866_s0 + $0x210] sm:$0xff] }
  0x1d   :  { %2336 = vmatmul.mubr.msk.f32.gmra.mrb[8].mxu1 %vm98_vm0, %v79_v60  ;;  %v78_v52 = vld [vmem:[%s3866_s0 + $0xe0] sm:$0xff]  ;;  %v1744_v53 = vld [vmem:[%s3866_s0 + $0x230] sm:$0xff]  ;;  %v77_v54 = vld [vmem:[%s3866_s0 + $0xd8] sm:$0xff] }
  0x1e   :  { %2470 = vmatpush3.bf16.msra.mxu0 %v2832_v59  ;;  %2502 = vmatpush3.bf16.msra.mxu1 %v2773_v42  ;;  %v1743_v55 = vld [vmem:[%s3866_s0 + $0x228] sm:$0xff]  ;;  %v81_v57 = vld [vmem:[%s3866_s0 + $0xf8] sm:$0xff]  ;;  %v80_v60 = vld [vmem:[%s3866_s0 + $0xf0] sm:$0xff] }
  0x1f   :  { %2338 = vmatprep.mubr.msk.f32.mxu1 %vm98_vm0, %v82_v63  ;;  %2472 = vmatprep.subr.bf16.mxu0 %v2850_v0  ;;  %v1747_v58 = vld [vmem:[%s3866_s0 + $0x248] sm:$0xff]  ;;  %v1746_v61 = vld [vmem:[%s3866_s0 + $0x240] sm:$0xff]  ;;  %v84_v62 = vld [vmem:[%s3866_s0 + $0x110] sm:$0xff] }
  0x20   :  { %2504 = vmatprep.subr.bf16.mxu1 %v2794_v48  ;;  %v1750_v63 = vld [vmem:[%s3866_s0 + $0x260] sm:$0xff] }
  0x21   :  { %2339 = vmatmul.mubr.msk.f32.gmra.mrb[10].mxu1 %vm98_vm0, %v85_v2  ;;  %v83_v2 = vld [vmem:[%s3866_s0 + $0x108] sm:$0xff] }
  0x22   :  { %2474 = vmatpush3.bf16.msra.mxu0 %v2854_v1  ;;  %2506 = vmatpush3.bf16.msra.mxu1 %v2804_v51 }
  0x23   :  { %2341 = vmatprep.mubr.msk.f32.mxu1 %vm98_vm0, %v88_v4  ;;  %2508 = vmatprep.subr.bf16.mxu1 %v2822_v56  ;;  %v1749_v4 = vld [vmem:[%s3866_s0 + $0x258] sm:$0xff] }
  0x24   :  { %2516 = vmatprep.subr.bf16.mxu0 %v2659_v7 }
  0x25   :  { %212 = vmatmul.mubr.f32.vlgmr.msra.gmra.mrb[0].mxu0 %v50_v5  ;;  %2342 = vmatmul.mubr.msk.f32.gmra.mrb[12].mxu1 %vm98_vm0, %v91_v6  ;;  %v87_v5 = vld [vmem:[%s3866_s0 + $0x128] sm:$0xff]  ;;  %v1753_v6 = vld [vmem:[%s3866_s0 + $0x278] sm:$0xff] }
  0x26   :  { %2518 = vmatpush3.bf16.msra.mxu0 %v2659_v7  ;;  %2510 = vmatpush3.bf16.msra.mxu1 %v2832_v59 }
  0x27   :  { %216 = vmatprep.mubr.f32.mxu0 %v54_v9  ;;  %2344 = vmatprep.mubr.msk.f32.mxu1 %vm98_vm0, %v94_v10  ;;  %v86_v9 = vld [vmem:[%s3866_s0 + $0x120] sm:$0xff]  ;;  %v1752_v10 = vld [vmem:[%s3866_s0 + $0x270] sm:$0xff] }
  0x28   :  { %2512 = vmatprep.subr.bf16.mxu1 %v2850_v0  ;;  %2520 = vmatprep.subr.bf16.mxu0 %v2686_v16 }
  0x29   :  { %217 = vmatmul.mubr.f32.gmra.mrb[2].mxu0 %v53_v11  ;;  %2345 = vmatmul.mubr.msk.f32.gmra.mrb[14].mxu1 %vm98_vm0, %v97_v13  ;;  %v90_v11 = vld [vmem:[%s3866_s0 + $0x140] sm:$0xff]  ;;  %v1756_v13 = vld [vmem:[%s3866_s0 + $0x290] sm:$0xff] }
  0x2a   :  { %221 = vmatprep.mubr.f32.mxu0 %v57_v14  ;;  %2514 = vmatpush3.bf16.msra.mxu1 %v2854_v1  ;;  %v89_v14 = vld [vmem:[%s3866_s0 + $0x138] sm:$0xff] }
  0x2b   :  { %598 = vmatprep.mubr.f32.mxu1 %v1723_v15  ;;  %2524 = vmatprep.subr.bf16.mxu1 %v2648_v3  ;;  %v1755_v15 = vld [vmem:[%s3866_s0 + $0x288] sm:$0xff] }
  0x2c   :  { %2522 = vmatpush3.bf16.msra.mxu0 %v2686_v16 }
  0x2d   :  { %222 = vmatmul.mubr.f32.gmra.mrb[4].mxu0 %v56_v18  ;;  %2556 = vmatprep.subr.bf16.mxu0 %v2659_v7  ;;  %v93_v18 = vld [vmem:[%s3866_s0 + $0x158] sm:$0xff] }
  0x2e   :  { %599 = vmatmul.mubr.f32.vlgmr.msra.gmra.mrb[16].mxu1 %v1722_v19  ;;  %226 = vmatprep.mubr.f32.mxu0 %v60_v20  ;;  %v1759_v19 = vld [vmem:[%s3866_s0 + $0x2a8] sm:$0xff]  ;;  %v92_v20 = vld [vmem:[%s3866_s0 + $0x150] sm:$0xff] }
  0x2f   :  { %603 = vmatprep.mubr.f32.mxu1 %v1726_v22  ;;  %2526 = vmatpush3.bf16.msra.mxu1 %v2661_v8  ;;  %v1758_v22 = vld [vmem:[%s3866_s0 + $0x2a0] sm:$0xff] }
  0x30   :  { %2528 = vmatprep.subr.bf16.mxu1 %v2673_v12 }
  0x31   :  { %227 = vmatmul.mubr.f32.gmra.mrb[6].mxu0 %v59_v23  ;;  %v96_v23 = vld [vmem:[%s3866_s0 + $0x170] sm:$0xff] }
  0x32   :  { %604 = vmatmul.mubr.f32.gmra.mrb[18].mxu1 %v1725_v24  ;;  %231 = vmatprep.mubr.f32.mxu0 %v63_v25  ;;  %v1762_v24 = vld [vmem:[%s3866_s0 + $0x2c0] sm:$0xff]  ;;  %v95_v25 = vld [vmem:[%s3866_s0 + $0x168] sm:$0xff] }
  0x33   :  { %608 = vmatprep.mubr.f32.mxu1 %v1729_v27  ;;  %2530 = vmatpush3.bf16.msra.mxu1 %v2688_v17  ;;  %v1761_v27 = vld [vmem:[%s3866_s0 + $0x2b8] sm:$0xff] }
  0x34   :  { %2532 = vmatprep.subr.bf16.mxu1 %v2701_v21 }
  0x35   :  { %232 = vmatmul.mubr.f32.gmra.mrb[8].mxu0 %v62_v28  ;;  %v1724_v28 = vld [vmem:[%s3866_s0 + $0x190] sm:$0xff] }
  0x36   :  { %609 = vmatmul.mubr.f32.gmra.mrb[20].mxu1 %v1728_v29  ;;  %236 = vmatprep.mubr.f32.mxu0 %v66_v30  ;;  %v1765_v29 = vld [vmem:[%s3866_s0 + $0x2d8] sm:$0xff]  ;;  %v1727_v30 = vld [vmem:[%s3866_s0 + $0x1a8] sm:$0xff] }
  0x37   :  { %613 = vmatprep.mubr.f32.mxu1 %v1732_v32  ;;  %2534 = vmatpush3.bf16.msra.mxu1 %v2718_v26  ;;  %v1764_v32 = vld [vmem:[%s3866_s0 + $0x2d0] sm:$0xff] }
  0x38   :  { %2536 = vmatprep.subr.bf16.mxu1 %v2735_v31 }
  0x39   :  { %237 = vmatmul.mubr.f32.gmra.mrb[10].mxu0 %v65_v33  ;;  %v1768_v33 = vld [vmem:[%s3866_s0 + $0x2f0] sm:$0xff] }
  0x3a   :  { %614 = vmatmul.mubr.f32.gmra.mrb[22].mxu1 %v1731_v35  ;;  %241 = vmatprep.mubr.f32.mxu0 %v69_v36  ;;  %v1730_v35 = vld [vmem:[%s3866_s0 + $0x1c0] sm:$0xff]  ;;  %v1733_v36 = vld [vmem:[%s3866_s0 + $0x1d8] sm:$0xff] }
  0x3b   :  { %618 = vmatprep.mubr.f32.mxu1 %v1735_v37  ;;  %2538 = vmatpush3.bf16.msra.mxu1 %v2745_v34  ;;  %v1767_v37 = vld [vmem:[%s3866_s0 + $0x2e8] sm:$0xff] }
  0x3c   :  { %2540 = vmatprep.subr.bf16.mxu1 %v2763_v39 }
  0x3d   :  { %242 = vmatmul.mubr.f32.gmra.mrb[12].mxu0 %v68_v38  ;;  %v1736_v38 = vld [vmem:[%s3866_s0 + $0x1f0] sm:$0xff] }
  0x3e   :  { %619 = vmatmul.mubr.f32.gmra.mrb[24].mxu1 %v1734_v40  ;;  %246 = vmatprep.mubr.f32.mxu0 %v72_v41  ;;  %v1787_v40 = vld [vmem:[%s3866_s0 + $0x308] sm:$0xff] }
  0x3f   :  { %623 = vmatprep.mubr.f32.mxu1 %v1738_v43  ;;  %2542 = vmatpush3.bf16.msra.mxu1 %v2773_v42  ;;  %v1739_v41 = vld [vmem:[%s3866_s0 + $0x208] sm:$0xff]  ;;  %v1786_v43 = vld [vmem:[%s3866_s0 + $0x300] sm:$0xff] }
  0x40   :  { %2544 = vmatprep.subr.bf16.mxu1 %v2794_v48 }
  0x41   :  { %247 = vmatmul.mubr.f32.gmra.mrb[14].mxu0 %v71_v44  ;;  %v1742_v44 = vld [vmem:[%s3866_s0 + $0x220] sm:$0xff] }
  0x42   :  { %624 = vmatmul.mubr.f32.gmra.mrb[26].mxu1 %v1737_v45  ;;  %251 = vmatprep.mubr.f32.mxu0 %v75_v46  ;;  %v1790_v45 = vld [vmem:[%s3866_s0 + $0x320] sm:$0xff]  ;;  %v1745_v46 = vld [vmem:[%s3866_s0 + $0x238] sm:$0xff] }
  0x43   :  { %628 = vmatprep.mubr.f32.mxu1 %v1741_v47  ;;  %2546 = vmatpush3.bf16.msra.mxu1 %v2804_v51  ;;  %v1789_v47 = vld [vmem:[%s3866_s0 + $0x318] sm:$0xff] }
  0x44   :  { %2548 = vmatprep.subr.bf16.mxu1 %v2822_v56 }
  0x45   :  { %252 = vmatmul.mubr.f32.gmra.mrb[16].mxu0 %v74_v49  ;;  %v1793_v49 = vld [vmem:[%s3866_s0 + $0x338] sm:$0xff] }
  0x46   :  { %629 = vmatmul.mubr.f32.gmra.mrb[28].mxu1 %v1740_v50  ;;  %256 = vmatprep.mubr.f32.mxu0 %v78_v52  ;;  %v1751_v50 = vld [vmem:[%s3866_s0 + $0x268] sm:$0xff]  ;;  %v1792_v52 = vld [vmem:[%s3866_s0 + $0x330] sm:$0xff] }
  0x47   :  { %633 = vmatprep.mubr.f32.mxu1 %v1744_v53  ;;  %2550 = vmatpush3.bf16.msra.mxu1 %v2832_v59  ;;  %v1754_v53 = vld [vmem:[%s3866_s0 + $0x280] sm:$0xff] }
  0x48   :  { %2552 = vmatprep.subr.bf16.mxu1 %v2850_v0 }
  0x49   :  { %257 = vmatmul.mubr.f32.gmra.mrb[18].mxu0 %v77_v54  ;;  %v1796_v54 = vld [vmem:[%s3866_s0 + $0x350] sm:$0xff] }
  0x4a   :  { %634 = vmatmul.mubr.f32.gmra.mrb[30].mxu1 %v1743_v55  ;;  %261 = vmatprep.mubr.f32.mxu0 %v81_v57  ;;  %v1757_v55 = vld [vmem:[%s3866_s0 + $0x298] sm:$0xff]  ;;  %v1795_v57 = vld [vmem:[%s3866_s0 + $0x348] sm:$0xff] }
  0x4b   :  { %638 = vmatprep.mubr.f32.mxu1 %v1747_v58  ;;  %2554 = vmatpush3.bf16.msra.mxu1 %v2854_v1  ;;  %v1760_v58 = vld [vmem:[%s3866_s0 + $0x2b0] sm:$0xff] }
  0x4c   :  { %2603 = vmatprep.subr.bf16.mxu1 %v2648_v3 }
  0x4d   :  { %262 = vmatmul.mubr.f32.gmra.mrb[20].mxu0 %v80_v60  ;;  %v1799_v60 = vld [vmem:[%s3866_s0 + $0x368] sm:$0xff] }
  0x4e   :  { %639 = vmatmul.mubr.f32.gmra.mrb[32].mxu1 %v1746_v61  ;;  %266 = vmatprep.mubr.f32.mxu0 %v84_v62  ;;  %v1763_v61 = vld [vmem:[%s3866_s0 + $0x2c8] sm:$0xff]  ;;  %v1798_v62 = vld [vmem:[%s3866_s0 + $0x360] sm:$0xff] }
  0x4f   :  { %643 = vmatprep.mubr.f32.mxu1 %v1750_v63  ;;  %v1766_v63 = vld [vmem:[%s3866_s0 + $0x2e0] sm:$0xff] }
  0x51   :  { %267 = vmatmul.mubr.f32.gmra.mrb[22].mxu0 %v83_v2  ;;  %v1802_v2 = vld [vmem:[%s3866_s0 + $0x380] sm:$0xff] }
  0x52   :  { %644 = vmatmul.mubr.f32.gmra.mrb[34].mxu1 %v1749_v4  ;;  %271 = vmatprep.mubr.f32.mxu0 %v87_v5  ;;  %v1769_v4 = vld [vmem:[%s3866_s0 + $0x2f8] sm:$0xff] }
  0x53   :  { %648 = vmatprep.mubr.f32.mxu1 %v1753_v6  ;;  %v1801_v5 = vld [vmem:[%s3866_s0 + $0x378] sm:$0xff]  ;;  %v1788_v6 = vld [vmem:[%s3866_s0 + $0x310] sm:$0xff] }
  0x55   :  { %272 = vmatmul.mubr.f32.gmra.mrb[24].mxu0 %v86_v9  ;;  %v1805_v9 = vld [vmem:[%s3866_s0 + $0x398] sm:$0xff] }
  0x56   :  { %649 = vmatmul.mubr.f32.gmra.mrb[36].mxu1 %v1752_v10  ;;  %276 = vmatprep.mubr.f32.mxu0 %v90_v11  ;;  %v1791_v10 = vld [vmem:[%s3866_s0 + $0x328] sm:$0xff]  ;;  %v1804_v11 = vld [vmem:[%s3866_s0 + $0x390] sm:$0xff] }
  0x57   :  { %653 = vmatprep.mubr.f32.mxu1 %v1756_v13  ;;  %v1808_v13 = vld [vmem:[%s3866_s0 + $0x3b0] sm:$0xff] }
  0x59   :  { %277 = vmatmul.mubr.f32.gmra.mrb[26].mxu0 %v89_v14  ;;  %v1794_v14 = vld [vmem:[%s3866_s0 + $0x340] sm:$0xff] }
  0x5a   :  { %654 = vmatmul.mubr.f32.gmra.mrb[38].mxu1 %v1755_v15  ;;  %281 = vmatprep.mubr.f32.mxu0 %v93_v18  ;;  %v1797_v15 = vld [vmem:[%s3866_s0 + $0x358] sm:$0xff]  ;;  %v1807_v18 = vld [vmem:[%s3866_s0 + $0x3a8] sm:$0xff] }
  0x5b   :  { %658 = vmatprep.mubr.f32.mxu1 %v1759_v19  ;;  %v1811_v19 = vld [vmem:[%s3866_s0 + $0x3c8] sm:$0xff] }
  0x5d   :  { %282 = vmatmul.mubr.f32.gmra.mrb[28].mxu0 %v92_v20  ;;  %v1810_v20 = vld [vmem:[%s3866_s0 + $0x3c0] sm:$0xff] }
  0x5e   :  { %659 = vmatmul.mubr.f32.gmra.mrb[40].mxu1 %v1758_v22  ;;  %286 = vmatprep.mubr.f32.mxu0 %v96_v23  ;;  %v1814_v22 = vld [vmem:[%s3866_s0 + $0x3e0] sm:$0xff]  ;;  %v1813_v23 = vld [vmem:[%s3866_s0 + $0x3d8] sm:$0xff] }
  0x5f   :  { %663 = vmatprep.mubr.f32.mxu1 %v1762_v24  ;;  %v1817_v24 = vld [vmem:[%s3866_s0 + $0x3f8] sm:$0xff] }
  0x61   :  { %287 = vmatmul.mubr.f32.gmra.mrb[30].mxu0 %v95_v25  ;;  %v1815_v25 = vld [vmem:[%s3866_s0 + $0x3e8] sm:$0xff] }
  0x62   :  { %664 = vmatmul.mubr.f32.gmra.mrb[42].mxu1 %v1761_v27  ;;  %2355 = vmatprep.mubr.msk.f32.mxu0 %vm98_vm0, %v1724_v28  ;;  %v1820_v27 = vld [vmem:[%s3866_s0 + $0x410] sm:$0xff]  ;;  %v1821_v28 = vld [vmem:[%s3866_s0 + $0x418] sm:$0xff] }
  0x63   :  { %668 = vmatprep.mubr.f32.mxu1 %v1765_v29  ;;  %v1823_v29 = vld [vmem:[%s3866_s0 + $0x428] sm:$0xff] }
  0x65   :  { %2356 = vmatmul.mubr.msk.f32.vlgmr.msra.gmra.mrb[32].mxu0 %vm98_vm0, %v1727_v30  ;;  %v1827_v30 = vld [vmem:[%s3866_s0 + $0x448] sm:$0xff] }
  0x66   :  { %669 = vmatmul.mubr.f32.gmra.mrb[44].mxu1 %v1764_v32  ;;  %2558 = vmatpush3.bf16.msra.mxu0 %v2659_v7  ;;  %v1826_v32 = vld [vmem:[%s3866_s0 + $0x440] sm:$0xff] }
  0x67   :  { %673 = vmatprep.mubr.f32.mxu1 %v1768_v33  ;;  %2358 = vmatprep.mubr.msk.f32.mxu0 %vm98_vm0, %v1730_v35  ;;  %v1833_v33 = vld [vmem:[%s3866_s0 + $0x478] sm:$0xff] }
  0x68   :  { %2560 = vmatprep.subr.bf16.mxu0 %v2686_v16  ;;  %v1829_v35 = vld [vmem:[%s3866_s0 + $0x458] sm:$0xff] }
  0x69   :  { %2359 = vmatmul.mubr.msk.f32.gmra.mrb[34].mxu0 %vm98_vm0, %v1733_v36  ;;  %v1850_v36 = vld [vmem:[%s3866_s0 + $0x480] sm:$0xff] }
  0x6a   :  { %674 = vmatmul.mubr.f32.gmra.mrb[46].mxu1 %v1767_v37  ;;  %2361 = vmatprep.mubr.msk.f32.mxu0 %vm98_vm0, %v1736_v38  ;;  %v1854_v37 = vld [vmem:[%s3866_s0 + $0x4a0] sm:$0xff]  ;;  %v1832_v38 = vld [vmem:[%s3866_s0 + $0x470] sm:$0xff] }
  0x6b   :  { %1001 = vmatprep.mubr.f32.mxu1 %v1787_v40  ;;  %2562 = vmatpush3.bf16.msra.mxu0 %v2686_v16  ;;  %v1831_v40 = vld [vmem:[%s3866_s0 + $0x468] sm:$0xff] }
  0x6c   :  { %2564 = vmatprep.subr.bf16.mxu0 %v2648_v3  ;;  %v1748_v3 = vld [vmem:[%s3866_s0 + $0x250] sm:$0xff] }
  0x6d   :  { %2362 = vmatmul.mubr.msk.f32.gmra.mrb[36].mxu0 %vm98_vm0, %v1739_v41  ;;  %v1857_v41 = vld [vmem:[%s3866_s0 + $0x4b8] sm:$0xff] }
  0x6e   :  { %1002 = vmatmul.mubr.f32.vlgmr.msra.gmra.mrb[48].mxu1 %v1786_v43  ;;  %2364 = vmatprep.mubr.msk.f32.mxu0 %vm98_vm0, %v1742_v44  ;;  %v1890_v43 = vld [vmem:[%s3866_s0 + $0x5c0] sm:$0xff]  ;;  %v1856_v44 = vld [vmem:[%s3866_s0 + $0x4b0] sm:$0xff] }
  0x6f   :  { %1006 = vmatprep.mubr.f32.mxu1 %v1790_v45  ;;  %2611 = vmatpush3.bf16.msra.mxu1 %v2661_v8  ;;  %v1889_v45 = vld [vmem:[%s3866_s0 + $0x5b8] sm:$0xff] }
  0x70   :  { %2604 = vmatprep.subr.bf16.mxu1 %v2673_v12 }
  0x71   :  { %2365 = vmatmul.mubr.msk.f32.gmra.mrb[38].mxu0 %vm98_vm0, %v1745_v46  ;;  %v1860_v46 = vld [vmem:[%s3866_s0 + $0x4d0] sm:$0xff] }
  0x72   :  { %1007 = vmatmul.mubr.f32.gmra.mrb[50].mxu1 %v1789_v47  ;;  %2367 = vmatprep.mubr.msk.f32.mxu0 %vm98_vm0, %v1748_v3  ;;  %v1893_v47 = vld [vmem:[%s3866_s0 + $0x5d8] sm:$0xff]  ;;  %v1859_v3 = vld [vmem:[%s3866_s0 + $0x4c8] sm:$0xff] }
  0x73   :  { %1011 = vmatprep.mubr.f32.mxu1 %v1793_v49  ;;  %2612 = vmatpush3.bf16.msra.mxu1 %v2688_v17  ;;  %v1892_v49 = vld [vmem:[%s3866_s0 + $0x5d0] sm:$0xff] }
  0x74   :  { %2605 = vmatprep.subr.bf16.mxu1 %v2701_v21 }
  0x75   :  { %2368 = vmatmul.mubr.msk.f32.gmra.mrb[40].mxu0 %vm98_vm0, %v1751_v50  ;;  %v1863_v50 = vld [vmem:[%s3866_s0 + $0x4e8] sm:$0xff] }
  0x76   :  { %1012 = vmatmul.mubr.f32.gmra.mrb[52].mxu1 %v1792_v52  ;;  %2370 = vmatprep.mubr.msk.f32.mxu0 %vm98_vm0, %v1754_v53  ;;  %v1896_v52 = vld [vmem:[%s3866_s0 + $0x5f0] sm:$0xff]  ;;  %v1895_v53 = vld [vmem:[%s3866_s0 + $0x5e8] sm:$0xff] }
  0x77   :  { %1016 = vmatprep.mubr.f32.mxu1 %v1796_v54  ;;  %2613 = vmatpush3.bf16.msra.mxu1 %v2718_v26  ;;  %v1866_v54 = vld [vmem:[%s3866_s0 + $0x500] sm:$0xff] }
  0x78   :  { %2606 = vmatprep.subr.bf16.mxu1 %v2735_v31 }
  0x79   :  { %2371 = vmatmul.mubr.msk.f32.gmra.mrb[42].mxu0 %vm98_vm0, %v1757_v55  ;;  %v1852_v55 = vld [vmem:[%s3866_s0 + $0x490] sm:$0xff] }
  0x7a   :  { %1017 = vmatmul.mubr.f32.gmra.mrb[54].mxu1 %v1795_v57  ;;  %2373 = vmatprep.mubr.msk.f32.mxu0 %vm98_vm0, %v1760_v58  ;;  %v1865_v57 = vld [vmem:[%s3866_s0 + $0x4f8] sm:$0xff] }
  0x7b   :  { %1021 = vmatprep.mubr.f32.mxu1 %v1799_v60  ;;  %2614 = vmatpush3.bf16.msra.mxu1 %v2745_v34  ;;  %v1869_v58 = vld [vmem:[%s3866_s0 + $0x518] sm:$0xff]  ;;  %v1858_v60 = vld [vmem:[%s3866_s0 + $0x4c0] sm:$0xff] }
  0x7c   :  { %2607 = vmatprep.subr.bf16.mxu1 %v2763_v39 }
  0x7d   :  { %2374 = vmatmul.mubr.msk.f32.gmra.mrb[44].mxu0 %vm98_vm0, %v1763_v61  ;;  %v1868_v61 = vld [vmem:[%s3866_s0 + $0x510] sm:$0xff] }
  0x7e   :  { %1022 = vmatmul.mubr.f32.gmra.mrb[56].mxu1 %v1798_v62  ;;  %2376 = vmatprep.mubr.msk.f32.mxu0 %vm98_vm0, %v1766_v63  ;;  %v1861_v62 = vld [vmem:[%s3866_s0 + $0x4d8] sm:$0xff]  ;;  %v1872_v63 = vld [vmem:[%s3866_s0 + $0x530] sm:$0xff] }
  0x7f   :  { %1026 = vmatprep.mubr.f32.mxu1 %v1802_v2  ;;  %2615 = vmatpush3.bf16.msra.mxu1 %v2773_v42  ;;  %v1864_v2 = vld [vmem:[%s3866_s0 + $0x4f0] sm:$0xff] }
  0x80   :  { %2608 = vmatprep.subr.bf16.mxu1 %v2794_v48 }
  0x81   :  { %2377 = vmatmul.mubr.msk.f32.gmra.mrb[46].mxu0 %vm98_vm0, %v1769_v4  ;;  %v1871_v4 = vld [vmem:[%s3866_s0 + $0x528] sm:$0xff] }
  0x82   :  { %1027 = vmatmul.mubr.f32.gmra.mrb[58].mxu1 %v1801_v5  ;;  %2387 = vmatprep.mubr.msk.f32.mxu0 %vm98_vm0, %v1788_v6  ;;  %v1867_v5 = vld [vmem:[%s3866_s0 + $0x508] sm:$0xff] }
  0x83   :  { %1031 = vmatprep.mubr.f32.mxu1 %v1805_v9  ;;  %2616 = vmatpush3.bf16.msra.mxu1 %v2804_v51  ;;  %v1875_v6 = vld [vmem:[%s3866_s0 + $0x548] sm:$0xff]  ;;  %v1870_v9 = vld [vmem:[%s3866_s0 + $0x520] sm:$0xff] }
  0x84   :  { %2609 = vmatprep.subr.bf16.mxu1 %v2822_v56 }
  0x85   :  { %2388 = vmatmul.mubr.msk.f32.vlgmr.msra.gmra.mrb[48].mxu0 %vm98_vm0, %v1791_v10  ;;  %v1874_v10 = vld [vmem:[%s3866_s0 + $0x540] sm:$0xff] }
  0x86   :  { %1032 = vmatmul.mubr.f32.gmra.mrb[60].mxu1 %v1804_v11  ;;  %2566 = vmatpush3.bf16.msra.mxu0 %v2661_v8  ;;  %v1800_v8 = vld [vmem:[%s3866_s0 + $0x370] sm:$0xff]  ;;  %v1873_v11 = vld [vmem:[%s3866_s0 + $0x538] sm:$0xff] }
  0x87   :  { %1036 = vmatprep.mubr.f32.mxu1 %v1808_v13  ;;  %2390 = vmatprep.mubr.msk.f32.mxu0 %vm98_vm0, %v1794_v14  ;;  %v1878_v13 = vld [vmem:[%s3866_s0 + $0x560] sm:$0xff]  ;;  %v1876_v14 = vld [vmem:[%s3866_s0 + $0x550] sm:$0xff] }
  0x88   :  { %2568 = vmatprep.subr.bf16.mxu0 %v2673_v12  ;;  %2617 = vmatpush3.bf16.msra.mxu1 %v2832_v59  ;;  %v1803_v12 = vld [vmem:[%s3866_s0 + $0x388] sm:$0xff] }
  0x89   :  { %2391 = vmatmul.mubr.msk.f32.gmra.mrb[50].mxu0 %vm98_vm0, %v1797_v15  ;;  %2610 = vmatprep.subr.bf16.mxu1 %v2850_v0  ;;  %v1877_v15 = vld [vmem:[%s3866_s0 + $0x558] sm:$0xff] }
  0x8a   :  { %1037 = vmatmul.mubr.f32.gmra.mrb[62].mxu1 %v1807_v18  ;;  %2570 = vmatpush3.bf16.msra.mxu0 %v2688_v17  ;;  %v1806_v17 = vld [vmem:[%s3866_s0 + $0x3a0] sm:$0xff]  ;;  %v1879_v18 = vld [vmem:[%s3866_s0 + $0x568] sm:$0xff] }
  0x8b   :  { %1041 = vmatprep.mubr.f32.mxu1 %v1811_v19  ;;  %2393 = vmatprep.mubr.msk.f32.mxu0 %vm98_vm0, %v1800_v8  ;;  %v1881_v19 = vld [vmem:[%s3866_s0 + $0x578] sm:$0xff]  ;;  %v1882_v8 = vld [vmem:[%s3866_s0 + $0x580] sm:$0xff] }
  0x8c   :  { %2572 = vmatprep.subr.bf16.mxu0 %v2701_v21  ;;  %2618 = vmatpush3.bf16.msra.mxu1 %v2854_v1  ;;  %v1809_v21 = vld [vmem:[%s3866_s0 + $0x3b8] sm:$0xff] }
  0x8d   :  { %2394 = vmatmul.mubr.msk.f32.gmra.mrb[52].mxu0 %vm98_vm0, %v1803_v12  ;;  %2596 = vmatprep.subr.bf16.mxu1 %v2659_v7  ;;  %v1880_v12 = vld [vmem:[%s3866_s0 + $0x570] sm:$0xff] }
  0x8e   :  { %1042 = vmatmul.mubr.f32.gmra.mrb[64].mxu1 %v1810_v20  ;;  %2574 = vmatpush3.bf16.msra.mxu0 %v2718_v26  ;;  %v1812_v26 = vld [vmem:[%s3866_s0 + $0x3d0] sm:$0xff]  ;;  %v1885_v20 = vld [vmem:[%s3866_s0 + $0x598] sm:$0xff] }
  0x8f   :  { %1046 = vmatprep.mubr.f32.mxu1 %v1814_v22  ;;  %2396 = vmatprep.mubr.msk.f32.mxu0 %vm98_vm0, %v1806_v17  ;;  %v1884_v22 = vld [vmem:[%s3866_s0 + $0x590] sm:$0xff] }
  0x90   :  { %2576 = vmatprep.subr.bf16.mxu0 %v2735_v31  ;;  %v1816_v31 = vld [vmem:[%s3866_s0 + $0x3f0] sm:$0xff] }
  0x91   :  { %2397 = vmatmul.mubr.msk.f32.gmra.mrb[54].mxu0 %vm98_vm0, %v1809_v21  ;;  %v1888_v17 = vld [vmem:[%s3866_s0 + $0x5b0] sm:$0xff]  ;;  %v1883_v21 = vld [vmem:[%s3866_s0 + $0x588] sm:$0xff] }
  0x92   :  { %1047 = vmatmul.mubr.f32.gmra.mrb[66].mxu1 %v1813_v23  ;;  %2578 = vmatpush3.bf16.msra.mxu0 %v2745_v34  ;;  %v1818_v34 = vld [vmem:[%s3866_s0 + $0x400] sm:$0xff]  ;;  %v1891_v23 = vld [vmem:[%s3866_s0 + $0x5c8] sm:$0xff] }
  0x93   :  { %1051 = vmatprep.mubr.f32.mxu1 %v1817_v24  ;;  %2399 = vmatprep.mubr.msk.f32.mxu0 %vm98_vm0, %v1812_v26  ;;  %v1887_v24 = vld [vmem:[%s3866_s0 + $0x5a8] sm:$0xff]  ;;  %v1894_v26 = vld [vmem:[%s3866_s0 + $0x5e0] sm:$0xff] }
  0x94   :  { %2580 = vmatprep.subr.bf16.mxu0 %v2763_v39  ;;  %v1819_v39 = vld [vmem:[%s3866_s0 + $0x408] sm:$0xff] }
  0x95   :  { %2400 = vmatmul.mubr.msk.f32.gmra.mrb[56].mxu0 %vm98_vm0, %v1815_v25  ;;  %v1886_v25 = vld [vmem:[%s3866_s0 + $0x5a0] sm:$0xff] }
  0x96   :  { %1052 = vmatmul.mubr.f32.gmra.mrb[68].mxu1 %v1816_v31  ;;  %2582 = vmatpush3.bf16.msra.mxu0 %v2773_v42  ;;  %v1824_v42 = vld [vmem:[%s3866_s0 + $0x430] sm:$0xff]  ;;  %v1897_v31 = vld [vmem:[%s3866_s0 + $0x5f8] sm:$0xff] }
  0x97   :  { %1056 = vmatprep.mubr.f32.mxu1 %v1820_v27  ;;  %2402 = vmatprep.mubr.msk.f32.mxu0 %vm98_vm0, %v1818_v34 }
  0x98   :  { %2584 = vmatprep.subr.bf16.mxu0 %v2794_v48  ;;  %v1822_v48 = vld [vmem:[%s3866_s0 + $0x420] sm:$0xff] }
  0x99   :  { %2403 = vmatmul.mubr.msk.f32.gmra.mrb[58].mxu0 %vm98_vm0, %v1821_v28 }
  0x9a   :  { %1057 = vmatmul.mubr.f32.gmra.mrb[70].mxu1 %v1819_v39  ;;  %2586 = vmatpush3.bf16.msra.mxu0 %v2804_v51  ;;  %v1830_v51 = vld [vmem:[%s3866_s0 + $0x460] sm:$0xff] }
  0x9b   :  { %1061 = vmatprep.mubr.f32.mxu1 %v1823_v29  ;;  %2405 = vmatprep.mubr.msk.f32.mxu0 %vm98_vm0, %v1824_v42 }
  0x9c   :  { %2588 = vmatprep.subr.bf16.mxu0 %v2822_v56  ;;  %v1825_v56 = vld [vmem:[%s3866_s0 + $0x438] sm:$0xff] }
  0x9d   :  { %2406 = vmatmul.mubr.msk.f32.gmra.mrb[60].mxu0 %vm98_vm0, %v1827_v30 }
  0x9e   :  { %1062 = vmatmul.mubr.f32.gmra.mrb[72].mxu1 %v1822_v48  ;;  %2590 = vmatpush3.bf16.msra.mxu0 %v2832_v59  ;;  %v1851_v59 = vld [vmem:[%s3866_s0 + $0x488] sm:$0xff] }
  0x9f   :  { %1066 = vmatprep.mubr.f32.mxu1 %v1826_v32  ;;  %2408 = vmatprep.mubr.msk.f32.mxu0 %vm98_vm0, %v1830_v51 }
  0xa0   :  { %2592 = vmatprep.subr.bf16.mxu0 %v2850_v0  ;;  %v1828_v0 = vld [vmem:[%s3866_s0 + $0x450] sm:$0xff] }
  0xa1   :  { %2409 = vmatmul.mubr.msk.f32.gmra.mrb[62].mxu0 %vm98_vm0, %v1833_v33 }
  0xa2   :  { %1067 = vmatmul.mubr.f32.gmra.mrb[74].mxu1 %v1825_v56  ;;  %2594 = vmatpush3.bf16.msra.mxu0 %v2854_v1  ;;  %v1853_v1 = vld [vmem:[%s3866_s0 + $0x498] sm:$0xff] }
  0xa3   :  { %1071 = vmatprep.mubr.f32.mxu1 %v1829_v35  ;;  %1404 = vmatprep.mubr.f32.mxu0 %v1851_v59 }
  0xa5   :  { %1405 = vmatmul.mubr.f32.vlgmr.msra.gmra.mrb[64].mxu0 %v1850_v36 }
  0xa6   :  { %1072 = vmatmul.mubr.f32.gmra.mrb[76].mxu1 %v1828_v0  ;;  %1409 = vmatprep.mubr.f32.mxu0 %v1854_v37 }
  0xa7   :  { %1076 = vmatprep.mubr.f32.mxu1 %v1832_v38 }
  0xa9   :  { %1410 = vmatmul.mubr.f32.gmra.mrb[66].mxu0 %v1853_v1 }
  0xaa   :  { %1077 = vmatmul.mubr.f32.gmra.mrb[78].mxu1 %v1831_v40  ;;  %1414 = vmatprep.mubr.f32.mxu0 %v1857_v41 }
  0xab   :  { %1469 = vmatprep.mubr.f32.mxu1 %v1890_v43 }
  0xad   :  { %1415 = vmatmul.mubr.f32.gmra.mrb[68].mxu0 %v1856_v44 }
  0xae   :  { %1470 = vmatmul.mubr.f32.vlgmr.msra.gmra.mrb[80].mxu1 %v1889_v45  ;;  %1419 = vmatprep.mubr.f32.mxu0 %v1860_v46 }
  0xaf   :  { %1474 = vmatprep.mubr.f32.mxu1 %v1893_v47  ;;  %2598 = vmatpush3.bf16.msra.mxu1 %v2659_v7  ;;  %v1862_v7 = vld [vmem:[%s3866_s0 + $0x4e0] sm:$0xff] }
  0xb0   :  { %2600 = vmatprep.subr.bf16.mxu1 %v2686_v16 }
  0xb1   :  { %1420 = vmatmul.mubr.f32.gmra.mrb[70].mxu0 %v1859_v3 }
  0xb2   :  { %1475 = vmatmul.mubr.f32.gmra.mrb[82].mxu1 %v1892_v49  ;;  %1424 = vmatprep.mubr.f32.mxu0 %v1863_v50 }
  0xb3   :  { %1479 = vmatprep.mubr.f32.mxu1 %v1896_v52  ;;  %2602 = vmatpush3.bf16.msra.mxu1 %v2686_v16  ;;  %v1855_v16 = vld [vmem:[%s3866_s0 + $0x4a8] sm:$0xff] }
  0xb5   :  { %1425 = vmatmul.mubr.f32.gmra.mrb[72].mxu0 %v1862_v7 }
  0xb6   :  { %1480 = vmatmul.mubr.f32.gmra.mrb[84].mxu1 %v1895_v53  ;;  %1429 = vmatprep.mubr.f32.mxu0 %v1866_v54 }
  0xb7   :  { %2419 = vmatprep.mubr.msk.f32.mxu1 %vm98_vm0, %v1852_v55 }
  0xb9   :  { %1430 = vmatmul.mubr.f32.gmra.mrb[74].mxu0 %v1865_v57 }
  0xba   :  { %2420 = vmatmul.mubr.msk.f32.vlgmr.msra.gmra.mrb[86].mxu1 %vm98_vm0, %v1855_v16  ;;  %1434 = vmatprep.mubr.f32.mxu0 %v1869_v58 }
  0xbb   :  { %2422 = vmatprep.mubr.msk.f32.mxu1 %vm98_vm0, %v1858_v60 }
  0xbd   :  { %1435 = vmatmul.mubr.f32.gmra.mrb[76].mxu0 %v1868_v61 }
  0xbe   :  { %2423 = vmatmul.mubr.msk.f32.gmra.mrb[88].mxu1 %vm98_vm0, %v1861_v62  ;;  %1439 = vmatprep.mubr.f32.mxu0 %v1872_v63 }
  0xbf   :  { %2425 = vmatprep.mubr.msk.f32.mxu1 %vm98_vm0, %v1864_v2 }
  0xc1   :  { %1440 = vmatmul.mubr.f32.gmra.mrb[78].mxu0 %v1871_v4 }
  0xc2   :  { %2426 = vmatmul.mubr.msk.f32.gmra.mrb[90].mxu1 %vm98_vm0, %v1867_v5  ;;  %1444 = vmatprep.mubr.f32.mxu0 %v1875_v6 }
  0xc3   :  { %2428 = vmatprep.mubr.msk.f32.mxu1 %vm98_vm0, %v1870_v9 }
  0xc5   :  { %1445 = vmatmul.mubr.f32.gmra.mrb[80].mxu0 %v1874_v10 }
  0xc6   :  { %2429 = vmatmul.mubr.msk.f32.gmra.mrb[92].mxu1 %vm98_vm0, %v1873_v11  ;;  %1449 = vmatprep.mubr.f32.mxu0 %v1878_v13 }
  0xc7   :  { %2431 = vmatprep.mubr.msk.f32.mxu1 %vm98_vm0, %v1876_v14 }
  0xc9   :  { %1450 = vmatmul.mubr.f32.gmra.mrb[82].mxu0 %v1877_v15 }
  0xca   :  { %2432 = vmatmul.mubr.msk.f32.gmra.mrb[94].mxu1 %vm98_vm0, %v1879_v18  ;;  %1454 = vmatprep.mubr.f32.mxu0 %v1881_v19 }
  0xcb   :  { %2434 = vmatprep.mubr.msk.f32.mxu1 %vm98_vm0, %v1882_v8 }
  0xcd   :  { %1455 = vmatmul.mubr.f32.gmra.mrb[84].mxu0 %v1880_v12 }
  0xce   :  { %2435 = vmatmul.mubr.msk.f32.gmra.mrb[96].mxu1 %vm98_vm0, %v1885_v20  ;;  %1459 = vmatprep.mubr.f32.mxu0 %v1884_v22 }
  0xcf   :  { %2437 = vmatprep.mubr.msk.f32.mxu1 %vm98_vm0, %v1888_v17 }
  0xd1   :  { %1460 = vmatmul.mubr.f32.gmra.mrb[86].mxu0 %v1883_v21 }
  0xd2   :  { %2438 = vmatmul.mubr.msk.f32.gmra.mrb[98].mxu1 %vm98_vm0, %v1891_v23  ;;  %1464 = vmatprep.mubr.f32.mxu0 %v1887_v24 }
  0xd3   :  { %2440 = vmatprep.mubr.msk.f32.mxu1 %vm98_vm0, %v1894_v26 }
  0xd5   :  { %1465 = vmatmul.mubr.f32.gmra.mrb[88].mxu0 %v1886_v25 }
  0xd6   :  { %2441 = vmatmul.mubr.msk.f32.gmra.mrb[100].mxu1 %vm98_vm0, %v1897_v31 }
  0xe0   :  { %v2325_v27 = vpop.f32.mrb[0].mxu1 }
  0xe1   :  { %v358_v34 = vpop.f32.mrb[1].mxu1 }
  0xe4   :  { %v2328_v28 = vpop.f32.mrb[2].mxu1 }
  0xe5   :  { %v368_v39 = vpop.f32.mrb[3].mxu1 }
  0xe8   :  { %v2331_v29 = vpop.f32.mrb[4].mxu1 }
  0xe9   :  { %v378_v42 = vpop.f32.mrb[5].mxu1 }
  0xec   :  { %v2334_v30 = vpop.f32.mrb[6].mxu1 }
  0xed   :  { %v388_v48 = vpop.f32.mrb[7].mxu1 }
  0xf0   :  { %v3519_v32 = vpop.f32.mrb[8].mxu1 }
  0xf1   :  { %v3521_v51 = vpop.f32.mrb[9].mxu1 }
  0xf4   :  { %v3523_v33 = vpop.f32.mrb[10].mxu1 }
  0xf5   :  { %v3525_v56 = vpop.f32.mrb[11].mxu1 }
  0xf8   :  { %v1947_v35 = vpop.f32.mrb[0].mxu0  ;;  %v3527_v36 = vpop.f32.mrb[12].mxu1 }
  0xf9   :  { %v1948_v59 = vpop.f32.mrb[1].mxu0  ;;  %v3529_v37 = vpop.f32.mrb[13].mxu1 }
  0xfa   :  { %v1949_v0 = vadd.f32 %v1948_v59, %v1947_v35 }
  0xfc   :  { %v3531_v38 = vadd.f32 %v1949_v0, %v358_v34  ;;  %v1950_v1 = vpop.f32.mrb[2].mxu0  ;;  %v3533_v41 = vpop.f32.mrb[14].mxu1 }
  0xfd   :  { %v1951_v40 = vpop.f32.mrb[3].mxu0  ;;  %v3535_v44 = vpop.f32.mrb[15].mxu1 }
  0xfe   :  { %v1952_v43 = vadd.f32 %v1951_v40, %v1950_v1 }
 0x100   :  { %v3537_v45 = vadd.f32 %v2325_v27, %v1952_v43  ;;  %v1953_v46 = vpop.f32.mrb[4].mxu0 }
 0x101   :  { %v1954_v47 = vpop.f32.mrb[5].mxu0  ;;  %v2047_v3 = vpop.f32.mrb[16].mxu1 }
 0x102   :  { %v1955_v49 = vadd.f32 %v1954_v47, %v1953_v46  ;;  %v2048_v50 = vpop.f32.mrb[17].mxu1 }
 0x103   :  { %v3539_v52 = vadd.f32 %v2048_v50, %v2047_v3 }
 0x104   :  { %v3541_v7 = vadd.f32 %v1955_v49, %v368_v39  ;;  %v1956_v53 = vpop.f32.mrb[6].mxu0 }
 0x105   :  { %v1957_v54 = vpop.f32.mrb[7].mxu0  ;;  %v2050_v55 = vpop.f32.mrb[18].mxu1 }
 0x106   :  { %v1958_v57 = vadd.f32 %v1957_v54, %v1956_v53  ;;  %v2051_v16 = vpop.f32.mrb[19].mxu1 }
 0x107   :  { %v3543_v58 = vadd.f32 %v2051_v16, %v2050_v55 }
 0x108   :  { %v3545_v60 = vadd.f32 %v2328_v28, %v1958_v57  ;;  %v1959_v61 = vpop.f32.mrb[8].mxu0 }
 0x109   :  { %v1960_v62 = vpop.f32.mrb[9].mxu0  ;;  %v2053_v63 = vpop.f32.mrb[20].mxu1 }
 0x10a   :  { %v1961_v2 = vadd.f32 %v1960_v62, %v1959_v61  ;;  %v2054_v4 = vpop.f32.mrb[21].mxu1 }
 0x10b   :  { %v3547_v5 = vadd.f32 %v2054_v4, %v2053_v63 }
 0x10c   :  { %v3549_v6 = vadd.f32 %v1961_v2, %v378_v42  ;;  %v1962_v9 = vpop.f32.mrb[10].mxu0 }
 0x10d   :  { %v1963_v10 = vpop.f32.mrb[11].mxu0  ;;  %v2056_v11 = vpop.f32.mrb[22].mxu1 }
 0x10e   :  { %v1964_v13 = vadd.f32 %v1963_v10, %v1962_v9  ;;  %v2057_v14 = vpop.f32.mrb[23].mxu1 }
 0x10f   :  { %v3551_v15 = vadd.f32 %v2057_v14, %v2056_v11 }
 0x110   :  { %v3553_v18 = vadd.f32 %v2331_v29, %v1964_v13  ;;  %v1965_v19 = vpop.f32.mrb[12].mxu0 }
 0x111   :  { %v1966_v8 = vpop.f32.mrb[13].mxu0  ;;  %v2059_v12 = vpop.f32.mrb[24].mxu1 }
 0x112   :  { %v1967_v20 = vadd.f32 %v1966_v8, %v1965_v19  ;;  %v2060_v22 = vpop.f32.mrb[25].mxu1 }
 0x113   :  { %v3555_v17 = vadd.f32 %v2060_v22, %v2059_v12 }
 0x114   :  { %v3557_v21 = vadd.f32 %v1967_v20, %v388_v48  ;;  %v1968_v23 = vpop.f32.mrb[14].mxu0 }
 0x115   :  { %v1969_v24 = vpop.f32.mrb[15].mxu0  ;;  %v2062_v26 = vpop.f32.mrb[26].mxu1 }
 0x116   :  { %v1970_v25 = vadd.f32 %v1969_v24, %v1968_v23  ;;  %v2063_v31 = vpop.f32.mrb[27].mxu1 }
 0x117   :  { %v3559_v27 = vadd.f32 %v2063_v31, %v2062_v26 }
 0x118   :  { %v3561_v34 = vadd.f32 %v2334_v30, %v1970_v25  ;;  %v1971_v28 = vpop.f32.mrb[16].mxu0 }
 0x119   :  { %v1972_v39 = vpop.f32.mrb[17].mxu0  ;;  %v2065_v29 = vpop.f32.mrb[28].mxu1 }
 0x11a   :  { %v1973_v42 = vadd.f32 %v1972_v39, %v1971_v28  ;;  %v2066_v35 = vpop.f32.mrb[29].mxu1 }
 0x11b   :  { %v3563_v59 = vadd.f32 %v2066_v35, %v2065_v29 }
 0x11c   :  { %v3566_v0 = vadd.f32 %v1973_v42, %v3521_v51  ;;  %v1974_v48 = vpop.f32.mrb[18].mxu0 }
 0x11d   :  { %v1975_v1 = vpop.f32.mrb[19].mxu0  ;;  %v2068_v40 = vpop.f32.mrb[30].mxu1 }
 0x11e   :  { %v1976_v43 = vadd.f32 %v1975_v1, %v1974_v48  ;;  %v2069_v46 = vpop.f32.mrb[31].mxu1 }
 0x11f   :  { %v3568_v47 = vadd.f32 %v2069_v46, %v2068_v40 }
 0x120   :  { %v3571_v30 = vadd.f32 %v3519_v32, %v1976_v43  ;;  %v1977_v3 = vpop.f32.mrb[20].mxu0 }
 0x121   :  { %v1978_v49 = vpop.f32.mrb[21].mxu0  ;;  %v2071_v50 = vpop.f32.mrb[32].mxu1 }
 0x122   :  { %v1979_v53 = vadd.f32 %v1978_v49, %v1977_v3  ;;  %v2072_v54 = vpop.f32.mrb[33].mxu1 }
 0x123   :  { %v3573_v55 = vadd.f32 %v2072_v54, %v2071_v50 }
 0x124   :  { %v3576_v51 = vadd.f32 %v1979_v53, %v3525_v56  ;;  %v1980_v57 = vpop.f32.mrb[22].mxu0 }
 0x125   :  { %v1981_v16 = vpop.f32.mrb[23].mxu0  ;;  %v2074_v61 = vpop.f32.mrb[34].mxu1 }
 0x126   :  { %v1982_v62 = vadd.f32 %v1981_v16, %v1980_v57  ;;  %v2075_v63 = vpop.f32.mrb[35].mxu1 }
 0x127   :  { %v3578_v2 = vadd.f32 %v2075_v63, %v2074_v61 }
 0x128   :  { %v3581_v32 = vadd.f32 %v3523_v33, %v1982_v62  ;;  %v1983_v4 = vpop.f32.mrb[24].mxu0 }
 0x129   :  { %v1984_v9 = vpop.f32.mrb[25].mxu0  ;;  %v2077_v10 = vpop.f32.mrb[36].mxu1 }
 0x12a   :  { %v1985_v11 = vadd.f32 %v1984_v9, %v1983_v4  ;;  %v2078_v13 = vpop.f32.mrb[37].mxu1 }
 0x12b   :  { %v3583_v14 = vadd.f32 %v2078_v13, %v2077_v10 }
 0x12c   :  { %v3586_v56 = vadd.f32 %v1985_v11, %v3529_v37  ;;  %v1986_v19 = vpop.f32.mrb[26].mxu0 }
 0x12d   :  { %v1987_v8 = vpop.f32.mrb[27].mxu0  ;;  %v2080_v12 = vpop.f32.mrb[38].mxu1 }
 0x12e   :  { %v1988_v20 = vadd.f32 %v1987_v8, %v1986_v19  ;;  %v2081_v22 = vpop.f32.mrb[39].mxu1 }
 0x12f   :  { %v2082_v23 = vadd.f32 %v2081_v22, %v2080_v12 }
 0x130   :  { %v3589_v24 = vadd.f32 %v3527_v36, %v1988_v20  ;;  %v1989_v33 = vpop.f32.mrb[28].mxu0 }
 0x131   :  { %v1990_v26 = vpop.f32.mrb[29].mxu0  ;;  %v2083_v25 = vpop.f32.mrb[40].mxu1 }
 0x132   :  { %v1991_v31 = vadd.f32 %v1990_v26, %v1989_v33  ;;  %v2084_v28 = vpop.f32.mrb[41].mxu1 }
 0x133   :  { %v3591_v39 = vadd.f32 %v2084_v28, %v2083_v25 }
 0x134   :  { %v3594_v29 = vadd.f32 %v1991_v31, %v3535_v44  ;;  %v1992_v37 = vpop.f32.mrb[30].mxu0 }
 0x135   :  { %v1993_v42 = vpop.f32.mrb[31].mxu0  ;;  %v2086_v35 = vpop.f32.mrb[42].mxu1 }
 0x136   :  { %v1994_v48 = vadd.f32 %v1993_v42, %v1992_v37  ;;  %v2087_v1 = vpop.f32.mrb[43].mxu1 }
 0x137   :  { %v2088_v40 = vadd.f32 %v2087_v1, %v2086_v35 }
 0x138   :  { %v3597_v43 = vadd.f32 %v3533_v41, %v1994_v48  ;;  %v2357_v36 = vpop.f32.mrb[32].mxu0 }
 0x139   :  { %v3600_v46 = vadd.f32 %v2357_v36, %v3543_v58  ;;  %v745_v3 = vpop.f32.mrb[33].mxu0  ;;  %v2089_v49 = vpop.f32.mrb[44].mxu1 }
 0x13a   :  { %v3603_v50 = vadd.f32 %v3539_v52, %v745_v3  ;;  %v2090_v44 = vpop.f32.mrb[45].mxu1 }
 0x13b   :  { %v825_v53 = vmax.f32 %v3537_v45, %v3600_v46  ;;  %v2091_v54 = vadd.f32 %v2090_v44, %v2089_v49 }
 0x13c   :  { %v824_v57 = vmax.f32 %v3531_v38, %v3603_v50  ;;  %v2360_v16 = vpop.f32.mrb[34].mxu0 }
 0x13d   :  { %v3610_v41 = vadd.f32 %v2360_v16, %v3551_v15  ;;  %v755_v61 = vpop.f32.mrb[35].mxu0  ;;  %v2092_v58 = vpop.f32.mrb[46].mxu1 }
 0x13e   :  { %v3613_v62 = vadd.f32 %v3547_v5, %v755_v61  ;;  %v2093_v63 = vpop.f32.mrb[47].mxu1 }
 0x13f   :  { %v827_v52 = vmax.f32 %v3545_v60, %v3610_v41  ;;  %v2094_v4 = vadd.f32 %v2093_v63, %v2092_v58 }
 0x140   :  { %v826_v9 = vmax.f32 %v3541_v7, %v3613_v62  ;;  %v2363_v10 = vpop.f32.mrb[36].mxu0 }
 0x141   :  { %v3620_v11 = vadd.f32 %v2363_v10, %v3559_v27  ;;  %v765_v13 = vpop.f32.mrb[37].mxu0  ;;  %v2147_v15 = vpop.f32.mrb[48].mxu1 }
 0x142   :  { %v3623_v19 = vadd.f32 %v3555_v17, %v765_v13  ;;  %v2148_v8 = vpop.f32.mrb[49].mxu1 }
 0x143   :  { %v829_v5 = vmax.f32 %v3553_v18, %v3620_v11  ;;  %v2149_v12 = vadd.f32 %v2148_v8, %v2147_v15 }
 0x144   :  { %v828_v20 = vmax.f32 %v3549_v6, %v3623_v19  ;;  %v2366_v22 = vpop.f32.mrb[38].mxu0 }
 0x145   :  { %v3630_v33 = vadd.f32 %v2366_v22, %v3568_v47  ;;  %v775_v26 = vpop.f32.mrb[39].mxu0  ;;  %v2150_v27 = vpop.f32.mrb[50].mxu1 }
 0x146   :  { %v3633_v25 = vadd.f32 %v3563_v59, %v775_v26  ;;  %v2151_v31 = vpop.f32.mrb[51].mxu1 }
 0x147   :  { %v831_v17 = vmax.f32 %v3561_v34, %v3630_v33  ;;  %v2152_v28 = vadd.f32 %v2151_v31, %v2150_v27 }
 0x148   :  { %v830_v37 = vmax.f32 %v3557_v21, %v3633_v25  ;;  %v2369_v42 = vpop.f32.mrb[40].mxu0 }
 0x149   :  { %v3640_v35 = vadd.f32 %v2369_v42, %v3578_v2  ;;  %v785_v48 = vpop.f32.mrb[41].mxu0  ;;  %v2153_v47 = vpop.f32.mrb[52].mxu1 }
 0x14a   :  { %v3643_v1 = vadd.f32 %v3573_v55, %v785_v48  ;;  %v2154_v36 = vpop.f32.mrb[53].mxu1 }
 0x14b   :  { %v833_v59 = vmax.f32 %v3571_v30, %v3640_v35  ;;  %v2155_v3 = vadd.f32 %v2154_v36, %v2153_v47 }
 0x14c   :  { %v832_v49 = vmax.f32 %v3566_v0, %v3643_v1  ;;  %v2372_v44 = vpop.f32.mrb[42].mxu0 }
 0x14d   :  { %v3649_v16 = vadd.f32 %v2372_v44, %v2082_v23  ;;  %v795_v61 = vpop.f32.mrb[43].mxu0  ;;  %v2156_v58 = vpop.f32.mrb[54].mxu1 }
 0x14e   :  { %v3652_v2 = vadd.f32 %v3583_v14, %v795_v61  ;;  %v2157_v63 = vpop.f32.mrb[55].mxu1 }
 0x14f   :  { %v835_v55 = vmax.f32 %v3581_v32, %v3649_v16  ;;  %v2158_v10 = vadd.f32 %v2157_v63, %v2156_v58 }
 0x150   :  { %v834_v13 = vmax.f32 %v3576_v51, %v3652_v2  ;;  %v2375_v15 = vpop.f32.mrb[44].mxu0 }
 0x151   :  { %v3658_v8 = vadd.f32 %v2375_v15, %v2088_v40  ;;  %v805_v22 = vpop.f32.mrb[45].mxu0  ;;  %v2159_v26 = vpop.f32.mrb[56].mxu1 }
 0x152   :  { %v3661_v23 = vadd.f32 %v3591_v39, %v805_v22  ;;  %v2160_v27 = vpop.f32.mrb[57].mxu1 }
 0x153   :  { %v2161_v31 = vadd.f32 %v2160_v27, %v2159_v26 }
 0x154   :  { %v2378_v48 = vpop.f32.mrb[46].mxu0  ;;  %v3869_v51 = vmax.f32 %v3586_v56, %v3661_v23 }
 0x155   :  { %v3667_v47 = vadd.f32 %v2378_v48, %v2094_v4  ;;  %v815_v36 = vpop.f32.mrb[47].mxu0  ;;  %v2162_v44 = vpop.f32.mrb[58].mxu1 }
 0x156   :  { %v3669_v40 = vadd.f32 %v2091_v54, %v815_v36  ;;  %v2163_v61 = vpop.f32.mrb[59].mxu1 }
 0x157   :  { %v2164_v58 = vadd.f32 %v2163_v61, %v2162_v44 }
 0x158   :  { %v838_v63 = vmax.f32 %v3594_v29, %v3669_v40  ;;  %v2389_v15 = vpop.f32.mrb[48].mxu0 }
 0x159   :  { %v1154_v22 = vadd.f32 %v2389_v15, %v2152_v28  ;;  %v1148_v26 = vpop.f32.mrb[49].mxu0  ;;  %v2165_v27 = vpop.f32.mrb[60].mxu1 }
 0x15a   :  { %v1149_v14 = vadd.f32 %v2149_v12, %v1148_v26  ;;  %v2166_v42 = vpop.f32.mrb[61].mxu1 }
 0x15b   :  { %v3678_v4 = vmax.f32 %v825_v53, %v1154_v22  ;;  %v2167_v54 = vadd.f32 %v2166_v42, %v2165_v27 }
 0x15c   :  { %v3683_v48 = vmax.f32 %v824_v57, %v1149_v14  ;;  %v2392_v36 = vpop.f32.mrb[50].mxu0 }
 0x15d   :  { %v1164_v44 = vadd.f32 %v2392_v36, %v2158_v10  ;;  %v1158_v61 = vpop.f32.mrb[51].mxu0  ;;  %v2168_v39 = vpop.f32.mrb[62].mxu1 }
 0x15e   :  { %v1159_v28 = vadd.f32 %v2155_v3, %v1158_v61  ;;  %v2169_v15 = vpop.f32.mrb[63].mxu1 }
 0x15f   :  { %v3688_v12 = vmax.f32 %v827_v52, %v1164_v44  ;;  %v2170_v45 = vadd.f32 %v2169_v15, %v2168_v39 }
 0x160   :  { %v3693_v46 = vmax.f32 %v826_v9, %v1159_v28  ;;  %v2395_v38 = vpop.f32.mrb[52].mxu0 }
 0x161   :  { %v1174_v50 = vadd.f32 %v2395_v38, %v2164_v58  ;;  %v1168_v53 = vpop.f32.mrb[53].mxu0  ;;  %v2171_v57 = vpop.f32.mrb[64].mxu1 }
 0x162   :  { %v1169_v10 = vadd.f32 %v2161_v31, %v1168_v53  ;;  %v2172_v14 = vpop.f32.mrb[65].mxu1 }
 0x163   :  { %v3698_v3 = vmax.f32 %v829_v5, %v1174_v50  ;;  %v2173_v60 = vadd.f32 %v2172_v14, %v2171_v57 }
 0x164   :  { %v3703_v41 = vmax.f32 %v828_v20, %v1169_v10  ;;  %v2398_v7 = vpop.f32.mrb[54].mxu0 }
 0x165   :  { %v1184_v62 = vadd.f32 %v2398_v7, %v2170_v45  ;;  %v2174_v52 = vpop.f32.mrb[66].mxu1  ;;  %v1178_v9 = vpop.f32.mrb[55].mxu0 }
 0x166   :  { %v1179_v42 = vadd.f32 %v2167_v54, %v1178_v9  ;;  %v2175_v39 = vpop.f32.mrb[67].mxu1 }
 0x167   :  { %v3708_v31 = vmax.f32 %v831_v17, %v1184_v62  ;;  %v2176_v18 = vadd.f32 %v2175_v39, %v2174_v52 }
 0x168   :  { %v3713_v11 = vmax.f32 %v830_v37, %v1179_v42  ;;  %v2401_v6 = vpop.f32.mrb[56].mxu0 }
 0x169   :  { %v1194_v19 = vadd.f32 %v2401_v6, %v2176_v18  ;;  %v1188_v5 = vpop.f32.mrb[57].mxu0  ;;  %v2177_v20 = vpop.f32.mrb[68].mxu1 }
 0x16a   :  { %v1189_v58 = vadd.f32 %v2173_v60, %v1188_v5  ;;  %v2178_v22 = vpop.f32.mrb[69].mxu1 }
 0x16b   :  { %v3718_v26 = vmax.f32 %v833_v59, %v1194_v19  ;;  %v2179_v34 = vadd.f32 %v2178_v22, %v2177_v20 }
 0x16c   :  { %v3723_v33 = vmax.f32 %v832_v49, %v1189_v58  ;;  %v2404_v21 = vpop.f32.mrb[58].mxu0  ;;  %v3871_v58 = vmax.f32 %v3597_v43, %v3667_v47 }
 0x16d   :  { %v2180_v25 = vpop.f32.mrb[70].mxu1  ;;  %v1198_v17 = vpop.f32.mrb[59].mxu0 }
 0x16e   :  { %v2181_v37 = vpop.f32.mrb[71].mxu1  ;;  %v1199_v27 = vadd.f32 %v2179_v34, %v1198_v17 }
 0x16f   :  { %v2182_v54 = vadd.f32 %v2181_v37, %v2180_v25 }
 0x170   :  { %v3728_v36 = vmax.f32 %v834_v13, %v1199_v27  ;;  %v2407_v30 = vpop.f32.mrb[60].mxu0 }
 0x171   :  { %v1204_v35 = vadd.f32 %v2404_v21, %v2182_v54  ;;  %v2183_v59 = vpop.f32.mrb[72].mxu1  ;;  %v1208_v44 = vpop.f32.mrb[61].mxu0 }
 0x172   :  { %v2184_v61 = vpop.f32.mrb[73].mxu1 }
 0x173   :  { %v3733_v0 = vmax.f32 %v835_v55, %v1204_v35  ;;  %v2185_v1 = vadd.f32 %v2184_v61, %v2183_v59  ;;  %v3870_v55 = vmax.f32 %v3589_v24, %v3658_v8 }
 0x174   :  { %v2410_v49 = vpop.f32.mrb[62].mxu0 }
 0x175   :  { %v1209_v28 = vadd.f32 %v2185_v1, %v1208_v44  ;;  %v2186_v15 = vpop.f32.mrb[74].mxu1  ;;  %v1218_v45 = vpop.f32.mrb[63].mxu0 }
 0x176   :  { %v2187_v38 = vpop.f32.mrb[75].mxu1 }
 0x177   :  { %v3738_v2 = vmax.f32 %v3869_v51, %v1209_v28  ;;  %v2188_v13 = vadd.f32 %v2187_v38, %v2186_v15 }
 0x178   :  { %v2247_v50 = vpop.f32.mrb[64].mxu0 }
 0x179   :  { %v1214_v53 = vadd.f32 %v2407_v30, %v2188_v13  ;;  %v2189_v57 = vpop.f32.mrb[76].mxu1  ;;  %v2248_v10 = vpop.f32.mrb[65].mxu0 }
 0x17a   :  { %v2190_v14 = vpop.f32.mrb[77].mxu1  ;;  %v2249_v32 = vadd.f32 %v2248_v10, %v2247_v50 }
 0x17b   :  { %v2191_v16 = vadd.f32 %v2190_v14, %v2189_v57  ;;  %v3743_v60 = vmax.f32 %v3870_v55, %v1214_v53 }
 0x17c   :  { %v2250_v7 = vpop.f32.mrb[66].mxu0 }
 0x17d   :  { %v1219_v62 = vadd.f32 %v2191_v16, %v1218_v45  ;;  %v2192_v52 = vpop.f32.mrb[78].mxu1  ;;  %v2251_v9 = vpop.f32.mrb[67].mxu0 }
 0x17e   :  { %v2193_v56 = vpop.f32.mrb[79].mxu1  ;;  %v2252_v23 = vadd.f32 %v2251_v9, %v2250_v7 }
 0x17f   :  { %v2194_v42 = vadd.f32 %v2193_v56, %v2192_v52  ;;  %v3748_v39 = vmax.f32 %v838_v63, %v1219_v62 }
 0x180   :  { %v2253_v18 = vpop.f32.mrb[68].mxu0 }
 0x181   :  { %v1224_v6 = vadd.f32 %v2410_v49, %v2194_v42  ;;  %v2254_v19 = vpop.f32.mrb[69].mxu0  ;;  %v2286_v5 = vpop.f32.mrb[80].mxu1  ;;  %v3764_v49 = vld [vmem:[%s3867_s2] ss:$0 sm:$0xff] }
 0x182   :  { %v2255_v20 = vadd.f32 %v2254_v19, %v2253_v18  ;;  %v2287_v24 = vpop.f32.mrb[81].mxu1 }
 0x183   :  { %v3750_v8 = vadd.f32 %v2287_v24, %v2286_v5  ;;  %v3755_v22 = vmax.f32 %v3871_v58, %v1224_v6 }
 0x184   :  { %v2256_v34 = vpop.f32.mrb[70].mxu0 }
 0x185   :  { %v2257_v21 = vpop.f32.mrb[71].mxu0  ;;  %v2289_v25 = vpop.f32.mrb[82].mxu1 }
 0x186   :  { %v2258_v17 = vadd.f32 %v2257_v21, %v2256_v34  ;;  %v2290_v29 = vpop.f32.mrb[83].mxu1 }
 0x187   :  { %v3757_v40 = vadd.f32 %v2290_v29, %v2289_v25 }
 0x188   :  { %v2259_v63 = vpop.f32.mrb[72].mxu0 }
 0x189   :  { %v2260_v37 = vpop.f32.mrb[73].mxu0  ;;  %v2292_v27 = vpop.f32.mrb[84].mxu1 }
 0x18a   :  { %v2261_v54 = vadd.f32 %v2260_v37, %v2259_v63  ;;  %v2293_v30 = vpop.f32.mrb[85].mxu1 }
 0x18b   :  { %v3759_v35 = vadd.f32 %v2293_v30, %v2292_v27 }
 0x18c   :  { %v2262_v59 = vpop.f32.mrb[74].mxu0 }
 0x18d   :  { %v2421_v44 = vpop.f32.mrb[86].mxu1  ;;  %v2263_v61 = vpop.f32.mrb[75].mxu0 }
 0x18e   :  { %v1557_v43 = vadd.f32 %v2421_v44, %v2252_v23  ;;  %v2264_v47 = vadd.f32 %v2263_v61, %v2262_v59  ;;  %v1551_v1 = vpop.f32.mrb[87].mxu1 }
 0x18f   :  { %v1552_v28 = vadd.f32 %v2249_v32, %v1551_v1 }
 0x190   :  { %v1631_v15 = vmax.f32 %v3678_v4, %v1557_v43  ;;  %v2265_v45 = vpop.f32.mrb[76].mxu0 }
 0x191   :  { %v1630_v38 = vmax.f32 %v3683_v48, %v1552_v28  ;;  %v2424_v51 = vpop.f32.mrb[88].mxu1  ;;  %v2266_v13 = vpop.f32.mrb[77].mxu0 }
 0x192   :  { %v1654_v50 = vadd.f32 %v3764_v49, %v1631_v15  ;;  %v1567_v53 = vadd.f32 %v2424_v51, %v2258_v17  ;;  %v2267_v57 = vadd.f32 %v2266_v13, %v2265_v45  ;;  %v1561_v10 = vpop.f32.mrb[89].mxu1 }
 0x193   :  { %v1653_v14 = vadd.f32 %v3764_v49, %v1630_v38  ;;  %v1562_v16 = vadd.f32 %v2255_v20, %v1561_v10 }
 0x194   :  { %v1670_v55 = vmax.f32 %v1654_v50, 0.0  ;;  %v1633_v7 = vmax.f32 %v3688_v12, %v1567_v53  ;;  %v2268_v32 = vpop.f32.mrb[78].mxu0 }
 0x195   :  { %v1669_v62 = vmax.f32 %v1653_v14, 0.0  ;;  %v1632_v4 = vmax.f32 %v3693_v46, %v1562_v16  ;;  %v2427_v52 = vpop.f32.mrb[90].mxu1  ;;  %v2269_v48 = vpop.f32.mrb[79].mxu0 }
 0x196   :  { %1687 = vst.msk [vmem:[%s3868_s3 + $0x8] sm:$0xff] %vm1685_vm1, %v1670_v55  ;;  %v1656_v9 = vadd.f32 %v3764_v49, %v1633_v7  ;;  %v1577_v56 = vadd.f32 %v2427_v52, %v2264_v47  ;;  %v2270_v23 = vadd.f32 %v2269_v48, %v2268_v32  ;;  %v1571_v42 = vpop.f32.mrb[91].mxu1 }
 0x197   :  { %1686 = vst.msk [vmem:[%s3868_s3] sm:$0xff] %vm1685_vm1, %v1669_v62  ;;  %v1655_v12 = vadd.f32 %v3764_v49, %v1632_v4  ;;  %v1572_v46 = vadd.f32 %v2261_v54, %v1571_v42 }
 0x198   :  { %v1672_v18 = vmax.f32 %v1656_v9, 0.0  ;;  %v1635_v6 = vmax.f32 %v3698_v3, %v1577_v56  ;;  %v2271_v19 = vpop.f32.mrb[80].mxu0 }
 0x199   :  { %v1671_v5 = vmax.f32 %v1655_v12, 0.0  ;;  %v1634_v20 = vmax.f32 %v3703_v41, %v1572_v46  ;;  %v2430_v24 = vpop.f32.mrb[92].mxu1  ;;  %v2272_v58 = vpop.f32.mrb[81].mxu0 }
 0x19a   :  { %1689 = vst.msk [vmem:[%s3868_s3 + $0x18] sm:$0xff] %vm1685_vm1, %v1672_v18  ;;  %v1658_v34 = vadd.f32 %v3764_v49, %v1635_v6  ;;  %v1587_v21 = vadd.f32 %v2430_v24, %v2270_v23  ;;  %v2273_v25 = vadd.f32 %v2272_v58, %v2271_v19  ;;  %v1581_v17 = vpop.f32.mrb[93].mxu1 }
 0x19b   :  { %1688 = vst.msk [vmem:[%s3868_s3 + $0x10] sm:$0xff] %vm1685_vm1, %v1671_v5  ;;  %v1657_v3 = vadd.f32 %v3764_v49, %v1634_v20  ;;  %v1582_v41 = vadd.f32 %v2267_v57, %v1581_v17 }
 0x19c   :  { %v1674_v29 = vmax.f32 %v1658_v34, 0.0  ;;  %v1637_v63 = vmax.f32 %v3708_v31, %v1587_v21  ;;  %v2274_v37 = vpop.f32.mrb[82].mxu0 }
 0x19d   :  { %v1673_v27 = vmax.f32 %v1657_v3, 0.0  ;;  %v1636_v54 = vmax.f32 %v3713_v11, %v1582_v41  ;;  %v2433_v30 = vpop.f32.mrb[94].mxu1  ;;  %v2275_v59 = vpop.f32.mrb[83].mxu0 }
 0x19e   :  { %1691 = vst.msk [vmem:[%s3868_s3 + $0x28] sm:$0xff] %vm1685_vm1, %v1674_v29  ;;  %v1660_v44 = vadd.f32 %v3764_v49, %v1637_v63  ;;  %v2276_v61 = vadd.f32 %v2275_v59, %v2274_v37  ;;  %v1591_v43 = vpop.f32.mrb[95].mxu1 }
 0x19f   :  { %1690 = vst.msk [vmem:[%s3868_s3 + $0x20] sm:$0xff] %vm1685_vm1, %v1673_v27  ;;  %v1659_v31 = vadd.f32 %v3764_v49, %v1636_v54  ;;  %v1592_v47 = vadd.f32 %v2273_v25, %v1591_v43 }
 0x1a0   :  { %v1676_v11 = vmax.f32 %v1660_v44, 0.0  ;;  %v1597_v1 = vadd.f32 %v2433_v30, %v2276_v61  ;;  %v2277_v28 = vpop.f32.mrb[84].mxu0 }
 0x1a1   :  { %v1675_v15 = vmax.f32 %v1659_v31, 0.0  ;;  %v1638_v45 = vmax.f32 %v3723_v33, %v1592_v47  ;;  %v2278_v38 = vpop.f32.mrb[85].mxu0  ;;  %v2436_v51 = vpop.f32.mrb[96].mxu1 }
 0x1a2   :  { %1693 = vst.msk [vmem:[%s3868_s3 + $0x38] sm:$0xff] %vm1685_vm1, %v1676_v11  ;;  %v1639_v13 = vmax.f32 %v3718_v26, %v1597_v1  ;;  %v2279_v50 = vadd.f32 %v2278_v38, %v2277_v28  ;;  %v1601_v53 = vpop.f32.mrb[97].mxu1 }
 0x1a3   :  { %1692 = vst.msk [vmem:[%s3868_s3 + $0x30] sm:$0xff] %vm1685_vm1, %v1675_v15  ;;  %v1661_v57 = vadd.f32 %v3764_v49, %v1638_v45 }
 0x1a4   :  { %v1662_v33 = vadd.f32 %v3764_v49, %v1639_v13  ;;  %v1602_v10 = vadd.f32 %v2279_v50, %v1601_v53  ;;  %v2280_v14 = vpop.f32.mrb[86].mxu0 }
 0x1a5   :  { %v1677_v16 = vmax.f32 %v1661_v57, 0.0  ;;  %v2439_v55 = vpop.f32.mrb[98].mxu1  ;;  %v2281_v7 = vpop.f32.mrb[87].mxu0 }
 0x1a6   :  { %v1678_v32 = vmax.f32 %v1662_v33, 0.0  ;;  %v1640_v62 = vmax.f32 %v3728_v36, %v1602_v10  ;;  %v1617_v26 = vadd.f32 %v2439_v55, %v3750_v8  ;;  %v2282_v4 = vadd.f32 %v2281_v7, %v2280_v14  ;;  %v1611_v52 = vpop.f32.mrb[99].mxu1 }
 0x1a7   :  { %1694 = vst.msk [vmem:[%s3868_s3 + $0x40] sm:$0xff] %vm1685_vm1, %v1677_v16 }
 0x1a8   :  { %1695 = vst.msk [vmem:[%s3868_s3 + $0x48] sm:$0xff] %vm1685_vm1, %v1678_v32  ;;  %v1663_v48 = vadd.f32 %v3764_v49, %v1640_v62  ;;  %v1643_v9 = vmax.f32 %v3743_v60, %v1617_v26  ;;  %v1607_v56 = vadd.f32 %v2436_v51, %v2282_v4  ;;  %v2283_v36 = vpop.f32.mrb[88].mxu0 }
 0x1a9   :  { %v2442_v23 = vpop.f32.mrb[100].mxu1  ;;  %v2284_v8 = vpop.f32.mrb[89].mxu0 }
 0x1aa   :  { %v1679_v42 = vmax.f32 %v1663_v48, 0.0  ;;  %v1666_v12 = vadd.f32 %v3764_v49, %v1643_v9  ;;  %v1641_v46 = vmax.f32 %v3733_v0, %v1607_v56  ;;  %v1627_v18 = vadd.f32 %v2442_v23, %v3759_v35  ;;  %v1621_v6 = vpop.f32.mrb[101].mxu1 }
 0x1ab   :  { %v2285_v19 = vadd.f32 %v2284_v8, %v2283_v36  ;;  %v1622_v5 = vadd.f32 %v3757_v40, %v1621_v6 }
 0x1ac   :  { %1696 = vst.msk [vmem:[%s3868_s3 + $0x50] sm:$0xff] %vm1685_vm1, %v1679_v42  ;;  %v1682_v60 = vmax.f32 %v1666_v12, 0.0  ;;  %v1664_v20 = vadd.f32 %v3764_v49, %v1641_v46  ;;  %v1645_v24 = vmax.f32 %v3755_v22, %v1627_v18 }
 0x1ad   :  { %v1612_v58 = vadd.f32 %v2285_v19, %v1611_v52  ;;  %v1644_v34 = vmax.f32 %v3748_v39, %v1622_v5 }
 0x1ae   :  { %1699 = vst.msk [vmem:[%s3868_s3 + $0x68] sm:$0xff] %vm1685_vm1, %v1682_v60  ;;  %v1680_v0 = vmax.f32 %v1664_v20, 0.0  ;;  %v1668_v40 = vadd.f32 %v3764_v49, %v1645_v24 }
 0x1af   :  { %v1642_v35 = vmax.f32 %v3738_v2, %v1612_v58  ;;  %v1667_v21 = vadd.f32 %v3764_v49, %v1644_v34 }
 0x1b0   :  { %1697 = vst.msk [vmem:[%s3868_s3 + $0x58] sm:$0xff] %vm1685_vm1, %v1680_v0  ;;  %v1684_v22 = vmax.f32 %v1668_v40, 0.0 }
 0x1b1   :  { %v1665_v39 = vadd.f32 %v3764_v49, %v1642_v35  ;;  %v1683_v25 = vmax.f32 %v1667_v21, 0.0 }
 0x1b2   :  { %1701 = vst.msk [vmem:[%s3868_s3 + $0x78] sm:$0xff] %vm1685_vm1, %v1684_v22 }
 0x1b3   :  { %v1681_v17 = vmax.f32 %v1665_v39, 0.0  ;;  %1700 = vst.msk [vmem:[%s3868_s3 + $0x70] sm:$0xff] %vm1685_vm1, %v1683_v25 }
 0x1b5   :  { %1698 = vst.msk [vmem:[%s3868_s3 + $0x60] sm:$0xff] %vm1685_vm1, %v1681_v17 }

// kernel: test_cnn_forward.6
= control target key start
LH: loop header
LB: loop body
LE: loop exit
PB: predicated region body
PF: predicated region fallthrough
CT: control target
= control target key end

     0   :  { %vm106_vm0 = vcmask 523264   ;;  %s2909_s1 = inlined_call_operand.vmem [shape: f32[576,128], index: 1, kind: input, shape index: {}]   ;;  %s2910_s0 = inlined_call_operand.vmem [shape: f32[4,32,576], index: 0, kind: input, shape index: {}]   ;;  %s2911_s2 = inlined_call_operand.vmem [shape: f32[1,128], index: 2, kind: input, shape index: {}]   ;;  %s2912_s3 = inlined_call_operand.vmem [shape: f32[32,128], index: 3, kind: output, shape index: {}]  }
   0x1   :  { %v30_v0 = vld [vmem:[%s2909_s1 + $0x80] sm:$0xff]  ;;  %v31_v1 = vld [vmem:[%s2909_s1 + $0x88] sm:$0xff]  ;;  %v32_v11 = vld [vmem:[%s2909_s1 + $0x90] sm:$0xff] }
   0x2   :  { %v62_v2 = vld [vmem:[%s2909_s1 + $0x180] sm:$0xff]  ;;  %v2187_v3 = vpack.c.bf16 %v31_v1, %v30_v0  ;;  %v63_v4 = vld [vmem:[%s2909_s1 + $0x188] sm:$0xff]  ;;  %v33_v13 = vld [vmem:[%s2909_s1 + $0x98] sm:$0xff] }
   0x3   :  { %v14_v5 = vld [vmem:[%s2909_s1] sm:$0xff]  ;;  %v15_v6 = vld [vmem:[%s2909_s1 + $0x8] sm:$0xff]  ;;  %v2198_v7 = vpack.c.bf16 %v63_v4, %v62_v2  ;;  %v64_v14 = vld [vmem:[%s2909_s1 + $0x190] sm:$0xff]  ;;  %v2225_v16 = vpack.c.bf16 %v33_v13, %v32_v11 }
   0x4   :  { %v2200_v8 = vpack.c.bf16 %v15_v6, %v14_v5  ;;  %v46_v9 = vld [vmem:[%s2909_s1 + $0x100] sm:$0xff]  ;;  %v47_v10 = vld [vmem:[%s2909_s1 + $0x108] sm:$0xff]  ;;  %1839 = vmatprep.subr.bf16.mxu0 %v2187_v3  ;;  %v65_v15 = vld [vmem:[%s2909_s1 + $0x198] sm:$0xff] }
   0x5   :  { %v2212_v12 = vpack.c.bf16 %v47_v10, %v46_v9  ;;  %1871 = vmatprep.subr.bf16.mxu1 %v2198_v7  ;;  %v2227_v17 = vpack.c.bf16 %v65_v15, %v64_v14  ;;  %v16_v18 = vld [vmem:[%s2909_s1 + $0x10] sm:$0xff]  ;;  %v17_v19 = vld [vmem:[%s2909_s1 + $0x18] sm:$0xff]  ;;  %v34_v23 = vld [vmem:[%s2909_s1 + $0xa0] sm:$0xff] }
   0x6   :  { %1841 = vmatpush3.bf16.msra.mxu0 %v2200_v8  ;;  %v48_v20 = vld [vmem:[%s2909_s1 + $0x110] sm:$0xff]  ;;  %v2239_v21 = vpack.c.bf16 %v17_v19, %v16_v18  ;;  %v49_v22 = vld [vmem:[%s2909_s1 + $0x118] sm:$0xff]  ;;  %v35_v24 = vld [vmem:[%s2909_s1 + $0xa8] sm:$0xff] }
   0x7   :  { %1873 = vmatpush3.bf16.msra.mxu1 %v2212_v12  ;;  %1843 = vmatprep.subr.bf16.mxu0 %v2225_v16  ;;  %v2252_v25 = vpack.c.bf16 %v49_v22, %v48_v20  ;;  %v2254_v26 = vpack.c.bf16 %v35_v24, %v34_v23  ;;  %v66_v27 = vld [vmem:[%s2909_s1 + $0x1a0] sm:$0xff]  ;;  %v67_v28 = vld [vmem:[%s2909_s1 + $0x1a8] sm:$0xff]  ;;  %v36_v35 = vld [vmem:[%s2909_s1 + $0xb0] sm:$0xff] }
   0x8   :  { %1875 = vmatprep.subr.bf16.mxu1 %v2227_v17  ;;  %v18_v29 = vld [vmem:[%s2909_s1 + $0x20] sm:$0xff]  ;;  %v2265_v30 = vpack.c.bf16 %v67_v28, %v66_v27  ;;  %v19_v31 = vld [vmem:[%s2909_s1 + $0x28] sm:$0xff]  ;;  %v37_v36 = vld [vmem:[%s2909_s1 + $0xb8] sm:$0xff] }
   0x9   :  { %v50_v32 = vld [vmem:[%s2909_s1 + $0x120] sm:$0xff]  ;;  %v51_v33 = vld [vmem:[%s2909_s1 + $0x128] sm:$0xff]  ;;  %v2277_v34 = vpack.c.bf16 %v19_v31, %v18_v29  ;;  %v68_v37 = vld [vmem:[%s2909_s1 + $0x1b0] sm:$0xff]  ;;  %v2292_v39 = vpack.c.bf16 %v37_v36, %v36_v35 }
   0xa   :  { %1845 = vmatpush3.bf16.msra.mxu0 %v2239_v21  ;;  %v2290_v38 = vpack.c.bf16 %v51_v33, %v50_v32  ;;  %v69_v40 = vld [vmem:[%s2909_s1 + $0x1b8] sm:$0xff]  ;;  %v20_v41 = vld [vmem:[%s2909_s1 + $0x30] sm:$0xff]  ;;  %v38_v46 = vld [vmem:[%s2909_s1 + $0xc0] sm:$0xff] }
   0xb   :  { %1877 = vmatpush3.bf16.msra.mxu1 %v2252_v25  ;;  %1847 = vmatprep.subr.bf16.mxu0 %v2254_v26  ;;  %v21_v42 = vld [vmem:[%s2909_s1 + $0x38] sm:$0xff]  ;;  %v2304_v43 = vpack.c.bf16 %v69_v40, %v68_v37  ;;  %v52_v44 = vld [vmem:[%s2909_s1 + $0x130] sm:$0xff]  ;;  %v39_v47 = vld [vmem:[%s2909_s1 + $0xc8] sm:$0xff] }
   0xc   :  { %1879 = vmatprep.subr.bf16.mxu1 %v2265_v30  ;;  %v53_v45 = vld [vmem:[%s2909_s1 + $0x138] sm:$0xff]  ;;  %v70_v48 = vld [vmem:[%s2909_s1 + $0x1c0] sm:$0xff]  ;;  %v71_v49 = vld [vmem:[%s2909_s1 + $0x1c8] sm:$0xff]  ;;  %v2325_v50 = vpack.c.bf16 %v21_v42, %v20_v41  ;;  %v2331_v52 = vpack.c.bf16 %v39_v47, %v38_v46 }
   0xd   :  { %v2329_v51 = vpack.c.bf16 %v53_v45, %v52_v44  ;;  %v22_v53 = vld [vmem:[%s2909_s1 + $0x40] sm:$0xff]  ;;  %v23_v54 = vld [vmem:[%s2909_s1 + $0x48] sm:$0xff]  ;;  %v2343_v56 = vpack.c.bf16 %v71_v49, %v70_v48  ;;  %v40_v58 = vld [vmem:[%s2909_s1 + $0xd0] sm:$0xff] }
   0xe   :  { %1849 = vmatpush3.bf16.msra.mxu0 %v2277_v34  ;;  %v54_v55 = vld [vmem:[%s2909_s1 + $0x140] sm:$0xff]  ;;  %v55_v57 = vld [vmem:[%s2909_s1 + $0x148] sm:$0xff]  ;;  %v41_v59 = vld [vmem:[%s2909_s1 + $0xd8] sm:$0xff]  ;;  %v2361_v62 = vpack.c.bf16 %v23_v54, %v22_v53 }
   0xf   :  { %1881 = vmatpush3.bf16.msra.mxu1 %v2290_v38  ;;  %1851 = vmatprep.subr.bf16.mxu0 %v2292_v39  ;;  %v72_v60 = vld [vmem:[%s2909_s1 + $0x1d0] sm:$0xff]  ;;  %v73_v61 = vld [vmem:[%s2909_s1 + $0x1d8] sm:$0xff]  ;;  %v2365_v63 = vpack.c.bf16 %v55_v57, %v54_v55  ;;  %v2367_v0 = vpack.c.bf16 %v41_v59, %v40_v58  ;;  %v42_v9 = vld [vmem:[%s2909_s1 + $0xe0] sm:$0xff] }
  0x10   :  { %1883 = vmatprep.subr.bf16.mxu1 %v2304_v43  ;;  %v24_v1 = vld [vmem:[%s2909_s1 + $0x50] sm:$0xff]  ;;  %v25_v2 = vld [vmem:[%s2909_s1 + $0x58] sm:$0xff]  ;;  %v2379_v5 = vpack.c.bf16 %v73_v61, %v72_v60  ;;  %v43_v10 = vld [vmem:[%s2909_s1 + $0xe8] sm:$0xff] }
  0x11   :  { %v56_v4 = vld [vmem:[%s2909_s1 + $0x150] sm:$0xff]  ;;  %v57_v6 = vld [vmem:[%s2909_s1 + $0x158] sm:$0xff]  ;;  %v74_v11 = vld [vmem:[%s2909_s1 + $0x1e0] sm:$0xff]  ;;  %v2397_v14 = vpack.c.bf16 %v25_v2, %v24_v1  ;;  %v2409_v20 = vpack.c.bf16 %v43_v10, %v42_v9 }
  0x12   :  { %1853 = vmatpush3.bf16.msra.mxu0 %v2325_v50  ;;  %v75_v13 = vld [vmem:[%s2909_s1 + $0x1e8] sm:$0xff]  ;;  %v26_v15 = vld [vmem:[%s2909_s1 + $0x60] sm:$0xff]  ;;  %v2407_v19 = vpack.c.bf16 %v57_v6, %v56_v4  ;;  %v89_v24 = vld [vmem:[%s2910_s0 + $0x18] sm:$0xff] }
  0x13   :  { %1885 = vmatpush3.bf16.msra.mxu1 %v2329_v51  ;;  %1855 = vmatprep.subr.bf16.mxu0 %v2331_v52  ;;  %v27_v18 = vld [vmem:[%s2909_s1 + $0x68] sm:$0xff]  ;;  %v58_v22 = vld [vmem:[%s2909_s1 + $0x160] sm:$0xff]  ;;  %v2421_v27 = vpack.c.bf16 %v75_v13, %v74_v11  ;;  %v44_v29 = vld [vmem:[%s2909_s1 + $0xf0] sm:$0xff] }
  0x14   :  { %1887 = vmatprep.subr.bf16.mxu1 %v2343_v56  ;;  %v87_v23 = vld [vmem:[%s2910_s0 + $0x8] sm:$0xff]  ;;  %v45_v31 = vld [vmem:[%s2909_s1 + $0xf8] sm:$0xff]  ;;  %v76_v32 = vld [vmem:[%s2909_s1 + $0x1f0] sm:$0xff]  ;;  %268 = vmatprep.mubr.f32.mxu1 %v89_v24  ;;  %v2439_v35 = vpack.c.bf16 %v27_v18, %v26_v15 }
  0x15   :  { %v59_v28 = vld [vmem:[%s2909_s1 + $0x168] sm:$0xff]  ;;  %183 = vmatprep.mubr.f32.mxu0 %v87_v23  ;;  %v77_v33 = vld [vmem:[%s2909_s1 + $0x1f8] sm:$0xff]  ;;  %v2445_v37 = vpack.c.bf16 %v45_v31, %v44_v29  ;;  %v28_v40 = vld [vmem:[%s2909_s1 + $0x70] sm:$0xff] }
  0x16   :  { %1857 = vmatpush3.bf16.msra.mxu0 %v2361_v62  ;;  %v2443_v36 = vpack.c.bf16 %v59_v28, %v58_v22  ;;  %v29_v41 = vld [vmem:[%s2909_s1 + $0x78] sm:$0xff]  ;;  %v60_v42 = vld [vmem:[%s2909_s1 + $0x170] sm:$0xff]  ;;  %v2457_v44 = vpack.c.bf16 %v77_v33, %v76_v32  ;;  %v78_v46 = vld [vmem:[%s2909_s1 + $0x200] sm:$0xff] }
  0x17   :  { %1889 = vmatpush3.bf16.msra.mxu1 %v2365_v63  ;;  %1859 = vmatprep.subr.bf16.mxu0 %v2367_v0  ;;  %v61_v45 = vld [vmem:[%s2909_s1 + $0x178] sm:$0xff]  ;;  %v79_v47 = vld [vmem:[%s2909_s1 + $0x208] sm:$0xff]  ;;  %v2469_v48 = vpack.c.bf16 %v29_v41, %v28_v40  ;;  %v80_v54 = vld [vmem:[%s2909_s1 + $0x210] sm:$0xff] }
  0x18   :  { %1891 = vmatprep.subr.bf16.mxu1 %v2379_v5  ;;  %v2473_v49 = vpack.c.bf16 %v61_v45, %v60_v42  ;;  %v2475_v53 = vpack.c.bf16 %v79_v47, %v78_v46  ;;  %v81_v55 = vld [vmem:[%s2909_s1 + $0x218] sm:$0xff]  ;;  %v86_v57 = vld [vmem:[%s2910_s0] sm:$0xff]  ;;  %v88_v58 = vld [vmem:[%s2910_s0 + $0x10] sm:$0xff] }
  0x19   :  { %v92_v59 = vld [vmem:[%s2910_s0 + $0x30] sm:$0xff]  ;;  %v2497_v60 = vpack.c.bf16 %v81_v55, %v80_v54  ;;  %v94_v61 = vld [vmem:[%s2910_s0 + $0x40] sm:$0xff]  ;;  %v83_v2 = vld [vmem:[%s2909_s1 + $0x228] sm:$0xff] }
  0x1a   :  { %1861 = vmatpush3.bf16.msra.mxu0 %v2397_v14  ;;  %v82_v1 = vld [vmem:[%s2909_s1 + $0x220] sm:$0xff]  ;;  %v91_v4 = vld [vmem:[%s2910_s0 + $0x28] sm:$0xff]  ;;  %v93_v6 = vld [vmem:[%s2910_s0 + $0x38] sm:$0xff] }
  0x1b   :  { %1893 = vmatpush3.bf16.msra.mxu1 %v2407_v19  ;;  %1863 = vmatprep.subr.bf16.mxu0 %v2409_v20  ;;  %v97_v9 = vld [vmem:[%s2910_s0 + $0x58] sm:$0xff]  ;;  %v2520_v10 = vpack.c.bf16 %v83_v2, %v82_v1  ;;  %v99_v11 = vld [vmem:[%s2910_s0 + $0x68] sm:$0xff]  ;;  %v84_v13 = vld [vmem:[%s2909_s1 + $0x230] sm:$0xff] }
  0x1c   :  { %1895 = vmatprep.subr.bf16.mxu1 %v2421_v27  ;;  %v85_v15 = vld [vmem:[%s2909_s1 + $0x238] sm:$0xff]  ;;  %v96_v18 = vld [vmem:[%s2910_s0 + $0x50] sm:$0xff]  ;;  %v98_v22 = vld [vmem:[%s2910_s0 + $0x60] sm:$0xff] }
  0x1d   :  { %v102_v23 = vld [vmem:[%s2910_s0 + $0x80] sm:$0xff]  ;;  %v2544_v24 = vpack.c.bf16 %v85_v15, %v84_v13  ;;  %v104_v28 = vld [vmem:[%s2910_s0 + $0x90] sm:$0xff]  ;;  %v101_v29 = vld [vmem:[%s2910_s0 + $0x78] sm:$0xff] }
  0x1e   :  { %1865 = vmatpush3.bf16.msra.mxu0 %v2439_v35  ;;  %v103_v31 = vld [vmem:[%s2910_s0 + $0x88] sm:$0xff]  ;;  %v90_v32 = vld [vmem:[%s2910_s0 + $0x20] sm:$0xff]  ;;  %v100_v41 = vld [vmem:[%s2910_s0 + $0x70] sm:$0xff] }
  0x1f   :  { %1897 = vmatpush3.bf16.msra.mxu1 %v2443_v36  ;;  %1867 = vmatprep.subr.bf16.mxu0 %v2445_v37  ;;  %v95_v33 = vld [vmem:[%s2910_s0 + $0x48] sm:$0xff]  ;;  %v105_v42 = vld [vmem:[%s2910_s0 + $0x98] sm:$0xff]  ;;  %v1277_v46 = vld [vmem:[%s2910_s0 + $0xa0] sm:$0xff] }
  0x20   :  { %1899 = vmatprep.subr.bf16.mxu1 %v2457_v44  ;;  %v1278_v40 = vld [vmem:[%s2910_s0 + $0xa8] sm:$0xff]  ;;  %v1280_v45 = vld [vmem:[%s2910_s0 + $0xb8] sm:$0xff]  ;;  %v1283_v47 = vld [vmem:[%s2910_s0 + $0xd0] sm:$0xff] }
  0x21   :  { %v1282_v54 = vld [vmem:[%s2910_s0 + $0xc8] sm:$0xff]  ;;  %v1288_v55 = vld [vmem:[%s2910_s0 + $0xf8] sm:$0xff]  ;;  %v1279_v1 = vld [vmem:[%s2910_s0 + $0xb0] sm:$0xff] }
  0x22   :  { %1869 = vmatpush3.bf16.msra.mxu0 %v2469_v48  ;;  %v1286_v2 = vld [vmem:[%s2910_s0 + $0xe8] sm:$0xff]  ;;  %v1296_v13 = vld [vmem:[%s2910_s0 + $0x138] sm:$0xff]  ;;  %v1289_v15 = vld [vmem:[%s2910_s0 + $0x100] sm:$0xff] }
  0x23   :  { %1901 = vmatpush3.bf16.msra.mxu1 %v2473_v49  ;;  %1903 = vmatprep.subr.bf16.mxu0 %v2475_v53 }
  0x24   :  { %1919 = vmatprep.subr.bf16.mxu1 %v2187_v3 }
  0x25   :  { %184 = vmatmul.mubr.f32.vlgmr.msra.gmra.mrb[0].mxu0 %v86_v57  ;;  %v1287_v57 = vld [vmem:[%s2910_s0 + $0xf0] sm:$0xff] }
  0x26   :  { %269 = vmatmul.mubr.f32.vlgmr.msra.gmra.mrb[0].mxu1 %v88_v58  ;;  %1905 = vmatpush3.bf16.msra.mxu0 %v2475_v53  ;;  %v1293_v58 = vld [vmem:[%s2910_s0 + $0x120] sm:$0xff] }
  0x27   :  { %1921 = vmatpush3.bf16.msra.mxu1 %v2200_v8  ;;  %188 = vmatprep.mubr.f32.mxu0 %v92_v59  ;;  %v1292_v59 = vld [vmem:[%s2910_s0 + $0x118] sm:$0xff] }
  0x28   :  { %273 = vmatprep.mubr.f32.mxu1 %v94_v61  ;;  %1907 = vmatprep.subr.bf16.mxu0 %v2497_v60  ;;  %v1281_v61 = vld [vmem:[%s2910_s0 + $0xc0] sm:$0xff] }
  0x29   :  { %189 = vmatmul.mubr.f32.gmra.mrb[2].mxu0 %v91_v4  ;;  %1923 = vmatprep.subr.bf16.mxu1 %v2225_v16  ;;  %v1285_v4 = vld [vmem:[%s2910_s0 + $0xe0] sm:$0xff] }
  0x2a   :  { %274 = vmatmul.mubr.f32.gmra.mrb[2].mxu1 %v93_v6  ;;  %1909 = vmatpush3.bf16.msra.mxu0 %v2497_v60  ;;  %v1284_v6 = vld [vmem:[%s2910_s0 + $0xd8] sm:$0xff] }
  0x2b   :  { %1925 = vmatpush3.bf16.msra.mxu1 %v2239_v21  ;;  %193 = vmatprep.mubr.f32.mxu0 %v97_v9  ;;  %v1291_v9 = vld [vmem:[%s2910_s0 + $0x110] sm:$0xff] }
  0x2c   :  { %278 = vmatprep.mubr.f32.mxu1 %v99_v11  ;;  %1911 = vmatprep.subr.bf16.mxu0 %v2520_v10  ;;  %v1290_v11 = vld [vmem:[%s2910_s0 + $0x108] sm:$0xff] }
  0x2d   :  { %194 = vmatmul.mubr.f32.gmra.mrb[4].mxu0 %v96_v18  ;;  %1927 = vmatprep.subr.bf16.mxu1 %v2254_v26  ;;  %v1304_v18 = vld [vmem:[%s2910_s0 + $0x158] sm:$0xff] }
  0x2e   :  { %279 = vmatmul.mubr.f32.gmra.mrb[4].mxu1 %v98_v22  ;;  %1913 = vmatpush3.bf16.msra.mxu0 %v2520_v10  ;;  %v1295_v22 = vld [vmem:[%s2910_s0 + $0x130] sm:$0xff] }
  0x2f   :  { %1929 = vmatpush3.bf16.msra.mxu1 %v2277_v34  ;;  %198 = vmatprep.mubr.f32.mxu0 %v102_v23  ;;  %v1294_v23 = vld [vmem:[%s2910_s0 + $0x128] sm:$0xff] }
  0x30   :  { %283 = vmatprep.mubr.f32.mxu1 %v104_v28  ;;  %1915 = vmatprep.subr.bf16.mxu0 %v2544_v24  ;;  %v1302_v28 = vld [vmem:[%s2910_s0 + $0x148] sm:$0xff] }
  0x31   :  { %199 = vmatmul.mubr.f32.gmra.mrb[6].mxu0 %v101_v29  ;;  %1931 = vmatprep.subr.bf16.mxu1 %v2292_v39  ;;  %v1301_v29 = vld [vmem:[%s2910_s0 + $0x140] sm:$0xff] }
  0x32   :  { %284 = vmatmul.mubr.f32.gmra.mrb[6].mxu1 %v103_v31  ;;  %1917 = vmatpush3.bf16.msra.mxu0 %v2544_v24  ;;  %v1303_v31 = vld [vmem:[%s2910_s0 + $0x150] sm:$0xff] }
  0x33   :  { %1933 = vmatpush3.bf16.msra.mxu1 %v2325_v50  ;;  %1766 = vmatprep.mubr.msk.f32.mxu0 %vm106_vm0, %v90_v32  ;;  %v1307_v32 = vld [vmem:[%s2910_s0 + $0x170] sm:$0xff] }
  0x34   :  { %1935 = vmatprep.subr.bf16.mxu1 %v2331_v52  ;;  %1951 = vmatprep.subr.bf16.mxu0 %v2198_v7 }
  0x35   :  { %1767 = vmatmul.mubr.msk.f32.vlgmr.msra.gmra.mrb[8].mxu0 %vm106_vm0, %v95_v33  ;;  %471 = vmatprep.mubr.f32.mxu1 %v1278_v40  ;;  %v1309_v33 = vld [vmem:[%s2910_s0 + $0x180] sm:$0xff]  ;;  %v1306_v40 = vld [vmem:[%s2910_s0 + $0x168] sm:$0xff] }
  0x36   :  { %1953 = vmatpush3.bf16.msra.mxu0 %v2212_v12  ;;  %1769 = vmatprep.mubr.msk.f32.mxu0 %vm106_vm0, %v100_v41  ;;  %v1308_v41 = vld [vmem:[%s2910_s0 + $0x178] sm:$0xff] }
  0x37   :  { %1937 = vmatpush3.bf16.msra.mxu1 %v2361_v62  ;;  %1955 = vmatprep.subr.bf16.mxu0 %v2227_v17 }
  0x38   :  { %1939 = vmatprep.subr.bf16.mxu1 %v2367_v0 }
  0x39   :  { %1770 = vmatmul.mubr.msk.f32.gmra.mrb[10].mxu0 %vm106_vm0, %v105_v42  ;;  %v1314_v42 = vld [vmem:[%s2910_s0 + $0x1a8] sm:$0xff] }
  0x3a   :  { %1957 = vmatpush3.bf16.msra.mxu0 %v2252_v25  ;;  %556 = vmatprep.mubr.f32.mxu0 %v1280_v45  ;;  %v1311_v45 = vld [vmem:[%s2910_s0 + $0x190] sm:$0xff] }
  0x3b   :  { %1941 = vmatpush3.bf16.msra.mxu1 %v2397_v14  ;;  %1959 = vmatprep.subr.bf16.mxu0 %v2265_v30 }
  0x3c   :  { %1943 = vmatprep.subr.bf16.mxu1 %v2409_v20 }
  0x3e   :  { %1961 = vmatpush3.bf16.msra.mxu0 %v2290_v38 }
  0x3f   :  { %1945 = vmatpush3.bf16.msra.mxu1 %v2439_v35  ;;  %1963 = vmatprep.subr.bf16.mxu0 %v2304_v43 }
  0x40   :  { %1947 = vmatprep.subr.bf16.mxu1 %v2445_v37 }
  0x42   :  { %1965 = vmatpush3.bf16.msra.mxu0 %v2329_v51 }
  0x43   :  { %1949 = vmatpush3.bf16.msra.mxu1 %v2469_v48  ;;  %1967 = vmatprep.subr.bf16.mxu0 %v2343_v56 }
  0x44   :  { %1983 = vmatprep.subr.bf16.mxu1 %v2475_v53 }
  0x46   :  { %472 = vmatmul.mubr.f32.vlgmr.msra.gmra.mrb[8].mxu1 %v1277_v46  ;;  %1969 = vmatpush3.bf16.msra.mxu0 %v2365_v63  ;;  %v1319_v46 = vld [vmem:[%s2910_s0 + $0x1d0] sm:$0xff] }
  0x47   :  { %1985 = vmatpush3.bf16.msra.mxu1 %v2475_v53  ;;  %476 = vmatprep.mubr.f32.mxu1 %v1283_v47  ;;  %v1316_v47 = vld [vmem:[%s2910_s0 + $0x1b8] sm:$0xff] }
  0x48   :  { %1971 = vmatprep.subr.bf16.mxu0 %v2379_v5  ;;  %1987 = vmatprep.subr.bf16.mxu1 %v2497_v60 }
  0x4a   :  { %477 = vmatmul.mubr.f32.gmra.mrb[10].mxu1 %v1282_v54  ;;  %1973 = vmatpush3.bf16.msra.mxu0 %v2407_v19  ;;  %v1326_v54 = vld [vmem:[%s2910_s0 + $0x1e8] sm:$0xff] }
  0x4b   :  { %1989 = vmatpush3.bf16.msra.mxu1 %v2497_v60  ;;  %481 = vmatprep.mubr.f32.mxu1 %v1288_v55  ;;  %v1310_v55 = vld [vmem:[%s2910_s0 + $0x188] sm:$0xff] }
  0x4c   :  { %1975 = vmatprep.subr.bf16.mxu0 %v2421_v27  ;;  %1991 = vmatprep.subr.bf16.mxu1 %v2520_v10 }
  0x4e   :  { %482 = vmatmul.mubr.f32.gmra.mrb[12].mxu1 %v1287_v57  ;;  %1977 = vmatpush3.bf16.msra.mxu0 %v2443_v36 }
  0x4f   :  { %1993 = vmatpush3.bf16.msra.mxu1 %v2520_v10  ;;  %486 = vmatprep.mubr.f32.mxu1 %v1293_v58 }
  0x50   :  { %1979 = vmatprep.subr.bf16.mxu0 %v2457_v44  ;;  %1995 = vmatprep.subr.bf16.mxu1 %v2544_v24 }
  0x52   :  { %487 = vmatmul.mubr.f32.gmra.mrb[14].mxu1 %v1292_v59  ;;  %1981 = vmatpush3.bf16.msra.mxu0 %v2473_v49 }
  0x53   :  { %1997 = vmatpush3.bf16.msra.mxu1 %v2544_v24  ;;  %1788 = vmatprep.mubr.msk.f32.mxu1 %vm106_vm0, %v1281_v61 }
  0x54   :  { %1999 = vmatprep.subr.bf16.mxu0 %v2187_v3  ;;  %2031 = vmatprep.subr.bf16.mxu1 %v2198_v7 }
  0x55   :  { %557 = vmatmul.mubr.f32.vlgmr.msra.gmra.mrb[12].mxu0 %v1279_v1 }
  0x56   :  { %1789 = vmatmul.mubr.msk.f32.vlgmr.msra.gmra.mrb[16].mxu1 %vm106_vm0, %v1286_v2  ;;  %2001 = vmatpush3.bf16.msra.mxu0 %v2200_v8 }
  0x57   :  { %2033 = vmatpush3.bf16.msra.mxu1 %v2212_v12  ;;  %561 = vmatprep.mubr.f32.mxu0 %v1285_v4 }
  0x58   :  { %2003 = vmatprep.subr.bf16.mxu0 %v2225_v16  ;;  %2035 = vmatprep.subr.bf16.mxu1 %v2227_v17 }
  0x59   :  { %562 = vmatmul.mubr.f32.gmra.mrb[14].mxu0 %v1284_v6  ;;  %1791 = vmatprep.mubr.msk.f32.mxu1 %vm106_vm0, %v1291_v9 }
  0x5a   :  { %2005 = vmatpush3.bf16.msra.mxu0 %v2239_v21  ;;  %566 = vmatprep.mubr.f32.mxu0 %v1290_v11 }
  0x5b   :  { %2037 = vmatpush3.bf16.msra.mxu1 %v2252_v25  ;;  %2007 = vmatprep.subr.bf16.mxu0 %v2254_v26 }
  0x5c   :  { %2039 = vmatprep.subr.bf16.mxu1 %v2265_v30  ;;  %1792 = vmatmul.mubr.msk.f32.gmra.mrb[18].mxu1 %vm106_vm0, %v1296_v13 }
  0x5d   :  { %567 = vmatmul.mubr.f32.gmra.mrb[16].mxu0 %v1289_v15  ;;  %848 = vmatprep.mubr.f32.mxu1 %v1304_v18 }
  0x5e   :  { %2009 = vmatpush3.bf16.msra.mxu0 %v2277_v34  ;;  %571 = vmatprep.mubr.f32.mxu0 %v1295_v22 }
  0x5f   :  { %2041 = vmatpush3.bf16.msra.mxu1 %v2290_v38  ;;  %2011 = vmatprep.subr.bf16.mxu0 %v2292_v39 }
  0x60   :  { %2043 = vmatprep.subr.bf16.mxu1 %v2304_v43 }
  0x61   :  { %572 = vmatmul.mubr.f32.gmra.mrb[18].mxu0 %v1294_v23 }
  0x62   :  { %2013 = vmatpush3.bf16.msra.mxu0 %v2325_v50  ;;  %763 = vmatprep.mubr.f32.mxu0 %v1302_v28 }
  0x63   :  { %2045 = vmatpush3.bf16.msra.mxu1 %v2329_v51  ;;  %2015 = vmatprep.subr.bf16.mxu0 %v2331_v52 }
  0x64   :  { %2047 = vmatprep.subr.bf16.mxu1 %v2343_v56 }
  0x66   :  { %2017 = vmatpush3.bf16.msra.mxu0 %v2361_v62 }
  0x67   :  { %2049 = vmatpush3.bf16.msra.mxu1 %v2365_v63  ;;  %2019 = vmatprep.subr.bf16.mxu0 %v2367_v0 }
  0x68   :  { %2051 = vmatprep.subr.bf16.mxu1 %v2379_v5 }
  0x6a   :  { %2021 = vmatpush3.bf16.msra.mxu0 %v2397_v14 }
  0x6b   :  { %2053 = vmatpush3.bf16.msra.mxu1 %v2407_v19  ;;  %2023 = vmatprep.subr.bf16.mxu0 %v2409_v20 }
  0x6c   :  { %2055 = vmatprep.subr.bf16.mxu1 %v2421_v27 }
  0x6e   :  { %2025 = vmatpush3.bf16.msra.mxu0 %v2439_v35 }
  0x6f   :  { %2057 = vmatpush3.bf16.msra.mxu1 %v2443_v36  ;;  %2027 = vmatprep.subr.bf16.mxu0 %v2445_v37 }
  0x70   :  { %2059 = vmatprep.subr.bf16.mxu1 %v2457_v44 }
  0x72   :  { %2029 = vmatpush3.bf16.msra.mxu0 %v2469_v48 }
  0x73   :  { %2061 = vmatpush3.bf16.msra.mxu1 %v2473_v49  ;;  %2063 = vmatprep.subr.bf16.mxu0 %v2475_v53 }
  0x74   :  { %2079 = vmatprep.subr.bf16.mxu1 %v2187_v3  ;;  %v1312_v3 = vld [vmem:[%s2910_s0 + $0x198] sm:$0xff] }
  0x75   :  { %764 = vmatmul.mubr.f32.vlgmr.msra.gmra.mrb[20].mxu0 %v1301_v29 }
  0x76   :  { %849 = vmatmul.mubr.f32.vlgmr.msra.gmra.mrb[20].mxu1 %v1303_v31  ;;  %2065 = vmatpush3.bf16.msra.mxu0 %v2475_v53 }
  0x77   :  { %768 = vmatprep.mubr.f32.mxu0 %v1307_v32  ;;  %853 = vmatprep.mubr.f32.mxu1 %v1309_v33 }
  0x78   :  { %2067 = vmatprep.subr.bf16.mxu0 %v2497_v60  ;;  %2081 = vmatpush3.bf16.msra.mxu1 %v2200_v8  ;;  %v1313_v8 = vld [vmem:[%s2910_s0 + $0x1a0] sm:$0xff] }
  0x79   :  { %769 = vmatmul.mubr.f32.gmra.mrb[22].mxu0 %v1306_v40  ;;  %2083 = vmatprep.subr.bf16.mxu1 %v2225_v16  ;;  %v1317_v16 = vld [vmem:[%s2910_s0 + $0x1c0] sm:$0xff] }
  0x7a   :  { %854 = vmatmul.mubr.f32.gmra.mrb[22].mxu1 %v1308_v41  ;;  %2069 = vmatpush3.bf16.msra.mxu0 %v2497_v60 }
  0x7b   :  { %773 = vmatprep.mubr.f32.mxu0 %v1312_v3  ;;  %858 = vmatprep.mubr.f32.mxu1 %v1314_v42 }
  0x7c   :  { %2071 = vmatprep.subr.bf16.mxu0 %v2520_v10  ;;  %2085 = vmatpush3.bf16.msra.mxu1 %v2239_v21  ;;  %v1318_v21 = vld [vmem:[%s2910_s0 + $0x1c8] sm:$0xff] }
  0x7d   :  { %774 = vmatmul.mubr.f32.gmra.mrb[24].mxu0 %v1311_v45  ;;  %2087 = vmatprep.subr.bf16.mxu1 %v2254_v26  ;;  %v1305_v26 = vld [vmem:[%s2910_s0 + $0x160] sm:$0xff] }
  0x7e   :  { %859 = vmatmul.mubr.f32.gmra.mrb[24].mxu1 %v1313_v8  ;;  %2073 = vmatpush3.bf16.msra.mxu0 %v2520_v10 }
  0x7f   :  { %778 = vmatprep.mubr.f32.mxu0 %v1317_v16  ;;  %863 = vmatprep.mubr.f32.mxu1 %v1319_v46 }
  0x80   :  { %2075 = vmatprep.subr.bf16.mxu0 %v2544_v24  ;;  %2089 = vmatpush3.bf16.msra.mxu1 %v2277_v34  ;;  %v1315_v34 = vld [vmem:[%s2910_s0 + $0x1b0] sm:$0xff] }
  0x81   :  { %779 = vmatmul.mubr.f32.gmra.mrb[26].mxu0 %v1316_v47  ;;  %2091 = vmatprep.subr.bf16.mxu1 %v2292_v39  ;;  %v1320_v39 = vld [vmem:[%s2910_s0 + $0x1d8] sm:$0xff] }
  0x82   :  { %864 = vmatmul.mubr.f32.gmra.mrb[26].mxu1 %v1318_v21  ;;  %2077 = vmatpush3.bf16.msra.mxu0 %v2544_v24 }
  0x83   :  { %1810 = vmatprep.mubr.msk.f32.mxu0 %vm106_vm0, %v1305_v26  ;;  %2111 = vmatprep.subr.bf16.mxu0 %v2198_v7  ;;  %v1328_v7 = vld [vmem:[%s2910_s0 + $0x1f8] sm:$0xff] }
  0x84   :  { %2093 = vmatpush3.bf16.msra.mxu1 %v2325_v50  ;;  %1055 = vmatprep.mubr.f32.mxu1 %v1326_v54  ;;  %v1340_v50 = vld [vmem:[%s2910_s0 + $0x258] sm:$0xff] }
  0x85   :  { %1811 = vmatmul.mubr.msk.f32.vlgmr.msra.gmra.mrb[28].mxu0 %vm106_vm0, %v1310_v55  ;;  %2095 = vmatprep.subr.bf16.mxu1 %v2331_v52  ;;  %v1327_v52 = vld [vmem:[%s2910_s0 + $0x1f0] sm:$0xff] }
  0x86   :  { %2113 = vmatpush3.bf16.msra.mxu0 %v2212_v12  ;;  %1813 = vmatprep.mubr.msk.f32.mxu0 %vm106_vm0, %v1315_v34  ;;  %v1325_v12 = vld [vmem:[%s2910_s0 + $0x1e0] sm:$0xff] }
  0x87   :  { %2115 = vmatprep.subr.bf16.mxu0 %v2227_v17  ;;  %v1331_v17 = vld [vmem:[%s2910_s0 + $0x210] sm:$0xff] }
  0x88   :  { %2097 = vmatpush3.bf16.msra.mxu1 %v2361_v62  ;;  %v1334_v62 = vld [vmem:[%s2910_s0 + $0x228] sm:$0xff] }
  0x89   :  { %1814 = vmatmul.mubr.msk.f32.gmra.mrb[30].mxu0 %vm106_vm0, %v1320_v39  ;;  %2099 = vmatprep.subr.bf16.mxu1 %v2367_v0  ;;  %v1332_v0 = vld [vmem:[%s2910_s0 + $0x218] sm:$0xff] }
  0x8a   :  { %2117 = vmatpush3.bf16.msra.mxu0 %v2252_v25  ;;  %1140 = vmatprep.mubr.f32.mxu0 %v1328_v7  ;;  %v1330_v25 = vld [vmem:[%s2910_s0 + $0x208] sm:$0xff] }
  0x8b   :  { %2119 = vmatprep.subr.bf16.mxu0 %v2265_v30  ;;  %v1336_v30 = vld [vmem:[%s2910_s0 + $0x238] sm:$0xff] }
  0x8c   :  { %2101 = vmatpush3.bf16.msra.mxu1 %v2397_v14  ;;  %v1344_v14 = vld [vmem:[%s2910_s0 + $0x278] sm:$0xff] }
  0x8d   :  { %2103 = vmatprep.subr.bf16.mxu1 %v2409_v20  ;;  %v1343_v20 = vld [vmem:[%s2910_s0 + $0x270] sm:$0xff] }
  0x8e   :  { %2121 = vmatpush3.bf16.msra.mxu0 %v2290_v38  ;;  %v1335_v38 = vld [vmem:[%s2910_s0 + $0x230] sm:$0xff] }
  0x8f   :  { %2123 = vmatprep.subr.bf16.mxu0 %v2304_v43  ;;  %v1341_v43 = vld [vmem:[%s2910_s0 + $0x260] sm:$0xff] }
  0x90   :  { %2105 = vmatpush3.bf16.msra.mxu1 %v2439_v35 }
  0x91   :  { %2107 = vmatprep.subr.bf16.mxu1 %v2445_v37 }
  0x92   :  { %2125 = vmatpush3.bf16.msra.mxu0 %v2329_v51  ;;  %v1329_v51 = vld [vmem:[%s2910_s0 + $0x200] sm:$0xff] }
  0x93   :  { %2127 = vmatprep.subr.bf16.mxu0 %v2343_v56  ;;  %v1333_v56 = vld [vmem:[%s2910_s0 + $0x220] sm:$0xff] }
  0x94   :  { %2109 = vmatpush3.bf16.msra.mxu1 %v2469_v48 }
  0x95   :  { %2143 = vmatprep.subr.bf16.mxu1 %v2475_v53 }
  0x96   :  { %2129 = vmatpush3.bf16.msra.mxu0 %v2365_v63  ;;  %v1339_v63 = vld [vmem:[%s2910_s0 + $0x250] sm:$0xff] }
  0x97   :  { %1056 = vmatmul.mubr.f32.vlgmr.msra.gmra.mrb[28].mxu1 %v1325_v12  ;;  %2131 = vmatprep.subr.bf16.mxu0 %v2379_v5  ;;  %v1338_v5 = vld [vmem:[%s2910_s0 + $0x248] sm:$0xff] }
  0x98   :  { %2145 = vmatpush3.bf16.msra.mxu1 %v2475_v53  ;;  %1060 = vmatprep.mubr.f32.mxu1 %v1331_v17 }
  0x99   :  { %2147 = vmatprep.subr.bf16.mxu1 %v2497_v60 }
  0x9a   :  { %2133 = vmatpush3.bf16.msra.mxu0 %v2407_v19  ;;  %v1337_v19 = vld [vmem:[%s2910_s0 + $0x240] sm:$0xff] }
  0x9b   :  { %1061 = vmatmul.mubr.f32.gmra.mrb[30].mxu1 %v1330_v25  ;;  %2135 = vmatprep.subr.bf16.mxu0 %v2421_v27  ;;  %v1342_v27 = vld [vmem:[%s2910_s0 + $0x268] sm:$0xff] }
  0x9c   :  { %2149 = vmatpush3.bf16.msra.mxu1 %v2497_v60  ;;  %1065 = vmatprep.mubr.f32.mxu1 %v1336_v30 }
  0x9d   :  { %2151 = vmatprep.subr.bf16.mxu1 %v2520_v10 }
  0x9e   :  { %2137 = vmatpush3.bf16.msra.mxu0 %v2443_v36 }
  0x9f   :  { %1066 = vmatmul.mubr.f32.gmra.mrb[32].mxu1 %v1335_v38  ;;  %2139 = vmatprep.subr.bf16.mxu0 %v2457_v44 }
  0xa0   :  { %2153 = vmatpush3.bf16.msra.mxu1 %v2520_v10  ;;  %1070 = vmatprep.mubr.f32.mxu1 %v1341_v43 }
  0xa1   :  { %2155 = vmatprep.subr.bf16.mxu1 %v2544_v24 }
  0xa2   :  { %2141 = vmatpush3.bf16.msra.mxu0 %v2473_v49 }
  0xa3   :  { %1071 = vmatmul.mubr.f32.gmra.mrb[34].mxu1 %v1340_v50 }
  0xa4   :  { %2157 = vmatpush3.bf16.msra.mxu1 %v2544_v24  ;;  %1832 = vmatprep.mubr.msk.f32.mxu1 %vm106_vm0, %v1329_v51 }
  0xa5   :  { %1141 = vmatmul.mubr.f32.vlgmr.msra.gmra.mrb[32].mxu0 %v1327_v52 }
  0xa6   :  { %1145 = vmatprep.mubr.f32.mxu0 %v1333_v56 }
  0xa7   :  { %1833 = vmatmul.mubr.msk.f32.vlgmr.msra.gmra.mrb[36].mxu1 %vm106_vm0, %v1334_v62 }
  0xa8   :  { %1835 = vmatprep.mubr.msk.f32.mxu1 %vm106_vm0, %v1339_v63 }
  0xa9   :  { %1146 = vmatmul.mubr.f32.gmra.mrb[34].mxu0 %v1332_v0 }
  0xaa   :  { %1150 = vmatprep.mubr.f32.mxu0 %v1338_v5 }
  0xab   :  { %1836 = vmatmul.mubr.msk.f32.gmra.mrb[38].mxu1 %vm106_vm0, %v1344_v14 }
  0xad   :  { %1151 = vmatmul.mubr.f32.gmra.mrb[36].mxu0 %v1337_v19 }
  0xae   :  { %1155 = vmatprep.mubr.f32.mxu0 %v1343_v20 }
  0xb1   :  { %1156 = vmatmul.mubr.f32.gmra.mrb[38].mxu0 %v1342_v27 }
  0xf8   :  { %v1382_v35 = vpop.f32.mrb[0].mxu0 }
  0xf9   :  { %v1426_v36 = vpop.f32.mrb[0].mxu1  ;;  %v1383_v37 = vpop.f32.mrb[1].mxu0 }
  0xfa   :  { %v1384_v44 = vadd.f32 %v1383_v37, %v1382_v35  ;;  %v1427_v48 = vpop.f32.mrb[1].mxu1 }
  0xfb   :  { %v1428_v49 = vadd.f32 %v1427_v48, %v1426_v36 }
  0xfc   :  { %v1385_v53 = vpop.f32.mrb[2].mxu0 }
  0xfd   :  { %v1429_v60 = vpop.f32.mrb[2].mxu1  ;;  %v1386_v10 = vpop.f32.mrb[3].mxu0  ;;  %v271_v24 = vadd.f32 %v1428_v49, %v1384_v44 }
  0xfe   :  { %v1387_v57 = vadd.f32 %v1386_v10, %v1385_v53  ;;  %v1430_v58 = vpop.f32.mrb[3].mxu1 }
  0xff   :  { %v1431_v59 = vadd.f32 %v1430_v58, %v1429_v60 }
 0x100   :  { %v1388_v61 = vpop.f32.mrb[4].mxu0 }
 0x101   :  { %v1432_v1 = vpop.f32.mrb[4].mxu1  ;;  %v1389_v2 = vpop.f32.mrb[5].mxu0  ;;  %v276_v4 = vadd.f32 %v1431_v59, %v1387_v57 }
 0x102   :  { %v1390_v6 = vadd.f32 %v1389_v2, %v1388_v61  ;;  %v1433_v9 = vpop.f32.mrb[5].mxu1 }
 0x103   :  { %v1434_v11 = vadd.f32 %v1433_v9, %v1432_v1 }
 0x104   :  { %v1391_v13 = vpop.f32.mrb[6].mxu0 }
 0x105   :  { %v1435_v15 = vpop.f32.mrb[6].mxu1  ;;  %v1392_v18 = vpop.f32.mrb[7].mxu0  ;;  %v281_v22 = vadd.f32 %v1434_v11, %v1390_v6 }
 0x106   :  { %v1393_v23 = vadd.f32 %v1392_v18, %v1391_v13  ;;  %v1436_v28 = vpop.f32.mrb[7].mxu1 }
 0x107   :  { %v1437_v29 = vadd.f32 %v1436_v28, %v1435_v15 }
 0x108   :  { %v1768_v31 = vpop.f32.mrb[8].mxu0 }
 0x109   :  { %v2882_v32 = vadd.f32 %v1768_v31, %v276_v4  ;;  %v355_v33 = vpop.f32.mrb[9].mxu0  ;;  %v286_v40 = vadd.f32 %v1437_v29, %v1393_v23 }
 0x10a   :  { %v2884_v41 = vadd.f32 %v355_v33, %v271_v24 }
 0x10c   :  { %v1771_v3 = vpop.f32.mrb[10].mxu0 }
 0x10d   :  { %v2886_v42 = vadd.f32 %v1771_v3, %v286_v40  ;;  %v365_v45 = vpop.f32.mrb[11].mxu0 }
 0x10e   :  { %v2888_v8 = vadd.f32 %v365_v45, %v281_v22 }
 0x119   :  { %v1482_v16 = vpop.f32.mrb[8].mxu1 }
 0x11a   :  { %v1483_v46 = vpop.f32.mrb[9].mxu1 }
 0x11b   :  { %v1484_v47 = vadd.f32 %v1483_v46, %v1482_v16 }
 0x11d   :  { %v1485_v21 = vpop.f32.mrb[10].mxu1 }
 0x11e   :  { %v1486_v26 = vpop.f32.mrb[11].mxu1 }
 0x11f   :  { %v1487_v54 = vadd.f32 %v1486_v26, %v1485_v21 }
 0x121   :  { %v1488_v55 = vpop.f32.mrb[12].mxu1 }
 0x122   :  { %v1489_v34 = vpop.f32.mrb[13].mxu1 }
 0x123   :  { %v1490_v39 = vadd.f32 %v1489_v34, %v1488_v55 }
 0x125   :  { %v1491_v7 = vpop.f32.mrb[14].mxu1 }
 0x126   :  { %v1492_v12 = vpop.f32.mrb[15].mxu1 }
 0x127   :  { %v1493_v17 = vadd.f32 %v1492_v12, %v1491_v7 }
 0x128   :  { %v1526_v25 = vpop.f32.mrb[12].mxu0 }
 0x129   :  { %v1527_v30 = vpop.f32.mrb[13].mxu0  ;;  %v1790_v38 = vpop.f32.mrb[16].mxu1 }
 0x12a   :  { %v1528_v43 = vadd.f32 %v1527_v30, %v1526_v25  ;;  %v643_v50 = vpop.f32.mrb[17].mxu1 }
 0x12c   :  { %v1529_v51 = vpop.f32.mrb[14].mxu0  ;;  %v559_v52 = vadd.f32 %v1528_v43, %v1484_v47 }
 0x12d   :  { %v1530_v56 = vpop.f32.mrb[15].mxu0 }
 0x12e   :  { %v1531_v62 = vadd.f32 %v1530_v56, %v1529_v51  ;;  %v644_v63 = vadd.f32 %v643_v50, %v559_v52 }
 0x12f   :  { %v1793_v0 = vpop.f32.mrb[18].mxu1 }
 0x130   :  { %v564_v5 = vadd.f32 %v1531_v62, %v1487_v54  ;;  %v662_v14 = vmax.f32 %v2884_v41, %v644_v63  ;;  %v1532_v19 = vpop.f32.mrb[16].mxu0  ;;  %v653_v20 = vpop.f32.mrb[19].mxu1 }
 0x131   :  { %v1533_v27 = vpop.f32.mrb[17].mxu0 }
 0x132   :  { %v649_v35 = vadd.f32 %v1790_v38, %v564_v5  ;;  %v1534_v36 = vadd.f32 %v1533_v27, %v1532_v19 }
 0x134   :  { %v1535_v37 = vpop.f32.mrb[18].mxu0  ;;  %v569_v44 = vadd.f32 %v1534_v36, %v1490_v39  ;;  %v663_v48 = vmax.f32 %v2882_v32, %v649_v35 }
 0x135   :  { %v1536_v49 = vpop.f32.mrb[19].mxu0 }
 0x136   :  { %v1537_v53 = vadd.f32 %v1536_v49, %v1535_v37  ;;  %v654_v60 = vadd.f32 %v653_v20, %v569_v44 }
 0x138   :  { %v574_v10 = vadd.f32 %v1537_v53, %v1493_v17  ;;  %v664_v24 = vmax.f32 %v2888_v8, %v654_v60 }
 0x13a   :  { %v659_v57 = vadd.f32 %v1793_v0, %v574_v10 }
 0x13c   :  { %v665_v58 = vmax.f32 %v2886_v42, %v659_v57 }
 0x148   :  { %v1582_v59 = vpop.f32.mrb[20].mxu0 }
 0x149   :  { %v1626_v61 = vpop.f32.mrb[20].mxu1  ;;  %v1583_v1 = vpop.f32.mrb[21].mxu0 }
 0x14a   :  { %v1584_v2 = vadd.f32 %v1583_v1, %v1582_v59  ;;  %v1627_v4 = vpop.f32.mrb[21].mxu1 }
 0x14b   :  { %v1628_v6 = vadd.f32 %v1627_v4, %v1626_v61 }
 0x14c   :  { %v1585_v9 = vpop.f32.mrb[22].mxu0 }
 0x14d   :  { %v1629_v11 = vpop.f32.mrb[22].mxu1  ;;  %v1586_v13 = vpop.f32.mrb[23].mxu0  ;;  %v851_v15 = vadd.f32 %v1628_v6, %v1584_v2 }
 0x14e   :  { %v1587_v18 = vadd.f32 %v1586_v13, %v1585_v9  ;;  %v1630_v22 = vpop.f32.mrb[23].mxu1 }
 0x14f   :  { %v1631_v23 = vadd.f32 %v1630_v22, %v1629_v11 }
 0x150   :  { %v1588_v28 = vpop.f32.mrb[24].mxu0 }
 0x151   :  { %v1632_v29 = vpop.f32.mrb[24].mxu1  ;;  %v1589_v31 = vpop.f32.mrb[25].mxu0  ;;  %v856_v32 = vadd.f32 %v1631_v23, %v1587_v18 }
 0x152   :  { %v1590_v33 = vadd.f32 %v1589_v31, %v1588_v28  ;;  %v1633_v40 = vpop.f32.mrb[25].mxu1 }
 0x153   :  { %v1634_v41 = vadd.f32 %v1633_v40, %v1632_v29 }
 0x154   :  { %v1591_v3 = vpop.f32.mrb[26].mxu0 }
 0x155   :  { %v1635_v42 = vpop.f32.mrb[26].mxu1  ;;  %v1592_v45 = vpop.f32.mrb[27].mxu0  ;;  %v861_v8 = vadd.f32 %v1634_v41, %v1590_v33 }
 0x156   :  { %v1593_v16 = vadd.f32 %v1592_v45, %v1591_v3  ;;  %v1636_v46 = vpop.f32.mrb[27].mxu1 }
 0x157   :  { %v1637_v47 = vadd.f32 %v1636_v46, %v1635_v42 }
 0x158   :  { %v1812_v21 = vpop.f32.mrb[28].mxu0 }
 0x159   :  { %v941_v26 = vadd.f32 %v1812_v21, %v856_v32  ;;  %v935_v54 = vpop.f32.mrb[29].mxu0  ;;  %v866_v55 = vadd.f32 %v1637_v47, %v1593_v16 }
 0x15a   :  { %v936_v34 = vadd.f32 %v935_v54, %v851_v15 }
 0x15b   :  { %v955_v39 = vmax.f32 %v663_v48, %v941_v26 }
 0x15c   :  { %v954_v7 = vmax.f32 %v662_v14, %v936_v34  ;;  %v1815_v12 = vpop.f32.mrb[30].mxu0 }
 0x15d   :  { %v951_v17 = vadd.f32 %v1815_v12, %v866_v55  ;;  %v945_v25 = vpop.f32.mrb[31].mxu0 }
 0x15e   :  { %v946_v30 = vadd.f32 %v945_v25, %v861_v8 }
 0x15f   :  { %v957_v38 = vmax.f32 %v665_v58, %v951_v17  ;;  %v1349_v58 = vld [vmem:[%s2911_s2] ss:$0 sm:$0xff] }
 0x160   :  { %v956_v43 = vmax.f32 %v664_v24, %v946_v30 }
 0x16a   :  { %v1682_v50 = vpop.f32.mrb[28].mxu1 }
 0x16b   :  { %v1683_v51 = vpop.f32.mrb[29].mxu1 }
 0x16c   :  { %v1684_v52 = vadd.f32 %v1683_v51, %v1682_v50 }
 0x16e   :  { %v1685_v56 = vpop.f32.mrb[30].mxu1 }
 0x16f   :  { %v1686_v62 = vpop.f32.mrb[31].mxu1 }
 0x170   :  { %v1687_v63 = vadd.f32 %v1686_v62, %v1685_v56 }
 0x172   :  { %v1688_v0 = vpop.f32.mrb[32].mxu1 }
 0x173   :  { %v1689_v5 = vpop.f32.mrb[33].mxu1 }
 0x174   :  { %v1690_v19 = vadd.f32 %v1689_v5, %v1688_v0 }
 0x176   :  { %v1691_v20 = vpop.f32.mrb[34].mxu1 }
 0x177   :  { %v1692_v27 = vpop.f32.mrb[35].mxu1 }
 0x178   :  { %v1726_v35 = vpop.f32.mrb[32].mxu0  ;;  %v1693_v36 = vadd.f32 %v1692_v27, %v1691_v20 }
 0x179   :  { %v1727_v14 = vpop.f32.mrb[33].mxu0 }
 0x17a   :  { %v1728_v37 = vadd.f32 %v1727_v14, %v1726_v35  ;;  %v1834_v44 = vpop.f32.mrb[36].mxu1 }
 0x17b   :  { %v1227_v48 = vpop.f32.mrb[37].mxu1 }
 0x17c   :  { %v1729_v49 = vpop.f32.mrb[34].mxu0  ;;  %v1143_v53 = vadd.f32 %v1728_v37, %v1684_v52 }
 0x17d   :  { %v1730_v60 = vpop.f32.mrb[35].mxu0 }
 0x17e   :  { %v1731_v10 = vadd.f32 %v1730_v60, %v1729_v49  ;;  %v1228_v24 = vadd.f32 %v1227_v48, %v1143_v53  ;;  %v1837_v57 = vpop.f32.mrb[38].mxu1 }
 0x17f   :  { %v1237_v59 = vpop.f32.mrb[39].mxu1 }
 0x180   :  { %v1148_v61 = vadd.f32 %v1731_v10, %v1687_v63  ;;  %v1246_v1 = vmax.f32 %v954_v7, %v1228_v24  ;;  %v1732_v2 = vpop.f32.mrb[36].mxu0 }
 0x181   :  { %v1733_v4 = vpop.f32.mrb[37].mxu0 }
 0x182   :  { %v1233_v6 = vadd.f32 %v1834_v44, %v1148_v61  ;;  %v1257_v9 = vadd.f32 %v1349_v58, %v1246_v1  ;;  %v1734_v11 = vadd.f32 %v1733_v4, %v1732_v2 }
 0x184   :  { %v1247_v13 = vmax.f32 %v955_v39, %v1233_v6  ;;  %v1261_v15 = vmax.f32 %v1257_v9, 0.0  ;;  %v1735_v18 = vpop.f32.mrb[38].mxu0  ;;  %v1153_v22 = vadd.f32 %v1734_v11, %v1690_v19 }
 0x185   :  { %v1736_v23 = vpop.f32.mrb[39].mxu0 }
 0x186   :  { %v1258_v28 = vadd.f32 %v1349_v58, %v1247_v13  ;;  %1265 = vst [vmem:[%s2912_s3] sm:$0xff] %v1261_v15  ;;  %v1737_v29 = vadd.f32 %v1736_v23, %v1735_v18  ;;  %v1238_v31 = vadd.f32 %v1237_v59, %v1153_v22 }
 0x188   :  { %v1262_v32 = vmax.f32 %v1258_v28, 0.0  ;;  %v1158_v33 = vadd.f32 %v1737_v29, %v1693_v36  ;;  %v1248_v40 = vmax.f32 %v956_v43, %v1238_v31 }
 0x18a   :  { %1266 = vst [vmem:[%s2912_s3 + $0x8] sm:$0xff] %v1262_v32  ;;  %v1243_v41 = vadd.f32 %v1837_v57, %v1158_v33  ;;  %v1259_v3 = vadd.f32 %v1349_v58, %v1248_v40 }
 0x18c   :  { %v1249_v42 = vmax.f32 %v957_v38, %v1243_v41  ;;  %v1263_v45 = vmax.f32 %v1259_v3, 0.0 }
 0x18e   :  { %v1260_v8 = vadd.f32 %v1349_v58, %v1249_v42  ;;  %1267 = vst [vmem:[%s2912_s3 + $0x10] sm:$0xff] %v1263_v45 }
 0x190   :  { %v1264_v16 = vmax.f32 %v1260_v8, 0.0 }
 0x192   :  { %1268 = vst [vmem:[%s2912_s3 + $0x18] sm:$0xff] %v1264_v16 }

// kernel: test_cnn_forward.7
= control target key start
LH: loop header
LB: loop body
LE: loop exit
PB: predicated region body
PF: predicated region fallthrough
CT: control target
= control target key end

     0   :  { %s3752_s0 = inlined_call_operand.vmem [shape: f32[2,2048], index: 0, kind: input, shape index: {}]   ;;  %s3753_s1 = inlined_call_operand.vmem [shape: f32[2048,256], index: 1, kind: input, shape index: {}]   ;;  %s3754_s2 = inlined_call_operand.vmem [shape: f32[1,256], index: 2, kind: input, shape index: {}]   ;;  %s3755_s3 = inlined_call_operand.vmem [shape: f32[2,256], index: 3, kind: input, shape index: {}]   ;;  %s3756_s4 = inlined_call_operand.vmem [shape: f32[256,128], index: 4, kind: input, shape index: {}]   ;;  %s3757_s5 = inlined_call_operand.vmem [shape: f32[1,128], index: 5, kind: input, shape index: {}]   ;;  %s3758_s6 = inlined_call_operand.hbm [shape: f32[2,128], index: 6, kind: output, shape index: {}]  }
   0x1   :  { %v29_v0 = vld [vmem:[%s3753_s1 + $0x8] sm:$0xff]  ;;  %v31_v1 = vld [vmem:[%s3753_s1 + $0x18] sm:$0xff]  ;;  %v28_v5 = vld [vmem:[%s3753_s1] sm:$0xff] }
   0x2   :  { %v285_v2 = vld [vmem:[%s3753_s1 + $0x808] sm:$0xff]  ;;  %v1385_v3 = vpack.c.bf16 %v31_v1, %v29_v0  ;;  %v287_v4 = vld [vmem:[%s3753_s1 + $0x818] sm:$0xff]  ;;  %v30_v6 = vld [vmem:[%s3753_s1 + $0x10] sm:$0xff] }
   0x3   :  { %v1641_v7 = vpack.c.bf16 %v287_v4, %v285_v2  ;;  %v1387_v8 = vpack.c.bf16 %v30_v6, %v28_v5  ;;  %v284_v9 = vld [vmem:[%s3753_s1 + $0x800] sm:$0xff]  ;;  %v286_v10 = vld [vmem:[%s3753_s1 + $0x810] sm:$0xff]  ;;  %v33_v11 = vld [vmem:[%s3753_s1 + $0x28] sm:$0xff] }
   0x4   :  { %1386 = vmatprep.subr.bf16.mxu1 %v1385_v3  ;;  %v1643_v12 = vpack.c.bf16 %v286_v10, %v284_v9  ;;  %v35_v13 = vld [vmem:[%s3753_s1 + $0x38] sm:$0xff]  ;;  %v289_v14 = vld [vmem:[%s3753_s1 + $0x828] sm:$0xff]  ;;  %v32_v18 = vld [vmem:[%s3753_s1 + $0x20] sm:$0xff] }
   0x5   :  { %v291_v15 = vld [vmem:[%s3753_s1 + $0x838] sm:$0xff]  ;;  %1642 = vmatprep.subr.bf16.mxu0 %v1641_v7  ;;  %1388 = vmatpush1.bf16.msra.mxu1 %v1387_v8  ;;  %v1389_v16 = vpack.c.bf16 %v35_v13, %v33_v11  ;;  %v34_v19 = vld [vmem:[%s3753_s1 + $0x30] sm:$0xff]  ;;  %v288_v20 = vld [vmem:[%s3753_s1 + $0x820] sm:$0xff] }
   0x6   :  { %v1645_v17 = vpack.c.bf16 %v291_v15, %v289_v14  ;;  %1644 = vmatpush1.bf16.msra.mxu0 %v1643_v12  ;;  %v1391_v21 = vpack.c.bf16 %v34_v19, %v32_v18  ;;  %v290_v22 = vld [vmem:[%s3753_s1 + $0x830] sm:$0xff]  ;;  %v37_v23 = vld [vmem:[%s3753_s1 + $0x48] sm:$0xff]  ;;  %v39_v24 = vld [vmem:[%s3753_s1 + $0x58] sm:$0xff] }
   0x7   :  { %1390 = vmatprep.subr.bf16.mxu1 %v1389_v16  ;;  %v1647_v25 = vpack.c.bf16 %v290_v22, %v288_v20  ;;  %v1393_v26 = vpack.c.bf16 %v39_v24, %v37_v23  ;;  %v293_v27 = vld [vmem:[%s3753_s1 + $0x848] sm:$0xff]  ;;  %v295_v28 = vld [vmem:[%s3753_s1 + $0x858] sm:$0xff]  ;;  %v36_v29 = vld [vmem:[%s3753_s1 + $0x40] sm:$0xff] }
   0x8   :  { %1646 = vmatprep.subr.bf16.mxu0 %v1645_v17  ;;  %v1649_v30 = vpack.c.bf16 %v295_v28, %v293_v27  ;;  %v38_v31 = vld [vmem:[%s3753_s1 + $0x50] sm:$0xff]  ;;  %v292_v32 = vld [vmem:[%s3753_s1 + $0x840] sm:$0xff]  ;;  %v41_v35 = vld [vmem:[%s3753_s1 + $0x68] sm:$0xff] }
   0x9   :  { %v294_v33 = vld [vmem:[%s3753_s1 + $0x850] sm:$0xff]  ;;  %1392 = vmatpush1.bf16.msra.mxu1 %v1391_v21  ;;  %v1395_v34 = vpack.c.bf16 %v38_v31, %v36_v29  ;;  %v43_v36 = vld [vmem:[%s3753_s1 + $0x78] sm:$0xff]  ;;  %v297_v37 = vld [vmem:[%s3753_s1 + $0x868] sm:$0xff] }
   0xa   :  { %1648 = vmatpush1.bf16.msra.mxu0 %v1647_v25  ;;  %1394 = vmatprep.subr.bf16.mxu1 %v1393_v26  ;;  %v1651_v38 = vpack.c.bf16 %v294_v33, %v292_v32  ;;  %v1397_v39 = vpack.c.bf16 %v43_v36, %v41_v35  ;;  %v299_v40 = vld [vmem:[%s3753_s1 + $0x878] sm:$0xff]  ;;  %v40_v41 = vld [vmem:[%s3753_s1 + $0x60] sm:$0xff]  ;;  %v42_v42 = vld [vmem:[%s3753_s1 + $0x70] sm:$0xff] }
   0xb   :  { %1650 = vmatprep.subr.bf16.mxu0 %v1649_v30  ;;  %v1653_v43 = vpack.c.bf16 %v299_v40, %v297_v37  ;;  %v296_v44 = vld [vmem:[%s3753_s1 + $0x860] sm:$0xff]  ;;  %v298_v45 = vld [vmem:[%s3753_s1 + $0x870] sm:$0xff]  ;;  %v45_v46 = vld [vmem:[%s3753_s1 + $0x88] sm:$0xff]  ;;  %v1399_v50 = vpack.c.bf16 %v42_v42, %v40_v41 }
   0xc   :  { %v47_v47 = vld [vmem:[%s3753_s1 + $0x98] sm:$0xff]  ;;  %v301_v48 = vld [vmem:[%s3753_s1 + $0x888] sm:$0xff]  ;;  %v1655_v51 = vpack.c.bf16 %v298_v45, %v296_v44  ;;  %v44_v53 = vld [vmem:[%s3753_s1 + $0x80] sm:$0xff] }
   0xd   :  { %v303_v49 = vld [vmem:[%s3753_s1 + $0x898] sm:$0xff]  ;;  %1396 = vmatpush1.bf16.msra.mxu1 %v1395_v34  ;;  %v1401_v52 = vpack.c.bf16 %v47_v47, %v45_v46  ;;  %v46_v54 = vld [vmem:[%s3753_s1 + $0x90] sm:$0xff]  ;;  %v300_v55 = vld [vmem:[%s3753_s1 + $0x880] sm:$0xff]  ;;  %v542_v46 = vlaneseq  ;;  %v1975_v47 = vmov 1983009808  }
   0xe   :  { %1652 = vmatpush1.bf16.msra.mxu0 %v1651_v38  ;;  %1398 = vmatprep.subr.bf16.mxu1 %v1397_v39  ;;  %v1657_v56 = vpack.c.bf16 %v303_v49, %v301_v48  ;;  %v302_v57 = vld [vmem:[%s3753_s1 + $0x890] sm:$0xff]  ;;  %v49_v58 = vld [vmem:[%s3753_s1 + $0xa8] sm:$0xff]  ;;  %v51_v59 = vld [vmem:[%s3753_s1 + $0xb8] sm:$0xff]  ;;  %v1403_v62 = vpack.c.bf16 %v46_v54, %v44_v53  ;;  %v558_v48 = vunpack.c.l.s4 %v1975_v47 }
   0xf   :  { %1654 = vmatprep.subr.bf16.mxu0 %v1653_v43  ;;  %v305_v60 = vld [vmem:[%s3753_s1 + $0x8a8] sm:$0xff]  ;;  %v307_v61 = vld [vmem:[%s3753_s1 + $0x8b8] sm:$0xff]  ;;  %v1659_v63 = vpack.c.bf16 %v302_v57, %v300_v55  ;;  %v1405_v0 = vpack.c.bf16 %v51_v59, %v49_v58  ;;  %v48_v1 = vld [vmem:[%s3753_s1 + $0xa0] sm:$0xff] }
  0x10   :  { %v50_v2 = vld [vmem:[%s3753_s1 + $0xb0] sm:$0xff]  ;;  %v304_v3 = vld [vmem:[%s3753_s1 + $0x8a0] sm:$0xff]  ;;  %v1661_v4 = vpack.c.bf16 %v307_v61, %v305_v60  ;;  %v53_v6 = vld [vmem:[%s3753_s1 + $0xc8] sm:$0xff]  ;;  %v2264_v61 = vshrl.u32 %v542_v46, 7 }
  0x11   :  { %1400 = vmatpush1.bf16.msra.mxu1 %v1399_v50  ;;  %v306_v5 = vld [vmem:[%s3753_s1 + $0x8b0] sm:$0xff]  ;;  %v55_v7 = vld [vmem:[%s3753_s1 + $0xd8] sm:$0xff]  ;;  %v309_v8 = vld [vmem:[%s3753_s1 + $0x8c8] sm:$0xff]  ;;  %v1407_v10 = vpack.c.bf16 %v50_v2, %v48_v1 }
  0x12   :  { %1656 = vmatpush1.bf16.msra.mxu0 %v1655_v51  ;;  %1402 = vmatprep.subr.bf16.mxu1 %v1401_v52  ;;  %v311_v9 = vld [vmem:[%s3753_s1 + $0x8d8] sm:$0xff]  ;;  %v1663_v11 = vpack.c.bf16 %v306_v5, %v304_v3  ;;  %v1409_v12 = vpack.c.bf16 %v55_v7, %v53_v6  ;;  %v52_v13 = vld [vmem:[%s3753_s1 + $0xc0] sm:$0xff]  ;;  %v54_v14 = vld [vmem:[%s3753_s1 + $0xd0] sm:$0xff] }
  0x13   :  { %1658 = vmatprep.subr.bf16.mxu0 %v1657_v56  ;;  %v308_v15 = vld [vmem:[%s3753_s1 + $0x8c0] sm:$0xff]  ;;  %v1665_v16 = vpack.c.bf16 %v311_v9, %v309_v8  ;;  %v310_v17 = vld [vmem:[%s3753_s1 + $0x8d0] sm:$0xff]  ;;  %v57_v18 = vld [vmem:[%s3753_s1 + $0xe8] sm:$0xff]  ;;  %v1411_v22 = vpack.c.bf16 %v54_v14, %v52_v13 }
  0x14   :  { %v59_v19 = vld [vmem:[%s3753_s1 + $0xf8] sm:$0xff]  ;;  %v313_v20 = vld [vmem:[%s3753_s1 + $0x8e8] sm:$0xff]  ;;  %v1667_v23 = vpack.c.bf16 %v310_v17, %v308_v15  ;;  %v56_v25 = vld [vmem:[%s3753_s1 + $0xe0] sm:$0xff] }
  0x15   :  { %1404 = vmatpush1.bf16.msra.mxu1 %v1403_v62  ;;  %v315_v21 = vld [vmem:[%s3753_s1 + $0x8f8] sm:$0xff]  ;;  %v1413_v24 = vpack.c.bf16 %v59_v19, %v57_v18  ;;  %v58_v26 = vld [vmem:[%s3753_s1 + $0xf0] sm:$0xff]  ;;  %v312_v27 = vld [vmem:[%s3753_s1 + $0x8e0] sm:$0xff]  ;;  %v559_v62 = vunpack.c.0.s8 %v558_v48 }
  0x16   :  { %1660 = vmatpush1.bf16.msra.mxu0 %v1659_v63  ;;  %1406 = vmatprep.subr.bf16.mxu1 %v1405_v0  ;;  %v1669_v28 = vpack.c.bf16 %v315_v21, %v313_v20  ;;  %v314_v29 = vld [vmem:[%s3753_s1 + $0x8f0] sm:$0xff]  ;;  %v61_v30 = vld [vmem:[%s3753_s1 + $0x108] sm:$0xff]  ;;  %v63_v31 = vld [vmem:[%s3753_s1 + $0x118] sm:$0xff]  ;;  %v1415_v34 = vpack.c.bf16 %v58_v26, %v56_v25 }
  0x17   :  { %1662 = vmatprep.subr.bf16.mxu0 %v1661_v4  ;;  %v317_v32 = vld [vmem:[%s3753_s1 + $0x908] sm:$0xff]  ;;  %v319_v33 = vld [vmem:[%s3753_s1 + $0x918] sm:$0xff]  ;;  %v1671_v35 = vpack.c.bf16 %v314_v29, %v312_v27  ;;  %v1417_v36 = vpack.c.bf16 %v63_v31, %v61_v30  ;;  %v60_v37 = vld [vmem:[%s3753_s1 + $0x100] sm:$0xff] }
  0x18   :  { %v62_v38 = vld [vmem:[%s3753_s1 + $0x110] sm:$0xff]  ;;  %v316_v39 = vld [vmem:[%s3753_s1 + $0x900] sm:$0xff]  ;;  %v1673_v40 = vpack.c.bf16 %v319_v33, %v317_v32  ;;  %v65_v42 = vld [vmem:[%s3753_s1 + $0x128] sm:$0xff] }
  0x19   :  { %1408 = vmatpush1.bf16.msra.mxu1 %v1407_v10  ;;  %v318_v41 = vld [vmem:[%s3753_s1 + $0x910] sm:$0xff]  ;;  %v67_v43 = vld [vmem:[%s3753_s1 + $0x138] sm:$0xff]  ;;  %v321_v44 = vld [vmem:[%s3753_s1 + $0x928] sm:$0xff]  ;;  %v1419_v49 = vpack.c.bf16 %v62_v38, %v60_v37 }
  0x1a   :  { %1664 = vmatpush1.bf16.msra.mxu0 %v1663_v11  ;;  %1410 = vmatprep.subr.bf16.mxu1 %v1409_v12  ;;  %v323_v45 = vld [vmem:[%s3753_s1 + $0x938] sm:$0xff]  ;;  %v1675_v50 = vpack.c.bf16 %v318_v41, %v316_v39  ;;  %v1421_v51 = vpack.c.bf16 %v67_v43, %v65_v42  ;;  %v64_v52 = vld [vmem:[%s3753_s1 + $0x120] sm:$0xff]  ;;  %v66_v53 = vld [vmem:[%s3753_s1 + $0x130] sm:$0xff]  ;;  %v2291_v11 = vsub.s32 %v559_v62, %v2264_v61 }
  0x1b   :  { %1666 = vmatprep.subr.bf16.mxu0 %v1665_v16  ;;  %v320_v54 = vld [vmem:[%s3753_s1 + $0x920] sm:$0xff]  ;;  %v1677_v55 = vpack.c.bf16 %v323_v45, %v321_v44  ;;  %v322_v56 = vld [vmem:[%s3753_s1 + $0x930] sm:$0xff]  ;;  %v69_v57 = vld [vmem:[%s3753_s1 + $0x148] sm:$0xff]  ;;  %v1423_v63 = vpack.c.bf16 %v66_v53, %v64_v52 }
  0x1c   :  { %v71_v58 = vld [vmem:[%s3753_s1 + $0x158] sm:$0xff]  ;;  %v325_v59 = vld [vmem:[%s3753_s1 + $0x948] sm:$0xff]  ;;  %v1679_v0 = vpack.c.bf16 %v322_v56, %v320_v54  ;;  %v68_v2 = vld [vmem:[%s3753_s1 + $0x140] sm:$0xff] }
  0x1d   :  { %1412 = vmatpush1.bf16.msra.mxu1 %v1411_v22  ;;  %v327_v60 = vld [vmem:[%s3753_s1 + $0x958] sm:$0xff]  ;;  %v1425_v1 = vpack.c.bf16 %v71_v58, %v69_v57  ;;  %v70_v3 = vld [vmem:[%s3753_s1 + $0x150] sm:$0xff]  ;;  %v324_v4 = vld [vmem:[%s3753_s1 + $0x940] sm:$0xff] }
  0x1e   :  { %1668 = vmatpush1.bf16.msra.mxu0 %v1667_v23  ;;  %1414 = vmatprep.subr.bf16.mxu1 %v1413_v24  ;;  %v1681_v5 = vpack.c.bf16 %v327_v60, %v325_v59  ;;  %v326_v6 = vld [vmem:[%s3753_s1 + $0x950] sm:$0xff]  ;;  %v73_v7 = vld [vmem:[%s3753_s1 + $0x168] sm:$0xff]  ;;  %v75_v8 = vld [vmem:[%s3753_s1 + $0x178] sm:$0xff]  ;;  %v1427_v12 = vpack.c.bf16 %v70_v3, %v68_v2 }
  0x1f   :  { %1670 = vmatprep.subr.bf16.mxu0 %v1669_v28  ;;  %v329_v9 = vld [vmem:[%s3753_s1 + $0x968] sm:$0xff]  ;;  %v331_v10 = vld [vmem:[%s3753_s1 + $0x978] sm:$0xff]  ;;  %v72_v13 = vld [vmem:[%s3753_s1 + $0x160] sm:$0xff]  ;;  %v1683_v14 = vpack.c.bf16 %v326_v6, %v324_v4  ;;  %v1429_v15 = vpack.c.bf16 %v75_v8, %v73_v7 }
  0x20   :  { %v74_v16 = vld [vmem:[%s3753_s1 + $0x170] sm:$0xff]  ;;  %v328_v17 = vld [vmem:[%s3753_s1 + $0x960] sm:$0xff]  ;;  %v1685_v19 = vpack.c.bf16 %v331_v10, %v329_v9  ;;  %v77_v20 = vld [vmem:[%s3753_s1 + $0x188] sm:$0xff] }
  0x21   :  { %1416 = vmatpush1.bf16.msra.mxu1 %v1415_v34  ;;  %v330_v18 = vld [vmem:[%s3753_s1 + $0x970] sm:$0xff]  ;;  %v79_v21 = vld [vmem:[%s3753_s1 + $0x198] sm:$0xff]  ;;  %v2314_v22 = vld [vmem:[%s3752_s0] sm:$0xff]  ;;  %v1431_v27 = vpack.c.bf16 %v74_v16, %v72_v13 }
  0x22   :  { %1672 = vmatpush1.bf16.msra.mxu0 %v1671_v35  ;;  %1418 = vmatprep.subr.bf16.mxu1 %v1417_v36  ;;  %v333_v23 = vld [vmem:[%s3753_s1 + $0x988] sm:$0xff]  ;;  %v335_v24 = vld [vmem:[%s3753_s1 + $0x998] sm:$0xff]  ;;  %v2324_v25 = vrot.slane %v2314_v22, %v2291_v11  ;;  %v2329_v26 = vld [vmem:[%s3752_s0 + $0x10] sm:$0xff]  ;;  %v1687_v29 = vpack.c.bf16 %v330_v18, %v328_v17  ;;  %v1433_v30 = vpack.c.bf16 %v79_v21, %v77_v20 }
  0x23   :  { %1674 = vmatprep.subr.bf16.mxu0 %v1673_v40  ;;  %v2333_v28 = vrot.slane %v2329_v26, %v2291_v11  ;;  %v76_v31 = vld [vmem:[%s3753_s1 + $0x180] sm:$0xff]  ;;  %v78_v32 = vld [vmem:[%s3753_s1 + $0x190] sm:$0xff]  ;;  %v1689_v35 = vpack.c.bf16 %v335_v24, %v333_v23  ;;  %v81_v37 = vld [vmem:[%s3753_s1 + $0x1a8] sm:$0xff] }
  0x24   :  { %v332_v33 = vld [vmem:[%s3753_s1 + $0x980] sm:$0xff]  ;;  %v571_v34 = vcombine.high %v2324_v25, %v2324_v25  ;;  %v334_v36 = vld [vmem:[%s3753_s1 + $0x990] sm:$0xff]  ;;  %v83_v38 = vld [vmem:[%s3753_s1 + $0x1b8] sm:$0xff]  ;;  %v1435_v42 = vpack.c.bf16 %v78_v32, %v76_v31 }
  0x25   :  { %1420 = vmatpush1.bf16.msra.mxu1 %v1419_v49  ;;  %v605_v39 = vcombine.high %v2333_v28, %v2333_v28  ;;  %v337_v40 = vld [vmem:[%s3753_s1 + $0x9a8] sm:$0xff]  ;;  %v339_v41 = vld [vmem:[%s3753_s1 + $0x9b8] sm:$0xff]  ;;  %v1691_v43 = vpack.c.bf16 %v334_v36, %v332_v33  ;;  %v1437_v44 = vpack.c.bf16 %v83_v38, %v81_v37  ;;  %v80_v45 = vld [vmem:[%s3753_s1 + $0x1a0] sm:$0xff] }
  0x26   :  { %1676 = vmatpush1.bf16.msra.mxu0 %v1675_v50  ;;  %1422 = vmatprep.subr.bf16.mxu1 %v1421_v51  ;;  %v82_v46 = vld [vmem:[%s3753_s1 + $0x1b0] sm:$0xff]  ;;  %v336_v47 = vld [vmem:[%s3753_s1 + $0x9a0] sm:$0xff]  ;;  %v1693_v48 = vpack.c.bf16 %v339_v41, %v337_v40  ;;  %v85_v50 = vld [vmem:[%s3753_s1 + $0x1c8] sm:$0xff] }
  0x27   :  { %1678 = vmatprep.subr.bf16.mxu0 %v1677_v55  ;;  %704 = vmatprep.mubr.f32.mxu1 %v571_v34  ;;  %v338_v49 = vld [vmem:[%s3753_s1 + $0x9b0] sm:$0xff]  ;;  %v87_v51 = vld [vmem:[%s3753_s1 + $0x1d8] sm:$0xff]  ;;  %v341_v52 = vld [vmem:[%s3753_s1 + $0x9c8] sm:$0xff]  ;;  %v1439_v54 = vpack.c.bf16 %v82_v46, %v80_v45 }
  0x28   :  { %988 = vmatprep.mubr.f32.mxu0 %v605_v39  ;;  %v343_v53 = vld [vmem:[%s3753_s1 + $0x9d8] sm:$0xff]  ;;  %v1695_v55 = vpack.c.bf16 %v338_v49, %v336_v47  ;;  %v1441_v56 = vpack.c.bf16 %v87_v51, %v85_v50  ;;  %v84_v57 = vld [vmem:[%s3753_s1 + $0x1c0] sm:$0xff]  ;;  %v86_v58 = vld [vmem:[%s3753_s1 + $0x1d0] sm:$0xff] }
  0x29   :  { %1424 = vmatpush1.bf16.msra.mxu1 %v1423_v63  ;;  %v340_v59 = vld [vmem:[%s3753_s1 + $0x9c0] sm:$0xff]  ;;  %v1697_v60 = vpack.c.bf16 %v343_v53, %v341_v52  ;;  %v342_v62 = vld [vmem:[%s3753_s1 + $0x9d0] sm:$0xff]  ;;  %v89_v63 = vld [vmem:[%s3753_s1 + $0x1e8] sm:$0xff]  ;;  %v1443_v3 = vpack.c.bf16 %v86_v58, %v84_v57 }
  0x2a   :  { %1680 = vmatpush1.bf16.msra.mxu0 %v1679_v0  ;;  %1426 = vmatprep.subr.bf16.mxu1 %v1425_v1  ;;  %v91_v0 = vld [vmem:[%s3753_s1 + $0x1f8] sm:$0xff]  ;;  %v345_v1 = vld [vmem:[%s3753_s1 + $0x9e8] sm:$0xff]  ;;  %v1699_v4 = vpack.c.bf16 %v342_v62, %v340_v59  ;;  %v88_v6 = vld [vmem:[%s3753_s1 + $0x1e0] sm:$0xff] }
  0x2b   :  { %1682 = vmatprep.subr.bf16.mxu0 %v1681_v5  ;;  %v347_v2 = vld [vmem:[%s3753_s1 + $0x9f8] sm:$0xff]  ;;  %v1445_v5 = vpack.c.bf16 %v91_v0, %v89_v63  ;;  %v90_v7 = vld [vmem:[%s3753_s1 + $0x1f0] sm:$0xff]  ;;  %v344_v8 = vld [vmem:[%s3753_s1 + $0x9e0] sm:$0xff] }
  0x2c   :  { %v1701_v9 = vpack.c.bf16 %v347_v2, %v345_v1  ;;  %v346_v10 = vld [vmem:[%s3753_s1 + $0x9f0] sm:$0xff]  ;;  %v93_v13 = vld [vmem:[%s3753_s1 + $0x208] sm:$0xff]  ;;  %v351_v17 = vld [vmem:[%s3753_s1 + $0xa18] sm:$0xff]  ;;  %v1447_v18 = vpack.c.bf16 %v90_v7, %v88_v6 }
  0x2d   :  { %1428 = vmatpush1.bf16.msra.mxu1 %v1427_v12  ;;  %v556_v12 = vcombine.high %v2314_v22, %v2314_v22  ;;  %v349_v16 = vld [vmem:[%s3753_s1 + $0xa08] sm:$0xff]  ;;  %v92_v21 = vld [vmem:[%s3753_s1 + $0x200] sm:$0xff]  ;;  %v94_v22 = vld [vmem:[%s3753_s1 + $0x210] sm:$0xff] }
  0x2e   :  { %1684 = vmatpush1.bf16.msra.mxu0 %v1683_v14  ;;  %1430 = vmatprep.subr.bf16.mxu1 %v1429_v15  ;;  %v95_v14 = vld [vmem:[%s3753_s1 + $0x218] sm:$0xff]  ;;  %v590_v15 = vcombine.high %v2329_v26, %v2329_v26  ;;  %v348_v23 = vld [vmem:[%s3753_s1 + $0xa00] sm:$0xff]  ;;  %v1705_v24 = vpack.c.bf16 %v351_v17, %v349_v16  ;;  %v350_v26 = vld [vmem:[%s3753_s1 + $0xa10] sm:$0xff]  ;;  %v1451_v34 = vpack.c.bf16 %v94_v22, %v92_v21 }
  0x2f   :  { %1686 = vmatprep.subr.bf16.mxu0 %v1685_v19  ;;  %v1703_v19 = vpack.c.bf16 %v346_v10, %v344_v8  ;;  %v1449_v20 = vpack.c.bf16 %v95_v14, %v93_v13  ;;  %v353_v31 = vld [vmem:[%s3753_s1 + $0xa28] sm:$0xff]  ;;  %v355_v32 = vld [vmem:[%s3753_s1 + $0xa38] sm:$0xff]  ;;  %v96_v37 = vld [vmem:[%s3753_s1 + $0x220] sm:$0xff] }
  0x30   :  { %v2467_v33 = vrot.slane %v590_v15, %v2291_v11  ;;  %v98_v38 = vld [vmem:[%s3753_s1 + $0x230] sm:$0xff]  ;;  %v352_v39 = vld [vmem:[%s3753_s1 + $0xa20] sm:$0xff]  ;;  %v1709_v40 = vpack.c.bf16 %v355_v32, %v353_v31  ;;  %v357_v45 = vld [vmem:[%s3753_s1 + $0xa48] sm:$0xff] }
  0x31   :  { %1432 = vmatpush1.bf16.msra.mxu1 %v1431_v27  ;;  %v97_v27 = vld [vmem:[%s3753_s1 + $0x228] sm:$0xff]  ;;  %v354_v41 = vld [vmem:[%s3753_s1 + $0xa30] sm:$0xff]  ;;  %v359_v46 = vld [vmem:[%s3753_s1 + $0xa58] sm:$0xff] }
  0x32   :  { %1688 = vmatpush1.bf16.msra.mxu0 %v1687_v29  ;;  %1434 = vmatprep.subr.bf16.mxu1 %v1433_v30  ;;  %v99_v29 = vld [vmem:[%s3753_s1 + $0x238] sm:$0xff]  ;;  %v2458_v30 = vrot.slane %v556_v12, %v2291_v11  ;;  %v606_v47 = vcombine.high %v2467_v33, %v2467_v33  ;;  %v1711_v49 = vpack.c.bf16 %v354_v41, %v352_v39  ;;  %v102_v51 = vld [vmem:[%s3753_s1 + $0x250] sm:$0xff]  ;;  %v356_v52 = vld [vmem:[%s3753_s1 + $0xa40] sm:$0xff] }
  0x33   :  { %1690 = vmatprep.subr.bf16.mxu0 %v1689_v35  ;;  %v1707_v35 = vpack.c.bf16 %v350_v26, %v348_v23  ;;  %v1453_v36 = vpack.c.bf16 %v99_v29, %v97_v27  ;;  %v1713_v53 = vpack.c.bf16 %v359_v46, %v357_v45  ;;  %v363_v57 = vld [vmem:[%s3753_s1 + $0xa78] sm:$0xff]  ;;  %v104_v62 = vld [vmem:[%s3753_s1 + $0x260] sm:$0xff]  ;;  %v106_v63 = vld [vmem:[%s3753_s1 + $0x270] sm:$0xff] }
  0x34   :  { %v360_v0 = vld [vmem:[%s3753_s1 + $0xa60] sm:$0xff]  ;;  %v362_v2 = vld [vmem:[%s3753_s1 + $0xa70] sm:$0xff]  ;;  %v367_v6 = vld [vmem:[%s3753_s1 + $0xa98] sm:$0xff]  ;;  %v1463_v7 = vpack.c.bf16 %v106_v63, %v104_v62 }
  0x35   :  { %1436 = vmatpush1.bf16.msra.mxu1 %v1435_v42  ;;  %v101_v42 = vld [vmem:[%s3753_s1 + $0x248] sm:$0xff]  ;;  %v1719_v8 = vpack.c.bf16 %v362_v2, %v360_v0  ;;  %v108_v10 = vld [vmem:[%s3753_s1 + $0x280] sm:$0xff]  ;;  %v110_v12 = vld [vmem:[%s3753_s1 + $0x290] sm:$0xff] }
  0x36   :  { %1692 = vmatpush1.bf16.msra.mxu0 %v1691_v43  ;;  %1438 = vmatprep.subr.bf16.mxu1 %v1437_v44  ;;  %v103_v43 = vld [vmem:[%s3753_s1 + $0x258] sm:$0xff]  ;;  %v572_v44 = vcombine.high %v2458_v30, %v2458_v30  ;;  %v364_v13 = vld [vmem:[%s3753_s1 + $0xa80] sm:$0xff]  ;;  %v366_v15 = vld [vmem:[%s3753_s1 + $0xa90] sm:$0xff] }
  0x37   :  { %1694 = vmatprep.subr.bf16.mxu0 %v1693_v48  ;;  %v1455_v48 = vpack.c.bf16 %v98_v38, %v96_v37  ;;  %v1457_v50 = vpack.c.bf16 %v103_v43, %v101_v42  ;;  %v113_v16 = vld [vmem:[%s3753_s1 + $0x2a8] sm:$0xff]  ;;  %v115_v17 = vld [vmem:[%s3753_s1 + $0x2b8] sm:$0xff]  ;;  %v1723_v21 = vpack.c.bf16 %v366_v15, %v364_v13  ;;  %v112_v23 = vld [vmem:[%s3753_s1 + $0x2a0] sm:$0xff] }
  0x38   :  { %v1469_v22 = vpack.c.bf16 %v115_v17, %v113_v16  ;;  %v368_v26 = vld [vmem:[%s3753_s1 + $0xaa0] sm:$0xff]  ;;  %v370_v29 = vld [vmem:[%s3753_s1 + $0xab0] sm:$0xff]  ;;  %v117_v31 = vld [vmem:[%s3753_s1 + $0x2c8] sm:$0xff] }
  0x39   :  { %1440 = vmatpush1.bf16.msra.mxu1 %v1439_v54  ;;  %v105_v54 = vld [vmem:[%s3753_s1 + $0x268] sm:$0xff]  ;;  %v119_v32 = vld [vmem:[%s3753_s1 + $0x2d8] sm:$0xff]  ;;  %v1727_v37 = vpack.c.bf16 %v370_v29, %v368_v26  ;;  %v116_v39 = vld [vmem:[%s3753_s1 + $0x2c0] sm:$0xff] }
  0x3a   :  { %1696 = vmatpush1.bf16.msra.mxu0 %v1695_v55  ;;  %1442 = vmatprep.subr.bf16.mxu1 %v1441_v56  ;;  %v107_v55 = vld [vmem:[%s3753_s1 + $0x278] sm:$0xff]  ;;  %v361_v56 = vld [vmem:[%s3753_s1 + $0xa68] sm:$0xff]  ;;  %v1473_v38 = vpack.c.bf16 %v119_v32, %v117_v31  ;;  %v372_v41 = vld [vmem:[%s3753_s1 + $0xac0] sm:$0xff] }
  0x3b   :  { %1698 = vmatprep.subr.bf16.mxu0 %v1697_v60  ;;  %v1461_v60 = vpack.c.bf16 %v107_v55, %v105_v54  ;;  %v1717_v1 = vpack.c.bf16 %v363_v57, %v361_v56  ;;  %v374_v43 = vld [vmem:[%s3753_s1 + $0xad0] sm:$0xff]  ;;  %v123_v45 = vld [vmem:[%s3753_s1 + $0x2f8] sm:$0xff]  ;;  %v377_v46 = vld [vmem:[%s3753_s1 + $0xae8] sm:$0xff] }
  0x3c   :  { %v125_v54 = vld [vmem:[%s3753_s1 + $0x308] sm:$0xff]  ;;  %v127_v55 = vld [vmem:[%s3753_s1 + $0x318] sm:$0xff]  ;;  %v124_v62 = vld [vmem:[%s3753_s1 + $0x300] sm:$0xff] }
  0x3d   :  { %1444 = vmatpush1.bf16.msra.mxu1 %v1443_v3  ;;  %v109_v3 = vld [vmem:[%s3753_s1 + $0x288] sm:$0xff]  ;;  %v383_v57 = vld [vmem:[%s3753_s1 + $0xb18] sm:$0xff]  ;;  %v126_v63 = vld [vmem:[%s3753_s1 + $0x310] sm:$0xff] }
  0x3e   :  { %1700 = vmatpush1.bf16.msra.mxu0 %v1699_v4  ;;  %1446 = vmatprep.subr.bf16.mxu1 %v1445_v5  ;;  %v111_v4 = vld [vmem:[%s3753_s1 + $0x298] sm:$0xff]  ;;  %v365_v5 = vld [vmem:[%s3753_s1 + $0xa88] sm:$0xff]  ;;  %v380_v0 = vld [vmem:[%s3753_s1 + $0xb00] sm:$0xff] }
  0x3f   :  { %1702 = vmatprep.subr.bf16.mxu0 %v1701_v9  ;;  %v1465_v9 = vpack.c.bf16 %v111_v4, %v109_v3  ;;  %v1721_v14 = vpack.c.bf16 %v367_v6, %v365_v5  ;;  %v381_v56 = vld [vmem:[%s3753_s1 + $0xb08] sm:$0xff]  ;;  %v382_v2 = vld [vmem:[%s3753_s1 + $0xb10] sm:$0xff]  ;;  %v131_v4 = vld [vmem:[%s3753_s1 + $0x338] sm:$0xff] }
  0x40   :  { %v129_v3 = vld [vmem:[%s3753_s1 + $0x328] sm:$0xff]  ;;  %v387_v6 = vld [vmem:[%s3753_s1 + $0xb38] sm:$0xff]  ;;  %v384_v13 = vld [vmem:[%s3753_s1 + $0xb20] sm:$0xff] }
  0x41   :  { %1448 = vmatpush1.bf16.msra.mxu1 %v1447_v18  ;;  %v369_v18 = vld [vmem:[%s3753_s1 + $0xaa8] sm:$0xff]  ;;  %v386_v15 = vld [vmem:[%s3753_s1 + $0xb30] sm:$0xff]  ;;  %v135_v17 = vld [vmem:[%s3753_s1 + $0x358] sm:$0xff] }
  0x42   :  { %1704 = vmatpush1.bf16.msra.mxu0 %v1703_v19  ;;  %1450 = vmatprep.subr.bf16.mxu1 %v1449_v20  ;;  %v371_v19 = vld [vmem:[%s3753_s1 + $0xab8] sm:$0xff]  ;;  %v1467_v20 = vpack.c.bf16 %v110_v12, %v108_v10  ;;  %v385_v5 = vld [vmem:[%s3753_s1 + $0xb28] sm:$0xff]  ;;  %v128_v10 = vld [vmem:[%s3753_s1 + $0x320] sm:$0xff] }
  0x43   :  { %1706 = vmatprep.subr.bf16.mxu0 %v1705_v24  ;;  %v114_v24 = vld [vmem:[%s3753_s1 + $0x2b0] sm:$0xff]  ;;  %v1725_v27 = vpack.c.bf16 %v371_v19, %v369_v18  ;;  %v133_v16 = vld [vmem:[%s3753_s1 + $0x348] sm:$0xff]  ;;  %v391_v19 = vld [vmem:[%s3753_s1 + $0xb58] sm:$0xff] }
  0x44   :  { %705 = vmatmul.mubr.f32.vlgmr.msra.gmra.mrb[0].mxu1 %v2324_v25  ;;  %v100_v25 = vld [vmem:[%s3753_s1 + $0x240] sm:$0xff]  ;;  %v130_v12 = vld [vmem:[%s3753_s1 + $0x330] sm:$0xff]  ;;  %v389_v18 = vld [vmem:[%s3753_s1 + $0xb48] sm:$0xff] }
  0x45   :  { %1452 = vmatpush1.bf16.msra.mxu1 %v1451_v34  ;;  %989 = vmatmul.mubr.f32.vlgmr.msra.gmra.mrb[0].mxu0 %v2333_v28  ;;  %v358_v28 = vld [vmem:[%s3753_s1 + $0xa50] sm:$0xff]  ;;  %v1459_v58 = vpack.c.bf16 %v102_v51, %v100_v25  ;;  %v373_v34 = vld [vmem:[%s3753_s1 + $0xac8] sm:$0xff]  ;;  %v120_v25 = vld [vmem:[%s3753_s1 + $0x2e0] sm:$0xff] }
  0x46   :  { %1708 = vmatpush1.bf16.msra.mxu0 %v1707_v35  ;;  %1454 = vmatprep.subr.bf16.mxu1 %v1453_v36  ;;  %v1715_v59 = vpack.c.bf16 %v358_v28, %v356_v52  ;;  %v375_v35 = vld [vmem:[%s3753_s1 + $0xad8] sm:$0xff]  ;;  %v1471_v36 = vpack.c.bf16 %v114_v24, %v112_v23  ;;  %v122_v51 = vld [vmem:[%s3753_s1 + $0x2f0] sm:$0xff]  ;;  %v376_v52 = vld [vmem:[%s3753_s1 + $0xae0] sm:$0xff] }
  0x47   :  { %1710 = vmatprep.subr.bf16.mxu0 %v1709_v40  ;;  %775 = vmatprep.mubr.f32.mxu1 %v572_v44  ;;  %v118_v40 = vld [vmem:[%s3753_s1 + $0x2d0] sm:$0xff]  ;;  %v1729_v42 = vpack.c.bf16 %v375_v35, %v373_v34  ;;  %v121_v44 = vld [vmem:[%s3753_s1 + $0x2e8] sm:$0xff]  ;;  %v132_v23 = vld [vmem:[%s3753_s1 + $0x340] sm:$0xff] }
  0x48   :  { %1059 = vmatprep.mubr.f32.mxu0 %v606_v47  ;;  %v379_v47 = vld [vmem:[%s3753_s1 + $0xaf8] sm:$0xff]  ;;  %v378_v28 = vld [vmem:[%s3753_s1 + $0xaf0] sm:$0xff]  ;;  %v388_v26 = vld [vmem:[%s3753_s1 + $0xb40] sm:$0xff] }
  0x49   :  { %1456 = vmatpush1.bf16.msra.mxu1 %v1455_v48  ;;  %v1475_v48 = vpack.c.bf16 %v118_v40, %v116_v39  ;;  %v134_v24 = vld [vmem:[%s3753_s1 + $0x350] sm:$0xff]  ;;  %v137_v31 = vld [vmem:[%s3753_s1 + $0x368] sm:$0xff]  ;;  %v139_v32 = vld [vmem:[%s3753_s1 + $0x378] sm:$0xff] }
  0x4a   :  { %1712 = vmatpush1.bf16.msra.mxu0 %v1711_v49  ;;  %1458 = vmatprep.subr.bf16.mxu1 %v1457_v50  ;;  %v1731_v49 = vpack.c.bf16 %v374_v43, %v372_v41  ;;  %v1477_v50 = vpack.c.bf16 %v123_v45, %v121_v44  ;;  %v390_v29 = vld [vmem:[%s3753_s1 + $0xb50] sm:$0xff]  ;;  %v393_v34 = vld [vmem:[%s3753_s1 + $0xb68] sm:$0xff]  ;;  %v395_v35 = vld [vmem:[%s3753_s1 + $0xb78] sm:$0xff] }
  0x4b   :  { %1714 = vmatprep.subr.bf16.mxu0 %v1713_v53  ;;  %v1733_v53 = vpack.c.bf16 %v379_v47, %v377_v46  ;;  %v136_v39 = vld [vmem:[%s3753_s1 + $0x360] sm:$0xff]  ;;  %v138_v40 = vld [vmem:[%s3753_s1 + $0x370] sm:$0xff]  ;;  %v141_v44 = vld [vmem:[%s3753_s1 + $0x388] sm:$0xff] }
  0x4c   :  { %v392_v41 = vld [vmem:[%s3753_s1 + $0xb60] sm:$0xff]  ;;  %v394_v43 = vld [vmem:[%s3753_s1 + $0xb70] sm:$0xff]  ;;  %v143_v45 = vld [vmem:[%s3753_s1 + $0x398] sm:$0xff] }
  0x4d   :  { %1460 = vmatpush1.bf16.msra.mxu1 %v1459_v58  ;;  %v1479_v58 = vpack.c.bf16 %v122_v51, %v120_v25  ;;  %v397_v46 = vld [vmem:[%s3753_s1 + $0xb88] sm:$0xff]  ;;  %v399_v47 = vld [vmem:[%s3753_s1 + $0xb98] sm:$0xff]  ;;  %v140_v25 = vld [vmem:[%s3753_s1 + $0x380] sm:$0xff] }
  0x4e   :  { %1716 = vmatpush1.bf16.msra.mxu0 %v1715_v59  ;;  %1462 = vmatprep.subr.bf16.mxu1 %v1461_v60  ;;  %v1735_v59 = vpack.c.bf16 %v378_v28, %v376_v52  ;;  %v1481_v60 = vpack.c.bf16 %v127_v55, %v125_v54  ;;  %v142_v51 = vld [vmem:[%s3753_s1 + $0x390] sm:$0xff]  ;;  %v396_v52 = vld [vmem:[%s3753_s1 + $0xb80] sm:$0xff]  ;;  %v145_v54 = vld [vmem:[%s3753_s1 + $0x3a8] sm:$0xff] }
  0x4f   :  { %1718 = vmatprep.subr.bf16.mxu0 %v1717_v1  ;;  %v1737_v1 = vpack.c.bf16 %v383_v57, %v381_v56  ;;  %v398_v28 = vld [vmem:[%s3753_s1 + $0xb90] sm:$0xff]  ;;  %v147_v55 = vld [vmem:[%s3753_s1 + $0x3b8] sm:$0xff]  ;;  %v401_v56 = vld [vmem:[%s3753_s1 + $0xba8] sm:$0xff] }
  0x50   :  { %v403_v57 = vld [vmem:[%s3753_s1 + $0xbb8] sm:$0xff] }
  0x51   :  { %1464 = vmatpush1.bf16.msra.mxu1 %v1463_v7  ;;  %v1483_v7 = vpack.c.bf16 %v126_v63, %v124_v62  ;;  %v144_v62 = vld [vmem:[%s3753_s1 + $0x3a0] sm:$0xff]  ;;  %v146_v63 = vld [vmem:[%s3753_s1 + $0x3b0] sm:$0xff] }
  0x52   :  { %1720 = vmatpush1.bf16.msra.mxu0 %v1719_v8  ;;  %1466 = vmatprep.subr.bf16.mxu1 %v1465_v9  ;;  %v1739_v8 = vpack.c.bf16 %v382_v2, %v380_v0  ;;  %v1485_v9 = vpack.c.bf16 %v131_v4, %v129_v3  ;;  %v400_v0 = vld [vmem:[%s3753_s1 + $0xba0] sm:$0xff]  ;;  %v402_v2 = vld [vmem:[%s3753_s1 + $0xbb0] sm:$0xff]  ;;  %v149_v3 = vld [vmem:[%s3753_s1 + $0x3c8] sm:$0xff] }
  0x53   :  { %1722 = vmatprep.subr.bf16.mxu0 %v1721_v14  ;;  %v1741_v14 = vpack.c.bf16 %v387_v6, %v385_v5  ;;  %v151_v4 = vld [vmem:[%s3753_s1 + $0x3d8] sm:$0xff]  ;;  %v405_v5 = vld [vmem:[%s3753_s1 + $0xbc8] sm:$0xff] }
  0x54   :  { %v407_v6 = vld [vmem:[%s3753_s1 + $0xbd8] sm:$0xff] }
  0x55   :  { %1468 = vmatpush1.bf16.msra.mxu1 %v1467_v20  ;;  %v1487_v20 = vpack.c.bf16 %v130_v12, %v128_v10  ;;  %v148_v10 = vld [vmem:[%s3753_s1 + $0x3c0] sm:$0xff]  ;;  %v150_v12 = vld [vmem:[%s3753_s1 + $0x3d0] sm:$0xff] }
  0x56   :  { %1724 = vmatpush1.bf16.msra.mxu0 %v1723_v21  ;;  %1470 = vmatprep.subr.bf16.mxu1 %v1469_v22  ;;  %v1743_v21 = vpack.c.bf16 %v386_v15, %v384_v13  ;;  %v1489_v22 = vpack.c.bf16 %v135_v17, %v133_v16  ;;  %v404_v13 = vld [vmem:[%s3753_s1 + $0xbc0] sm:$0xff]  ;;  %v406_v15 = vld [vmem:[%s3753_s1 + $0xbd0] sm:$0xff]  ;;  %v153_v16 = vld [vmem:[%s3753_s1 + $0x3e8] sm:$0xff] }
  0x57   :  { %1726 = vmatprep.subr.bf16.mxu0 %v1725_v27  ;;  %v1745_v27 = vpack.c.bf16 %v391_v19, %v389_v18  ;;  %v155_v17 = vld [vmem:[%s3753_s1 + $0x3f8] sm:$0xff]  ;;  %v409_v18 = vld [vmem:[%s3753_s1 + $0xbe8] sm:$0xff] }
  0x58   :  { %v411_v19 = vld [vmem:[%s3753_s1 + $0xbf8] sm:$0xff] }
  0x59   :  { %1472 = vmatpush1.bf16.msra.mxu1 %v1471_v36  ;;  %v1491_v36 = vpack.c.bf16 %v134_v24, %v132_v23  ;;  %v152_v23 = vld [vmem:[%s3753_s1 + $0x3e0] sm:$0xff]  ;;  %v154_v24 = vld [vmem:[%s3753_s1 + $0x3f0] sm:$0xff] }
  0x5a   :  { %1728 = vmatpush1.bf16.msra.mxu0 %v1727_v37  ;;  %1474 = vmatprep.subr.bf16.mxu1 %v1473_v38  ;;  %v1747_v37 = vpack.c.bf16 %v390_v29, %v388_v26  ;;  %v1493_v38 = vpack.c.bf16 %v139_v32, %v137_v31  ;;  %v408_v26 = vld [vmem:[%s3753_s1 + $0xbe0] sm:$0xff]  ;;  %v410_v29 = vld [vmem:[%s3753_s1 + $0xbf0] sm:$0xff]  ;;  %v157_v31 = vld [vmem:[%s3753_s1 + $0x408] sm:$0xff] }
  0x5b   :  { %1730 = vmatprep.subr.bf16.mxu0 %v1729_v42  ;;  %v1749_v42 = vpack.c.bf16 %v395_v35, %v393_v34  ;;  %v159_v32 = vld [vmem:[%s3753_s1 + $0x418] sm:$0xff]  ;;  %v413_v34 = vld [vmem:[%s3753_s1 + $0xc08] sm:$0xff] }
  0x5c   :  { %v415_v35 = vld [vmem:[%s3753_s1 + $0xc18] sm:$0xff] }
  0x5d   :  { %1476 = vmatpush1.bf16.msra.mxu1 %v1475_v48  ;;  %v1495_v48 = vpack.c.bf16 %v138_v40, %v136_v39  ;;  %v156_v39 = vld [vmem:[%s3753_s1 + $0x400] sm:$0xff]  ;;  %v158_v40 = vld [vmem:[%s3753_s1 + $0x410] sm:$0xff] }
  0x5e   :  { %1732 = vmatpush1.bf16.msra.mxu0 %v1731_v49  ;;  %1478 = vmatprep.subr.bf16.mxu1 %v1477_v50  ;;  %v1751_v49 = vpack.c.bf16 %v394_v43, %v392_v41  ;;  %v1497_v50 = vpack.c.bf16 %v143_v45, %v141_v44  ;;  %v412_v41 = vld [vmem:[%s3753_s1 + $0xc00] sm:$0xff]  ;;  %v414_v43 = vld [vmem:[%s3753_s1 + $0xc10] sm:$0xff]  ;;  %v161_v44 = vld [vmem:[%s3753_s1 + $0x428] sm:$0xff] }
  0x5f   :  { %1734 = vmatprep.subr.bf16.mxu0 %v1733_v53  ;;  %v1753_v53 = vpack.c.bf16 %v399_v47, %v397_v46  ;;  %v163_v45 = vld [vmem:[%s3753_s1 + $0x438] sm:$0xff]  ;;  %v417_v46 = vld [vmem:[%s3753_s1 + $0xc28] sm:$0xff] }
  0x60   :  { %v419_v47 = vld [vmem:[%s3753_s1 + $0xc38] sm:$0xff] }
  0x61   :  { %1480 = vmatpush1.bf16.msra.mxu1 %v1479_v58  ;;  %v1499_v58 = vpack.c.bf16 %v142_v51, %v140_v25  ;;  %v1771_v25 = vpack.c.bf16 %v414_v43, %v412_v41  ;;  %v1517_v51 = vpack.c.bf16 %v163_v45, %v161_v44  ;;  %v176_v43 = vld [vmem:[%s3753_s1 + $0x4a0] sm:$0xff]  ;;  %v178_v44 = vld [vmem:[%s3753_s1 + $0x4b0] sm:$0xff] }
  0x62   :  { %1736 = vmatpush1.bf16.msra.mxu0 %v1735_v59  ;;  %1482 = vmatprep.subr.bf16.mxu1 %v1481_v60  ;;  %v1755_v59 = vpack.c.bf16 %v398_v28, %v396_v52  ;;  %v1501_v60 = vpack.c.bf16 %v147_v55, %v145_v54  ;;  %v162_v52 = vld [vmem:[%s3753_s1 + $0x430] sm:$0xff]  ;;  %v2880_v54 = vld [vmem:[%s3752_s0 + $0x18] sm:$0xff]  ;;  %v1773_v55 = vpack.c.bf16 %v419_v47, %v417_v46  ;;  %v432_v45 = vld [vmem:[%s3753_s1 + $0xca0] sm:$0xff] }
  0x63   :  { %1738 = vmatprep.subr.bf16.mxu0 %v1737_v1  ;;  %v1757_v1 = vpack.c.bf16 %v403_v57, %v401_v56  ;;  %v418_v56 = vld [vmem:[%s3753_s1 + $0xc30] sm:$0xff]  ;;  %v165_v57 = vld [vmem:[%s3753_s1 + $0x448] sm:$0xff] }
  0x64   :  { %v434_v47 = vld [vmem:[%s3753_s1 + $0xcb0] sm:$0xff] }
  0x65   :  { %1484 = vmatpush1.bf16.msra.mxu1 %v1483_v7  ;;  %v1503_v7 = vpack.c.bf16 %v146_v63, %v144_v62  ;;  %v423_v62 = vld [vmem:[%s3753_s1 + $0xc58] sm:$0xff] }
  0x66   :  { %1740 = vmatpush1.bf16.msra.mxu0 %v1739_v8  ;;  %1486 = vmatprep.subr.bf16.mxu1 %v1485_v9  ;;  %v1759_v8 = vpack.c.bf16 %v402_v2, %v400_v0  ;;  %v1505_v9 = vpack.c.bf16 %v151_v4, %v149_v3  ;;  %v164_v3 = vld [vmem:[%s3753_s1 + $0x440] sm:$0xff]  ;;  %v166_v4 = vld [vmem:[%s3753_s1 + $0x450] sm:$0xff] }
  0x67   :  { %1742 = vmatprep.subr.bf16.mxu0 %v1741_v14  ;;  %v1761_v14 = vpack.c.bf16 %v407_v6, %v405_v5  ;;  %v422_v6 = vld [vmem:[%s3753_s1 + $0xc50] sm:$0xff] }
  0x69   :  { %1488 = vmatpush1.bf16.msra.mxu1 %v1487_v20  ;;  %v1507_v20 = vpack.c.bf16 %v150_v12, %v148_v10  ;;  %v427_v10 = vld [vmem:[%s3753_s1 + $0xc78] sm:$0xff]  ;;  %v1523_v12 = vpack.c.bf16 %v166_v4, %v164_v3 }
  0x6a   :  { %1744 = vmatpush1.bf16.msra.mxu0 %v1743_v21  ;;  %1490 = vmatprep.subr.bf16.mxu1 %v1489_v22  ;;  %v1763_v21 = vpack.c.bf16 %v406_v15, %v404_v13  ;;  %v1509_v22 = vpack.c.bf16 %v155_v17, %v153_v16  ;;  %v168_v15 = vld [vmem:[%s3753_s1 + $0x460] sm:$0xff]  ;;  %v170_v16 = vld [vmem:[%s3753_s1 + $0x470] sm:$0xff] }
  0x6b   :  { %1746 = vmatprep.subr.bf16.mxu0 %v1745_v27  ;;  %v1765_v27 = vpack.c.bf16 %v411_v19, %v409_v18  ;;  %v424_v17 = vld [vmem:[%s3753_s1 + $0xc60] sm:$0xff]  ;;  %v426_v19 = vld [vmem:[%s3753_s1 + $0xc70] sm:$0xff] }
  0x6d   :  { %1492 = vmatpush1.bf16.msra.mxu1 %v1491_v36  ;;  %v1511_v36 = vpack.c.bf16 %v154_v24, %v152_v23  ;;  %v431_v23 = vld [vmem:[%s3753_s1 + $0xc98] sm:$0xff]  ;;  %v1527_v24 = vpack.c.bf16 %v170_v16, %v168_v15 }
  0x6e   :  { %1748 = vmatpush1.bf16.msra.mxu0 %v1747_v37  ;;  %1494 = vmatprep.subr.bf16.mxu1 %v1493_v38  ;;  %v1767_v37 = vpack.c.bf16 %v410_v29, %v408_v26  ;;  %v1513_v38 = vpack.c.bf16 %v159_v32, %v157_v31  ;;  %v1783_v26 = vpack.c.bf16 %v426_v19, %v424_v17  ;;  %v172_v29 = vld [vmem:[%s3753_s1 + $0x480] sm:$0xff]  ;;  %v174_v31 = vld [vmem:[%s3753_s1 + $0x490] sm:$0xff] }
  0x6f   :  { %1750 = vmatprep.subr.bf16.mxu0 %v1749_v42  ;;  %v1769_v42 = vpack.c.bf16 %v415_v35, %v413_v34  ;;  %v428_v32 = vld [vmem:[%s3753_s1 + $0xc80] sm:$0xff]  ;;  %v430_v35 = vld [vmem:[%s3753_s1 + $0xc90] sm:$0xff] }
  0x70   :  { %v1787_v41 = vpack.c.bf16 %v430_v35, %v428_v32  ;;  %v188_v17 = vld [vmem:[%s3753_s1 + $0x500] sm:$0xff] }
  0x71   :  { %1496 = vmatpush1.bf16.msra.mxu1 %v1495_v48  ;;  %v1515_v48 = vpack.c.bf16 %v158_v40, %v156_v39  ;;  %v435_v39 = vld [vmem:[%s3753_s1 + $0xcb8] sm:$0xff]  ;;  %v1531_v40 = vpack.c.bf16 %v174_v31, %v172_v29  ;;  %v444_v19 = vld [vmem:[%s3753_s1 + $0xd00] sm:$0xff] }
  0x72   :  { %1752 = vmatpush1.bf16.msra.mxu0 %v1751_v49  ;;  %1498 = vmatprep.subr.bf16.mxu1 %v1497_v50  ;;  %v160_v49 = vld [vmem:[%s3753_s1 + $0x420] sm:$0xff]  ;;  %v2865_v50 = vld [vmem:[%s3752_s0 + $0x8] sm:$0xff] }
  0x73   :  { %1754 = vmatprep.subr.bf16.mxu0 %v1753_v53  ;;  %v416_v53 = vld [vmem:[%s3753_s1 + $0xc20] sm:$0xff]  ;;  %v2875_v28 = vrot.slane %v2865_v50, %v2291_v11  ;;  %v1519_v0 = vpack.c.bf16 %v162_v52, %v160_v49  ;;  %v183_v49 = vld [vmem:[%s3753_s1 + $0x4d8] sm:$0xff]  ;;  %v1535_v52 = vpack.c.bf16 %v178_v44, %v176_v43 }
  0x74   :  { %v192_v32 = vld [vmem:[%s3753_s1 + $0x520] sm:$0xff] }
  0x75   :  { %1500 = vmatpush1.bf16.msra.mxu1 %v1499_v58  ;;  %v167_v58 = vld [vmem:[%s3753_s1 + $0x458] sm:$0xff]  ;;  %v588_v63 = vcombine.high %v2875_v28, %v2875_v28  ;;  %v448_v35 = vld [vmem:[%s3753_s1 + $0xd20] sm:$0xff] }
  0x76   :  { %1756 = vmatpush1.bf16.msra.mxu0 %v1755_v59  ;;  %1502 = vmatprep.subr.bf16.mxu1 %v1501_v60  ;;  %v2893_v59 = vrot.slane %v2880_v54, %v2291_v11  ;;  %v421_v60 = vld [vmem:[%s3753_s1 + $0xc48] sm:$0xff]  ;;  %v1521_v2 = vpack.c.bf16 %v167_v58, %v165_v57  ;;  %v182_v57 = vld [vmem:[%s3753_s1 + $0x4d0] sm:$0xff]  ;;  %v436_v58 = vld [vmem:[%s3753_s1 + $0xcc0] sm:$0xff] }
  0x77   :  { %1758 = vmatprep.subr.bf16.mxu0 %v1757_v1  ;;  %v1777_v5 = vpack.c.bf16 %v423_v62, %v421_v60  ;;  %v438_v62 = vld [vmem:[%s3753_s1 + $0xcd0] sm:$0xff] }
  0x78   :  { %v622_v1 = vcombine.high %v2893_v59, %v2893_v59  ;;  %v1795_v3 = vpack.c.bf16 %v438_v62, %v436_v58  ;;  %v200_v58 = vld [vmem:[%s3753_s1 + $0x560] sm:$0xff] }
  0x79   :  { %1504 = vmatpush1.bf16.msra.mxu1 %v1503_v7  ;;  %v169_v7 = vld [vmem:[%s3753_s1 + $0x468] sm:$0xff]  ;;  %v456_v62 = vld [vmem:[%s3753_s1 + $0xd60] sm:$0xff] }
  0x7a   :  { %1760 = vmatpush1.bf16.msra.mxu0 %v1759_v8  ;;  %1506 = vmatprep.subr.bf16.mxu1 %v1505_v9  ;;  %v171_v8 = vld [vmem:[%s3753_s1 + $0x478] sm:$0xff]  ;;  %v425_v9 = vld [vmem:[%s3753_s1 + $0xc68] sm:$0xff] }
  0x7b   :  { %1762 = vmatprep.subr.bf16.mxu0 %v1761_v14  ;;  %v1525_v14 = vpack.c.bf16 %v171_v8, %v169_v7  ;;  %v1781_v18 = vpack.c.bf16 %v427_v10, %v425_v9  ;;  %v442_v8 = vld [vmem:[%s3753_s1 + $0xcf0] sm:$0xff]  ;;  %v189_v9 = vld [vmem:[%s3753_s1 + $0x508] sm:$0xff]  ;;  %v191_v10 = vld [vmem:[%s3753_s1 + $0x518] sm:$0xff] }
  0x7c   :  { %v1545_v16 = vpack.c.bf16 %v191_v10, %v189_v9  ;;  %v462_v10 = vld [vmem:[%s3753_s1 + $0xd90] sm:$0xff] }
  0x7d   :  { %1508 = vmatpush1.bf16.msra.mxu1 %v1507_v20  ;;  %v173_v20 = vld [vmem:[%s3753_s1 + $0x488] sm:$0xff] }
  0x7e   :  { %1764 = vmatpush1.bf16.msra.mxu0 %v1763_v21  ;;  %1510 = vmatprep.subr.bf16.mxu1 %v1509_v22  ;;  %v175_v21 = vld [vmem:[%s3753_s1 + $0x498] sm:$0xff]  ;;  %v429_v22 = vld [vmem:[%s3753_s1 + $0xc88] sm:$0xff] }
  0x7f   :  { %1766 = vmatprep.subr.bf16.mxu0 %v1765_v27  ;;  %v1529_v27 = vpack.c.bf16 %v175_v21, %v173_v20  ;;  %v1785_v34 = vpack.c.bf16 %v431_v23, %v429_v22  ;;  %v446_v21 = vld [vmem:[%s3753_s1 + $0xd10] sm:$0xff]  ;;  %v193_v22 = vld [vmem:[%s3753_s1 + $0x528] sm:$0xff]  ;;  %v195_v23 = vld [vmem:[%s3753_s1 + $0x538] sm:$0xff] }
  0x80   :  { %v1803_v29 = vpack.c.bf16 %v446_v21, %v444_v19  ;;  %v1549_v31 = vpack.c.bf16 %v195_v23, %v193_v22  ;;  %v208_v19 = vld [vmem:[%s3753_s1 + $0x5a0] sm:$0xff]  ;;  %v466_v23 = vld [vmem:[%s3753_s1 + $0xdb0] sm:$0xff] }
  0x81   :  { %1512 = vmatpush1.bf16.msra.mxu1 %v1511_v36  ;;  %v177_v36 = vld [vmem:[%s3753_s1 + $0x4a8] sm:$0xff]  ;;  %v464_v21 = vld [vmem:[%s3753_s1 + $0xda0] sm:$0xff] }
  0x82   :  { %1768 = vmatpush1.bf16.msra.mxu0 %v1767_v37  ;;  %1514 = vmatprep.subr.bf16.mxu1 %v1513_v38  ;;  %v179_v37 = vld [vmem:[%s3753_s1 + $0x4b8] sm:$0xff]  ;;  %v433_v38 = vld [vmem:[%s3753_s1 + $0xca8] sm:$0xff] }
  0x83   :  { %1770 = vmatprep.subr.bf16.mxu0 %v1769_v42  ;;  %v1533_v42 = vpack.c.bf16 %v179_v37, %v177_v36  ;;  %v1789_v46 = vpack.c.bf16 %v435_v39, %v433_v38  ;;  %v450_v37 = vld [vmem:[%s3753_s1 + $0xd30] sm:$0xff]  ;;  %v197_v38 = vld [vmem:[%s3753_s1 + $0x548] sm:$0xff]  ;;  %v199_v39 = vld [vmem:[%s3753_s1 + $0x558] sm:$0xff] }
  0x84   :  { %776 = vmatmul.mubr.f32.vlgmr.msra.gmra.mrb[0].mxu1 %v2458_v30  ;;  %v1775_v30 = vpack.c.bf16 %v418_v56, %v416_v53  ;;  %v1791_v53 = vpack.c.bf16 %v434_v47, %v432_v45  ;;  %v180_v56 = vld [vmem:[%s3753_s1 + $0x4c0] sm:$0xff]  ;;  %v1807_v43 = vpack.c.bf16 %v450_v37, %v448_v35  ;;  %v1553_v44 = vpack.c.bf16 %v199_v39, %v197_v38 }
  0x85   :  { %1516 = vmatpush1.bf16.msra.mxu1 %v1515_v48  ;;  %1060 = vmatmul.mubr.f32.vlgmr.msra.gmra.mrb[0].mxu0 %v2467_v33  ;;  %v420_v33 = vld [vmem:[%s3753_s1 + $0xc40] sm:$0xff]  ;;  %v181_v48 = vld [vmem:[%s3753_s1 + $0x4c8] sm:$0xff] }
  0x86   :  { %1772 = vmatpush1.bf16.msra.mxu0 %v1771_v25  ;;  %1518 = vmatprep.subr.bf16.mxu1 %v1517_v51  ;;  %v1779_v13 = vpack.c.bf16 %v422_v6, %v420_v33  ;;  %v437_v25 = vld [vmem:[%s3753_s1 + $0xcc8] sm:$0xff]  ;;  %v439_v51 = vld [vmem:[%s3753_s1 + $0xcd8] sm:$0xff]  ;;  %v184_v33 = vld [vmem:[%s3753_s1 + $0x4e0] sm:$0xff] }
  0x87   :  { %1774 = vmatprep.subr.bf16.mxu0 %v1773_v55  ;;  %846 = vmatprep.mubr.f32.mxu1 %v588_v63  ;;  %v1537_v55 = vpack.c.bf16 %v183_v49, %v181_v48  ;;  %v1793_v60 = vpack.c.bf16 %v439_v51, %v437_v25  ;;  %v185_v63 = vld [vmem:[%s3753_s1 + $0x4e8] sm:$0xff]  ;;  %v440_v6 = vld [vmem:[%s3753_s1 + $0xce0] sm:$0xff]  ;;  %v454_v49 = vld [vmem:[%s3753_s1 + $0xd50] sm:$0xff] }
  0x88   :  { %1130 = vmatprep.mubr.f32.mxu0 %v622_v1  ;;  %v441_v1 = vld [vmem:[%s3753_s1 + $0xce8] sm:$0xff]  ;;  %v1799_v15 = vpack.c.bf16 %v442_v8, %v440_v6  ;;  %v196_v45 = vld [vmem:[%s3753_s1 + $0x540] sm:$0xff]  ;;  %v203_v51 = vld [vmem:[%s3753_s1 + $0x578] sm:$0xff] }
  0x89   :  { %1520 = vmatpush1.bf16.msra.mxu1 %v1519_v0  ;;  %v187_v0 = vld [vmem:[%s3753_s1 + $0x4f8] sm:$0xff]  ;;  %v452_v47 = vld [vmem:[%s3753_s1 + $0xd40] sm:$0xff]  ;;  %v201_v25 = vld [vmem:[%s3753_s1 + $0x568] sm:$0xff] }
  0x8a   :  { %1776 = vmatpush1.bf16.msra.mxu0 %v1775_v30  ;;  %1522 = vmatprep.subr.bf16.mxu1 %v1521_v2  ;;  %v443_v30 = vld [vmem:[%s3753_s1 + $0xcf8] sm:$0xff]  ;;  %v1539_v2 = vpack.c.bf16 %v182_v57, %v180_v56  ;;  %v1541_v4 = vpack.c.bf16 %v187_v0, %v185_v63  ;;  %v1811_v56 = vpack.c.bf16 %v454_v49, %v452_v47  ;;  %v458_v0 = vld [vmem:[%s3753_s1 + $0xd70] sm:$0xff]  ;;  %v204_v6 = vld [vmem:[%s3753_s1 + $0x580] sm:$0xff] }
  0x8b   :  { %1778 = vmatprep.subr.bf16.mxu0 %v1777_v5  ;;  %v186_v5 = vld [vmem:[%s3753_s1 + $0x4f0] sm:$0xff]  ;;  %v1797_v7 = vpack.c.bf16 %v443_v30, %v441_v1  ;;  %v1557_v57 = vpack.c.bf16 %v203_v51, %v201_v25  ;;  %v205_v1 = vld [vmem:[%s3753_s1 + $0x588] sm:$0xff]  ;;  %v207_v30 = vld [vmem:[%s3753_s1 + $0x598] sm:$0xff] }
  0x8c   :  { %v460_v8 = vld [vmem:[%s3753_s1 + $0xd80] sm:$0xff] }
  0x8d   :  { %1524 = vmatpush1.bf16.msra.mxu1 %v1523_v12  ;;  %v445_v12 = vld [vmem:[%s3753_s1 + $0xd08] sm:$0xff] }
  0x8e   :  { %1780 = vmatpush1.bf16.msra.mxu0 %v1779_v13  ;;  %1526 = vmatprep.subr.bf16.mxu1 %v1525_v14  ;;  %v447_v13 = vld [vmem:[%s3753_s1 + $0xd18] sm:$0xff]  ;;  %v1543_v14 = vpack.c.bf16 %v186_v5, %v184_v33  ;;  %v1815_v33 = vpack.c.bf16 %v458_v0, %v456_v62  ;;  %v1561_v5 = vpack.c.bf16 %v207_v30, %v205_v1 }
  0x8f   :  { %1782 = vmatprep.subr.bf16.mxu0 %v1781_v18  ;;  %v190_v18 = vld [vmem:[%s3753_s1 + $0x510] sm:$0xff]  ;;  %v1801_v20 = vpack.c.bf16 %v447_v13, %v445_v12  ;;  %v209_v12 = vld [vmem:[%s3753_s1 + $0x5a8] sm:$0xff]  ;;  %v211_v13 = vld [vmem:[%s3753_s1 + $0x5b8] sm:$0xff] }
  0x91   :  { %1528 = vmatpush1.bf16.msra.mxu1 %v1527_v24  ;;  %v449_v24 = vld [vmem:[%s3753_s1 + $0xd28] sm:$0xff] }
  0x92   :  { %1784 = vmatpush1.bf16.msra.mxu0 %v1783_v26  ;;  %1530 = vmatprep.subr.bf16.mxu1 %v1529_v27  ;;  %v451_v26 = vld [vmem:[%s3753_s1 + $0xd38] sm:$0xff]  ;;  %v1547_v27 = vpack.c.bf16 %v190_v18, %v188_v17  ;;  %v1819_v17 = vpack.c.bf16 %v462_v10, %v460_v8  ;;  %v1565_v18 = vpack.c.bf16 %v211_v13, %v209_v12 }
  0x93   :  { %1786 = vmatprep.subr.bf16.mxu0 %v1785_v34  ;;  %v194_v34 = vld [vmem:[%s3753_s1 + $0x530] sm:$0xff]  ;;  %v1805_v36 = vpack.c.bf16 %v451_v26, %v449_v24  ;;  %v213_v24 = vld [vmem:[%s3753_s1 + $0x5c8] sm:$0xff]  ;;  %v215_v26 = vld [vmem:[%s3753_s1 + $0x5d8] sm:$0xff] }
  0x95   :  { %1532 = vmatpush1.bf16.msra.mxu1 %v1531_v40  ;;  %v453_v40 = vld [vmem:[%s3753_s1 + $0xd48] sm:$0xff] }
  0x96   :  { %1788 = vmatpush1.bf16.msra.mxu0 %v1787_v41  ;;  %1534 = vmatprep.subr.bf16.mxu1 %v1533_v42  ;;  %v455_v41 = vld [vmem:[%s3753_s1 + $0xd58] sm:$0xff]  ;;  %v1551_v42 = vpack.c.bf16 %v194_v34, %v192_v32 }
  0x97   :  { %1790 = vmatprep.subr.bf16.mxu0 %v1789_v46  ;;  %v198_v46 = vld [vmem:[%s3753_s1 + $0x550] sm:$0xff]  ;;  %v1809_v48 = vpack.c.bf16 %v455_v41, %v453_v40 }
  0x99   :  { %1536 = vmatpush1.bf16.msra.mxu1 %v1535_v52  ;;  %v457_v52 = vld [vmem:[%s3753_s1 + $0xd68] sm:$0xff] }
  0x9a   :  { %1792 = vmatpush1.bf16.msra.mxu0 %v1791_v53  ;;  %1538 = vmatprep.subr.bf16.mxu1 %v1537_v55  ;;  %v459_v53 = vld [vmem:[%s3753_s1 + $0xd78] sm:$0xff]  ;;  %v1555_v55 = vpack.c.bf16 %v198_v46, %v196_v45 }
  0x9b   :  { %1794 = vmatprep.subr.bf16.mxu0 %v1793_v60  ;;  %v202_v60 = vld [vmem:[%s3753_s1 + $0x570] sm:$0xff]  ;;  %v1813_v63 = vpack.c.bf16 %v459_v53, %v457_v52 }
  0x9d   :  { %1540 = vmatpush1.bf16.msra.mxu1 %v1539_v2  ;;  %v461_v2 = vld [vmem:[%s3753_s1 + $0xd88] sm:$0xff] }
  0x9e   :  { %1796 = vmatpush1.bf16.msra.mxu0 %v1795_v3  ;;  %1542 = vmatprep.subr.bf16.mxu1 %v1541_v4  ;;  %v463_v3 = vld [vmem:[%s3753_s1 + $0xd98] sm:$0xff]  ;;  %v1559_v4 = vpack.c.bf16 %v202_v60, %v200_v58 }
  0x9f   :  { %1798 = vmatprep.subr.bf16.mxu0 %v1797_v7  ;;  %v206_v7 = vld [vmem:[%s3753_s1 + $0x590] sm:$0xff]  ;;  %v1817_v9 = vpack.c.bf16 %v463_v3, %v461_v2 }
  0xa1   :  { %1544 = vmatpush1.bf16.msra.mxu1 %v1543_v14  ;;  %v465_v14 = vld [vmem:[%s3753_s1 + $0xda8] sm:$0xff] }
  0xa2   :  { %1800 = vmatpush1.bf16.msra.mxu0 %v1799_v15  ;;  %1546 = vmatprep.subr.bf16.mxu1 %v1545_v16  ;;  %v467_v15 = vld [vmem:[%s3753_s1 + $0xdb8] sm:$0xff]  ;;  %v1563_v16 = vpack.c.bf16 %v206_v7, %v204_v6 }
  0xa3   :  { %1802 = vmatprep.subr.bf16.mxu0 %v1801_v20  ;;  %v210_v20 = vld [vmem:[%s3753_s1 + $0x5b0] sm:$0xff]  ;;  %v1821_v22 = vpack.c.bf16 %v467_v15, %v465_v14 }
  0xa5   :  { %1548 = vmatpush1.bf16.msra.mxu1 %v1547_v27  ;;  %v469_v27 = vld [vmem:[%s3753_s1 + $0xdc8] sm:$0xff] }
  0xa6   :  { %1804 = vmatpush1.bf16.msra.mxu0 %v1803_v29  ;;  %1550 = vmatprep.subr.bf16.mxu1 %v1549_v31  ;;  %v471_v29 = vld [vmem:[%s3753_s1 + $0xdd8] sm:$0xff] }
  0xa7   :  { %1806 = vmatprep.subr.bf16.mxu0 %v1805_v36 }
  0xa9   :  { %1552 = vmatpush1.bf16.msra.mxu1 %v1551_v42 }
  0xaa   :  { %1808 = vmatpush1.bf16.msra.mxu0 %v1807_v43  ;;  %1554 = vmatprep.subr.bf16.mxu1 %v1553_v44 }
  0xab   :  { %1810 = vmatprep.subr.bf16.mxu0 %v1809_v48 }
  0xad   :  { %1556 = vmatpush1.bf16.msra.mxu1 %v1555_v55 }
  0xae   :  { %1812 = vmatpush1.bf16.msra.mxu0 %v1811_v56  ;;  %1558 = vmatprep.subr.bf16.mxu1 %v1557_v57 }
  0xaf   :  { %1814 = vmatprep.subr.bf16.mxu0 %v1813_v63 }
  0xb1   :  { %1560 = vmatpush1.bf16.msra.mxu1 %v1559_v4 }
  0xb2   :  { %1816 = vmatpush1.bf16.msra.mxu0 %v1815_v33  ;;  %1562 = vmatprep.subr.bf16.mxu1 %v1561_v5 }
  0xb3   :  { %1818 = vmatprep.subr.bf16.mxu0 %v1817_v9 }
  0xb4   :  { %11 = vsyncpa [#allocation3], 0  ;;  %v1567_v31 = vpack.c.bf16 %v210_v20, %v208_v19  ;;  %v1823_v32 = vpack.c.bf16 %v466_v23, %v464_v21  ;;  %v1569_v34 = vpack.c.bf16 %v215_v26, %v213_v24  ;;  %v212_v35 = vld [vmem:[%s3753_s1 + $0x5c0] sm:$0xff]  ;;  %v214_v36 = vld [vmem:[%s3753_s1 + $0x5d0] sm:$0xff]  ;;  %v1825_v38 = vpack.c.bf16 %v471_v29, %v469_v27  ;;  %s1976_s16 = smov [#allocation2]  }
  0xb5   :  { %1564 = vmatpush1.bf16.msra.mxu1 %v1563_v16  ;;  %v468_v37 = vld [vmem:[%s3753_s1 + $0xdc0] sm:$0xff]  ;;  %v470_v39 = vld [vmem:[%s3753_s1 + $0xdd0] sm:$0xff]  ;;  %v217_v40 = vld [vmem:[%s3753_s1 + $0x5e8] sm:$0xff]  ;;  %v1571_v44 = vpack.c.bf16 %v214_v36, %v212_v35  ;;  %v573_v55 = vcombine.high %v2865_v50, %v2865_v50  ;;  %v607_v58 = vcombine.high %v2880_v54, %v2880_v54 }
  0xb6   :  { %1820 = vmatpush1.bf16.msra.mxu0 %v1819_v17  ;;  %1566 = vmatprep.subr.bf16.mxu1 %v1565_v18  ;;  %v219_v41 = vld [vmem:[%s3753_s1 + $0x5f8] sm:$0xff]  ;;  %v473_v42 = vld [vmem:[%s3753_s1 + $0xde8] sm:$0xff]  ;;  %v1827_v45 = vpack.c.bf16 %v470_v39, %v468_v37  ;;  %v216_v47 = vld [vmem:[%s3753_s1 + $0x5e0] sm:$0xff] }
  0xb7   :  { %1822 = vmatprep.subr.bf16.mxu0 %v1821_v22  ;;  %v475_v43 = vld [vmem:[%s3753_s1 + $0xdf8] sm:$0xff]  ;;  %v1573_v46 = vpack.c.bf16 %v219_v41, %v217_v40  ;;  %v218_v48 = vld [vmem:[%s3753_s1 + $0x5f0] sm:$0xff]  ;;  %v472_v49 = vld [vmem:[%s3753_s1 + $0xde0] sm:$0xff]  ;;  %v3266_v4 = vrot.slane %v573_v55, %v2291_v11  ;;  %v3275_v6 = vrot.slane %v607_v58, %v2291_v11 }
  0xb8   :  { %v1829_v25 = vpack.c.bf16 %v475_v43, %v473_v42  ;;  %v474_v51 = vld [vmem:[%s3753_s1 + $0xdf0] sm:$0xff]  ;;  %v221_v52 = vld [vmem:[%s3753_s1 + $0x608] sm:$0xff]  ;;  %v223_v53 = vld [vmem:[%s3753_s1 + $0x618] sm:$0xff]  ;;  %v1575_v60 = vpack.c.bf16 %v218_v48, %v216_v47 }
  0xb9   :  { %1568 = vmatpush1.bf16.msra.mxu1 %v1567_v31  ;;  %v477_v56 = vld [vmem:[%s3753_s1 + $0xe08] sm:$0xff]  ;;  %v479_v57 = vld [vmem:[%s3753_s1 + $0xe18] sm:$0xff]  ;;  %v1831_v62 = vpack.c.bf16 %v474_v51, %v472_v49  ;;  %v1577_v63 = vpack.c.bf16 %v223_v53, %v221_v52  ;;  %v220_v50 = vld [vmem:[%s3753_s1 + $0x600] sm:$0xff]  ;;  %v589_v17 = vcombine.high %v3266_v4, %v3266_v4  ;;  %v623_v20 = vcombine.high %v3275_v6, %v3275_v6 }
  0xba   :  { %1824 = vmatpush1.bf16.msra.mxu0 %v1823_v32  ;;  %1570 = vmatprep.subr.bf16.mxu1 %v1569_v34  ;;  %v222_v0 = vld [vmem:[%s3753_s1 + $0x610] sm:$0xff]  ;;  %v476_v1 = vld [vmem:[%s3753_s1 + $0xe00] sm:$0xff]  ;;  %v1833_v54 = vpack.c.bf16 %v479_v57, %v477_v56  ;;  %v225_v2 = vld [vmem:[%s3753_s1 + $0x628] sm:$0xff] }
  0xbb   :  { %1826 = vmatprep.subr.bf16.mxu0 %v1825_v38  ;;  %v478_v30 = vld [vmem:[%s3753_s1 + $0xe10] sm:$0xff]  ;;  %v227_v3 = vld [vmem:[%s3753_s1 + $0x638] sm:$0xff]  ;;  %v481_v33 = vld [vmem:[%s3753_s1 + $0xe28] sm:$0xff]  ;;  %v1579_v7 = vpack.c.bf16 %v222_v0, %v220_v50 }
  0xbc   :  { %v483_v5 = vld [vmem:[%s3753_s1 + $0xe38] sm:$0xff]  ;;  %v1835_v8 = vpack.c.bf16 %v478_v30, %v476_v1  ;;  %v1581_v9 = vpack.c.bf16 %v227_v3, %v225_v2  ;;  %v224_v10 = vld [vmem:[%s3753_s1 + $0x620] sm:$0xff]  ;;  %v226_v12 = vld [vmem:[%s3753_s1 + $0x630] sm:$0xff] }
  0xbd   :  { %1572 = vmatpush1.bf16.msra.mxu1 %v1571_v44  ;;  %v480_v13 = vld [vmem:[%s3753_s1 + $0xe20] sm:$0xff]  ;;  %v1837_v11 = vpack.c.bf16 %v483_v5, %v481_v33  ;;  %v482_v14 = vld [vmem:[%s3753_s1 + $0xe30] sm:$0xff]  ;;  %v229_v15 = vld [vmem:[%s3753_s1 + $0x648] sm:$0xff]  ;;  %v1583_v21 = vpack.c.bf16 %v226_v12, %v224_v10 }
  0xbe   :  { %1828 = vmatpush1.bf16.msra.mxu0 %v1827_v45  ;;  %1574 = vmatprep.subr.bf16.mxu1 %v1573_v46  ;;  %v231_v16 = vld [vmem:[%s3753_s1 + $0x658] sm:$0xff]  ;;  %v485_v18 = vld [vmem:[%s3753_s1 + $0xe48] sm:$0xff]  ;;  %v1839_v22 = vpack.c.bf16 %v482_v14, %v480_v13  ;;  %v230_v24 = vld [vmem:[%s3753_s1 + $0x650] sm:$0xff] }
  0xbf   :  { %1830 = vmatprep.subr.bf16.mxu0 %v1829_v25  ;;  %v487_v19 = vld [vmem:[%s3753_s1 + $0xe58] sm:$0xff]  ;;  %v1585_v23 = vpack.c.bf16 %v231_v16, %v229_v15  ;;  %v484_v26 = vld [vmem:[%s3753_s1 + $0xe40] sm:$0xff]  ;;  %v233_v29 = vld [vmem:[%s3753_s1 + $0x668] sm:$0xff] }
  0xc0   :  { %v1841_v27 = vpack.c.bf16 %v487_v19, %v485_v18  ;;  %v235_v31 = vld [vmem:[%s3753_s1 + $0x678] sm:$0xff]  ;;  %v489_v32 = vld [vmem:[%s3753_s1 + $0xe68] sm:$0xff]  ;;  %v232_v38 = vld [vmem:[%s3753_s1 + $0x660] sm:$0xff] }
  0xc1   :  { %1576 = vmatpush1.bf16.msra.mxu1 %v1575_v60  ;;  %v491_v34 = vld [vmem:[%s3753_s1 + $0xe78] sm:$0xff]  ;;  %v1589_v37 = vpack.c.bf16 %v235_v31, %v233_v29  ;;  %v234_v39 = vld [vmem:[%s3753_s1 + $0x670] sm:$0xff]  ;;  %v488_v40 = vld [vmem:[%s3753_s1 + $0xe60] sm:$0xff] }
  0xc2   :  { %1832 = vmatpush1.bf16.msra.mxu0 %v1831_v62  ;;  %1578 = vmatprep.subr.bf16.mxu1 %v1577_v63  ;;  %v1845_v41 = vpack.c.bf16 %v491_v34, %v489_v32  ;;  %v490_v42 = vld [vmem:[%s3753_s1 + $0xe70] sm:$0xff]  ;;  %v237_v43 = vld [vmem:[%s3753_s1 + $0x688] sm:$0xff]  ;;  %v239_v44 = vld [vmem:[%s3753_s1 + $0x698] sm:$0xff]  ;;  %v1591_v47 = vpack.c.bf16 %v234_v39, %v232_v38 }
  0xc3   :  { %1834 = vmatprep.subr.bf16.mxu0 %v1833_v54  ;;  %v493_v45 = vld [vmem:[%s3753_s1 + $0xe88] sm:$0xff]  ;;  %v495_v46 = vld [vmem:[%s3753_s1 + $0xe98] sm:$0xff]  ;;  %v1847_v48 = vpack.c.bf16 %v490_v42, %v488_v40  ;;  %v1593_v49 = vpack.c.bf16 %v239_v44, %v237_v43  ;;  %v236_v25 = vld [vmem:[%s3753_s1 + $0x680] sm:$0xff] }
  0xc4   :  { %847 = vmatmul.mubr.f32.vlgmr.msra.gmra.mrb[0].mxu1 %v2875_v28  ;;  %v228_v28 = vld [vmem:[%s3753_s1 + $0x640] sm:$0xff]  ;;  %v238_v51 = vld [vmem:[%s3753_s1 + $0x690] sm:$0xff]  ;;  %v1849_v53 = vpack.c.bf16 %v495_v46, %v493_v45  ;;  %v241_v56 = vld [vmem:[%s3753_s1 + $0x6a8] sm:$0xff] }
  0xc5   :  { %1580 = vmatpush1.bf16.msra.mxu1 %v1579_v7  ;;  %1131 = vmatmul.mubr.f32.vlgmr.msra.gmra.mrb[0].mxu0 %v2893_v59  ;;  %v486_v59 = vld [vmem:[%s3753_s1 + $0xe50] sm:$0xff]  ;;  %v1587_v35 = vpack.c.bf16 %v230_v24, %v228_v28  ;;  %v492_v52 = vld [vmem:[%s3753_s1 + $0xe80] sm:$0xff]  ;;  %v243_v57 = vld [vmem:[%s3753_s1 + $0x6b8] sm:$0xff]  ;;  %v1595_v62 = vpack.c.bf16 %v238_v51, %v236_v25 }
  0xc6   :  { %1836 = vmatpush1.bf16.msra.mxu0 %v1835_v8  ;;  %1582 = vmatprep.subr.bf16.mxu1 %v1581_v9  ;;  %v1843_v36 = vpack.c.bf16 %v486_v59, %v484_v26  ;;  %v494_v55 = vld [vmem:[%s3753_s1 + $0xe90] sm:$0xff]  ;;  %v497_v58 = vld [vmem:[%s3753_s1 + $0xea8] sm:$0xff]  ;;  %v499_v60 = vld [vmem:[%s3753_s1 + $0xeb8] sm:$0xff]  ;;  %v1597_v50 = vpack.c.bf16 %v243_v57, %v241_v56 }
  0xc7   :  { %1838 = vmatprep.subr.bf16.mxu0 %v1837_v11  ;;  %917 = vmatprep.mubr.f32.mxu1 %v589_v17  ;;  %v1851_v63 = vpack.c.bf16 %v494_v55, %v492_v52  ;;  %v240_v0 = vld [vmem:[%s3753_s1 + $0x6a0] sm:$0xff]  ;;  %v242_v1 = vld [vmem:[%s3753_s1 + $0x6b0] sm:$0xff]  ;;  %v1853_v30 = vpack.c.bf16 %v499_v60, %v497_v58  ;;  %v245_v3 = vld [vmem:[%s3753_s1 + $0x6c8] sm:$0xff] }
  0xc8   :  { %1201 = vmatprep.mubr.f32.mxu0 %v623_v20  ;;  %v496_v54 = vld [vmem:[%s3753_s1 + $0xea0] sm:$0xff]  ;;  %v498_v2 = vld [vmem:[%s3753_s1 + $0xeb0] sm:$0xff]  ;;  %v247_v33 = vld [vmem:[%s3753_s1 + $0x6d8] sm:$0xff]  ;;  %v1599_v8 = vpack.c.bf16 %v242_v1, %v240_v0 }
  0xc9   :  { %1584 = vmatpush1.bf16.msra.mxu1 %v1583_v21  ;;  %v501_v5 = vld [vmem:[%s3753_s1 + $0xec8] sm:$0xff]  ;;  %v503_v7 = vld [vmem:[%s3753_s1 + $0xed8] sm:$0xff]  ;;  %v1855_v9 = vpack.c.bf16 %v498_v2, %v496_v54  ;;  %v1601_v10 = vpack.c.bf16 %v247_v33, %v245_v3  ;;  %v244_v12 = vld [vmem:[%s3753_s1 + $0x6c0] sm:$0xff] }
  0xca   :  { %1840 = vmatpush1.bf16.msra.mxu0 %v1839_v22  ;;  %1586 = vmatprep.subr.bf16.mxu1 %v1585_v23  ;;  %v246_v13 = vld [vmem:[%s3753_s1 + $0x6d0] sm:$0xff]  ;;  %v500_v11 = vld [vmem:[%s3753_s1 + $0xec0] sm:$0xff]  ;;  %v1857_v14 = vpack.c.bf16 %v503_v7, %v501_v5  ;;  %v249_v16 = vld [vmem:[%s3753_s1 + $0x6e8] sm:$0xff] }
  0xcb   :  { %1842 = vmatprep.subr.bf16.mxu0 %v1841_v27  ;;  %v502_v15 = vld [vmem:[%s3753_s1 + $0xed0] sm:$0xff]  ;;  %v251_v17 = vld [vmem:[%s3753_s1 + $0x6f8] sm:$0xff]  ;;  %v505_v18 = vld [vmem:[%s3753_s1 + $0xee8] sm:$0xff]  ;;  %v1603_v20 = vpack.c.bf16 %v246_v13, %v244_v12 }
  0xcc   :  { %v507_v19 = vld [vmem:[%s3753_s1 + $0xef8] sm:$0xff]  ;;  %v1859_v21 = vpack.c.bf16 %v502_v15, %v500_v11  ;;  %v1605_v22 = vpack.c.bf16 %v251_v17, %v249_v16  ;;  %v248_v23 = vld [vmem:[%s3753_s1 + $0x6e0] sm:$0xff]  ;;  %v250_v28 = vld [vmem:[%s3753_s1 + $0x6f0] sm:$0xff] }
  0xcd   :  { %1588 = vmatpush1.bf16.msra.mxu1 %v1587_v35  ;;  %v504_v24 = vld [vmem:[%s3753_s1 + $0xee0] sm:$0xff]  ;;  %v1861_v26 = vpack.c.bf16 %v507_v19, %v505_v18  ;;  %v506_v27 = vld [vmem:[%s3753_s1 + $0xef0] sm:$0xff]  ;;  %v253_v59 = vld [vmem:[%s3753_s1 + $0x708] sm:$0xff]  ;;  %v1607_v34 = vpack.c.bf16 %v250_v28, %v248_v23 }
  0xce   :  { %1844 = vmatpush1.bf16.msra.mxu0 %v1843_v36  ;;  %1590 = vmatprep.subr.bf16.mxu1 %v1589_v37  ;;  %v255_v29 = vld [vmem:[%s3753_s1 + $0x718] sm:$0xff]  ;;  %v509_v31 = vld [vmem:[%s3753_s1 + $0xf08] sm:$0xff]  ;;  %v1863_v35 = vpack.c.bf16 %v506_v27, %v504_v24  ;;  %v252_v37 = vld [vmem:[%s3753_s1 + $0x700] sm:$0xff] }
  0xcf   :  { %1846 = vmatprep.subr.bf16.mxu0 %v1845_v41  ;;  %v511_v32 = vld [vmem:[%s3753_s1 + $0xf18] sm:$0xff]  ;;  %v1609_v36 = vpack.c.bf16 %v255_v29, %v253_v59  ;;  %v254_v38 = vld [vmem:[%s3753_s1 + $0x710] sm:$0xff]  ;;  %v508_v39 = vld [vmem:[%s3753_s1 + $0xf00] sm:$0xff] }
  0xd0   :  { %v1865_v40 = vpack.c.bf16 %v511_v32, %v509_v31  ;;  %v510_v41 = vld [vmem:[%s3753_s1 + $0xf10] sm:$0xff]  ;;  %v257_v42 = vld [vmem:[%s3753_s1 + $0x728] sm:$0xff]  ;;  %v259_v43 = vld [vmem:[%s3753_s1 + $0x738] sm:$0xff]  ;;  %v1611_v46 = vpack.c.bf16 %v254_v38, %v252_v37 }
  0xd1   :  { %1592 = vmatpush1.bf16.msra.mxu1 %v1591_v47  ;;  %v513_v44 = vld [vmem:[%s3753_s1 + $0xf28] sm:$0xff]  ;;  %v515_v45 = vld [vmem:[%s3753_s1 + $0xf38] sm:$0xff]  ;;  %v1867_v47 = vpack.c.bf16 %v510_v41, %v508_v39  ;;  %v258_v25 = vld [vmem:[%s3753_s1 + $0x730] sm:$0xff] }
  0xd2   :  { %1848 = vmatpush1.bf16.msra.mxu0 %v1847_v48  ;;  %1594 = vmatprep.subr.bf16.mxu1 %v1593_v49  ;;  %v1613_v48 = vpack.c.bf16 %v259_v43, %v257_v42  ;;  %v256_v49 = vld [vmem:[%s3753_s1 + $0x720] sm:$0xff]  ;;  %v1869_v52 = vpack.c.bf16 %v515_v45, %v513_v44  ;;  %v261_v55 = vld [vmem:[%s3753_s1 + $0x748] sm:$0xff]  ;;  %v263_v56 = vld [vmem:[%s3753_s1 + $0x758] sm:$0xff] }
  0xd3   :  { %1850 = vmatprep.subr.bf16.mxu0 %v1849_v53  ;;  %v512_v51 = vld [vmem:[%s3753_s1 + $0xf20] sm:$0xff]  ;;  %v514_v53 = vld [vmem:[%s3753_s1 + $0xf30] sm:$0xff]  ;;  %v517_v57 = vld [vmem:[%s3753_s1 + $0xf48] sm:$0xff]  ;;  %v1615_v60 = vpack.c.bf16 %v258_v25, %v256_v49 }
  0xd4   :  { %v519_v58 = vld [vmem:[%s3753_s1 + $0xf58] sm:$0xff]  ;;  %v262_v0 = vld [vmem:[%s3753_s1 + $0x750] sm:$0xff]  ;;  %v516_v1 = vld [vmem:[%s3753_s1 + $0xf40] sm:$0xff] }
  0xd5   :  { %1596 = vmatpush1.bf16.msra.mxu1 %v1595_v62  ;;  %v1871_v62 = vpack.c.bf16 %v514_v53, %v512_v51  ;;  %v1873_v54 = vpack.c.bf16 %v519_v58, %v517_v57  ;;  %v265_v2 = vld [vmem:[%s3753_s1 + $0x768] sm:$0xff]  ;;  %v267_v3 = vld [vmem:[%s3753_s1 + $0x778] sm:$0xff]  ;;  %v266_v12 = vld [vmem:[%s3753_s1 + $0x770] sm:$0xff] }
  0xd6   :  { %1852 = vmatpush1.bf16.msra.mxu0 %v1851_v63  ;;  %1598 = vmatprep.subr.bf16.mxu1 %v1597_v50  ;;  %v1617_v63 = vpack.c.bf16 %v263_v56, %v261_v55  ;;  %v260_v50 = vld [vmem:[%s3753_s1 + $0x740] sm:$0xff]  ;;  %v521_v33 = vld [vmem:[%s3753_s1 + $0xf68] sm:$0xff]  ;;  %v523_v5 = vld [vmem:[%s3753_s1 + $0xf78] sm:$0xff] }
  0xd7   :  { %1854 = vmatprep.subr.bf16.mxu0 %v1853_v30  ;;  %v518_v30 = vld [vmem:[%s3753_s1 + $0xf50] sm:$0xff]  ;;  %v1619_v7 = vpack.c.bf16 %v262_v0, %v260_v50  ;;  %v520_v13 = vld [vmem:[%s3753_s1 + $0xf60] sm:$0xff]  ;;  %v1877_v11 = vpack.c.bf16 %v523_v5, %v521_v33  ;;  %v269_v15 = vld [vmem:[%s3753_s1 + $0x788] sm:$0xff] }
  0xd8   :  { %v271_v16 = vld [vmem:[%s3753_s1 + $0x798] sm:$0xff]  ;;  %v525_v17 = vld [vmem:[%s3753_s1 + $0xf88] sm:$0xff]  ;;  %v270_v23 = vld [vmem:[%s3753_s1 + $0x790] sm:$0xff] }
  0xd9   :  { %1600 = vmatpush1.bf16.msra.mxu1 %v1599_v8  ;;  %v1875_v8 = vpack.c.bf16 %v518_v30, %v516_v1  ;;  %v527_v18 = vld [vmem:[%s3753_s1 + $0xf98] sm:$0xff]  ;;  %v524_v28 = vld [vmem:[%s3753_s1 + $0xf80] sm:$0xff]  ;;  %v273_v27 = vld [vmem:[%s3753_s1 + $0x7a8] sm:$0xff] }
  0xda   :  { %1856 = vmatpush1.bf16.msra.mxu0 %v1855_v9  ;;  %1602 = vmatprep.subr.bf16.mxu1 %v1601_v10  ;;  %v1621_v9 = vpack.c.bf16 %v267_v3, %v265_v2  ;;  %v264_v10 = vld [vmem:[%s3753_s1 + $0x760] sm:$0xff]  ;;  %v1881_v24 = vpack.c.bf16 %v527_v18, %v525_v17  ;;  %v275_v59 = vld [vmem:[%s3753_s1 + $0x7b8] sm:$0xff]  ;;  %v529_v29 = vld [vmem:[%s3753_s1 + $0xfa8] sm:$0xff] }
  0xdb   :  { %1858 = vmatprep.subr.bf16.mxu0 %v1857_v14  ;;  %v522_v14 = vld [vmem:[%s3753_s1 + $0xf70] sm:$0xff]  ;;  %v1623_v19 = vpack.c.bf16 %v266_v12, %v264_v10  ;;  %v531_v31 = vld [vmem:[%s3753_s1 + $0xfb8] sm:$0xff]  ;;  %v528_v38 = vld [vmem:[%s3753_s1 + $0xfa0] sm:$0xff] }
  0xdc   :  { %v274_v37 = vld [vmem:[%s3753_s1 + $0x7b0] sm:$0xff]  ;;  %v1885_v39 = vpack.c.bf16 %v531_v31, %v529_v29  ;;  %v277_v41 = vld [vmem:[%s3753_s1 + $0x7c8] sm:$0xff]  ;;  %v279_v42 = vld [vmem:[%s3753_s1 + $0x7d8] sm:$0xff] }
  0xdd   :  { %1604 = vmatpush1.bf16.msra.mxu1 %v1603_v20  ;;  %v1879_v20 = vpack.c.bf16 %v522_v14, %v520_v13  ;;  %v533_v43 = vld [vmem:[%s3753_s1 + $0xfc8] sm:$0xff]  ;;  %v535_v44 = vld [vmem:[%s3753_s1 + $0xfd8] sm:$0xff]  ;;  %v278_v49 = vld [vmem:[%s3753_s1 + $0x7d0] sm:$0xff] }
  0xde   :  { %1860 = vmatpush1.bf16.msra.mxu0 %v1859_v21  ;;  %1606 = vmatprep.subr.bf16.mxu1 %v1605_v22  ;;  %v1625_v21 = vpack.c.bf16 %v271_v16, %v269_v15  ;;  %v268_v22 = vld [vmem:[%s3753_s1 + $0x780] sm:$0xff]  ;;  %v1889_v51 = vpack.c.bf16 %v535_v44, %v533_v43  ;;  %v281_v53 = vld [vmem:[%s3753_s1 + $0x7e8] sm:$0xff]  ;;  %v283_v55 = vld [vmem:[%s3753_s1 + $0x7f8] sm:$0xff] }
  0xdf   :  { %1862 = vmatprep.subr.bf16.mxu0 %v1861_v26  ;;  %v526_v26 = vld [vmem:[%s3753_s1 + $0xf90] sm:$0xff]  ;;  %v1627_v32 = vpack.c.bf16 %v270_v23, %v268_v22  ;;  %v532_v25 = vld [vmem:[%s3753_s1 + $0xfc0] sm:$0xff]  ;;  %v537_v56 = vld [vmem:[%s3753_s1 + $0xfe8] sm:$0xff] }
  0xe0   :  { %v539_v57 = vld [vmem:[%s3753_s1 + $0xff8] sm:$0xff]  ;;  %v282_v50 = vld [vmem:[%s3753_s1 + $0x7f0] sm:$0xff]  ;;  %v536_v0 = vld [vmem:[%s3753_s1 + $0xfe0] sm:$0xff] }
  0xe1   :  { %1608 = vmatpush1.bf16.msra.mxu1 %v1607_v34  ;;  %v1883_v34 = vpack.c.bf16 %v526_v26, %v524_v28  ;;  %v1893_v1 = vpack.c.bf16 %v539_v57, %v537_v56  ;;  %v1240_v30 = vld [vmem:[%s3756_s4 + $0x80] sm:$0xff]  ;;  %v1241_v2 = vld [vmem:[%s3756_s4 + $0x88] sm:$0xff]  ;;  %v1243_v10 = vld [vmem:[%s3756_s4 + $0x98] sm:$0xff] }
  0xe2   :  { %1864 = vmatpush1.bf16.msra.mxu0 %v1863_v35  ;;  %1610 = vmatprep.subr.bf16.mxu1 %v1609_v36  ;;  %v1629_v35 = vpack.c.bf16 %v275_v59, %v273_v27  ;;  %v272_v36 = vld [vmem:[%s3753_s1 + $0x7a0] sm:$0xff]  ;;  %v1897_v5 = vpack.c.bf16 %v1241_v2, %v1240_v30  ;;  %v1227_v14 = vld [vmem:[%s3756_s4 + $0x18] sm:$0xff]  ;;  %v1245_v16 = vld [vmem:[%s3756_s4 + $0xa8] sm:$0xff] }
  0xe3   :  { %1866 = vmatprep.subr.bf16.mxu0 %v1865_v40  ;;  %v530_v40 = vld [vmem:[%s3753_s1 + $0xfb0] sm:$0xff]  ;;  %v1631_v45 = vpack.c.bf16 %v274_v37, %v272_v36  ;;  %v1244_v15 = vld [vmem:[%s3756_s4 + $0xa0] sm:$0xff]  ;;  %v1231_v28 = vld [vmem:[%s3756_s4 + $0x38] sm:$0xff] }
  0xe4   :  { %v1905_v18 = vpack.c.bf16 %v1245_v16, %v1244_v15  ;;  %v1230_v23 = vld [vmem:[%s3756_s4 + $0x30] sm:$0xff]  ;;  %v1249_v26 = vld [vmem:[%s3756_s4 + $0xc8] sm:$0xff]  ;;  %v1232_v29 = vld [vmem:[%s3756_s4 + $0x40] sm:$0xff] }
  0xe5   :  { %1612 = vmatpush1.bf16.msra.mxu1 %v1611_v46  ;;  %v1887_v46 = vpack.c.bf16 %v530_v40, %v528_v38  ;;  %v1911_v27 = vpack.c.bf16 %v1231_v28, %v1230_v23  ;;  %v1233_v31 = vld [vmem:[%s3756_s4 + $0x48] sm:$0xff]  ;;  %v1234_v37 = vld [vmem:[%s3756_s4 + $0x50] sm:$0xff]  ;;  %v1235_v38 = vld [vmem:[%s3756_s4 + $0x58] sm:$0xff] }
  0xe6   :  { %1868 = vmatpush1.bf16.msra.mxu0 %v1867_v47  ;;  %1614 = vmatprep.subr.bf16.mxu1 %v1613_v48  ;;  %v1633_v47 = vpack.c.bf16 %v279_v42, %v277_v41  ;;  %v276_v48 = vld [vmem:[%s3753_s1 + $0x7c0] sm:$0xff]  ;;  %v1253_v41 = vld [vmem:[%s3756_s4 + $0xe8] sm:$0xff] }
  0xe7   :  { %1870 = vmatprep.subr.bf16.mxu0 %v1869_v52  ;;  %v534_v52 = vld [vmem:[%s3753_s1 + $0xfd0] sm:$0xff]  ;;  %v1635_v58 = vpack.c.bf16 %v278_v49, %v276_v48  ;;  %v1252_v40 = vld [vmem:[%s3756_s4 + $0xe0] sm:$0xff]  ;;  %v1237_v44 = vld [vmem:[%s3756_s4 + $0x68] sm:$0xff] }
  0xe8   :  { %v1921_v42 = vpack.c.bf16 %v1253_v41, %v1252_v40  ;;  %v1236_v43 = vld [vmem:[%s3756_s4 + $0x60] sm:$0xff]  ;;  %v1238_v49 = vld [vmem:[%s3756_s4 + $0x70] sm:$0xff] }
  0xe9   :  { %1616 = vmatpush1.bf16.msra.mxu1 %v1615_v60  ;;  %v1891_v60 = vpack.c.bf16 %v534_v52, %v532_v25  ;;  %v1239_v25 = vld [vmem:[%s3756_s4 + $0x78] sm:$0xff]  ;;  %v544_v52 = vsub.s32 0, %v2264_v61 }
  0xea   :  { %1872 = vmatpush1.bf16.msra.mxu0 %v1871_v62  ;;  %1618 = vmatprep.subr.bf16.mxu1 %v1617_v63  ;;  %v1637_v62 = vpack.c.bf16 %v283_v55, %v281_v53  ;;  %v280_v63 = vld [vmem:[%s3753_s1 + $0x7e0] sm:$0xff]  ;;  %v548_v55 = vsub.s32 1, %v2264_v61 }
  0xeb   :  { %1874 = vmatprep.subr.bf16.mxu0 %v1873_v54  ;;  %v538_v54 = vld [vmem:[%s3753_s1 + $0xff0] sm:$0xff]  ;;  %v1639_v3 = vpack.c.bf16 %v282_v50, %v280_v63  ;;  %v540_v53 = vld [vmem:[%s3754_s2] sm:$0x3] }
  0xec   :  { %v1895_v33 = vpack.c.bf16 %v538_v54, %v536_v0  ;;  %v545_v56 = vrot.slane %v540_v53, %v544_v52  ;;  %v549_v57 = vrot.slane %v540_v53, %v548_v55  ;;  %v1348_v63 = vld.sshfl [vmem:[%s3755_s3] sm:$0x33 pattern:$0x76325410]  ;;  %s1340_s3 = sshll.u32 %s1976_s16, 4  ;;  %s1341_s3 = int_to_ptr.vmem [resolvable:$true] %s1340_s3 }
  0xed   :  { %1620 = vmatpush1.bf16.msra.mxu1 %v1619_v7  ;;  %v1224_v7 = vld [vmem:[%s3756_s4] sm:$0xff]  ;;  %v1219_v2 = vcombine.high %v1348_v63, %v1348_v63  ;;  %s1951_s17 = scalar_lea.vmem %s1341_s3, 32  ;;  %p1956_p1 = scmp.lt.s32.totalorder %s1341_s3, %s1341_s3 }
  0xee   :  { %1876 = vmatpush1.bf16.msra.mxu0 %v1875_v8  ;;  %1622 = vmatprep.subr.bf16.mxu1 %v1621_v9  ;;  %v1225_v8 = vld [vmem:[%s3756_s4 + $0x8] sm:$0xff]  ;;  %v1242_v9 = vld [vmem:[%s3756_s4 + $0x90] sm:$0xff]  ;;  %p1952_p0 = scmp.ne.s32.totalorder %s1341_s3, %s1951_s17  ;;  %p1957_p2 = scmp.lt.s32.totalorder %s1951_s17, %s1951_s17 }
  0xef   :  { %1878 = vmatprep.subr.bf16.mxu0 %v1877_v11  ;;  %v1899_v12 = vpack.c.bf16 %v1225_v8, %v1224_v7  ;;  %v1901_v13 = vpack.c.bf16 %v1243_v10, %v1242_v9  ;;  %v1226_v11 = vld [vmem:[%s3756_s4 + $0x10] sm:$0xff]  ;;  %v1349_v9 = vld [vmem:[%s3757_s5] ss:$0 sm:$0xff] }
  0xf0   :  { %v1903_v17 = vpack.c.bf16 %v1227_v14, %v1226_v11  ;;  %p1958_p3 = por %p1957_p2, %p1956_p1 }
  0xf1   :  { %1624 = vmatpush1.bf16.msra.mxu1 %v1623_v19  ;;  %v1228_v19 = vld [vmem:[%s3756_s4 + $0x20] sm:$0xff] }
  0xf2   :  { %1880 = vmatpush1.bf16.msra.mxu0 %v1879_v20  ;;  %1626 = vmatprep.subr.bf16.mxu1 %v1625_v21  ;;  %v1229_v20 = vld [vmem:[%s3756_s4 + $0x28] sm:$0xff]  ;;  %v1246_v21 = vld [vmem:[%s3756_s4 + $0xb0] sm:$0xff]  ;;  %p1959_p4 = pnand %p1958_p3, %p1952_p0 }
  0xf3   :  { %1882 = vmatprep.subr.bf16.mxu0 %v1881_v24  ;;  %v1248_v24 = vld [vmem:[%s3756_s4 + $0xc0] sm:$0xff] }
  0xf4   :  { %v1913_v59 = vpack.c.bf16 %v1249_v26, %v1248_v24 }
  0xf5   :  { %1628 = vmatpush1.bf16.msra.mxu1 %v1627_v32  ;;  %v1250_v32 = vld [vmem:[%s3756_s4 + $0xd0] sm:$0xff] }
  0xf6   :  { %1884 = vmatpush1.bf16.msra.mxu0 %v1883_v34  ;;  %1630 = vmatprep.subr.bf16.mxu1 %v1629_v35  ;;  %v1251_v34 = vld [vmem:[%s3756_s4 + $0xd8] sm:$0xff]  ;;  %v1915_v35 = vpack.c.bf16 %v1233_v31, %v1232_v29 }
  0xf7   :  { %1886 = vmatprep.subr.bf16.mxu0 %v1885_v39  ;;  %v1917_v36 = vpack.c.bf16 %v1251_v34, %v1250_v32  ;;  %v1919_v39 = vpack.c.bf16 %v1235_v38, %v1234_v37 }
  0xf9   :  { %1632 = vmatpush1.bf16.msra.mxu1 %v1631_v45  ;;  %v1923_v45 = vpack.c.bf16 %v1237_v44, %v1236_v43 }
  0xfa   :  { %1888 = vmatpush1.bf16.msra.mxu0 %v1887_v46  ;;  %1634 = vmatprep.subr.bf16.mxu1 %v1633_v47  ;;  %v1254_v46 = vld [vmem:[%s3756_s4 + $0xf0] sm:$0xff]  ;;  %v1255_v47 = vld [vmem:[%s3756_s4 + $0xf8] sm:$0xff] }
  0xfb   :  { %1890 = vmatprep.subr.bf16.mxu0 %v1889_v51  ;;  %v1925_v48 = vpack.c.bf16 %v1255_v47, %v1254_v46  ;;  %v1927_v51 = vpack.c.bf16 %v1239_v25, %v1238_v49 }
  0xfd   :  { %1636 = vmatpush1.bf16.msra.mxu1 %v1635_v58 }
  0xfe   :  { %1892 = vmatpush1.bf16.msra.mxu0 %v1891_v60  ;;  %1638 = vmatprep.subr.bf16.mxu1 %v1637_v62 }
  0xff   :  { %1894 = vmatprep.subr.bf16.mxu0 %v1893_v1 }
 0x101   :  { %1640 = vmatpush1.bf16.msra.mxu1 %v1639_v3 }
 0x102   :  { %1896 = vmatpush1.bf16.msra.mxu0 %v1895_v33  ;;  %1898 = vmatprep.subr.bf16.mxu1 %v1897_v5 }
 0x104   :  { %918 = vmatmul.mubr.f32.vlgmr.msra.gmra.mrb[0].mxu1 %v3266_v4  ;;  %v1247_v4 = vld [vmem:[%s3756_s4 + $0xb8] sm:$0xff] }
 0x105   :  { %1202 = vmatmul.mubr.f32.vlgmr.msra.gmra.mrb[0].mxu0 %v3275_v6  ;;  %1900 = vmatpush3.bf16.msra.mxu1 %v1899_v12  ;;  %v1907_v6 = vpack.c.bf16 %v1229_v20, %v1228_v19  ;;  %v1909_v22 = vpack.c.bf16 %v1247_v4, %v1246_v21 }
 0x106   :  { %1902 = vmatprep.subr.bf16.mxu1 %v1901_v13 }
 0x109   :  { %1904 = vmatpush3.bf16.msra.mxu1 %v1903_v17 }
 0x10a   :  { %1906 = vmatprep.subr.bf16.mxu1 %v1905_v18 }
 0x10d   :  { %1908 = vmatpush3.bf16.msra.mxu1 %v1907_v6 }
 0x10e   :  { %1910 = vmatprep.subr.bf16.mxu1 %v1909_v22 }
 0x111   :  { %1912 = vmatpush3.bf16.msra.mxu1 %v1911_v27 }
 0x112   :  { %1914 = vmatprep.subr.bf16.mxu1 %v1913_v59 }
 0x115   :  { %1916 = vmatpush3.bf16.msra.mxu1 %v1915_v35 }
 0x116   :  { %1918 = vmatprep.subr.bf16.mxu1 %v1917_v36 }
 0x119   :  { %1920 = vmatpush3.bf16.msra.mxu1 %v1919_v39 }
 0x11a   :  { %1922 = vmatprep.subr.bf16.mxu1 %v1921_v42 }
 0x11d   :  { %1924 = vmatpush3.bf16.msra.mxu1 %v1923_v45 }
 0x11e   :  { %1926 = vmatprep.subr.bf16.mxu1 %v1925_v48 }
 0x121   :  { %1928 = vmatpush3.bf16.msra.mxu1 %v1927_v51 }
 0x1d7   :  { %v919_v58 = vpop.f32.mrb[0].mxu1 }
 0x1d8   :  { %v1929_v60 = vadd.f32 %v919_v58, %v545_v56  ;;  %v1203_v62 = vpop.f32.mrb[0].mxu0  ;;  %v921_v50 = vpop.f32.mrb[1].mxu1 }
 0x1d9   :  { %v1931_v0 = vadd.f32 %v921_v50, %v549_v57  ;;  %v1205_v1 = vpop.f32.mrb[1].mxu0 }
 0x1da   :  { %v1930_v54 = vadd.f32 %v1929_v60, %v1203_v62 }
 0x1db   :  { %v1932_v30 = vadd.f32 %v1931_v0, %v1205_v1 }
 0x1dc   :  { %v1208_v3 = vmax.f32 %v1930_v54, 0.0 }
 0x1dd   :  { %v1209_v33 = vmax.f32 %v1932_v30, 0.0 }
 0x1de   :  { %v1222_v7 = vmul.f32 %v1348_v63, %v1208_v3 }
 0x1df   :  { %v1223_v5 = vmul.f32 %v1219_v2, %v1209_v33 }
 0x1e1   :  { %1327 = vmatprep.mubr.f32.mxu1 %v1223_v5 }
 0x1e2   :  { %1328 = vmatmul.mubr.f32.vlgmr.msra.gmra.mrb[2].mxu1 %v1222_v7 }
 0x2b5   :  { %v1382_v61 = vpop.f32.mrb[2].mxu1 }
 0x2b6   :  { %v1383_v8 = vpop.f32.mrb[3].mxu1 }
 0x2b7   :  { %v1384_v10 = vadd.f32 %v1383_v8, %v1382_v61 }
 0x2b9   :  { %v1330_v12 = vadd.f32 %v1384_v10, %v1349_v9 }
 0x2bb   :  { %1333 = vst [vmem:[#allocation2] sm:$0x3] %v1330_v12 }
 0x2bc   :  { %1962 = shalt.err (!%p1959_p4)
}
 0x2bd   :  { %s1963_s20 = scalar_lea.hbm %s3758_s6, 32 }
 0x2be   :  { %p1964_p5 = scmp.ne.s32.totalorder %s3758_s6, %s1963_s20  ;;  %p1967_p6 = scmp.lt.u32.totalorder %s1963_s20, %s3758_s6 }
 0x2c0   :  { %p1969_p7 = pnand %p1967_p6, %p1964_p5 }
 0x2c2   :  { %1972 = shalt.err (!%p1969_p7)
}
 0x2c3   :  { %1343 = dma.vmem_to_hbm [thread:$0]  %s1341_s3, 32, %s3758_s6, [#allocation3]  }
 0x2c4   :  { %1973 = dma.done.wait [#allocation3], 32  }
 0x2c5   :  { %1974 = vsyncadd [#allocation3], 4294967264 }
 0x2c6   :  { %1347 = vsyncpa [#allocation3], 1 }

</bundles_post_ra>
